<compile_context>
chip_gen: v7x
topology: tpu7x:2x2x1
jax: 0.10.0
libtpu: 0.0.40
codegen_flags: <defaults>
</compile_context>

<pallas_src>
import jax
import jax.numpy as jnp
from jax.experimental import pallas as pl
from jax.experimental.pallas import tpu as pltpu

IN_FEATURES = 3 * 224 * 224   # 150528
H1 = 512
H2 = 320
NUM_CLASSES = 60

TK = 21504                    # 150528 / 21504 = 7 reduction steps
NK = IN_FEATURES // TK        # 7
NJ = 2                        # H1 split into two 256-wide halves (v7x dual-TC)
H1_HALF = H1 // NJ            # 256


def _head_kernel(x_ref, w1_ref, b1_ref, w2_ref, out_ref, acc_ref):
    """Grid = (NJ, NK): axis 0 = H1 half ('parallel'), axis 1 = K reduction."""
    k = pl.program_id(1)

    @pl.when(k == 0)
    def _():
        # Fold the fc1 bias into the accumulator init (saves epilogue work).
        acc_ref[...] = jnp.broadcast_to(b1_ref[...], acc_ref.shape)

    # fc1 partial accumulation: bf16 x bf16 -> f32 on the MXU.
    acc_ref[...] += jnp.dot(x_ref[0], w1_ref[...],
                            preferred_element_type=jnp.float32)

    @pl.when(k == pl.num_programs(1) - 1)
    def _():
        h1 = jnp.maximum(acc_ref[...], 0.0)                      # relu1 (half)
        # Partial fc2 for this H1 half; the two halves are summed outside.
        out_ref[0] = jnp.dot(h1, w2_ref[...],
                             preferred_element_type=jnp.float32)


@jax.jit
def ann_forward(x, w1, b1, w2, b2, w3, b3):
    """x: (B, 3, 224, 224) float32 -> (B, NUM_CLASSES) float32."""
    B = x.shape[0]
    Bp = B + (-B) % 8                               # pad batch to sublane mult
    xf = x.reshape(B, -1)                           # torch.flatten(x, 1)
    xf = jnp.pad(xf, ((0, Bp - B), (0, 0)))
    # (NK, Bp, TK) bf16: each x block is one contiguous DMA per K step.
    x3 = xf.astype(jnp.bfloat16).reshape(Bp, NK, TK).transpose(1, 0, 2)

    cost = pl.CostEstimate(
        flops=2 * Bp * IN_FEATURES * H1 + 2 * Bp * H1 * H2,
        transcendentals=0,
        bytes_accessed=(IN_FEATURES * H1 * 2            # W1 (bf16)
                        + NJ * Bp * IN_FEATURES * 2     # x (bf16, per half)
                        + H1 * H2 * 4 + H1 * 4          # W2, b1
                        + NJ * Bp * H2 * 4),            # partial fc2 outputs
    )

    partial2 = pl.pallas_call(
        _head_kernel,
        out_shape=jax.ShapeDtypeStruct((NJ, Bp, H2), jnp.float32),
        grid_spec=pltpu.PrefetchScalarGridSpec(
            num_scalar_prefetch=0,
            grid=(NJ, NK),
            in_specs=[
                pl.BlockSpec((1, Bp, TK),    lambda j, k: (k, 0, 0)),  # x tile
                pl.BlockSpec((TK, H1_HALF),  lambda j, k: (k, j)),     # W1 tile
                pl.BlockSpec((1, H1_HALF),   lambda j, k: (0, j)),     # b1 half
                pl.BlockSpec((H1_HALF, H2),  lambda j, k: (j, 0)),     # W2 half
            ],
            out_specs=pl.BlockSpec((1, Bp, H2), lambda j, k: (j, 0, 0)),
            scratch_shapes=[pltpu.VMEM((Bp, H1_HALF), jnp.float32)],
        ),
        compiler_params=pltpu.CompilerParams(
            dimension_semantics=("parallel", "arbitrary"),
            vmem_limit_bytes=40 * 1024 * 1024,   # ~22 MiB actually used
        ),
        cost_estimate=cost,
    )(x3, w1, b1, w2)

    # Tiny tail: merge the two fc2 halves, bias + relu2, fc3 (plain XLA).
    h2 = jnp.maximum(partial2[0] + partial2[1] + b2, 0.0)
    out = jnp.dot(h2, w3, preferred_element_type=jnp.float32) + b3
    return out[:B]


def init_params(key):
    """Deterministic synthetic parameters (dense-head shapes)."""
    k1, k2, k3, k4, k5, k6 = jax.random.split(key, 6)
    scale = 0.01
    # Stored as (in, out) = transpose of PyTorch's (out, in) weight layout.
    # W1 is kept in bf16: the kernel is HBM-bound on this single stream.
    w1 = (scale * jax.random.normal(k1, (IN_FEATURES, H1), jnp.float32)
          ).astype(jnp.bfloat16)
    b1 = scale * jax.random.normal(k2, (1, H1), jnp.float32)
    w2 = scale * jax.random.normal(k3, (H1, H2), jnp.float32)
    b2 = scale * jax.random.normal(k4, (1, H2), jnp.float32)
    w3 = scale * jax.random.normal(k5, (H2, NUM_CLASSES), jnp.float32)
    b3 = scale * jax.random.normal(k6, (1, NUM_CLASSES), jnp.float32)
    return w1, b1, w2, b2, w3, b3


def reference_forward(x, w1, b1, w2, b2, w3, b3):
    """Precision-matched reference: bf16 fc1 inputs, f32 accumulation."""
    xf = x.reshape(x.shape[0], -1)
    h1 = jnp.maximum(
        jnp.dot(xf.astype(jnp.bfloat16), w1.astype(jnp.bfloat16),
                preferred_element_type=jnp.float32) + b1, 0.0)
    h2 = jnp.maximum(
        jnp.dot(h1, w2, preferred_element_type=jnp.float32) + b2, 0.0)
    return jnp.dot(h2, w3, preferred_element_type=jnp.float32) + b3


if __name__ == "__main__":
    key = jax.random.PRNGKey(0)
    kx, kp = jax.random.split(key)

    # Small batch; spatial/channel dims fixed by the module (3 x 224 x 224).
    x = jax.random.normal(kx, (2, 3, 224, 224), jnp.float32)
    params = init_params(kp)

    out = ann_forward(x, *params)
    out = jax.block_until_ready(out)

    ref = reference_forward(x, *params)
    assert out.shape == (2, NUM_CLASSES), out.shape
    max_err = float(jnp.max(jnp.abs(out - ref)))
    assert jnp.allclose(out, ref, atol=2e-3, rtol=2e-3), max_err

    print("KERNEL_OK")
</pallas_src>

<mosaic_0001>
module attributes {stable_mosaic.version = 11 : i64} {
  func.func @_head_kernel(%arg0: i32, %arg1: i32, %arg2: memref<1x8x21504xbf16, #tpu.memory_space<vmem>>, %arg3: memref<21504x256xbf16, #tpu.memory_space<vmem>>, %arg4: memref<1x256xf32, #tpu.memory_space<vmem>>, %arg5: memref<256x320xf32, #tpu.memory_space<vmem>>, %arg6: memref<1x8x320xf32, #tpu.memory_space<vmem>>, %arg7: memref<8x256xf32, #tpu.memory_space<vmem>>) attributes {dimension_semantics = [#tpu.dimension_semantics<parallel>, #tpu.dimension_semantics<arbitrary>], iteration_bounds = array<i64: 2, 7>, scalar_prefetch = 0 : i64, scratch_operands = 1 : i64, tpu.core_type = #tpu.core_type<tc>, window_params = [{transform_indices = @transform_0, window_bounds = array<i64: 1, 8, 21504>}, {transform_indices = @transform_1, window_bounds = array<i64: 21504, 256>}, {transform_indices = @transform_2, window_bounds = array<i64: 1, 256>}, {transform_indices = @transform_3, window_bounds = array<i64: 256, 320>}, {transform_indices = @transform_4, window_bounds = array<i64: 1, 8, 320>}]} {
    %c0_i32 = arith.constant 0 : i32
    %0 = arith.cmpi eq, %arg1, %c0_i32 : i32
    %1 = arith.extui %0 : i1 to i32
    %c0_i32_0 = arith.constant 0 : i32
    %2 = arith.cmpi ne, %1, %c0_i32_0 : i32
    scf.if %2 {
      %c0_10 = arith.constant 0 : index
      %c0_11 = arith.constant 0 : index
      %13 = vector.load %arg4[%c0_10, %c0_11] : memref<1x256xf32, #tpu.memory_space<vmem>>, vector<1x256xf32>
      %14 = vector.shape_cast %13 : vector<1x256xf32> to vector<1x256xf32>
      %15 = vector.broadcast %14 : vector<1x256xf32> to vector<8x256xf32>
      %c0_12 = arith.constant 0 : index
      %c0_13 = arith.constant 0 : index
      %16 = vector.load %arg7[%c0_12, %c0_13] : memref<8x256xf32, #tpu.memory_space<vmem>>, vector<8x256xf32>
      tpu.vector_store %arg7[%c0_12, %c0_13], %15 {strides = array<i32>} : memref<8x256xf32, #tpu.memory_space<vmem>>, vector<8x256xf32>,
    } else {
    }
    %c0 = arith.constant 0 : index
    %c0_1 = arith.constant 0 : index
    %3 = vector.load %arg7[%c0, %c0_1] : memref<8x256xf32, #tpu.memory_space<vmem>>, vector<8x256xf32>
    %c0_2 = arith.constant 0 : index
    %c0_3 = arith.constant 0 : index
    %c0_4 = arith.constant 0 : index
    %4 = vector.load %arg2[%c0_2, %c0_3, %c0_4] : memref<1x8x21504xbf16, #tpu.memory_space<vmem>>, vector<1x8x21504xbf16>
    %5 = vector.shape_cast %4 : vector<1x8x21504xbf16> to vector<8x21504xbf16>
    %c0_5 = arith.constant 0 : index
    %c0_6 = arith.constant 0 : index
    %6 = vector.load %arg3[%c0_5, %c0_6] : memref<21504x256xbf16, #tpu.memory_space<vmem>>, vector<21504x256xbf16>
    %cst = arith.constant dense<0.000000e+00> : vector<8x256xf32>
    %7 = tpu.matmul %5, %6, %cst {dimension_numbers = #tpu.dot_dimension_numbers<[1], [0], [0], [1], [0, 0, 1, 1], [], []>} : vector<8x21504xbf16>, vector<21504x256xbf16>, vector<8x256xf32> -> vector<8x256xf32>
    %8 = arith.addf %3, %7 : vector<8x256xf32>
    %c0_7 = arith.constant 0 : index
    %c0_8 = arith.constant 0 : index
    %9 = vector.load %arg7[%c0_7, %c0_8] : memref<8x256xf32, #tpu.memory_space<vmem>>, vector<8x256xf32>
    tpu.vector_store %arg7[%c0_7, %c0_8], %8 {strides = array<i32>} : memref<8x256xf32, #tpu.memory_space<vmem>>, vector<8x256xf32>,
    %c6_i32 = arith.constant 6 : i32
    %10 = arith.cmpi eq, %arg1, %c6_i32 : i32
    %11 = arith.extui %10 : i1 to i32
    %c0_i32_9 = arith.constant 0 : i32
    %12 = arith.cmpi ne, %11, %c0_i32_9 : i32
    scf.if %12 {
      %c0_10 = arith.constant 0 : index
      %c0_11 = arith.constant 0 : index
      %13 = vector.load %arg7[%c0_10, %c0_11] : memref<8x256xf32, #tpu.memory_space<vmem>>, vector<8x256xf32>
      %cst_12 = arith.constant 0.000000e+00 : f32
      %14 = vector.broadcast %cst_12 : f32 to vector<8x256xf32>
      %15 = arith.maximumf %13, %14 : vector<8x256xf32>
      %c0_13 = arith.constant 0 : index
      %c0_14 = arith.constant 0 : index
      %16 = vector.load %arg5[%c0_13, %c0_14] : memref<256x320xf32, #tpu.memory_space<vmem>>, vector<256x320xf32>
      %cst_15 = arith.constant dense<0.000000e+00> : vector<8x320xf32>
      %17 = tpu.matmul %15, %16, %cst_15 {dimension_numbers = #tpu.dot_dimension_numbers<[1], [0], [0], [1], [0, 0, 1, 1], [], []>} : vector<8x256xf32>, vector<256x320xf32>, vector<8x320xf32> -> vector<8x320xf32>
      %c0_16 = arith.constant 0 : index
      %c0_17 = arith.constant 0 : index
      %c0_18 = arith.constant 0 : index
      %18 = vector.load %arg6[%c0_16, %c0_17, %c0_18] : memref<1x8x320xf32, #tpu.memory_space<vmem>>, vector<1x8x320xf32>
      %19 = vector.shape_cast %18 : vector<1x8x320xf32> to vector<8x320xf32>
      %20 = vector.shape_cast %17 : vector<8x320xf32> to vector<1x8x320xf32>
      tpu.vector_store %arg6[%c0_16, %c0_17, %c0_18], %20 {strides = array<i32>} : memref<1x8x320xf32, #tpu.memory_space<vmem>>, vector<1x8x320xf32>,
    } else {
    }
    return
  }
  func.func @transform_0(%arg0: i32, %arg1: i32) -> (i32, i32, i32) {
    %c0_i32 = arith.constant 0 : i32
    %c0_i32_0 = arith.constant 0 : i32
    %c0_i32_1 = arith.constant 0 : i32
    return %arg1, %c0_i32, %c0_i32_0 : i32, i32, i32
  }
  func.func @transform_1(%arg0: i32, %arg1: i32) -> (i32, i32) {
    %c0_i32 = arith.constant 0 : i32
    return %arg1, %arg0 : i32, i32
  }
  func.func @transform_2(%arg0: i32, %arg1: i32) -> (i32, i32) {
    %c0_i32 = arith.constant 0 : i32
    %c0_i32_0 = arith.constant 0 : i32
    return %c0_i32, %arg0 : i32, i32
  }
  func.func @transform_3(%arg0: i32, %arg1: i32) -> (i32, i32) {
    %c0_i32 = arith.constant 0 : i32
    %c0_i32_0 = arith.constant 0 : i32
    return %arg0, %c0_i32 : i32, i32
  }
  func.func @transform_4(%arg0: i32, %arg1: i32) -> (i32, i32, i32) {
    %c0_i32 = arith.constant 0 : i32
    %c0_i32_0 = arith.constant 0 : i32
    %c0_i32_1 = arith.constant 0 : i32
    return %arg0, %c0_i32, %c0_i32_0 : i32, i32, i32
  }
}

</mosaic_0001>

<bundles_post_ra>
// kernel: ann_forward.1
= control target key start
LH: loop header
LB: loop body
LE: loop exit
PB: predicated region body
PF: predicated region fallthrough
CT: control target
= control target key end

     0   :  { %s32104_s0 = inlined_call_operand.vmem [shape: bf16[7,8,21504], index: 0, kind: input, shape index: {}]   ;;  %s32105_s1 = inlined_call_operand.hbm [shape: bf16[150528,512], index: 1, kind: input, shape index: {}]   ;;  %s32106_s2 = inlined_call_operand.vmem [shape: f32[1,512], index: 2, kind: input, shape index: {}]   ;;  %s32107_s3 = inlined_call_operand.vmem [shape: f32[512,320], index: 3, kind: input, shape index: {}]   ;;  %s32108_s4 = inlined_call_operand.vmem [shape: f32[2,8,320], index: 4, kind: output, shape index: {}]  }
   0x1   :  { %32109 = sst [smem:[#allocation6_spill]] %s32105_s1 }
   0x2   :  { %9 = vsyncpa [#allocation4], 0 }
   0x3   :  { %11 = vsyncpa [#allocation4 + $0x1], 0  ;;  %s28343_s15 = smov 0   ;;  %s28345_s16 = smov 0  }
   0x4   :  { %s28347_s17 = smov 0   ;;  %s28349_s18 = smov 0  }
   0x5   :  { %s28351_s19 = smov 0   ;;  %s28353_s20 = smov 0  }
   0x6   :  { %s28355_s21 = smov 0   ;;  %s28357_s22 = smov 0  }
   0x7 LB: > { %s20932_s23 = sadd.s32 4294967295, %s28312_s22   ;;  %s26_s24 = sadd.s32 1, %s28304_s20  ;;  %s28312_s22 = sphi %s28357_s22, %s17_s22   ;;  %s28308_s21 = sphi %s28355_s21, %s32120_s21   ;;  %s28304_s20 = sphi %s28353_s20, %s32119_s20   ;;  %s28300_s19 = sphi %s28351_s19, %s32118_s19   ;;  %s28296_s18 = sphi %s28349_s18, %s32117_s18   ;;  %s28292_s17 = sphi %s28347_s17, %s32116_s17   ;;  %s28288_s16 = sphi %s28345_s16, %s32115_s16   ;;  %s28284_s15 = sphi %s28343_s15, %s32114_s15  }
   0x8   : > { %p27_p0 = scmp.ge.s32.totalorder %s26_s24, 7  ;;  %s29_s25 = sadd.s32 1, %s28308_s21 }
   0x9   : > { %s64_s26 = sadd.s32 1, %s28292_s17  ;;  %p71_p1 = scmp.ne.s32.totalorder %s28292_s17, %s28288_s16 }
   0xa   : > { %s32122_s24 = smov (%p27_p0, %s26_s24), 0  ;;  %s32124_s25 = smov (!%p27_p0, %s29_s25), %s28308_s21 }
   0xb   : > { %s59_s27 = ssub.s32 %s28304_s20, %s32122_s24  ;;  %p72_p2 = scmp.eq.s32.totalorder %s28312_s22, 0 }
   0xc   : > { %p31_p3 = scmp.ge.s32.totalorder %s32124_s25, 2  ;;  %p77_p4 = scmp.ne.s32.totalorder %s28288_s16, %s28284_s15 }
   0xd   : > { %p28394_p5 = por %p72_p2, %p71_p1  ;;  %p78_p6 = scmp.eq.s32.totalorder %s20932_s23, 0 }
   0xe   : > { %s32126_s25 = smov (%p31_p3, %s32124_s25), 0  ;;  %p23948_p8 = scmp.lt.s32.totalorder %s28312_s22, 14 }
   0xf   : > { %p28400_p7 = por %p78_p6, %p77_p4  ;;  %s60_s30 = ssub.s32 %s28308_s21, %s32126_s25 }
  0x10   : > { %s61_s5 = sor.u32 %s60_s30, %s59_s27  ;;  %s187_s6 = sand.u32 1, %s28292_s17  }
  0x11   : > { %p62_p9 = scmp.eq.s32.totalorder %s61_s5, 0  ;;  %s23937_s7 = smul.u32 21504, %s187_s6 }
  0x12   : > { %s20936_s8 = sshll.u32 %s28308_s21, 1  ;;  %s23805_s10 = smul.u32 10752, %s28304_s20 }
  0x13   : > { %s28410_s9 = scalar_select %p62_p9, %s28292_s17, %s64_s26  }
  0x14   : > { %s191_s11 = scalar_lea.vmem [#allocation3], %s23937_s7  ;;  %p28415_p10 = pnand %p23948_p8, %p28394_p5 }
  0x15   : > { %s201_s12 = sshll.u32 %s191_s11, 4  ;;  %s198_s14 = sadd.s32 %s23805_s10, %s20936_s8  ;;  %s28419_s12 = int_to_ptr.vmem [resolvable:$true] %s201_s12 }
  0x16   : > { %s20938_s15 = sshll.u32 %s198_s14, 6  ;;  %s32113_s1 = sld [smem:[#allocation6_spill]] }
  0x17   : > { %s28426_s26 = scalar_lea.sflag [#allocation4], %s187_s6  ;;  %p28218_p12 = pneg %p28415_p10 }
  0x1c   : > { %s28424_s30 = scalar_lea.hbm %s32113_s1, %s20938_s15  ;;  %s28221_s8 = scalar_lea.hbm %s32113_s1, 4816896 }
  0x1d   : > { %s28216_s28 = scalar_lea.hbm %s28424_s30, 344064  ;;  %p28222_p1 = scmp.lt.u32.totalorder %s28424_s30, %s32113_s1 }
  0x1e   : > { %p28217_p11 = scmp.ne.s32.totalorder %s28424_s30, %s28216_s28  ;;  %p28223_p2 = scmp.lt.u32.totalorder %s28221_s8, %s28216_s28 }
  0x1f   : > { %p28225_p4 = scmp.lt.u32.totalorder %s28216_s28, %s28424_s30 }
  0x20   : > { %p28219_p13 = pnand %p28218_p12, %p28217_p11  ;;  %p28224_p3 = por %p28223_p2, %p28222_p1 }
  0x22   : > { %p28220_p0 = pneg %p28219_p13  ;;  %p28226_p5 = por %p28225_p4, %p28224_p3 }
  0x24   : > { %p28227_p6 = pnand %p28226_p5, %p28220_p0 }
  0x26   : > { %28230 = shalt.err (!%p28227_p6)
}
  0x27   : > { %s28231_s6 = scalar_lea.vmem %s28419_s12, 344064  ;;  %s28314_s14 = smov [#allocation3]  }
  0x28   : > { %p28232_p8 = scmp.ne.s32.totalorder %s28419_s12, %s28231_s6  ;;  %s28236_s15 = sshll.u32 %s28314_s14, 4  ;;  %s28237_s15 = int_to_ptr.vmem [resolvable:$false] %s28236_s15 }
  0x29   : > { %s28238_s23 = scalar_lea.vmem %s28237_s15, 688128  ;;  %p28239_p13 = scmp.lt.s32.totalorder %s28419_s12, %s28237_s15 }
  0x2a   : > { %p28234_p9 = pnand %p28232_p8, %p28218_p12  ;;  %p28240_p1 = scmp.lt.s32.totalorder %s28238_s23, %s28231_s6 }
  0x2c   : > { %p28235_p11 = pneg %p28234_p9  ;;  %p28241_p2 = por %p28240_p1, %p28239_p13 }
  0x2e   : > { %p28242_p3 = pnand %p28241_p2, %p28235_p11 }
  0x30   : > { %28245 = shalt.err (!%p28242_p3)
}
  0x31   : > { %s28315_s27 = smov 256   ;;  %s28316_s28 = smov 128  }
  0x32   : > { %s28317_s5 = smov 8   ;;  %p20939_p12 = scmp.ge.s32.totalorder %s28312_s22, 1 }
  0x33   : > { %23947 = dma.hbm_to_vmem [thread:$0]  (!%p28415_p10), %s28424_s30, 344064, %s28419_s12, %s28426_s26, %s28315_s27, %s28316_s28, %s28317_s5  }
  0x34   : > { %p227_p0 = scmp.lt.s32.totalorder %s28312_s22, 15 }
  0x36   : > { %p228_p4 = pnand %p20939_p12, %p227_p0 }
  0x37   : > { %s233_s7 = sand.u32 (!%p228_p4), 1, %s28288_s16  }
  0x38   : > { %231 = sbr.rel (%p228_p4) target bundleno = 3245 (0xcad), region = 36  ;;  %s234_s10 = scalar_lea.sflag (!%p228_p4), [#allocation4], %s233_s7 }
  0x39   : > { %s23938_s8 = smul.u32 (!%p228_p4), 21504, %s233_s7 }
  0x3b   : > { %s28457_s11 = scalar_lea.vmem (!%p228_p4), [#allocation3], %s23938_s8 }
  0x3f   : > { %28279 = dma.done.wait (%p28400_p7), %s234_s10, 344064  }
  0x40   : > { %28281 = vsyncadd (%p28400_p7), %s234_s10, 4294623232  ;;  %p277_p10 = scmp.lt.s32.totalorder %s28296_s18, 6  ;;  %s20941_s12 = sshll.u32 %s28300_s19, 1 }
  0x41   : > { %p285_p5 = scmp.lt.s32.totalorder %s20941_s12, 3  ;;  %s20942_s13 = sshll.u32 %s28300_s19, 5 }
  0x42   : > { %s278_s30 = scalar_select %p277_p10, %s28296_s18, 6 }
  0x43   : > { %s32128_s12 = smov (!%p285_p5, %s20941_s12), 3  ;;  %p290_p6 = scmp.lt.s32.totalorder %s20942_s13, 63 }
  0x44   : > { %s23939_s26 = smul.u32 672, %s278_s30  ;;  %s287_s15 = scalar_lea.vmem %s32106_s2, %s32128_s12 }
  0x45   : > { %p296_p8 = scmp.lt.s32.totalorder %s28300_s19, 1  ;;  %s32130_s13 = smov (!%p290_p6, %s20942_s13), 63 }
  0x46   : > { %s28474_s27 = scalar_lea.vmem %s32104_s0, %s23939_s26  ;;  %s23940_s28 = smul.u32 24, %s32130_s13 }
  0x47   : > { %s32132_s19 = smov (!%p296_p8, %s28300_s19), 1  ;;  %p20945_p7 = scmp.ne.s32.totalorder %s28296_s18, 0 }
  0x48   : > { %s23941_s5 = smul.u32 24, %s32132_s19  ;;  %s28480_s10 = scalar_lea.vmem %s32107_s3, %s23940_s28  ;;  %v307_v0 = vlaneseq (!%p20945_p7)  ;;  %v305_v2 = vld [vmem:[%s287_s15] sm:$0x3] (!%p20945_p7) }
  0x49   : > { %304 = sbr.rel (%p20945_p7) target bundleno = 81 (0x51), region = 44 }
  0x4a   : > { %s28485_s6 = scalar_lea.vmem %s32108_s4, %s23941_s5  ;;  %v308_v1 = vshrl.u32 (!%p20945_p7), %v307_v0, 7 }
  0x4c   : > { %v309_v3 = vsub.s32 (!%p20945_p7), 0, %v308_v1  ;;  %v313_v4 = vsub.s32 (!%p20945_p7), 1, %v308_v1 }
  0x4e   : > { %v310_v5 = vrot.slane (!%p20945_p7), %v305_v2, %v309_v3  ;;  %v314_v6 = vrot.slane (!%p20945_p7), %v305_v2, %v313_v4 }
  0x50   : > { %317 = vst [vmem:[#allocation2] sm:$0xff] %v310_v5  ;;  %318 = vst [vmem:[#allocation2 + $0x8] sm:$0xff] %v314_v6 }
  0x51 PF: > { %v24016_v7 = vld [vmem:[%s28457_s11 + $0x4] ss:$8 sps:$4 sm:$0xff]   ;;  %v24020_v9 = vld [vmem:[%s28457_s11] ss:$8 sps:$4 sm:$0xff]   ;;  %v24022_v11 = vld [vmem:[%s28457_s11 + $0x14] ss:$8 sps:$4 sm:$0xff]  }
  0x52   : > { %v24018_v8 = vld [vmem:[%s28457_s11 + $0x104] ss:$8 sps:$4 sm:$0xff]   ;;  %17121 = vmatprep.subr.bf16.mxu0 %v24016_v7  ;;  %v24021_v10 = vld [vmem:[%s28457_s11 + $0x100] ss:$8 sps:$4 sm:$0xff]   ;;  %v24024_v12 = vld [vmem:[%s28457_s11 + $0x114] ss:$8 sps:$4 sm:$0xff]  }
  0x53   : > { %17162 = vmatprep.subr.bf16.mxu1 %v24018_v8  ;;  %17122 = vmatpush1.bf16.msra.mxu0 %v24020_v9  ;;  %v24026_v13 = vld [vmem:[%s28457_s11 + $0x10] ss:$8 sps:$4 sm:$0xff]   ;;  %v24028_v15 = vld [vmem:[%s28457_s11 + $0x24] ss:$8 sps:$4 sm:$0xff]   ;;  %v24032_v17 = vld [vmem:[%s28457_s11 + $0x20] ss:$8 sps:$4 sm:$0xff]  }
  0x54   : > { %17163 = vmatpush1.bf16.msra.mxu1 %v24021_v10  ;;  %17123 = vmatprep.subr.bf16.mxu0 %v24022_v11  ;;  %v24027_v14 = vld [vmem:[%s28457_s11 + $0x110] ss:$8 sps:$4 sm:$0xff]   ;;  %v24030_v16 = vld [vmem:[%s28457_s11 + $0x124] ss:$8 sps:$4 sm:$0xff]   ;;  %v24033_v18 = vld [vmem:[%s28457_s11 + $0x120] ss:$8 sps:$4 sm:$0xff]  }
  0x55   : > { %17164 = vmatprep.subr.bf16.mxu1 %v24024_v12  ;;  %v24034_v19 = vld [vmem:[%s28457_s11 + $0x34] ss:$8 sps:$4 sm:$0xff]   ;;  %v24038_v21 = vld [vmem:[%s28457_s11 + $0x30] ss:$8 sps:$4 sm:$0xff]   ;;  %v24040_v23 = vld [vmem:[%s28457_s11 + $0x44] ss:$8 sps:$4 sm:$0xff]  }
  0x56   : > { %v24036_v20 = vld [vmem:[%s28457_s11 + $0x134] ss:$8 sps:$4 sm:$0xff]   ;;  %v24039_v22 = vld [vmem:[%s28457_s11 + $0x130] ss:$8 sps:$4 sm:$0xff]   ;;  %v24042_v24 = vld [vmem:[%s28457_s11 + $0x144] ss:$8 sps:$4 sm:$0xff]  }
  0x57   : > { %17124 = vmatpush1.bf16.msra.mxu0 %v24026_v13  ;;  %v24044_v25 = vld [vmem:[%s28457_s11 + $0x40] ss:$8 sps:$4 sm:$0xff]   ;;  %v24046_v27 = vld [vmem:[%s28457_s11 + $0x54] ss:$8 sps:$4 sm:$0xff]   ;;  %v24050_v29 = vld [vmem:[%s28457_s11 + $0x50] ss:$8 sps:$4 sm:$0xff]  }
  0x58   : > { %17165 = vmatpush1.bf16.msra.mxu1 %v24027_v14  ;;  %17125 = vmatprep.subr.bf16.mxu0 %v24028_v15  ;;  %v24045_v26 = vld [vmem:[%s28457_s11 + $0x140] ss:$8 sps:$4 sm:$0xff]   ;;  %v24048_v28 = vld [vmem:[%s28457_s11 + $0x154] ss:$8 sps:$4 sm:$0xff]   ;;  %v24051_v30 = vld [vmem:[%s28457_s11 + $0x150] ss:$8 sps:$4 sm:$0xff]  }
  0x59   : > { %17166 = vmatprep.subr.bf16.mxu1 %v24030_v16  ;;  %v24052_v31 = vld [vmem:[%s28457_s11 + $0x64] ss:$8 sps:$4 sm:$0xff]   ;;  %v24056_v33 = vld [vmem:[%s28457_s11 + $0x60] ss:$8 sps:$4 sm:$0xff]   ;;  %v24058_v35 = vld [vmem:[%s28457_s11 + $0x74] ss:$8 sps:$4 sm:$0xff]  }
  0x5a   : > { %v24054_v32 = vld [vmem:[%s28457_s11 + $0x164] ss:$8 sps:$4 sm:$0xff]   ;;  %v24057_v34 = vld [vmem:[%s28457_s11 + $0x160] ss:$8 sps:$4 sm:$0xff]   ;;  %v24060_v36 = vld [vmem:[%s28457_s11 + $0x174] ss:$8 sps:$4 sm:$0xff]  }
  0x5b   : > { %17126 = vmatpush1.bf16.msra.mxu0 %v24032_v17  ;;  %v24062_v37 = vld [vmem:[%s28457_s11 + $0x70] ss:$8 sps:$4 sm:$0xff]   ;;  %v24064_v39 = vld [vmem:[%s28457_s11 + $0x84] ss:$8 sps:$4 sm:$0xff]   ;;  %v24068_v41 = vld [vmem:[%s28457_s11 + $0x80] ss:$8 sps:$4 sm:$0xff]  }
  0x5c   : > { %17167 = vmatpush1.bf16.msra.mxu1 %v24033_v18  ;;  %17127 = vmatprep.subr.bf16.mxu0 %v24034_v19  ;;  %v24063_v38 = vld [vmem:[%s28457_s11 + $0x170] ss:$8 sps:$4 sm:$0xff]   ;;  %v24066_v40 = vld [vmem:[%s28457_s11 + $0x184] ss:$8 sps:$4 sm:$0xff]   ;;  %v24069_v42 = vld [vmem:[%s28457_s11 + $0x180] ss:$8 sps:$4 sm:$0xff]  }
  0x5d   : > { %17168 = vmatprep.subr.bf16.mxu1 %v24036_v20  ;;  %v24070_v43 = vld [vmem:[%s28457_s11 + $0x94] ss:$8 sps:$4 sm:$0xff]   ;;  %v24074_v45 = vld [vmem:[%s28457_s11 + $0x90] ss:$8 sps:$4 sm:$0xff]   ;;  %v24076_v47 = vld [vmem:[%s28457_s11 + $0xa4] ss:$8 sps:$4 sm:$0xff]  }
  0x5e   : > { %v24072_v44 = vld [vmem:[%s28457_s11 + $0x194] ss:$8 sps:$4 sm:$0xff]   ;;  %v24075_v46 = vld [vmem:[%s28457_s11 + $0x190] ss:$8 sps:$4 sm:$0xff]   ;;  %v24078_v48 = vld [vmem:[%s28457_s11 + $0x1a4] ss:$8 sps:$4 sm:$0xff]  }
  0x5f   : > { %17128 = vmatpush1.bf16.msra.mxu0 %v24038_v21  ;;  %v24080_v49 = vld [vmem:[%s28457_s11 + $0xa0] ss:$8 sps:$4 sm:$0xff]   ;;  %v24082_v51 = vld [vmem:[%s28457_s11 + $0xb4] ss:$8 sps:$4 sm:$0xff]   ;;  %v24086_v56 = vld [vmem:[%s28457_s11 + $0xb0] ss:$8 sps:$4 sm:$0xff]  }
  0x60   : > { %17169 = vmatpush1.bf16.msra.mxu1 %v24039_v22  ;;  %17129 = vmatprep.subr.bf16.mxu0 %v24040_v23  ;;  %v24081_v50 = vld [vmem:[%s28457_s11 + $0x1a0] ss:$8 sps:$4 sm:$0xff]   ;;  %v24084_v52 = vld [vmem:[%s28457_s11 + $0x1b4] ss:$8 sps:$4 sm:$0xff]   ;;  %v24087_v57 = vld [vmem:[%s28457_s11 + $0x1b0] ss:$8 sps:$4 sm:$0xff]  }
  0x61   : > { %17170 = vmatprep.subr.bf16.mxu1 %v24042_v24  ;;  %v321_v53 = vld [vmem:[%s28474_s27] sm:$0xff]  ;;  %v322_v55 = vld [vmem:[%s28474_s27 + $0x8] sm:$0xff]  ;;  %v24088_v59 = vld [vmem:[%s28457_s11 + $0xc4] ss:$8 sps:$4 sm:$0xff]   ;;  %p23802_p9 = scmp.ne.s32.totalorder %s28296_s18, 6 }
  0x62   : > { %v20947_v54 = vcombine.high %v321_v53, %v321_v53  ;;  %v20949_v58 = vcombine.high %v322_v55, %v322_v55  ;;  %v24090_v60 = vld [vmem:[%s28457_s11 + $0x1c4] ss:$8 sps:$4 sm:$0xff]   ;;  %v24092_v61 = vld [vmem:[%s28457_s11 + $0xc0] ss:$8 sps:$4 sm:$0xff]   ;;  %v24094_v63 = vld [vmem:[%s28457_s11 + $0xd4] ss:$8 sps:$4 sm:$0xff]   ;;  %v20946_v13 = vcombine.low %v321_v53, %v321_v53  ;;  %v20948_v14 = vcombine.low %v322_v55, %v322_v55 }
  0x63   : > { %17130 = vmatpush1.bf16.msra.mxu0 %v24044_v25  ;;  %v24093_v62 = vld [vmem:[%s28457_s11 + $0x1c0] ss:$8 sps:$4 sm:$0xff]   ;;  %v24096_v0 = vld [vmem:[%s28457_s11 + $0x1d4] ss:$8 sps:$4 sm:$0xff]   ;;  %v24098_v1 = vld [vmem:[%s28457_s11 + $0xd0] ss:$8 sps:$4 sm:$0xff]  }
  0x64   : > { %17171 = vmatpush1.bf16.msra.mxu1 %v24045_v26  ;;  %17131 = vmatprep.subr.bf16.mxu0 %v24046_v27  ;;  %v24099_v2 = vld [vmem:[%s28457_s11 + $0x1d0] ss:$8 sps:$4 sm:$0xff]   ;;  %v24100_v3 = vld [vmem:[%s28457_s11 + $0xe4] ss:$8 sps:$4 sm:$0xff]   ;;  %v24104_v5 = vld [vmem:[%s28457_s11 + $0xe0] ss:$8 sps:$4 sm:$0xff]  }
  0x65   : > { %17172 = vmatprep.subr.bf16.mxu1 %v24048_v28  ;;  %17153 = vmatprep.mubr.bf16.mxu0 %v20947_v54  ;;  %v24102_v4 = vld [vmem:[%s28457_s11 + $0x1e4] ss:$8 sps:$4 sm:$0xff]   ;;  %v24105_v6 = vld [vmem:[%s28457_s11 + $0x1e0] ss:$8 sps:$4 sm:$0xff]   ;;  %v24106_v7 = vld [vmem:[%s28457_s11 + $0xf4] ss:$8 sps:$4 sm:$0xff]  }
  0x66   : > { %17194 = vmatprep.mubr.bf16.mxu1 %v20949_v58  ;;  %v24108_v8 = vld [vmem:[%s28457_s11 + $0x1f4] ss:$8 sps:$4 sm:$0xff]   ;;  %v24110_v9 = vld [vmem:[%s28457_s11 + $0xf0] ss:$8 sps:$4 sm:$0xff]   ;;  %v24118_v11 = vld [vmem:[%s28457_s11 + $0x204] ss:$8 sps:$4 sm:$0xff]  }
  0x67   : > { %17132 = vmatpush1.bf16.msra.mxu0 %v24050_v29  ;;  %v24111_v10 = vld [vmem:[%s28457_s11 + $0x1f0] ss:$8 sps:$4 sm:$0xff]   ;;  %v24121_v12 = vld [vmem:[%s28457_s11 + $0x304] ss:$8 sps:$4 sm:$0xff]   ;;  %v24116_v15 = vld [vmem:[%s28457_s11 + $0x200] ss:$8 sps:$4 sm:$0xff]  }
  0x68   : > { %17173 = vmatpush1.bf16.msra.mxu1 %v24051_v30  ;;  %17133 = vmatprep.subr.bf16.mxu0 %v24052_v31  ;;  %v24119_v16 = vld [vmem:[%s28457_s11 + $0x300] ss:$8 sps:$4 sm:$0xff]   ;;  %v24124_v17 = vld [vmem:[%s28457_s11 + $0x214] ss:$8 sps:$4 sm:$0xff]   ;;  %v24122_v19 = vld [vmem:[%s28457_s11 + $0x210] ss:$8 sps:$4 sm:$0xff]  }
  0x69   : > { %17174 = vmatprep.subr.bf16.mxu1 %v24054_v32  ;;  %v24127_v18 = vld [vmem:[%s28457_s11 + $0x314] ss:$8 sps:$4 sm:$0xff]   ;;  %v24125_v20 = vld [vmem:[%s28457_s11 + $0x310] ss:$8 sps:$4 sm:$0xff]   ;;  %v24130_v21 = vld [vmem:[%s28457_s11 + $0x224] ss:$8 sps:$4 sm:$0xff]  }
  0x6a   : > { %v24133_v22 = vld [vmem:[%s28457_s11 + $0x324] ss:$8 sps:$4 sm:$0xff]   ;;  %v24128_v23 = vld [vmem:[%s28457_s11 + $0x220] ss:$8 sps:$4 sm:$0xff]   ;;  %v24136_v25 = vld [vmem:[%s28457_s11 + $0x234] ss:$8 sps:$4 sm:$0xff]  }
  0x6b   : > { %17134 = vmatpush1.bf16.msra.mxu0 %v24056_v33  ;;  %v24131_v24 = vld [vmem:[%s28457_s11 + $0x320] ss:$8 sps:$4 sm:$0xff]   ;;  %v24139_v26 = vld [vmem:[%s28457_s11 + $0x334] ss:$8 sps:$4 sm:$0xff]   ;;  %v24134_v27 = vld [vmem:[%s28457_s11 + $0x230] ss:$8 sps:$4 sm:$0xff]  }
  0x6c   : > { %17175 = vmatpush1.bf16.msra.mxu1 %v24057_v34  ;;  %17135 = vmatprep.subr.bf16.mxu0 %v24058_v35  ;;  %v24137_v28 = vld [vmem:[%s28457_s11 + $0x330] ss:$8 sps:$4 sm:$0xff]   ;;  %v24142_v29 = vld [vmem:[%s28457_s11 + $0x244] ss:$8 sps:$4 sm:$0xff]   ;;  %v24140_v31 = vld [vmem:[%s28457_s11 + $0x240] ss:$8 sps:$4 sm:$0xff]  }
  0x6d   : > { %17176 = vmatprep.subr.bf16.mxu1 %v24060_v36  ;;  %v24145_v30 = vld [vmem:[%s28457_s11 + $0x344] ss:$8 sps:$4 sm:$0xff]   ;;  %v24143_v32 = vld [vmem:[%s28457_s11 + $0x340] ss:$8 sps:$4 sm:$0xff]   ;;  %v24148_v33 = vld [vmem:[%s28457_s11 + $0x254] ss:$8 sps:$4 sm:$0xff]  }
  0x6e   : > { %v24151_v34 = vld [vmem:[%s28457_s11 + $0x354] ss:$8 sps:$4 sm:$0xff]   ;;  %v24146_v35 = vld [vmem:[%s28457_s11 + $0x250] ss:$8 sps:$4 sm:$0xff]   ;;  %v24181_v58 = vld [vmem:[%s28457_s11 + $0x3a4] ss:$8 sps:$4 sm:$0xff]  }
  0x6f   : > { %17136 = vmatpush1.bf16.msra.mxu0 %v24062_v37  ;;  %v24149_v36 = vld [vmem:[%s28457_s11 + $0x350] ss:$8 sps:$4 sm:$0xff]   ;;  %v24154_v37 = vld [vmem:[%s28457_s11 + $0x264] ss:$8 sps:$4 sm:$0xff]   ;;  %v24172_v53 = vld [vmem:[%s28457_s11 + $0x294] ss:$8 sps:$4 sm:$0xff]  }
  0x70   : > { %17177 = vmatpush1.bf16.msra.mxu1 %v24063_v38  ;;  %17137 = vmatprep.subr.bf16.mxu0 %v24064_v39  ;;  %v24157_v38 = vld [vmem:[%s28457_s11 + $0x364] ss:$8 sps:$4 sm:$0xff]   ;;  %v24175_v54 = vld [vmem:[%s28457_s11 + $0x394] ss:$8 sps:$4 sm:$0xff]   ;;  %v24170_v55 = vld [vmem:[%s28457_s11 + $0x290] ss:$8 sps:$4 sm:$0xff]  }
  0x71   : > { %17178 = vmatprep.subr.bf16.mxu1 %v24066_v40  ;;  %v28581_v39 = vld [vmem:[%s28474_s27 + $0x10] sm:$0xff]  ;;  %v28584_v40 = vld [vmem:[%s28474_s27 + $0x18] sm:$0xff]  ;;  %vm20816_vm0 = vcmask (!%p23802_p9), 523264  }
  0x73   : > { %17138 = vmatpush1.bf16.msra.mxu0 %v24068_v41  ;;  %v24152_v41 = vld [vmem:[%s28457_s11 + $0x260] ss:$8 sps:$4 sm:$0xff]  }
  0x74   : > { %17179 = vmatpush1.bf16.msra.mxu1 %v24069_v42  ;;  %17139 = vmatprep.subr.bf16.mxu0 %v24070_v43  ;;  %v24155_v42 = vld [vmem:[%s28457_s11 + $0x360] ss:$8 sps:$4 sm:$0xff]   ;;  %v20951_v43 = vcombine.high %v28581_v39, %v28581_v39 }
  0x75   : > { %17180 = vmatprep.subr.bf16.mxu1 %v24072_v44  ;;  %v20953_v44 = vcombine.high %v28584_v40, %v28584_v40 }
  0x77   : > { %17140 = vmatpush1.bf16.msra.mxu0 %v24074_v45  ;;  %v24160_v45 = vld [vmem:[%s28457_s11 + $0x274] ss:$8 sps:$4 sm:$0xff]  }
  0x78   : > { %17181 = vmatpush1.bf16.msra.mxu1 %v24075_v46  ;;  %17141 = vmatprep.subr.bf16.mxu0 %v24076_v47  ;;  %v24163_v46 = vld [vmem:[%s28457_s11 + $0x374] ss:$8 sps:$4 sm:$0xff]   ;;  %v24158_v47 = vld [vmem:[%s28457_s11 + $0x270] ss:$8 sps:$4 sm:$0xff]  }
  0x79   : > { %17182 = vmatprep.subr.bf16.mxu1 %v24078_v48  ;;  %v24161_v48 = vld [vmem:[%s28457_s11 + $0x370] ss:$8 sps:$4 sm:$0xff]  }
  0x7b   : > { %17142 = vmatpush1.bf16.msra.mxu0 %v24080_v49  ;;  %v24166_v49 = vld [vmem:[%s28457_s11 + $0x284] ss:$8 sps:$4 sm:$0xff]  }
  0x7c   : > { %17183 = vmatpush1.bf16.msra.mxu1 %v24081_v50  ;;  %17143 = vmatprep.subr.bf16.mxu0 %v24082_v51  ;;  %v24169_v50 = vld [vmem:[%s28457_s11 + $0x384] ss:$8 sps:$4 sm:$0xff]   ;;  %v24164_v51 = vld [vmem:[%s28457_s11 + $0x280] ss:$8 sps:$4 sm:$0xff]  }
  0x7d   : > { %17184 = vmatprep.subr.bf16.mxu1 %v24084_v52  ;;  %v24167_v52 = vld [vmem:[%s28457_s11 + $0x380] ss:$8 sps:$4 sm:$0xff]  }
  0x7f   : > { %17144 = vmatpush1.bf16.msra.mxu0 %v24086_v56  ;;  %v24173_v56 = vld [vmem:[%s28457_s11 + $0x390] ss:$8 sps:$4 sm:$0xff]  }
  0x80   : > { %17185 = vmatpush1.bf16.msra.mxu1 %v24087_v57  ;;  %17145 = vmatprep.subr.bf16.mxu0 %v24088_v59  ;;  %v24178_v57 = vld [vmem:[%s28457_s11 + $0x2a4] ss:$8 sps:$4 sm:$0xff]   ;;  %v24176_v59 = vld [vmem:[%s28457_s11 + $0x2a0] ss:$8 sps:$4 sm:$0xff]  }
  0x81   : > { %17186 = vmatprep.subr.bf16.mxu1 %v24090_v60  ;;  %v24179_v60 = vld [vmem:[%s28457_s11 + $0x3a0] ss:$8 sps:$4 sm:$0xff]  }
  0x83   : > { %17146 = vmatpush1.bf16.msra.mxu0 %v24092_v61  ;;  %v24184_v61 = vld [vmem:[%s28457_s11 + $0x2b4] ss:$8 sps:$4 sm:$0xff]  }
  0x84   : > { %17187 = vmatpush1.bf16.msra.mxu1 %v24093_v62  ;;  %17147 = vmatprep.subr.bf16.mxu0 %v24094_v63  ;;  %v24187_v62 = vld [vmem:[%s28457_s11 + $0x3b4] ss:$8 sps:$4 sm:$0xff]   ;;  %v24182_v63 = vld [vmem:[%s28457_s11 + $0x2b0] ss:$8 sps:$4 sm:$0xff]  }
  0x85   : > { %17188 = vmatprep.subr.bf16.mxu1 %v24096_v0  ;;  %v24185_v0 = vld [vmem:[%s28457_s11 + $0x3b0] ss:$8 sps:$4 sm:$0xff]  }
  0x87   : > { %17148 = vmatpush1.bf16.msra.mxu0 %v24098_v1  ;;  %v24190_v1 = vld [vmem:[%s28457_s11 + $0x2c4] ss:$8 sps:$4 sm:$0xff]  }
  0x88   : > { %17189 = vmatpush1.bf16.msra.mxu1 %v24099_v2  ;;  %17149 = vmatprep.subr.bf16.mxu0 %v24100_v3  ;;  %v24193_v2 = vld [vmem:[%s28457_s11 + $0x3c4] ss:$8 sps:$4 sm:$0xff]   ;;  %v24188_v3 = vld [vmem:[%s28457_s11 + $0x2c0] ss:$8 sps:$4 sm:$0xff]  }
  0x89   : > { %17190 = vmatprep.subr.bf16.mxu1 %v24102_v4  ;;  %v24191_v4 = vld [vmem:[%s28457_s11 + $0x3c0] ss:$8 sps:$4 sm:$0xff]  }
  0x8b   : > { %17150 = vmatpush1.bf16.msra.mxu0 %v24104_v5  ;;  %v24196_v5 = vld [vmem:[%s28457_s11 + $0x2d4] ss:$8 sps:$4 sm:$0xff]  }
  0x8c   : > { %17191 = vmatpush1.bf16.msra.mxu1 %v24105_v6  ;;  %17151 = vmatprep.subr.bf16.mxu0 %v24106_v7  ;;  %v24199_v6 = vld [vmem:[%s28457_s11 + $0x3d4] ss:$8 sps:$4 sm:$0xff]   ;;  %v24194_v7 = vld [vmem:[%s28457_s11 + $0x2d0] ss:$8 sps:$4 sm:$0xff]  }
  0x8d   : > { %17192 = vmatprep.subr.bf16.mxu1 %v24108_v8  ;;  %v24197_v8 = vld [vmem:[%s28457_s11 + $0x3d0] ss:$8 sps:$4 sm:$0xff]  }
  0x8f   : > { %17152 = vmatpush1.bf16.msra.mxu0 %v24110_v9  ;;  %v24202_v9 = vld [vmem:[%s28457_s11 + $0x2e4] ss:$8 sps:$4 sm:$0xff]  }
  0x90   : > { %17193 = vmatpush1.bf16.msra.mxu1 %v24111_v10  ;;  %17203 = vmatprep.subr.bf16.mxu0 %v24118_v11  ;;  %v24205_v10 = vld [vmem:[%s28457_s11 + $0x3e4] ss:$8 sps:$4 sm:$0xff]   ;;  %v24200_v11 = vld [vmem:[%s28457_s11 + $0x2e0] ss:$8 sps:$4 sm:$0xff]  }
  0x91   : > { %17244 = vmatprep.subr.bf16.mxu1 %v24121_v12  ;;  %v24203_v12 = vld [vmem:[%s28457_s11 + $0x3e0] ss:$8 sps:$4 sm:$0xff]  }
  0x92   : > { %17154 = vmatmul.mubr.bf16.vlgmr.msra.gmra.mrb[0].mxu0 %v20946_v13  ;;  %v24208_v13 = vld [vmem:[%s28457_s11 + $0x2f4] ss:$8 sps:$4 sm:$0xff]  }
  0x93   : > { %17195 = vmatmul.mubr.bf16.vlgmr.msra.gmra.mrb[0].mxu1 %v20948_v14  ;;  %17204 = vmatpush1.bf16.msra.mxu0 %v24116_v15  ;;  %v24211_v14 = vld [vmem:[%s28457_s11 + $0x3f4] ss:$8 sps:$4 sm:$0xff]   ;;  %v24206_v15 = vld [vmem:[%s28457_s11 + $0x2f0] ss:$8 sps:$4 sm:$0xff]  }
  0x94   : > { %17245 = vmatpush1.bf16.msra.mxu1 %v24119_v16  ;;  %17205 = vmatprep.subr.bf16.mxu0 %v24124_v17  ;;  %v24209_v16 = vld [vmem:[%s28457_s11 + $0x3f0] ss:$8 sps:$4 sm:$0xff]   ;;  %v24218_v17 = vld [vmem:[%s28457_s11 + $0x404] ss:$8 sps:$4 sm:$0xff]  }
  0x95   : > { %17246 = vmatprep.subr.bf16.mxu1 %v24127_v18  ;;  %17235 = vmatprep.mubr.bf16.mxu0 %v20951_v43  ;;  %v24221_v18 = vld [vmem:[%s28457_s11 + $0x504] ss:$8 sps:$4 sm:$0xff]   ;;  %v24248_v43 = vld [vmem:[%s28457_s11 + $0x454] ss:$8 sps:$4 sm:$0xff]  }
  0x96   : > { %17276 = vmatprep.mubr.bf16.mxu1 %v20953_v44  ;;  %v24251_v44 = vld [vmem:[%s28457_s11 + $0x554] ss:$8 sps:$4 sm:$0xff]  }
  0x97   : > { %17206 = vmatpush1.bf16.msra.mxu0 %v24122_v19  ;;  %v20950_v19 = vcombine.low %v28581_v39, %v28581_v39  ;;  %v24242_v39 = vld [vmem:[%s28457_s11 + $0x444] ss:$8 sps:$4 sm:$0xff]  }
  0x98   : > { %17247 = vmatpush1.bf16.msra.mxu1 %v24125_v20  ;;  %17207 = vmatprep.subr.bf16.mxu0 %v24130_v21  ;;  %v20952_v20 = vcombine.low %v28584_v40, %v28584_v40  ;;  %v24216_v21 = vld [vmem:[%s28457_s11 + $0x400] ss:$8 sps:$4 sm:$0xff]   ;;  %v24245_v40 = vld [vmem:[%s28457_s11 + $0x544] ss:$8 sps:$4 sm:$0xff]  }
  0x99   : > { %17248 = vmatprep.subr.bf16.mxu1 %v24133_v22  ;;  %v24219_v22 = vld [vmem:[%s28457_s11 + $0x500] ss:$8 sps:$4 sm:$0xff]  }
  0x9b   : > { %17208 = vmatpush1.bf16.msra.mxu0 %v24128_v23  ;;  %v24224_v23 = vld [vmem:[%s28457_s11 + $0x414] ss:$8 sps:$4 sm:$0xff]  }
  0x9c   : > { %17249 = vmatpush1.bf16.msra.mxu1 %v24131_v24  ;;  %17209 = vmatprep.subr.bf16.mxu0 %v24136_v25  ;;  %v24227_v24 = vld [vmem:[%s28457_s11 + $0x514] ss:$8 sps:$4 sm:$0xff]  }
  0x9d   : > { %17250 = vmatprep.subr.bf16.mxu1 %v24139_v26  ;;  %v28639_v25 = vld [vmem:[%s28474_s27 + $0x20] sm:$0xff]  ;;  %v28642_v26 = vld [vmem:[%s28474_s27 + $0x28] sm:$0xff] }
  0x9f   : > { %17210 = vmatpush1.bf16.msra.mxu0 %v24134_v27  ;;  %v20955_v27 = vcombine.high %v28639_v25, %v28639_v25 }
  0xa0   : > { %17251 = vmatpush1.bf16.msra.mxu1 %v24137_v28  ;;  %17211 = vmatprep.subr.bf16.mxu0 %v24142_v29  ;;  %v20957_v28 = vcombine.high %v28642_v26, %v28642_v26  ;;  %v24222_v29 = vld [vmem:[%s28457_s11 + $0x410] ss:$8 sps:$4 sm:$0xff]  }
  0xa1   : > { %17252 = vmatprep.subr.bf16.mxu1 %v24145_v30  ;;  %v24225_v30 = vld [vmem:[%s28457_s11 + $0x510] ss:$8 sps:$4 sm:$0xff]  }
  0xa3   : > { %17212 = vmatpush1.bf16.msra.mxu0 %v24140_v31  ;;  %v24230_v31 = vld [vmem:[%s28457_s11 + $0x424] ss:$8 sps:$4 sm:$0xff]  }
  0xa4   : > { %17253 = vmatpush1.bf16.msra.mxu1 %v24143_v32  ;;  %17213 = vmatprep.subr.bf16.mxu0 %v24148_v33  ;;  %v24233_v32 = vld [vmem:[%s28457_s11 + $0x524] ss:$8 sps:$4 sm:$0xff]   ;;  %v24228_v33 = vld [vmem:[%s28457_s11 + $0x420] ss:$8 sps:$4 sm:$0xff]  }
  0xa5   : > { %17254 = vmatprep.subr.bf16.mxu1 %v24151_v34  ;;  %v24231_v34 = vld [vmem:[%s28457_s11 + $0x520] ss:$8 sps:$4 sm:$0xff]  }
  0xa7   : > { %17214 = vmatpush1.bf16.msra.mxu0 %v24146_v35  ;;  %v24236_v35 = vld [vmem:[%s28457_s11 + $0x434] ss:$8 sps:$4 sm:$0xff]  }
  0xa8   : > { %17255 = vmatpush1.bf16.msra.mxu1 %v24149_v36  ;;  %17215 = vmatprep.subr.bf16.mxu0 %v24154_v37  ;;  %v24239_v36 = vld [vmem:[%s28457_s11 + $0x534] ss:$8 sps:$4 sm:$0xff]   ;;  %v24234_v37 = vld [vmem:[%s28457_s11 + $0x430] ss:$8 sps:$4 sm:$0xff]  }
  0xa9   : > { %17256 = vmatprep.subr.bf16.mxu1 %v24157_v38  ;;  %v24237_v38 = vld [vmem:[%s28457_s11 + $0x530] ss:$8 sps:$4 sm:$0xff]  }
  0xab   : > { %17216 = vmatpush1.bf16.msra.mxu0 %v24152_v41  ;;  %v24240_v41 = vld [vmem:[%s28457_s11 + $0x440] ss:$8 sps:$4 sm:$0xff]  }
  0xac   : > { %17257 = vmatpush1.bf16.msra.mxu1 %v24155_v42  ;;  %17217 = vmatprep.subr.bf16.mxu0 %v24160_v45  ;;  %v24243_v42 = vld [vmem:[%s28457_s11 + $0x540] ss:$8 sps:$4 sm:$0xff]   ;;  %v24246_v45 = vld [vmem:[%s28457_s11 + $0x450] ss:$8 sps:$4 sm:$0xff]  }
  0xad   : > { %17258 = vmatprep.subr.bf16.mxu1 %v24163_v46  ;;  %v24249_v46 = vld [vmem:[%s28457_s11 + $0x550] ss:$8 sps:$4 sm:$0xff]  }
  0xaf   : > { %17218 = vmatpush1.bf16.msra.mxu0 %v24158_v47  ;;  %v24254_v47 = vld [vmem:[%s28457_s11 + $0x464] ss:$8 sps:$4 sm:$0xff]  }
  0xb0   : > { %17259 = vmatpush1.bf16.msra.mxu1 %v24161_v48  ;;  %17219 = vmatprep.subr.bf16.mxu0 %v24166_v49  ;;  %v24257_v48 = vld [vmem:[%s28457_s11 + $0x564] ss:$8 sps:$4 sm:$0xff]   ;;  %v24252_v49 = vld [vmem:[%s28457_s11 + $0x460] ss:$8 sps:$4 sm:$0xff]  }
  0xb1   : > { %17260 = vmatprep.subr.bf16.mxu1 %v24169_v50  ;;  %v24255_v50 = vld [vmem:[%s28457_s11 + $0x560] ss:$8 sps:$4 sm:$0xff]  }
  0xb3   : > { %17220 = vmatpush1.bf16.msra.mxu0 %v24164_v51  ;;  %v24260_v51 = vld [vmem:[%s28457_s11 + $0x474] ss:$8 sps:$4 sm:$0xff]  }
  0xb4   : > { %17261 = vmatpush1.bf16.msra.mxu1 %v24167_v52  ;;  %17221 = vmatprep.subr.bf16.mxu0 %v24172_v53  ;;  %v24263_v52 = vld [vmem:[%s28457_s11 + $0x574] ss:$8 sps:$4 sm:$0xff]   ;;  %v24258_v53 = vld [vmem:[%s28457_s11 + $0x470] ss:$8 sps:$4 sm:$0xff]  }
  0xb5   : > { %17262 = vmatprep.subr.bf16.mxu1 %v24175_v54  ;;  %v24261_v54 = vld [vmem:[%s28457_s11 + $0x570] ss:$8 sps:$4 sm:$0xff]  }
  0xb7   : > { %17222 = vmatpush1.bf16.msra.mxu0 %v24170_v55  ;;  %v24266_v55 = vld [vmem:[%s28457_s11 + $0x484] ss:$8 sps:$4 sm:$0xff]  }
  0xb8   : > { %17263 = vmatpush1.bf16.msra.mxu1 %v24173_v56  ;;  %17223 = vmatprep.subr.bf16.mxu0 %v24178_v57  ;;  %v24269_v56 = vld [vmem:[%s28457_s11 + $0x584] ss:$8 sps:$4 sm:$0xff]   ;;  %v24264_v57 = vld [vmem:[%s28457_s11 + $0x480] ss:$8 sps:$4 sm:$0xff]  }
  0xb9   : > { %17264 = vmatprep.subr.bf16.mxu1 %v24181_v58  ;;  %v24267_v58 = vld [vmem:[%s28457_s11 + $0x580] ss:$8 sps:$4 sm:$0xff]  }
  0xbb   : > { %17224 = vmatpush1.bf16.msra.mxu0 %v24176_v59  ;;  %v24272_v59 = vld [vmem:[%s28457_s11 + $0x494] ss:$8 sps:$4 sm:$0xff]  }
  0xbc   : > { %17265 = vmatpush1.bf16.msra.mxu1 %v24179_v60  ;;  %17225 = vmatprep.subr.bf16.mxu0 %v24184_v61  ;;  %v24275_v60 = vld [vmem:[%s28457_s11 + $0x594] ss:$8 sps:$4 sm:$0xff]   ;;  %v24270_v61 = vld [vmem:[%s28457_s11 + $0x490] ss:$8 sps:$4 sm:$0xff]  }
  0xbd   : > { %17266 = vmatprep.subr.bf16.mxu1 %v24187_v62  ;;  %v24273_v62 = vld [vmem:[%s28457_s11 + $0x590] ss:$8 sps:$4 sm:$0xff]  }
  0xbf   : > { %17226 = vmatpush1.bf16.msra.mxu0 %v24182_v63  ;;  %v24278_v63 = vld [vmem:[%s28457_s11 + $0x4a4] ss:$8 sps:$4 sm:$0xff]  }
  0xc0   : > { %17267 = vmatpush1.bf16.msra.mxu1 %v24185_v0  ;;  %17227 = vmatprep.subr.bf16.mxu0 %v24190_v1  ;;  %v24281_v0 = vld [vmem:[%s28457_s11 + $0x5a4] ss:$8 sps:$4 sm:$0xff]   ;;  %v24276_v1 = vld [vmem:[%s28457_s11 + $0x4a0] ss:$8 sps:$4 sm:$0xff]  }
  0xc1   : > { %17268 = vmatprep.subr.bf16.mxu1 %v24193_v2  ;;  %v24279_v2 = vld [vmem:[%s28457_s11 + $0x5a0] ss:$8 sps:$4 sm:$0xff]  }
  0xc3   : > { %17228 = vmatpush1.bf16.msra.mxu0 %v24188_v3  ;;  %v24284_v3 = vld [vmem:[%s28457_s11 + $0x4b4] ss:$8 sps:$4 sm:$0xff]  }
  0xc4   : > { %17269 = vmatpush1.bf16.msra.mxu1 %v24191_v4  ;;  %17229 = vmatprep.subr.bf16.mxu0 %v24196_v5  ;;  %v24287_v4 = vld [vmem:[%s28457_s11 + $0x5b4] ss:$8 sps:$4 sm:$0xff]   ;;  %v24282_v5 = vld [vmem:[%s28457_s11 + $0x4b0] ss:$8 sps:$4 sm:$0xff]  }
  0xc5   : > { %17270 = vmatprep.subr.bf16.mxu1 %v24199_v6  ;;  %v24285_v6 = vld [vmem:[%s28457_s11 + $0x5b0] ss:$8 sps:$4 sm:$0xff]  }
  0xc7   : > { %17230 = vmatpush1.bf16.msra.mxu0 %v24194_v7  ;;  %v24290_v7 = vld [vmem:[%s28457_s11 + $0x4c4] ss:$8 sps:$4 sm:$0xff]  }
  0xc8   : > { %17271 = vmatpush1.bf16.msra.mxu1 %v24197_v8  ;;  %17231 = vmatprep.subr.bf16.mxu0 %v24202_v9  ;;  %v24293_v8 = vld [vmem:[%s28457_s11 + $0x5c4] ss:$8 sps:$4 sm:$0xff]   ;;  %v24288_v9 = vld [vmem:[%s28457_s11 + $0x4c0] ss:$8 sps:$4 sm:$0xff]  }
  0xc9   : > { %17272 = vmatprep.subr.bf16.mxu1 %v24205_v10  ;;  %v24291_v10 = vld [vmem:[%s28457_s11 + $0x5c0] ss:$8 sps:$4 sm:$0xff]  }
  0xcb   : > { %17232 = vmatpush1.bf16.msra.mxu0 %v24200_v11  ;;  %v24296_v11 = vld [vmem:[%s28457_s11 + $0x4d4] ss:$8 sps:$4 sm:$0xff]  }
  0xcc   : > { %17273 = vmatpush1.bf16.msra.mxu1 %v24203_v12  ;;  %17233 = vmatprep.subr.bf16.mxu0 %v24208_v13  ;;  %v24299_v12 = vld [vmem:[%s28457_s11 + $0x5d4] ss:$8 sps:$4 sm:$0xff]   ;;  %v24294_v13 = vld [vmem:[%s28457_s11 + $0x4d0] ss:$8 sps:$4 sm:$0xff]  }
  0xcd   : > { %17274 = vmatprep.subr.bf16.mxu1 %v24211_v14  ;;  %v24297_v14 = vld [vmem:[%s28457_s11 + $0x5d0] ss:$8 sps:$4 sm:$0xff]  }
  0xcf   : > { %17234 = vmatpush1.bf16.msra.mxu0 %v24206_v15  ;;  %v24302_v15 = vld [vmem:[%s28457_s11 + $0x4e4] ss:$8 sps:$4 sm:$0xff]  }
  0xd0   : > { %17275 = vmatpush1.bf16.msra.mxu1 %v24209_v16  ;;  %17285 = vmatprep.subr.bf16.mxu0 %v24218_v17  ;;  %v24305_v16 = vld [vmem:[%s28457_s11 + $0x5e4] ss:$8 sps:$4 sm:$0xff]   ;;  %v24300_v17 = vld [vmem:[%s28457_s11 + $0x4e0] ss:$8 sps:$4 sm:$0xff]  }
  0xd1   : > { %17326 = vmatprep.subr.bf16.mxu1 %v24221_v18  ;;  %v24303_v18 = vld [vmem:[%s28457_s11 + $0x5e0] ss:$8 sps:$4 sm:$0xff]  }
  0xd2   : > { %17236 = vmatmul.mubr.bf16.vlgmr.msra.gmra.mrb[4].mxu0 %v20950_v19  ;;  %v24308_v19 = vld [vmem:[%s28457_s11 + $0x4f4] ss:$8 sps:$4 sm:$0xff]  }
  0xd3   : > { %17277 = vmatmul.mubr.bf16.vlgmr.msra.gmra.mrb[4].mxu1 %v20952_v20  ;;  %17286 = vmatpush1.bf16.msra.mxu0 %v24216_v21  ;;  %v24311_v20 = vld [vmem:[%s28457_s11 + $0x5f4] ss:$8 sps:$4 sm:$0xff]   ;;  %v24306_v21 = vld [vmem:[%s28457_s11 + $0x4f0] ss:$8 sps:$4 sm:$0xff]  }
  0xd4   : > { %17327 = vmatpush1.bf16.msra.mxu1 %v24219_v22  ;;  %17287 = vmatprep.subr.bf16.mxu0 %v24224_v23  ;;  %v24309_v22 = vld [vmem:[%s28457_s11 + $0x5f0] ss:$8 sps:$4 sm:$0xff]   ;;  %v24318_v23 = vld [vmem:[%s28457_s11 + $0x604] ss:$8 sps:$4 sm:$0xff]  }
  0xd5   : > { %17328 = vmatprep.subr.bf16.mxu1 %v24227_v24  ;;  %17317 = vmatprep.mubr.bf16.mxu0 %v20955_v27  ;;  %v24321_v24 = vld [vmem:[%s28457_s11 + $0x704] ss:$8 sps:$4 sm:$0xff]   ;;  %v24316_v27 = vld [vmem:[%s28457_s11 + $0x600] ss:$8 sps:$4 sm:$0xff]  }
  0xd6   : > { %17358 = vmatprep.mubr.bf16.mxu1 %v20957_v28  ;;  %v24319_v28 = vld [vmem:[%s28457_s11 + $0x700] ss:$8 sps:$4 sm:$0xff]  }
  0xd7   : > { %17288 = vmatpush1.bf16.msra.mxu0 %v24222_v29  ;;  %v20954_v29 = vcombine.low %v28639_v25, %v28639_v25 }
  0xd8   : > { %17329 = vmatpush1.bf16.msra.mxu1 %v24225_v30  ;;  %17289 = vmatprep.subr.bf16.mxu0 %v24230_v31  ;;  %v20956_v30 = vcombine.low %v28642_v26, %v28642_v26  ;;  %v28715_v31 = vld [vmem:[%s28474_s27 + $0x30] sm:$0xff] }
  0xd9   : > { %17330 = vmatprep.subr.bf16.mxu1 %v24233_v32  ;;  %v28718_v32 = vld [vmem:[%s28474_s27 + $0x38] sm:$0xff]  ;;  %v20959_v25 = vcombine.high %v28715_v31, %v28715_v31 }
  0xda   : > { %v20961_v26 = vcombine.high %v28718_v32, %v28718_v32 }
  0xdb   : > { %17290 = vmatpush1.bf16.msra.mxu0 %v24228_v33  ;;  %v24324_v33 = vld [vmem:[%s28457_s11 + $0x614] ss:$8 sps:$4 sm:$0xff]  }
  0xdc   : > { %17331 = vmatpush1.bf16.msra.mxu1 %v24231_v34  ;;  %17291 = vmatprep.subr.bf16.mxu0 %v24236_v35  ;;  %v24327_v34 = vld [vmem:[%s28457_s11 + $0x714] ss:$8 sps:$4 sm:$0xff]   ;;  %v24322_v35 = vld [vmem:[%s28457_s11 + $0x610] ss:$8 sps:$4 sm:$0xff]  }
  0xdd   : > { %17332 = vmatprep.subr.bf16.mxu1 %v24239_v36  ;;  %v24325_v36 = vld [vmem:[%s28457_s11 + $0x710] ss:$8 sps:$4 sm:$0xff]  }
  0xdf   : > { %17292 = vmatpush1.bf16.msra.mxu0 %v24234_v37  ;;  %v24330_v37 = vld [vmem:[%s28457_s11 + $0x624] ss:$8 sps:$4 sm:$0xff]  }
  0xe0   : > { %17333 = vmatpush1.bf16.msra.mxu1 %v24237_v38  ;;  %17293 = vmatprep.subr.bf16.mxu0 %v24242_v39  ;;  %v24333_v38 = vld [vmem:[%s28457_s11 + $0x724] ss:$8 sps:$4 sm:$0xff]   ;;  %v24328_v39 = vld [vmem:[%s28457_s11 + $0x620] ss:$8 sps:$4 sm:$0xff]  }
  0xe1   : > { %17334 = vmatprep.subr.bf16.mxu1 %v24245_v40  ;;  %v24331_v40 = vld [vmem:[%s28457_s11 + $0x720] ss:$8 sps:$4 sm:$0xff]  }
  0xe3   : > { %17294 = vmatpush1.bf16.msra.mxu0 %v24240_v41  ;;  %v24336_v41 = vld [vmem:[%s28457_s11 + $0x634] ss:$8 sps:$4 sm:$0xff]  }
  0xe4   : > { %17335 = vmatpush1.bf16.msra.mxu1 %v24243_v42  ;;  %17295 = vmatprep.subr.bf16.mxu0 %v24248_v43  ;;  %v24339_v42 = vld [vmem:[%s28457_s11 + $0x734] ss:$8 sps:$4 sm:$0xff]   ;;  %v24334_v43 = vld [vmem:[%s28457_s11 + $0x630] ss:$8 sps:$4 sm:$0xff]  }
  0xe5   : > { %17336 = vmatprep.subr.bf16.mxu1 %v24251_v44  ;;  %v24337_v44 = vld [vmem:[%s28457_s11 + $0x730] ss:$8 sps:$4 sm:$0xff]  }
  0xe7   : > { %17296 = vmatpush1.bf16.msra.mxu0 %v24246_v45  ;;  %v24342_v45 = vld [vmem:[%s28457_s11 + $0x644] ss:$8 sps:$4 sm:$0xff]  }
  0xe8   : > { %17337 = vmatpush1.bf16.msra.mxu1 %v24249_v46  ;;  %17297 = vmatprep.subr.bf16.mxu0 %v24254_v47  ;;  %v24345_v46 = vld [vmem:[%s28457_s11 + $0x744] ss:$8 sps:$4 sm:$0xff]   ;;  %v24340_v47 = vld [vmem:[%s28457_s11 + $0x640] ss:$8 sps:$4 sm:$0xff]  }
  0xe9   : > { %17338 = vmatprep.subr.bf16.mxu1 %v24257_v48  ;;  %v24343_v48 = vld [vmem:[%s28457_s11 + $0x740] ss:$8 sps:$4 sm:$0xff]  }
  0xeb   : > { %17298 = vmatpush1.bf16.msra.mxu0 %v24252_v49  ;;  %v24348_v49 = vld [vmem:[%s28457_s11 + $0x654] ss:$8 sps:$4 sm:$0xff]  }
  0xec   : > { %17339 = vmatpush1.bf16.msra.mxu1 %v24255_v50  ;;  %17299 = vmatprep.subr.bf16.mxu0 %v24260_v51  ;;  %v24351_v50 = vld [vmem:[%s28457_s11 + $0x754] ss:$8 sps:$4 sm:$0xff]   ;;  %v24346_v51 = vld [vmem:[%s28457_s11 + $0x650] ss:$8 sps:$4 sm:$0xff]  }
  0xed   : > { %17340 = vmatprep.subr.bf16.mxu1 %v24263_v52  ;;  %v24349_v52 = vld [vmem:[%s28457_s11 + $0x750] ss:$8 sps:$4 sm:$0xff]  }
  0xef   : > { %17300 = vmatpush1.bf16.msra.mxu0 %v24258_v53  ;;  %v24354_v53 = vld [vmem:[%s28457_s11 + $0x664] ss:$8 sps:$4 sm:$0xff]  }
  0xf0   : > { %17341 = vmatpush1.bf16.msra.mxu1 %v24261_v54  ;;  %17301 = vmatprep.subr.bf16.mxu0 %v24266_v55  ;;  %v24357_v54 = vld [vmem:[%s28457_s11 + $0x764] ss:$8 sps:$4 sm:$0xff]   ;;  %v24352_v55 = vld [vmem:[%s28457_s11 + $0x660] ss:$8 sps:$4 sm:$0xff]  }
  0xf1   : > { %17342 = vmatprep.subr.bf16.mxu1 %v24269_v56  ;;  %v24355_v56 = vld [vmem:[%s28457_s11 + $0x760] ss:$8 sps:$4 sm:$0xff]  }
  0xf3   : > { %17302 = vmatpush1.bf16.msra.mxu0 %v24264_v57  ;;  %v24360_v57 = vld [vmem:[%s28457_s11 + $0x674] ss:$8 sps:$4 sm:$0xff]  }
  0xf4   : > { %17343 = vmatpush1.bf16.msra.mxu1 %v24267_v58  ;;  %17303 = vmatprep.subr.bf16.mxu0 %v24272_v59  ;;  %v24363_v58 = vld [vmem:[%s28457_s11 + $0x774] ss:$8 sps:$4 sm:$0xff]   ;;  %v24358_v59 = vld [vmem:[%s28457_s11 + $0x670] ss:$8 sps:$4 sm:$0xff]  }
  0xf5   : > { %17344 = vmatprep.subr.bf16.mxu1 %v24275_v60  ;;  %v24361_v60 = vld [vmem:[%s28457_s11 + $0x770] ss:$8 sps:$4 sm:$0xff]  }
  0xf7   : > { %17304 = vmatpush1.bf16.msra.mxu0 %v24270_v61  ;;  %v24366_v61 = vld [vmem:[%s28457_s11 + $0x684] ss:$8 sps:$4 sm:$0xff]  }
  0xf8   : > { %17345 = vmatpush1.bf16.msra.mxu1 %v24273_v62  ;;  %17305 = vmatprep.subr.bf16.mxu0 %v24278_v63  ;;  %v24369_v62 = vld [vmem:[%s28457_s11 + $0x784] ss:$8 sps:$4 sm:$0xff]   ;;  %v24364_v63 = vld [vmem:[%s28457_s11 + $0x680] ss:$8 sps:$4 sm:$0xff]  }
  0xf9   : > { %17346 = vmatprep.subr.bf16.mxu1 %v24281_v0  ;;  %v24367_v0 = vld [vmem:[%s28457_s11 + $0x780] ss:$8 sps:$4 sm:$0xff]  }
  0xfb   : > { %17306 = vmatpush1.bf16.msra.mxu0 %v24276_v1  ;;  %v24372_v1 = vld [vmem:[%s28457_s11 + $0x694] ss:$8 sps:$4 sm:$0xff]  }
  0xfc   : > { %17347 = vmatpush1.bf16.msra.mxu1 %v24279_v2  ;;  %17307 = vmatprep.subr.bf16.mxu0 %v24284_v3  ;;  %v24375_v2 = vld [vmem:[%s28457_s11 + $0x794] ss:$8 sps:$4 sm:$0xff]   ;;  %v24370_v3 = vld [vmem:[%s28457_s11 + $0x690] ss:$8 sps:$4 sm:$0xff]  }
  0xfd   : > { %17348 = vmatprep.subr.bf16.mxu1 %v24287_v4  ;;  %v24373_v4 = vld [vmem:[%s28457_s11 + $0x790] ss:$8 sps:$4 sm:$0xff]  }
  0xff   : > { %17308 = vmatpush1.bf16.msra.mxu0 %v24282_v5  ;;  %v24378_v5 = vld [vmem:[%s28457_s11 + $0x6a4] ss:$8 sps:$4 sm:$0xff]  }
 0x100   : > { %17349 = vmatpush1.bf16.msra.mxu1 %v24285_v6  ;;  %17309 = vmatprep.subr.bf16.mxu0 %v24290_v7  ;;  %v24381_v6 = vld [vmem:[%s28457_s11 + $0x7a4] ss:$8 sps:$4 sm:$0xff]   ;;  %v24376_v7 = vld [vmem:[%s28457_s11 + $0x6a0] ss:$8 sps:$4 sm:$0xff]  }
 0x101   : > { %17350 = vmatprep.subr.bf16.mxu1 %v24293_v8  ;;  %v24379_v8 = vld [vmem:[%s28457_s11 + $0x7a0] ss:$8 sps:$4 sm:$0xff]  }
 0x103   : > { %17310 = vmatpush1.bf16.msra.mxu0 %v24288_v9  ;;  %v24384_v9 = vld [vmem:[%s28457_s11 + $0x6b4] ss:$8 sps:$4 sm:$0xff]  }
 0x104   : > { %17351 = vmatpush1.bf16.msra.mxu1 %v24291_v10  ;;  %17311 = vmatprep.subr.bf16.mxu0 %v24296_v11  ;;  %v24387_v10 = vld [vmem:[%s28457_s11 + $0x7b4] ss:$8 sps:$4 sm:$0xff]   ;;  %v24382_v11 = vld [vmem:[%s28457_s11 + $0x6b0] ss:$8 sps:$4 sm:$0xff]  }
 0x105   : > { %17352 = vmatprep.subr.bf16.mxu1 %v24299_v12  ;;  %v24385_v12 = vld [vmem:[%s28457_s11 + $0x7b0] ss:$8 sps:$4 sm:$0xff]  }
 0x107   : > { %17312 = vmatpush1.bf16.msra.mxu0 %v24294_v13  ;;  %v24390_v13 = vld [vmem:[%s28457_s11 + $0x6c4] ss:$8 sps:$4 sm:$0xff]  }
 0x108   : > { %17353 = vmatpush1.bf16.msra.mxu1 %v24297_v14  ;;  %17313 = vmatprep.subr.bf16.mxu0 %v24302_v15  ;;  %v24393_v14 = vld [vmem:[%s28457_s11 + $0x7c4] ss:$8 sps:$4 sm:$0xff]   ;;  %v24388_v15 = vld [vmem:[%s28457_s11 + $0x6c0] ss:$8 sps:$4 sm:$0xff]  }
 0x109   : > { %17354 = vmatprep.subr.bf16.mxu1 %v24305_v16  ;;  %v24391_v16 = vld [vmem:[%s28457_s11 + $0x7c0] ss:$8 sps:$4 sm:$0xff]  }
 0x10b   : > { %17314 = vmatpush1.bf16.msra.mxu0 %v24300_v17  ;;  %v24396_v17 = vld [vmem:[%s28457_s11 + $0x6d4] ss:$8 sps:$4 sm:$0xff]  }
 0x10c   : > { %17355 = vmatpush1.bf16.msra.mxu1 %v24303_v18  ;;  %17315 = vmatprep.subr.bf16.mxu0 %v24308_v19  ;;  %v24399_v18 = vld [vmem:[%s28457_s11 + $0x7d4] ss:$8 sps:$4 sm:$0xff]   ;;  %v24394_v19 = vld [vmem:[%s28457_s11 + $0x6d0] ss:$8 sps:$4 sm:$0xff]  }
 0x10d   : > { %17356 = vmatprep.subr.bf16.mxu1 %v24311_v20  ;;  %v24397_v20 = vld [vmem:[%s28457_s11 + $0x7d0] ss:$8 sps:$4 sm:$0xff]  }
 0x10f   : > { %17316 = vmatpush1.bf16.msra.mxu0 %v24306_v21  ;;  %v24402_v21 = vld [vmem:[%s28457_s11 + $0x6e4] ss:$8 sps:$4 sm:$0xff]  }
 0x110   : > { %17357 = vmatpush1.bf16.msra.mxu1 %v24309_v22  ;;  %17367 = vmatprep.subr.bf16.mxu0 %v24318_v23  ;;  %v24405_v22 = vld [vmem:[%s28457_s11 + $0x7e4] ss:$8 sps:$4 sm:$0xff]   ;;  %v24400_v23 = vld [vmem:[%s28457_s11 + $0x6e0] ss:$8 sps:$4 sm:$0xff]  }
 0x111   : > { %17408 = vmatprep.subr.bf16.mxu1 %v24321_v24  ;;  %v24403_v24 = vld [vmem:[%s28457_s11 + $0x7e0] ss:$8 sps:$4 sm:$0xff]  }
 0x112   : > { %17318 = vmatmul.mubr.bf16.vlgmr.msra.gmra.mrb[8].mxu0 %v20954_v29  ;;  %v24406_v29 = vld [vmem:[%s28457_s11 + $0x6f0] ss:$8 sps:$4 sm:$0xff]  }
 0x113   : > { %17359 = vmatmul.mubr.bf16.vlgmr.msra.gmra.mrb[8].mxu1 %v20956_v30  ;;  %17368 = vmatpush1.bf16.msra.mxu0 %v24316_v27  ;;  %v24408_v27 = vld [vmem:[%s28457_s11 + $0x6f4] ss:$8 sps:$4 sm:$0xff]   ;;  %v24409_v30 = vld [vmem:[%s28457_s11 + $0x7f0] ss:$8 sps:$4 sm:$0xff]  }
 0x114   : > { %17409 = vmatpush1.bf16.msra.mxu1 %v24319_v28  ;;  %17369 = vmatprep.subr.bf16.mxu0 %v24324_v33  ;;  %v24411_v28 = vld [vmem:[%s28457_s11 + $0x7f4] ss:$8 sps:$4 sm:$0xff]   ;;  %v24418_v33 = vld [vmem:[%s28457_s11 + $0x804] ss:$8 sps:$4 sm:$0xff]  }
 0x115   : > { %17410 = vmatprep.subr.bf16.mxu1 %v24327_v34  ;;  %17399 = vmatprep.mubr.bf16.mxu0 %v20959_v25  ;;  %v24421_v34 = vld [vmem:[%s28457_s11 + $0x904] ss:$8 sps:$4 sm:$0xff]   ;;  %v28787_v25 = vld [vmem:[%s28474_s27 + $0x40] sm:$0xff] }
 0x116   : > { %17440 = vmatprep.mubr.bf16.mxu1 %v20961_v26  ;;  %v20958_v26 = vcombine.low %v28715_v31, %v28715_v31  ;;  %v20963_v31 = vcombine.high %v28787_v25, %v28787_v25 }
 0x117   : > { %17370 = vmatpush1.bf16.msra.mxu0 %v24322_v35  ;;  %v20960_v35 = vcombine.low %v28718_v32, %v28718_v32 }
 0x118   : > { %17411 = vmatpush1.bf16.msra.mxu1 %v24325_v36  ;;  %17371 = vmatprep.subr.bf16.mxu0 %v24330_v37  ;;  %v28794_v36 = vld [vmem:[%s28474_s27 + $0x48] sm:$0xff]  ;;  %v24416_v37 = vld [vmem:[%s28457_s11 + $0x800] ss:$8 sps:$4 sm:$0xff]  }
 0x119   : > { %17412 = vmatprep.subr.bf16.mxu1 %v24333_v38  ;;  %v24419_v38 = vld [vmem:[%s28457_s11 + $0x900] ss:$8 sps:$4 sm:$0xff]   ;;  %v20965_v32 = vcombine.high %v28794_v36, %v28794_v36 }
 0x11b   : > { %17372 = vmatpush1.bf16.msra.mxu0 %v24328_v39  ;;  %v24424_v39 = vld [vmem:[%s28457_s11 + $0x814] ss:$8 sps:$4 sm:$0xff]  }
 0x11c   : > { %17413 = vmatpush1.bf16.msra.mxu1 %v24331_v40  ;;  %17373 = vmatprep.subr.bf16.mxu0 %v24336_v41  ;;  %v24427_v40 = vld [vmem:[%s28457_s11 + $0x914] ss:$8 sps:$4 sm:$0xff]   ;;  %v24422_v41 = vld [vmem:[%s28457_s11 + $0x810] ss:$8 sps:$4 sm:$0xff]  }
 0x11d   : > { %17414 = vmatprep.subr.bf16.mxu1 %v24339_v42  ;;  %v24425_v42 = vld [vmem:[%s28457_s11 + $0x910] ss:$8 sps:$4 sm:$0xff]  }
 0x11f   : > { %17374 = vmatpush1.bf16.msra.mxu0 %v24334_v43  ;;  %v24430_v43 = vld [vmem:[%s28457_s11 + $0x824] ss:$8 sps:$4 sm:$0xff]  }
 0x120   : > { %17415 = vmatpush1.bf16.msra.mxu1 %v24337_v44  ;;  %17375 = vmatprep.subr.bf16.mxu0 %v24342_v45  ;;  %v24433_v44 = vld [vmem:[%s28457_s11 + $0x924] ss:$8 sps:$4 sm:$0xff]   ;;  %v24428_v45 = vld [vmem:[%s28457_s11 + $0x820] ss:$8 sps:$4 sm:$0xff]  }
 0x121   : > { %17416 = vmatprep.subr.bf16.mxu1 %v24345_v46  ;;  %v24431_v46 = vld [vmem:[%s28457_s11 + $0x920] ss:$8 sps:$4 sm:$0xff]  }
 0x123   : > { %17376 = vmatpush1.bf16.msra.mxu0 %v24340_v47  ;;  %v24436_v47 = vld [vmem:[%s28457_s11 + $0x834] ss:$8 sps:$4 sm:$0xff]  }
 0x124   : > { %17417 = vmatpush1.bf16.msra.mxu1 %v24343_v48  ;;  %17377 = vmatprep.subr.bf16.mxu0 %v24348_v49  ;;  %v24439_v48 = vld [vmem:[%s28457_s11 + $0x934] ss:$8 sps:$4 sm:$0xff]   ;;  %v24434_v49 = vld [vmem:[%s28457_s11 + $0x830] ss:$8 sps:$4 sm:$0xff]  }
 0x125   : > { %17418 = vmatprep.subr.bf16.mxu1 %v24351_v50  ;;  %v24437_v50 = vld [vmem:[%s28457_s11 + $0x930] ss:$8 sps:$4 sm:$0xff]  }
 0x127   : > { %17378 = vmatpush1.bf16.msra.mxu0 %v24346_v51  ;;  %v24442_v51 = vld [vmem:[%s28457_s11 + $0x844] ss:$8 sps:$4 sm:$0xff]  }
 0x128   : > { %17419 = vmatpush1.bf16.msra.mxu1 %v24349_v52  ;;  %17379 = vmatprep.subr.bf16.mxu0 %v24354_v53  ;;  %v24445_v52 = vld [vmem:[%s28457_s11 + $0x944] ss:$8 sps:$4 sm:$0xff]   ;;  %v24440_v53 = vld [vmem:[%s28457_s11 + $0x840] ss:$8 sps:$4 sm:$0xff]  }
 0x129   : > { %17420 = vmatprep.subr.bf16.mxu1 %v24357_v54  ;;  %v24443_v54 = vld [vmem:[%s28457_s11 + $0x940] ss:$8 sps:$4 sm:$0xff]  }
 0x12b   : > { %17380 = vmatpush1.bf16.msra.mxu0 %v24352_v55  ;;  %v24448_v55 = vld [vmem:[%s28457_s11 + $0x854] ss:$8 sps:$4 sm:$0xff]  }
 0x12c   : > { %17421 = vmatpush1.bf16.msra.mxu1 %v24355_v56  ;;  %17381 = vmatprep.subr.bf16.mxu0 %v24360_v57  ;;  %v24451_v56 = vld [vmem:[%s28457_s11 + $0x954] ss:$8 sps:$4 sm:$0xff]   ;;  %v24446_v57 = vld [vmem:[%s28457_s11 + $0x850] ss:$8 sps:$4 sm:$0xff]  }
 0x12d   : > { %17422 = vmatprep.subr.bf16.mxu1 %v24363_v58  ;;  %v24449_v58 = vld [vmem:[%s28457_s11 + $0x950] ss:$8 sps:$4 sm:$0xff]  }
 0x12f   : > { %17382 = vmatpush1.bf16.msra.mxu0 %v24358_v59  ;;  %v24454_v59 = vld [vmem:[%s28457_s11 + $0x864] ss:$8 sps:$4 sm:$0xff]  }
 0x130   : > { %17423 = vmatpush1.bf16.msra.mxu1 %v24361_v60  ;;  %17383 = vmatprep.subr.bf16.mxu0 %v24366_v61  ;;  %v24457_v60 = vld [vmem:[%s28457_s11 + $0x964] ss:$8 sps:$4 sm:$0xff]  }
 0x131   : > { %17424 = vmatprep.subr.bf16.mxu1 %v24369_v62 }
 0x133   : > { %17384 = vmatpush1.bf16.msra.mxu0 %v24364_v63  ;;  %v24452_v63 = vld [vmem:[%s28457_s11 + $0x860] ss:$8 sps:$4 sm:$0xff]  }
 0x134   : > { %17425 = vmatpush1.bf16.msra.mxu1 %v24367_v0  ;;  %17385 = vmatprep.subr.bf16.mxu0 %v24372_v1  ;;  %v24455_v0 = vld [vmem:[%s28457_s11 + $0x960] ss:$8 sps:$4 sm:$0xff]  }
 0x135   : > { %17426 = vmatprep.subr.bf16.mxu1 %v24375_v2 }
 0x137   : > { %17386 = vmatpush1.bf16.msra.mxu0 %v24370_v3 }
 0x138   : > { %17427 = vmatpush1.bf16.msra.mxu1 %v24373_v4  ;;  %17387 = vmatprep.subr.bf16.mxu0 %v24378_v5 }
 0x139   : > { %17428 = vmatprep.subr.bf16.mxu1 %v24381_v6 }
 0x13b   : > { %17388 = vmatpush1.bf16.msra.mxu0 %v24376_v7 }
 0x13c   : > { %17429 = vmatpush1.bf16.msra.mxu1 %v24379_v8  ;;  %17389 = vmatprep.subr.bf16.mxu0 %v24384_v9  ;;  %v24460_v9 = vld [vmem:[%s28457_s11 + $0x874] ss:$8 sps:$4 sm:$0xff]  }
 0x13d   : > { %17430 = vmatprep.subr.bf16.mxu1 %v24387_v10  ;;  %v24463_v10 = vld [vmem:[%s28457_s11 + $0x974] ss:$8 sps:$4 sm:$0xff]  }
 0x13f   : > { %17390 = vmatpush1.bf16.msra.mxu0 %v24382_v11  ;;  %v24458_v11 = vld [vmem:[%s28457_s11 + $0x870] ss:$8 sps:$4 sm:$0xff]  }
 0x140   : > { %17431 = vmatpush1.bf16.msra.mxu1 %v24385_v12  ;;  %17391 = vmatprep.subr.bf16.mxu0 %v24390_v13  ;;  %v24461_v12 = vld [vmem:[%s28457_s11 + $0x970] ss:$8 sps:$4 sm:$0xff]   ;;  %v24466_v13 = vld [vmem:[%s28457_s11 + $0x884] ss:$8 sps:$4 sm:$0xff]  }
 0x141   : > { %17432 = vmatprep.subr.bf16.mxu1 %v24393_v14  ;;  %v24469_v14 = vld [vmem:[%s28457_s11 + $0x984] ss:$8 sps:$4 sm:$0xff]  }
 0x143   : > { %17392 = vmatpush1.bf16.msra.mxu0 %v24388_v15  ;;  %v24464_v15 = vld [vmem:[%s28457_s11 + $0x880] ss:$8 sps:$4 sm:$0xff]  }
 0x144   : > { %17433 = vmatpush1.bf16.msra.mxu1 %v24391_v16  ;;  %17393 = vmatprep.subr.bf16.mxu0 %v24396_v17  ;;  %v24467_v16 = vld [vmem:[%s28457_s11 + $0x980] ss:$8 sps:$4 sm:$0xff]   ;;  %v24472_v17 = vld [vmem:[%s28457_s11 + $0x894] ss:$8 sps:$4 sm:$0xff]  }
 0x145   : > { %17434 = vmatprep.subr.bf16.mxu1 %v24399_v18  ;;  %v24475_v18 = vld [vmem:[%s28457_s11 + $0x994] ss:$8 sps:$4 sm:$0xff]  }
 0x147   : > { %17394 = vmatpush1.bf16.msra.mxu0 %v24394_v19  ;;  %v24470_v19 = vld [vmem:[%s28457_s11 + $0x890] ss:$8 sps:$4 sm:$0xff]  }
 0x148   : > { %17435 = vmatpush1.bf16.msra.mxu1 %v24397_v20  ;;  %17395 = vmatprep.subr.bf16.mxu0 %v24402_v21  ;;  %v24473_v20 = vld [vmem:[%s28457_s11 + $0x990] ss:$8 sps:$4 sm:$0xff]   ;;  %v24478_v21 = vld [vmem:[%s28457_s11 + $0x8a4] ss:$8 sps:$4 sm:$0xff]  }
 0x149   : > { %17436 = vmatprep.subr.bf16.mxu1 %v24405_v22  ;;  %v24481_v22 = vld [vmem:[%s28457_s11 + $0x9a4] ss:$8 sps:$4 sm:$0xff]  }
 0x14b   : > { %17396 = vmatpush1.bf16.msra.mxu0 %v24400_v23  ;;  %v24476_v23 = vld [vmem:[%s28457_s11 + $0x8a0] ss:$8 sps:$4 sm:$0xff]  }
 0x14c   : > { %17437 = vmatpush1.bf16.msra.mxu1 %v24403_v24  ;;  %17397 = vmatprep.subr.bf16.mxu0 %v24408_v27  ;;  %v24479_v24 = vld [vmem:[%s28457_s11 + $0x9a0] ss:$8 sps:$4 sm:$0xff]   ;;  %v24484_v27 = vld [vmem:[%s28457_s11 + $0x8b4] ss:$8 sps:$4 sm:$0xff]  }
 0x14d   : > { %17438 = vmatprep.subr.bf16.mxu1 %v24411_v28  ;;  %v24487_v28 = vld [vmem:[%s28457_s11 + $0x9b4] ss:$8 sps:$4 sm:$0xff]  }
 0x14f   : > { %17398 = vmatpush1.bf16.msra.mxu0 %v24406_v29  ;;  %v24482_v29 = vld [vmem:[%s28457_s11 + $0x8b0] ss:$8 sps:$4 sm:$0xff]  }
 0x150   : > { %17439 = vmatpush1.bf16.msra.mxu1 %v24409_v30  ;;  %17449 = vmatprep.subr.bf16.mxu0 %v24418_v33  ;;  %v24485_v30 = vld [vmem:[%s28457_s11 + $0x9b0] ss:$8 sps:$4 sm:$0xff]   ;;  %v24490_v33 = vld [vmem:[%s28457_s11 + $0x8c4] ss:$8 sps:$4 sm:$0xff]  }
 0x151   : > { %17490 = vmatprep.subr.bf16.mxu1 %v24421_v34  ;;  %v24493_v34 = vld [vmem:[%s28457_s11 + $0x9c4] ss:$8 sps:$4 sm:$0xff]  }
 0x152   : > { %17400 = vmatmul.mubr.bf16.vlgmr.msra.gmra.mrb[12].mxu0 %v20958_v26  ;;  %v24488_v26 = vld [vmem:[%s28457_s11 + $0x8c0] ss:$8 sps:$4 sm:$0xff]  }
 0x153   : > { %17441 = vmatmul.mubr.bf16.vlgmr.msra.gmra.mrb[12].mxu1 %v20960_v35  ;;  %17450 = vmatpush1.bf16.msra.mxu0 %v24416_v37  ;;  %v24491_v35 = vld [vmem:[%s28457_s11 + $0x9c0] ss:$8 sps:$4 sm:$0xff]   ;;  %v24496_v37 = vld [vmem:[%s28457_s11 + $0x8d4] ss:$8 sps:$4 sm:$0xff]  }
 0x154   : > { %17491 = vmatpush1.bf16.msra.mxu1 %v24419_v38  ;;  %17451 = vmatprep.subr.bf16.mxu0 %v24424_v39  ;;  %v24499_v38 = vld [vmem:[%s28457_s11 + $0x9d4] ss:$8 sps:$4 sm:$0xff]   ;;  %v24494_v39 = vld [vmem:[%s28457_s11 + $0x8d0] ss:$8 sps:$4 sm:$0xff]  }
 0x155   : > { %17492 = vmatprep.subr.bf16.mxu1 %v24427_v40  ;;  %17481 = vmatprep.mubr.bf16.mxu0 %v20963_v31  ;;  %v24497_v40 = vld [vmem:[%s28457_s11 + $0x9d0] ss:$8 sps:$4 sm:$0xff]   ;;  %v24502_v31 = vld [vmem:[%s28457_s11 + $0x8e4] ss:$8 sps:$4 sm:$0xff]  }
 0x156   : > { %17522 = vmatprep.mubr.bf16.mxu1 %v20965_v32  ;;  %v24505_v32 = vld [vmem:[%s28457_s11 + $0x9e4] ss:$8 sps:$4 sm:$0xff]  }
 0x157   : > { %17452 = vmatpush1.bf16.msra.mxu0 %v24422_v41  ;;  %v24500_v41 = vld [vmem:[%s28457_s11 + $0x8e0] ss:$8 sps:$4 sm:$0xff]  }
 0x158   : > { %17493 = vmatpush1.bf16.msra.mxu1 %v24425_v42  ;;  %17453 = vmatprep.subr.bf16.mxu0 %v24430_v43  ;;  %v24503_v42 = vld [vmem:[%s28457_s11 + $0x9e0] ss:$8 sps:$4 sm:$0xff]   ;;  %v24508_v43 = vld [vmem:[%s28457_s11 + $0x8f4] ss:$8 sps:$4 sm:$0xff]  }
 0x159   : > { %17494 = vmatprep.subr.bf16.mxu1 %v24433_v44  ;;  %v24511_v44 = vld [vmem:[%s28457_s11 + $0x9f4] ss:$8 sps:$4 sm:$0xff]  }
 0x15b   : > { %17454 = vmatpush1.bf16.msra.mxu0 %v24428_v45  ;;  %v24506_v45 = vld [vmem:[%s28457_s11 + $0x8f0] ss:$8 sps:$4 sm:$0xff]  }
 0x15c   : > { %17495 = vmatpush1.bf16.msra.mxu1 %v24431_v46  ;;  %17455 = vmatprep.subr.bf16.mxu0 %v24436_v47  ;;  %v24509_v46 = vld [vmem:[%s28457_s11 + $0x9f0] ss:$8 sps:$4 sm:$0xff]   ;;  %v24518_v47 = vld [vmem:[%s28457_s11 + $0xa04] ss:$8 sps:$4 sm:$0xff]  }
 0x15d   : > { %17496 = vmatprep.subr.bf16.mxu1 %v24439_v48  ;;  %v24521_v48 = vld [vmem:[%s28457_s11 + $0xb04] ss:$8 sps:$4 sm:$0xff]  }
 0x15f   : > { %17456 = vmatpush1.bf16.msra.mxu0 %v24434_v49  ;;  %v24516_v49 = vld [vmem:[%s28457_s11 + $0xa00] ss:$8 sps:$4 sm:$0xff]  }
 0x160   : > { %17497 = vmatpush1.bf16.msra.mxu1 %v24437_v50  ;;  %17457 = vmatprep.subr.bf16.mxu0 %v24442_v51  ;;  %v24519_v50 = vld [vmem:[%s28457_s11 + $0xb00] ss:$8 sps:$4 sm:$0xff]   ;;  %v20962_v51 = vcombine.low %v28787_v25, %v28787_v25 }
 0x161   : > { %17498 = vmatprep.subr.bf16.mxu1 %v24445_v52  ;;  %v20964_v52 = vcombine.low %v28794_v36, %v28794_v36 }
 0x163   : > { %17458 = vmatpush1.bf16.msra.mxu0 %v24440_v53  ;;  %v28875_v53 = vld [vmem:[%s28474_s27 + $0x50] sm:$0xff] }
 0x164   : > { %17499 = vmatpush1.bf16.msra.mxu1 %v24443_v54  ;;  %17459 = vmatprep.subr.bf16.mxu0 %v24448_v55  ;;  %v28878_v54 = vld [vmem:[%s28474_s27 + $0x58] sm:$0xff]  ;;  %v24524_v55 = vld [vmem:[%s28457_s11 + $0xa14] ss:$8 sps:$4 sm:$0xff]   ;;  %v20967_v25 = vcombine.high %v28875_v53, %v28875_v53 }
 0x165   : > { %17500 = vmatprep.subr.bf16.mxu1 %v24451_v56  ;;  %v17155_v61 = vpop.f32.mrb[0].mxu0  ;;  %v24527_v56 = vld [vmem:[%s28457_s11 + $0xb14] ss:$8 sps:$4 sm:$0xff]   ;;  %v20969_v36 = vcombine.high %v28878_v54, %v28878_v54 }
 0x166   : > { %v17196_v62 = vpop.f32.mrb[0].mxu1  ;;  %v17157_v2 = vpop.f32.mrb[1].mxu0 }
 0x167   : > { %v28826_v1 = vadd.f32 %v17196_v62, %v17155_v61  ;;  %v17198_v3 = vpop.f32.mrb[1].mxu1  ;;  %v17159_v5 = vpop.f32.mrb[2].mxu0  ;;  %17460 = vmatpush1.bf16.msra.mxu0 %v24446_v57  ;;  %v24522_v57 = vld [vmem:[%s28457_s11 + $0xa10] ss:$8 sps:$4 sm:$0xff]   ;;  %v24528_v61 = vld [vmem:[%s28457_s11 + $0xa20] ss:$8 sps:$4 sm:$0xff]  }
 0x168   : > { %v28828_v4 = vadd.f32 %v17198_v3, %v17157_v2  ;;  %v17200_v6 = vpop.f32.mrb[2].mxu1  ;;  %17501 = vmatpush1.bf16.msra.mxu1 %v24449_v58  ;;  %v17160_v7 = vpop.f32.mrb[3].mxu0  ;;  %17461 = vmatprep.subr.bf16.mxu0 %v24454_v59  ;;  %v24525_v58 = vld [vmem:[%s28457_s11 + $0xb10] ss:$8 sps:$4 sm:$0xff]   ;;  %v24530_v59 = vld [vmem:[%s28457_s11 + $0xa24] ss:$8 sps:$4 sm:$0xff]  }
 0x169   : > { %v17201_v8 = vpop.f32.mrb[3].mxu1  ;;  %17502 = vmatprep.subr.bf16.mxu1 %v24457_v60  ;;  %v24533_v60 = vld [vmem:[%s28457_s11 + $0xb24] ss:$8 sps:$4 sm:$0xff]   ;;  %v24531_v62 = vld [vmem:[%s28457_s11 + $0xb20] ss:$8 sps:$4 sm:$0xff]  }
 0x16a   : > { %v24534_v2 = vld [vmem:[%s28457_s11 + $0xa30] ss:$8 sps:$4 sm:$0xff]   ;;  %v24542_v5 = vld [vmem:[%s28457_s11 + $0xa44] ss:$8 sps:$4 sm:$0xff]   ;;  %v24540_v7 = vld [vmem:[%s28457_s11 + $0xa40] ss:$8 sps:$4 sm:$0xff]  }
 0x16b   : > { %17462 = vmatpush1.bf16.msra.mxu0 %v24452_v63  ;;  %v24536_v63 = vld [vmem:[%s28457_s11 + $0xa34] ss:$8 sps:$4 sm:$0xff]   ;;  %v24537_v3 = vld [vmem:[%s28457_s11 + $0xb30] ss:$8 sps:$4 sm:$0xff]   ;;  %v24545_v6 = vld [vmem:[%s28457_s11 + $0xb44] ss:$8 sps:$4 sm:$0xff]  }
 0x16c   : > { %17503 = vmatpush1.bf16.msra.mxu1 %v24455_v0  ;;  %17463 = vmatprep.subr.bf16.mxu0 %v24460_v9  ;;  %v24539_v0 = vld [vmem:[%s28457_s11 + $0xb34] ss:$8 sps:$4 sm:$0xff]   ;;  %v24543_v8 = vld [vmem:[%s28457_s11 + $0xb40] ss:$8 sps:$4 sm:$0xff]  }
 0x16d   : > { %17504 = vmatprep.subr.bf16.mxu1 %v24463_v10  ;;  %v24548_v9 = vld [vmem:[%s28457_s11 + $0xa54] ss:$8 sps:$4 sm:$0xff]  }
 0x16e   : > { %v24551_v10 = vld [vmem:[%s28457_s11 + $0xb54] ss:$8 sps:$4 sm:$0xff]  }
 0x16f   : > { %17464 = vmatpush1.bf16.msra.mxu0 %v24458_v11  ;;  %v24546_v11 = vld [vmem:[%s28457_s11 + $0xa50] ss:$8 sps:$4 sm:$0xff]  }
 0x170   : > { %17505 = vmatpush1.bf16.msra.mxu1 %v24461_v12  ;;  %17465 = vmatprep.subr.bf16.mxu0 %v24466_v13  ;;  %v24549_v12 = vld [vmem:[%s28457_s11 + $0xb50] ss:$8 sps:$4 sm:$0xff]   ;;  %v24554_v13 = vld [vmem:[%s28457_s11 + $0xa64] ss:$8 sps:$4 sm:$0xff]  }
 0x171   : > { %17506 = vmatprep.subr.bf16.mxu1 %v24469_v14  ;;  %v24557_v14 = vld [vmem:[%s28457_s11 + $0xb64] ss:$8 sps:$4 sm:$0xff]  }
 0x173   : > { %17466 = vmatpush1.bf16.msra.mxu0 %v24464_v15 }
 0x174   : > { %17507 = vmatpush1.bf16.msra.mxu1 %v24467_v16  ;;  %17467 = vmatprep.subr.bf16.mxu0 %v24472_v17  ;;  %v24552_v17 = vld [vmem:[%s28457_s11 + $0xa60] ss:$8 sps:$4 sm:$0xff]  }
 0x175   : > { %17508 = vmatprep.subr.bf16.mxu1 %v24475_v18  ;;  %v24555_v18 = vld [vmem:[%s28457_s11 + $0xb60] ss:$8 sps:$4 sm:$0xff]  }
 0x177   : > { %17468 = vmatpush1.bf16.msra.mxu0 %v24470_v19 }
 0x178   : > { %17509 = vmatpush1.bf16.msra.mxu1 %v24473_v20  ;;  %17469 = vmatprep.subr.bf16.mxu0 %v24478_v21 }
 0x179   : > { %17510 = vmatprep.subr.bf16.mxu1 %v24481_v22 }
 0x17b   : > { %17470 = vmatpush1.bf16.msra.mxu0 %v24476_v23 }
 0x17c   : > { %17511 = vmatpush1.bf16.msra.mxu1 %v24479_v24  ;;  %17471 = vmatprep.subr.bf16.mxu0 %v24484_v27 }
 0x17d   : > { %17512 = vmatprep.subr.bf16.mxu1 %v24487_v28 }
 0x17f   : > { %17472 = vmatpush1.bf16.msra.mxu0 %v24482_v29 }
 0x180   : > { %17513 = vmatpush1.bf16.msra.mxu1 %v24485_v30  ;;  %17473 = vmatprep.subr.bf16.mxu0 %v24490_v33  ;;  %v24563_v30 = vld [vmem:[%s28457_s11 + $0xb74] ss:$8 sps:$4 sm:$0xff]  }
 0x181   : > { %17514 = vmatprep.subr.bf16.mxu1 %v24493_v34  ;;  %v24561_v34 = vld [vmem:[%s28457_s11 + $0xb70] ss:$8 sps:$4 sm:$0xff]  }
 0x183   : > { %17474 = vmatpush1.bf16.msra.mxu0 %v24488_v26  ;;  %v24566_v26 = vld [vmem:[%s28457_s11 + $0xa84] ss:$8 sps:$4 sm:$0xff]  }
 0x184   : > { %17515 = vmatpush1.bf16.msra.mxu1 %v24491_v35  ;;  %17475 = vmatprep.subr.bf16.mxu0 %v24496_v37  ;;  %v24569_v35 = vld [vmem:[%s28457_s11 + $0xb84] ss:$8 sps:$4 sm:$0xff]   ;;  %v24564_v37 = vld [vmem:[%s28457_s11 + $0xa80] ss:$8 sps:$4 sm:$0xff]  }
 0x185   : > { %17516 = vmatprep.subr.bf16.mxu1 %v24499_v38  ;;  %v24567_v38 = vld [vmem:[%s28457_s11 + $0xb80] ss:$8 sps:$4 sm:$0xff]  }
 0x187   : > { %17476 = vmatpush1.bf16.msra.mxu0 %v24494_v39  ;;  %v24572_v39 = vld [vmem:[%s28457_s11 + $0xa94] ss:$8 sps:$4 sm:$0xff]  }
 0x188   : > { %17517 = vmatpush1.bf16.msra.mxu1 %v24497_v40  ;;  %17477 = vmatprep.subr.bf16.mxu0 %v24502_v31  ;;  %v24575_v40 = vld [vmem:[%s28457_s11 + $0xb94] ss:$8 sps:$4 sm:$0xff]   ;;  %v24570_v31 = vld [vmem:[%s28457_s11 + $0xa90] ss:$8 sps:$4 sm:$0xff]  }
 0x189   : > { %17518 = vmatprep.subr.bf16.mxu1 %v24505_v32  ;;  %v24573_v32 = vld [vmem:[%s28457_s11 + $0xb90] ss:$8 sps:$4 sm:$0xff]  }
 0x18b   : > { %17478 = vmatpush1.bf16.msra.mxu0 %v24500_v41  ;;  %v24578_v41 = vld [vmem:[%s28457_s11 + $0xaa4] ss:$8 sps:$4 sm:$0xff]  }
 0x18c   : > { %17519 = vmatpush1.bf16.msra.mxu1 %v24503_v42  ;;  %17479 = vmatprep.subr.bf16.mxu0 %v24508_v43  ;;  %v24581_v42 = vld [vmem:[%s28457_s11 + $0xba4] ss:$8 sps:$4 sm:$0xff]   ;;  %v24576_v43 = vld [vmem:[%s28457_s11 + $0xaa0] ss:$8 sps:$4 sm:$0xff]  }
 0x18d   : > { %17520 = vmatprep.subr.bf16.mxu1 %v24511_v44  ;;  %v24579_v44 = vld [vmem:[%s28457_s11 + $0xba0] ss:$8 sps:$4 sm:$0xff]  }
 0x18f   : > { %17480 = vmatpush1.bf16.msra.mxu0 %v24506_v45  ;;  %v24584_v45 = vld [vmem:[%s28457_s11 + $0xab4] ss:$8 sps:$4 sm:$0xff]  }
 0x190   : > { %17521 = vmatpush1.bf16.msra.mxu1 %v24509_v46  ;;  %17531 = vmatprep.subr.bf16.mxu0 %v24518_v47  ;;  %v24587_v46 = vld [vmem:[%s28457_s11 + $0xbb4] ss:$8 sps:$4 sm:$0xff]   ;;  %v24582_v47 = vld [vmem:[%s28457_s11 + $0xab0] ss:$8 sps:$4 sm:$0xff]  }
 0x191   : > { %17572 = vmatprep.subr.bf16.mxu1 %v24521_v48  ;;  %v24585_v48 = vld [vmem:[%s28457_s11 + $0xbb0] ss:$8 sps:$4 sm:$0xff]  }
 0x192   : > { %17482 = vmatmul.mubr.bf16.vlgmr.msra.gmra.mrb[16].mxu0 %v20962_v51  ;;  %v24588_v51 = vld [vmem:[%s28457_s11 + $0xac0] ss:$8 sps:$4 sm:$0xff]  }
 0x193   : > { %17523 = vmatmul.mubr.bf16.vlgmr.msra.gmra.mrb[16].mxu1 %v20964_v52  ;;  %17532 = vmatpush1.bf16.msra.mxu0 %v24516_v49  ;;  %v24590_v49 = vld [vmem:[%s28457_s11 + $0xac4] ss:$8 sps:$4 sm:$0xff]   ;;  %v24591_v52 = vld [vmem:[%s28457_s11 + $0xbc0] ss:$8 sps:$4 sm:$0xff]  }
 0x194   : > { %17573 = vmatpush1.bf16.msra.mxu1 %v24519_v50  ;;  %17533 = vmatprep.subr.bf16.mxu0 %v24524_v55  ;;  %v24593_v50 = vld [vmem:[%s28457_s11 + $0xbc4] ss:$8 sps:$4 sm:$0xff]   ;;  %v24596_v55 = vld [vmem:[%s28457_s11 + $0xad4] ss:$8 sps:$4 sm:$0xff]  }
 0x195   : > { %17574 = vmatprep.subr.bf16.mxu1 %v24527_v56  ;;  %17563 = vmatprep.mubr.bf16.mxu0 %v20967_v25  ;;  %v24599_v56 = vld [vmem:[%s28457_s11 + $0xbd4] ss:$8 sps:$4 sm:$0xff]   ;;  %v24594_v25 = vld [vmem:[%s28457_s11 + $0xad0] ss:$8 sps:$4 sm:$0xff]  }
 0x196   : > { %17604 = vmatprep.mubr.bf16.mxu1 %v20969_v36  ;;  %v24597_v36 = vld [vmem:[%s28457_s11 + $0xbd0] ss:$8 sps:$4 sm:$0xff]  }
 0x197   : > { %17534 = vmatpush1.bf16.msra.mxu0 %v24522_v57  ;;  %v24602_v57 = vld [vmem:[%s28457_s11 + $0xae4] ss:$8 sps:$4 sm:$0xff]  }
 0x198   : > { %17575 = vmatpush1.bf16.msra.mxu1 %v24525_v58  ;;  %17535 = vmatprep.subr.bf16.mxu0 %v24530_v59  ;;  %v24605_v58 = vld [vmem:[%s28457_s11 + $0xbe4] ss:$8 sps:$4 sm:$0xff]   ;;  %v24600_v59 = vld [vmem:[%s28457_s11 + $0xae0] ss:$8 sps:$4 sm:$0xff]  }
 0x199   : > { %17576 = vmatprep.subr.bf16.mxu1 %v24533_v60  ;;  %v24603_v60 = vld [vmem:[%s28457_s11 + $0xbe0] ss:$8 sps:$4 sm:$0xff]  }
 0x19b   : > { %17536 = vmatpush1.bf16.msra.mxu0 %v24528_v61  ;;  %v24608_v61 = vld [vmem:[%s28457_s11 + $0xaf4] ss:$8 sps:$4 sm:$0xff]  }
 0x19c   : > { %17577 = vmatpush1.bf16.msra.mxu1 %v24531_v62  ;;  %17537 = vmatprep.subr.bf16.mxu0 %v24536_v63  ;;  %v24611_v62 = vld [vmem:[%s28457_s11 + $0xbf4] ss:$8 sps:$4 sm:$0xff]   ;;  %v24606_v63 = vld [vmem:[%s28457_s11 + $0xaf0] ss:$8 sps:$4 sm:$0xff]  }
 0x19d   : > { %17578 = vmatprep.subr.bf16.mxu1 %v24539_v0  ;;  %v24609_v0 = vld [vmem:[%s28457_s11 + $0xbf0] ss:$8 sps:$4 sm:$0xff]  }
 0x19f   : > { %17538 = vmatpush1.bf16.msra.mxu0 %v24534_v2  ;;  %v24618_v2 = vld [vmem:[%s28457_s11 + $0xc04] ss:$8 sps:$4 sm:$0xff]  }
 0x1a0   : > { %17579 = vmatpush1.bf16.msra.mxu1 %v24537_v3  ;;  %17539 = vmatprep.subr.bf16.mxu0 %v24542_v5  ;;  %v24621_v3 = vld [vmem:[%s28457_s11 + $0xd04] ss:$8 sps:$4 sm:$0xff]   ;;  %v24616_v5 = vld [vmem:[%s28457_s11 + $0xc00] ss:$8 sps:$4 sm:$0xff]  }
 0x1a1   : > { %17580 = vmatprep.subr.bf16.mxu1 %v24545_v6  ;;  %v24619_v6 = vld [vmem:[%s28457_s11 + $0xd00] ss:$8 sps:$4 sm:$0xff]  }
 0x1a3   : > { %17540 = vmatpush1.bf16.msra.mxu0 %v24540_v7  ;;  %v20966_v7 = vcombine.low %v28875_v53, %v28875_v53 }
 0x1a4   : > { %17581 = vmatpush1.bf16.msra.mxu1 %v24543_v8  ;;  %17541 = vmatprep.subr.bf16.mxu0 %v24548_v9  ;;  %v20968_v8 = vcombine.low %v28878_v54, %v28878_v54  ;;  %v28959_v9 = vld [vmem:[%s28474_s27 + $0x60] sm:$0xff] }
 0x1a5   : > { %17582 = vmatprep.subr.bf16.mxu1 %v24551_v10  ;;  %v17237_v15 = vpop.f32.mrb[4].mxu0  ;;  %v28962_v10 = vld [vmem:[%s28474_s27 + $0x68] sm:$0xff]  ;;  %v20971_v53 = vcombine.high %v28959_v9, %v28959_v9 }
 0x1a6   : > { %v17278_v16 = vpop.f32.mrb[4].mxu1  ;;  %v17238_v19 = vadd.f32 %v17237_v15, %v28826_v1  ;;  %v17239_v20 = vpop.f32.mrb[5].mxu0  ;;  %v24560_v1 = vld [vmem:[%s28457_s11 + $0xa74] ss:$8 sps:$4 sm:$0xff]   ;;  %v20973_v54 = vcombine.high %v28962_v10, %v28962_v10  ;;  %v24630_v15 = vld [vmem:[%s28457_s11 + $0xc24] ss:$8 sps:$4 sm:$0xff]  }
 0x1a7   : > { %v17280_v21 = vpop.f32.mrb[5].mxu1  ;;  %v17240_v22 = vadd.f32 %v17239_v20, %v28828_v4  ;;  %v17241_v23 = vpop.f32.mrb[6].mxu0  ;;  %17542 = vmatpush1.bf16.msra.mxu0 %v24546_v11  ;;  %v24558_v4 = vld [vmem:[%s28457_s11 + $0xa70] ss:$8 sps:$4 sm:$0xff]   ;;  %v24624_v11 = vld [vmem:[%s28457_s11 + $0xc14] ss:$8 sps:$4 sm:$0xff]  }
 0x1a8   : > { %v17282_v24 = vpop.f32.mrb[6].mxu1  ;;  %17583 = vmatpush1.bf16.msra.mxu1 %v24549_v12  ;;  %v28910_v27 = vadd.f32 %v17278_v16, %v17238_v19  ;;  %v17242_v28 = vpop.f32.mrb[7].mxu0  ;;  %17543 = vmatprep.subr.bf16.mxu0 %v24554_v13  ;;  %v24627_v12 = vld [vmem:[%s28457_s11 + $0xd14] ss:$8 sps:$4 sm:$0xff]   ;;  %v24622_v13 = vld [vmem:[%s28457_s11 + $0xc10] ss:$8 sps:$4 sm:$0xff]  }
 0x1a9   : > { %v17283_v29 = vpop.f32.mrb[7].mxu1  ;;  %17584 = vmatprep.subr.bf16.mxu1 %v24557_v14  ;;  %v28914_v33 = vadd.f32 %v17280_v21, %v17240_v22  ;;  %v24625_v14 = vld [vmem:[%s28457_s11 + $0xd10] ss:$8 sps:$4 sm:$0xff]   ;;  %v24633_v16 = vld [vmem:[%s28457_s11 + $0xd24] ss:$8 sps:$4 sm:$0xff]  }
 0x1aa   : > { %v24636_v19 = vld [vmem:[%s28457_s11 + $0xc34] ss:$8 sps:$4 sm:$0xff]   ;;  %v24634_v21 = vld [vmem:[%s28457_s11 + $0xc30] ss:$8 sps:$4 sm:$0xff]   ;;  %v24642_v23 = vld [vmem:[%s28457_s11 + $0xc44] ss:$8 sps:$4 sm:$0xff]  }
 0x1ab   : > { %17544 = vmatpush1.bf16.msra.mxu0 %v24552_v17  ;;  %v24628_v17 = vld [vmem:[%s28457_s11 + $0xc20] ss:$8 sps:$4 sm:$0xff]   ;;  %v24639_v20 = vld [vmem:[%s28457_s11 + $0xd34] ss:$8 sps:$4 sm:$0xff]   ;;  %v24637_v22 = vld [vmem:[%s28457_s11 + $0xd30] ss:$8 sps:$4 sm:$0xff]  }
 0x1ac   : > { %17585 = vmatpush1.bf16.msra.mxu1 %v24555_v18  ;;  %17545 = vmatprep.subr.bf16.mxu0 %v24560_v1  ;;  %v24631_v18 = vld [vmem:[%s28457_s11 + $0xd20] ss:$8 sps:$4 sm:$0xff]   ;;  %v24645_v24 = vld [vmem:[%s28457_s11 + $0xd44] ss:$8 sps:$4 sm:$0xff]   ;;  %v24648_v1 = vld [vmem:[%s28457_s11 + $0xc54] ss:$8 sps:$4 sm:$0xff]  }
 0x1ad   : > { %17586 = vmatprep.subr.bf16.mxu1 %v24563_v30  ;;  %v24640_v28 = vld [vmem:[%s28457_s11 + $0xc40] ss:$8 sps:$4 sm:$0xff]   ;;  %v24651_v30 = vld [vmem:[%s28457_s11 + $0xd54] ss:$8 sps:$4 sm:$0xff]  }
 0x1ae   : > { %v24643_v29 = vld [vmem:[%s28457_s11 + $0xd40] ss:$8 sps:$4 sm:$0xff]  }
 0x1af   : > { %17546 = vmatpush1.bf16.msra.mxu0 %v24558_v4  ;;  %v24646_v4 = vld [vmem:[%s28457_s11 + $0xc50] ss:$8 sps:$4 sm:$0xff]  }
 0x1b0   : > { %17587 = vmatpush1.bf16.msra.mxu1 %v24561_v34  ;;  %17547 = vmatprep.subr.bf16.mxu0 %v24566_v26  ;;  %v24649_v34 = vld [vmem:[%s28457_s11 + $0xd50] ss:$8 sps:$4 sm:$0xff]   ;;  %v24654_v26 = vld [vmem:[%s28457_s11 + $0xc64] ss:$8 sps:$4 sm:$0xff]  }
 0x1b1   : > { %17588 = vmatprep.subr.bf16.mxu1 %v24569_v35  ;;  %v24657_v35 = vld [vmem:[%s28457_s11 + $0xd64] ss:$8 sps:$4 sm:$0xff]  }
 0x1b3   : > { %17548 = vmatpush1.bf16.msra.mxu0 %v24564_v37 }
 0x1b4   : > { %17589 = vmatpush1.bf16.msra.mxu1 %v24567_v38  ;;  %17549 = vmatprep.subr.bf16.mxu0 %v24572_v39  ;;  %v24652_v39 = vld [vmem:[%s28457_s11 + $0xc60] ss:$8 sps:$4 sm:$0xff]  }
 0x1b5   : > { %17590 = vmatprep.subr.bf16.mxu1 %v24575_v40  ;;  %v24655_v40 = vld [vmem:[%s28457_s11 + $0xd60] ss:$8 sps:$4 sm:$0xff]  }
 0x1b7   : > { %17550 = vmatpush1.bf16.msra.mxu0 %v24570_v31 }
 0x1b8   : > { %17591 = vmatpush1.bf16.msra.mxu1 %v24573_v32  ;;  %17551 = vmatprep.subr.bf16.mxu0 %v24578_v41 }
 0x1b9   : > { %17592 = vmatprep.subr.bf16.mxu1 %v24581_v42 }
 0x1bb   : > { %17552 = vmatpush1.bf16.msra.mxu0 %v24576_v43 }
 0x1bc   : > { %17593 = vmatpush1.bf16.msra.mxu1 %v24579_v44  ;;  %17553 = vmatprep.subr.bf16.mxu0 %v24584_v45 }
 0x1bd   : > { %17594 = vmatprep.subr.bf16.mxu1 %v24587_v46 }
 0x1bf   : > { %17554 = vmatpush1.bf16.msra.mxu0 %v24582_v47 }
 0x1c0   : > { %17595 = vmatpush1.bf16.msra.mxu1 %v24585_v48  ;;  %17555 = vmatprep.subr.bf16.mxu0 %v24590_v49  ;;  %v24663_v48 = vld [vmem:[%s28457_s11 + $0xd74] ss:$8 sps:$4 sm:$0xff]  }
 0x1c1   : > { %17596 = vmatprep.subr.bf16.mxu1 %v24593_v50  ;;  %v24661_v50 = vld [vmem:[%s28457_s11 + $0xd70] ss:$8 sps:$4 sm:$0xff]  }
 0x1c3   : > { %17556 = vmatpush1.bf16.msra.mxu0 %v24588_v51  ;;  %v24666_v51 = vld [vmem:[%s28457_s11 + $0xc84] ss:$8 sps:$4 sm:$0xff]  }
 0x1c4   : > { %17597 = vmatpush1.bf16.msra.mxu1 %v24591_v52  ;;  %17557 = vmatprep.subr.bf16.mxu0 %v24596_v55  ;;  %v24669_v52 = vld [vmem:[%s28457_s11 + $0xd84] ss:$8 sps:$4 sm:$0xff]   ;;  %v24664_v55 = vld [vmem:[%s28457_s11 + $0xc80] ss:$8 sps:$4 sm:$0xff]  }
 0x1c5   : > { %17598 = vmatprep.subr.bf16.mxu1 %v24599_v56  ;;  %v24667_v56 = vld [vmem:[%s28457_s11 + $0xd80] ss:$8 sps:$4 sm:$0xff]  }
 0x1c7   : > { %17558 = vmatpush1.bf16.msra.mxu0 %v24594_v25  ;;  %v24672_v25 = vld [vmem:[%s28457_s11 + $0xc94] ss:$8 sps:$4 sm:$0xff]  }
 0x1c8   : > { %17599 = vmatpush1.bf16.msra.mxu1 %v24597_v36  ;;  %17559 = vmatprep.subr.bf16.mxu0 %v24602_v57  ;;  %v24675_v36 = vld [vmem:[%s28457_s11 + $0xd94] ss:$8 sps:$4 sm:$0xff]   ;;  %v24670_v57 = vld [vmem:[%s28457_s11 + $0xc90] ss:$8 sps:$4 sm:$0xff]  }
 0x1c9   : > { %17600 = vmatprep.subr.bf16.mxu1 %v24605_v58  ;;  %v24673_v58 = vld [vmem:[%s28457_s11 + $0xd90] ss:$8 sps:$4 sm:$0xff]  }
 0x1cb   : > { %17560 = vmatpush1.bf16.msra.mxu0 %v24600_v59  ;;  %v24678_v59 = vld [vmem:[%s28457_s11 + $0xca4] ss:$8 sps:$4 sm:$0xff]  }
 0x1cc   : > { %17601 = vmatpush1.bf16.msra.mxu1 %v24603_v60  ;;  %17561 = vmatprep.subr.bf16.mxu0 %v24608_v61  ;;  %v24681_v60 = vld [vmem:[%s28457_s11 + $0xda4] ss:$8 sps:$4 sm:$0xff]   ;;  %v24676_v61 = vld [vmem:[%s28457_s11 + $0xca0] ss:$8 sps:$4 sm:$0xff]  }
 0x1cd   : > { %17602 = vmatprep.subr.bf16.mxu1 %v24611_v62  ;;  %v24679_v62 = vld [vmem:[%s28457_s11 + $0xda0] ss:$8 sps:$4 sm:$0xff]  }
 0x1cf   : > { %17562 = vmatpush1.bf16.msra.mxu0 %v24606_v63  ;;  %v24684_v63 = vld [vmem:[%s28457_s11 + $0xcb4] ss:$8 sps:$4 sm:$0xff]  }
 0x1d0   : > { %17603 = vmatpush1.bf16.msra.mxu1 %v24609_v0  ;;  %17613 = vmatprep.subr.bf16.mxu0 %v24618_v2  ;;  %v24687_v0 = vld [vmem:[%s28457_s11 + $0xdb4] ss:$8 sps:$4 sm:$0xff]   ;;  %v24682_v2 = vld [vmem:[%s28457_s11 + $0xcb0] ss:$8 sps:$4 sm:$0xff]  }
 0x1d1   : > { %17654 = vmatprep.subr.bf16.mxu1 %v24621_v3  ;;  %v24685_v3 = vld [vmem:[%s28457_s11 + $0xdb0] ss:$8 sps:$4 sm:$0xff]  }
 0x1d2   : > { %17564 = vmatmul.mubr.bf16.vlgmr.msra.gmra.mrb[20].mxu0 %v20966_v7  ;;  %v24688_v7 = vld [vmem:[%s28457_s11 + $0xcc0] ss:$8 sps:$4 sm:$0xff]  }
 0x1d3   : > { %17605 = vmatmul.mubr.bf16.vlgmr.msra.gmra.mrb[20].mxu1 %v20968_v8  ;;  %17614 = vmatpush1.bf16.msra.mxu0 %v24616_v5  ;;  %v24690_v5 = vld [vmem:[%s28457_s11 + $0xcc4] ss:$8 sps:$4 sm:$0xff]   ;;  %v24691_v8 = vld [vmem:[%s28457_s11 + $0xdc0] ss:$8 sps:$4 sm:$0xff]  }
 0x1d4   : > { %17655 = vmatpush1.bf16.msra.mxu1 %v24619_v6  ;;  %17615 = vmatprep.subr.bf16.mxu0 %v24624_v11  ;;  %v24693_v6 = vld [vmem:[%s28457_s11 + $0xdc4] ss:$8 sps:$4 sm:$0xff]   ;;  %v24696_v11 = vld [vmem:[%s28457_s11 + $0xcd4] ss:$8 sps:$4 sm:$0xff]  }
 0x1d5   : > { %17656 = vmatprep.subr.bf16.mxu1 %v24627_v12  ;;  %17645 = vmatprep.mubr.bf16.mxu0 %v20971_v53  ;;  %v24699_v12 = vld [vmem:[%s28457_s11 + $0xdd4] ss:$8 sps:$4 sm:$0xff]   ;;  %v24694_v53 = vld [vmem:[%s28457_s11 + $0xcd0] ss:$8 sps:$4 sm:$0xff]  }
 0x1d6   : > { %17686 = vmatprep.mubr.bf16.mxu1 %v20973_v54  ;;  %v24697_v54 = vld [vmem:[%s28457_s11 + $0xdd0] ss:$8 sps:$4 sm:$0xff]  }
 0x1d7   : > { %17616 = vmatpush1.bf16.msra.mxu0 %v24622_v13  ;;  %v24702_v13 = vld [vmem:[%s28457_s11 + $0xce4] ss:$8 sps:$4 sm:$0xff]  }
 0x1d8   : > { %17657 = vmatpush1.bf16.msra.mxu1 %v24625_v14  ;;  %17617 = vmatprep.subr.bf16.mxu0 %v24630_v15  ;;  %v24705_v14 = vld [vmem:[%s28457_s11 + $0xde4] ss:$8 sps:$4 sm:$0xff]   ;;  %v24700_v15 = vld [vmem:[%s28457_s11 + $0xce0] ss:$8 sps:$4 sm:$0xff]  }
 0x1d9   : > { %17658 = vmatprep.subr.bf16.mxu1 %v24633_v16  ;;  %v24703_v16 = vld [vmem:[%s28457_s11 + $0xde0] ss:$8 sps:$4 sm:$0xff]  }
 0x1db   : > { %17618 = vmatpush1.bf16.msra.mxu0 %v24628_v17  ;;  %v24708_v17 = vld [vmem:[%s28457_s11 + $0xcf4] ss:$8 sps:$4 sm:$0xff]  }
 0x1dc   : > { %17659 = vmatpush1.bf16.msra.mxu1 %v24631_v18  ;;  %17619 = vmatprep.subr.bf16.mxu0 %v24636_v19  ;;  %v24711_v18 = vld [vmem:[%s28457_s11 + $0xdf4] ss:$8 sps:$4 sm:$0xff]   ;;  %v24706_v19 = vld [vmem:[%s28457_s11 + $0xcf0] ss:$8 sps:$4 sm:$0xff]  }
 0x1dd   : > { %17660 = vmatprep.subr.bf16.mxu1 %v24639_v20  ;;  %v24709_v20 = vld [vmem:[%s28457_s11 + $0xdf0] ss:$8 sps:$4 sm:$0xff]  }
 0x1df   : > { %17620 = vmatpush1.bf16.msra.mxu0 %v24634_v21  ;;  %v24718_v21 = vld [vmem:[%s28457_s11 + $0xe04] ss:$8 sps:$4 sm:$0xff]  }
 0x1e0   : > { %17661 = vmatpush1.bf16.msra.mxu1 %v24637_v22  ;;  %17621 = vmatprep.subr.bf16.mxu0 %v24642_v23  ;;  %v24721_v22 = vld [vmem:[%s28457_s11 + $0xf04] ss:$8 sps:$4 sm:$0xff]   ;;  %v24716_v23 = vld [vmem:[%s28457_s11 + $0xe00] ss:$8 sps:$4 sm:$0xff]  }
 0x1e1   : > { %17662 = vmatprep.subr.bf16.mxu1 %v24645_v24  ;;  %v24719_v24 = vld [vmem:[%s28457_s11 + $0xf00] ss:$8 sps:$4 sm:$0xff]  }
 0x1e3   : > { %17622 = vmatpush1.bf16.msra.mxu0 %v24640_v28  ;;  %v20970_v28 = vcombine.low %v28959_v9, %v28959_v9 }
 0x1e4   : > { %17663 = vmatpush1.bf16.msra.mxu1 %v24643_v29  ;;  %17623 = vmatprep.subr.bf16.mxu0 %v24648_v1  ;;  %v20972_v29 = vcombine.low %v28962_v10, %v28962_v10  ;;  %v29043_v1 = vld [vmem:[%s28474_s27 + $0x70] sm:$0xff] }
 0x1e5   : > { %17664 = vmatprep.subr.bf16.mxu1 %v24651_v30  ;;  %v17319_v37 = vpop.f32.mrb[8].mxu0  ;;  %v29046_v30 = vld [vmem:[%s28474_s27 + $0x78] sm:$0xff]  ;;  %v20975_v9 = vcombine.high %v29043_v1, %v29043_v1 }
 0x1e6   : > { %v17360_v38 = vpop.f32.mrb[8].mxu1  ;;  %v17320_v31 = vadd.f32 %v17319_v37, %v28910_v27  ;;  %v17321_v32 = vpop.f32.mrb[9].mxu0  ;;  %v24660_v27 = vld [vmem:[%s28457_s11 + $0xc74] ss:$8 sps:$4 sm:$0xff]   ;;  %v20977_v10 = vcombine.high %v29046_v30, %v29046_v30  ;;  %v24730_v37 = vld [vmem:[%s28457_s11 + $0xe24] ss:$8 sps:$4 sm:$0xff]  }
 0x1e7   : > { %v17362_v41 = vpop.f32.mrb[9].mxu1  ;;  %v17322_v42 = vadd.f32 %v17321_v32, %v28914_v33  ;;  %v17323_v43 = vpop.f32.mrb[10].mxu0  ;;  %17624 = vmatpush1.bf16.msra.mxu0 %v24646_v4  ;;  %v24658_v33 = vld [vmem:[%s28457_s11 + $0xc70] ss:$8 sps:$4 sm:$0xff]   ;;  %v24724_v4 = vld [vmem:[%s28457_s11 + $0xe14] ss:$8 sps:$4 sm:$0xff]  }
 0x1e8   : > { %v17364_v44 = vpop.f32.mrb[10].mxu1  ;;  %17665 = vmatpush1.bf16.msra.mxu1 %v24649_v34  ;;  %v28994_v45 = vadd.f32 %v17360_v38, %v17320_v31  ;;  %v17324_v46 = vpop.f32.mrb[11].mxu0  ;;  %17625 = vmatprep.subr.bf16.mxu0 %v24654_v26  ;;  %v24727_v34 = vld [vmem:[%s28457_s11 + $0xf14] ss:$8 sps:$4 sm:$0xff]   ;;  %v24722_v26 = vld [vmem:[%s28457_s11 + $0xe10] ss:$8 sps:$4 sm:$0xff]  }
 0x1e9   : > { %v17365_v47 = vpop.f32.mrb[11].mxu1  ;;  %17666 = vmatprep.subr.bf16.mxu1 %v24657_v35  ;;  %v28998_v49 = vadd.f32 %v17362_v41, %v17322_v42  ;;  %v24725_v35 = vld [vmem:[%s28457_s11 + $0xf10] ss:$8 sps:$4 sm:$0xff]   ;;  %v24733_v38 = vld [vmem:[%s28457_s11 + $0xf24] ss:$8 sps:$4 sm:$0xff]  }
 0x1ea   : > { %v24736_v31 = vld [vmem:[%s28457_s11 + $0xe34] ss:$8 sps:$4 sm:$0xff]   ;;  %v24734_v41 = vld [vmem:[%s28457_s11 + $0xe30] ss:$8 sps:$4 sm:$0xff]   ;;  %v24742_v43 = vld [vmem:[%s28457_s11 + $0xe44] ss:$8 sps:$4 sm:$0xff]  }
 0x1eb   : > { %17626 = vmatpush1.bf16.msra.mxu0 %v24652_v39  ;;  %v24728_v39 = vld [vmem:[%s28457_s11 + $0xe20] ss:$8 sps:$4 sm:$0xff]   ;;  %v24739_v32 = vld [vmem:[%s28457_s11 + $0xf34] ss:$8 sps:$4 sm:$0xff]   ;;  %v24737_v42 = vld [vmem:[%s28457_s11 + $0xf30] ss:$8 sps:$4 sm:$0xff]  }
 0x1ec   : > { %17667 = vmatpush1.bf16.msra.mxu1 %v24655_v40  ;;  %17627 = vmatprep.subr.bf16.mxu0 %v24660_v27  ;;  %v24731_v40 = vld [vmem:[%s28457_s11 + $0xf20] ss:$8 sps:$4 sm:$0xff]   ;;  %v24745_v44 = vld [vmem:[%s28457_s11 + $0xf44] ss:$8 sps:$4 sm:$0xff]   ;;  %v24748_v27 = vld [vmem:[%s28457_s11 + $0xe54] ss:$8 sps:$4 sm:$0xff]  }
 0x1ed   : > { %17668 = vmatprep.subr.bf16.mxu1 %v24663_v48  ;;  %v24740_v46 = vld [vmem:[%s28457_s11 + $0xe40] ss:$8 sps:$4 sm:$0xff]   ;;  %v24751_v48 = vld [vmem:[%s28457_s11 + $0xf54] ss:$8 sps:$4 sm:$0xff]  }
 0x1ee   : > { %v24743_v47 = vld [vmem:[%s28457_s11 + $0xf40] ss:$8 sps:$4 sm:$0xff]  }
 0x1ef   : > { %17628 = vmatpush1.bf16.msra.mxu0 %v24658_v33  ;;  %v24746_v33 = vld [vmem:[%s28457_s11 + $0xe50] ss:$8 sps:$4 sm:$0xff]  }
 0x1f0   : > { %17669 = vmatpush1.bf16.msra.mxu1 %v24661_v50  ;;  %17629 = vmatprep.subr.bf16.mxu0 %v24666_v51  ;;  %v24749_v50 = vld [vmem:[%s28457_s11 + $0xf50] ss:$8 sps:$4 sm:$0xff]   ;;  %v24754_v51 = vld [vmem:[%s28457_s11 + $0xe64] ss:$8 sps:$4 sm:$0xff]  }
 0x1f1   : > { %17670 = vmatprep.subr.bf16.mxu1 %v24669_v52  ;;  %v24757_v52 = vld [vmem:[%s28457_s11 + $0xf64] ss:$8 sps:$4 sm:$0xff]  }
 0x1f3   : > { %17630 = vmatpush1.bf16.msra.mxu0 %v24664_v55 }
 0x1f4   : > { %17671 = vmatpush1.bf16.msra.mxu1 %v24667_v56  ;;  %17631 = vmatprep.subr.bf16.mxu0 %v24672_v25  ;;  %v24752_v25 = vld [vmem:[%s28457_s11 + $0xe60] ss:$8 sps:$4 sm:$0xff]  }
 0x1f5   : > { %17672 = vmatprep.subr.bf16.mxu1 %v24675_v36  ;;  %v24755_v36 = vld [vmem:[%s28457_s11 + $0xf60] ss:$8 sps:$4 sm:$0xff]  }
 0x1f7   : > { %17632 = vmatpush1.bf16.msra.mxu0 %v24670_v57 }
 0x1f8   : > { %17673 = vmatpush1.bf16.msra.mxu1 %v24673_v58  ;;  %17633 = vmatprep.subr.bf16.mxu0 %v24678_v59 }
 0x1f9   : > { %17674 = vmatprep.subr.bf16.mxu1 %v24681_v60 }
 0x1fb   : > { %17634 = vmatpush1.bf16.msra.mxu0 %v24676_v61 }
 0x1fc   : > { %17675 = vmatpush1.bf16.msra.mxu1 %v24679_v62  ;;  %17635 = vmatprep.subr.bf16.mxu0 %v24684_v63 }
 0x1fd   : > { %17676 = vmatprep.subr.bf16.mxu1 %v24687_v0 }
 0x1ff   : > { %17636 = vmatpush1.bf16.msra.mxu0 %v24682_v2 }
 0x200   : > { %17677 = vmatpush1.bf16.msra.mxu1 %v24685_v3  ;;  %17637 = vmatprep.subr.bf16.mxu0 %v24690_v5  ;;  %v24763_v3 = vld [vmem:[%s28457_s11 + $0xf74] ss:$8 sps:$4 sm:$0xff]  }
 0x201   : > { %17678 = vmatprep.subr.bf16.mxu1 %v24693_v6  ;;  %v24761_v6 = vld [vmem:[%s28457_s11 + $0xf70] ss:$8 sps:$4 sm:$0xff]  }
 0x203   : > { %17638 = vmatpush1.bf16.msra.mxu0 %v24688_v7  ;;  %v24766_v7 = vld [vmem:[%s28457_s11 + $0xe84] ss:$8 sps:$4 sm:$0xff]  }
 0x204   : > { %17679 = vmatpush1.bf16.msra.mxu1 %v24691_v8  ;;  %17639 = vmatprep.subr.bf16.mxu0 %v24696_v11  ;;  %v24769_v8 = vld [vmem:[%s28457_s11 + $0xf84] ss:$8 sps:$4 sm:$0xff]   ;;  %v24764_v11 = vld [vmem:[%s28457_s11 + $0xe80] ss:$8 sps:$4 sm:$0xff]  }
 0x205   : > { %17680 = vmatprep.subr.bf16.mxu1 %v24699_v12  ;;  %v24767_v12 = vld [vmem:[%s28457_s11 + $0xf80] ss:$8 sps:$4 sm:$0xff]  }
 0x207   : > { %17640 = vmatpush1.bf16.msra.mxu0 %v24694_v53  ;;  %v24772_v53 = vld [vmem:[%s28457_s11 + $0xe94] ss:$8 sps:$4 sm:$0xff]  }
 0x208   : > { %17681 = vmatpush1.bf16.msra.mxu1 %v24697_v54  ;;  %17641 = vmatprep.subr.bf16.mxu0 %v24702_v13  ;;  %v24775_v54 = vld [vmem:[%s28457_s11 + $0xf94] ss:$8 sps:$4 sm:$0xff]   ;;  %v24770_v13 = vld [vmem:[%s28457_s11 + $0xe90] ss:$8 sps:$4 sm:$0xff]  }
 0x209   : > { %17682 = vmatprep.subr.bf16.mxu1 %v24705_v14  ;;  %v24773_v14 = vld [vmem:[%s28457_s11 + $0xf90] ss:$8 sps:$4 sm:$0xff]  }
 0x20b   : > { %17642 = vmatpush1.bf16.msra.mxu0 %v24700_v15  ;;  %v24778_v15 = vld [vmem:[%s28457_s11 + $0xea4] ss:$8 sps:$4 sm:$0xff]  }
 0x20c   : > { %17683 = vmatpush1.bf16.msra.mxu1 %v24703_v16  ;;  %17643 = vmatprep.subr.bf16.mxu0 %v24708_v17  ;;  %v24781_v16 = vld [vmem:[%s28457_s11 + $0xfa4] ss:$8 sps:$4 sm:$0xff]   ;;  %v24776_v17 = vld [vmem:[%s28457_s11 + $0xea0] ss:$8 sps:$4 sm:$0xff]  }
 0x20d   : > { %17684 = vmatprep.subr.bf16.mxu1 %v24711_v18  ;;  %v24779_v18 = vld [vmem:[%s28457_s11 + $0xfa0] ss:$8 sps:$4 sm:$0xff]  }
 0x20f   : > { %17644 = vmatpush1.bf16.msra.mxu0 %v24706_v19  ;;  %v24784_v19 = vld [vmem:[%s28457_s11 + $0xeb4] ss:$8 sps:$4 sm:$0xff]  }
 0x210   : > { %17685 = vmatpush1.bf16.msra.mxu1 %v24709_v20  ;;  %17695 = vmatprep.subr.bf16.mxu0 %v24718_v21  ;;  %v24787_v20 = vld [vmem:[%s28457_s11 + $0xfb4] ss:$8 sps:$4 sm:$0xff]   ;;  %v24782_v21 = vld [vmem:[%s28457_s11 + $0xeb0] ss:$8 sps:$4 sm:$0xff]  }
 0x211   : > { %17736 = vmatprep.subr.bf16.mxu1 %v24721_v22  ;;  %v24785_v22 = vld [vmem:[%s28457_s11 + $0xfb0] ss:$8 sps:$4 sm:$0xff]  }
 0x212   : > { %17646 = vmatmul.mubr.bf16.vlgmr.msra.gmra.mrb[24].mxu0 %v20970_v28  ;;  %v24788_v28 = vld [vmem:[%s28457_s11 + $0xec0] ss:$8 sps:$4 sm:$0xff]  }
 0x213   : > { %17687 = vmatmul.mubr.bf16.vlgmr.msra.gmra.mrb[24].mxu1 %v20972_v29  ;;  %17696 = vmatpush1.bf16.msra.mxu0 %v24716_v23  ;;  %v24790_v23 = vld [vmem:[%s28457_s11 + $0xec4] ss:$8 sps:$4 sm:$0xff]   ;;  %v24791_v29 = vld [vmem:[%s28457_s11 + $0xfc0] ss:$8 sps:$4 sm:$0xff]  }
 0x214   : > { %17737 = vmatpush1.bf16.msra.mxu1 %v24719_v24  ;;  %17697 = vmatprep.subr.bf16.mxu0 %v24724_v4  ;;  %v24793_v24 = vld [vmem:[%s28457_s11 + $0xfc4] ss:$8 sps:$4 sm:$0xff]   ;;  %v24796_v4 = vld [vmem:[%s28457_s11 + $0xed4] ss:$8 sps:$4 sm:$0xff]  }
 0x215   : > { %17738 = vmatprep.subr.bf16.mxu1 %v24727_v34  ;;  %17727 = vmatprep.mubr.bf16.mxu0 %v20975_v9  ;;  %v24799_v34 = vld [vmem:[%s28457_s11 + $0xfd4] ss:$8 sps:$4 sm:$0xff]   ;;  %v24794_v9 = vld [vmem:[%s28457_s11 + $0xed0] ss:$8 sps:$4 sm:$0xff]  }
 0x216   : > { %17768 = vmatprep.mubr.bf16.mxu1 %v20977_v10  ;;  %v24797_v10 = vld [vmem:[%s28457_s11 + $0xfd0] ss:$8 sps:$4 sm:$0xff]  }
 0x217   : > { %17698 = vmatpush1.bf16.msra.mxu0 %v24722_v26  ;;  %v24802_v26 = vld [vmem:[%s28457_s11 + $0xee4] ss:$8 sps:$4 sm:$0xff]  }
 0x218   : > { %17739 = vmatpush1.bf16.msra.mxu1 %v24725_v35  ;;  %17699 = vmatprep.subr.bf16.mxu0 %v24730_v37  ;;  %v24805_v35 = vld [vmem:[%s28457_s11 + $0xfe4] ss:$8 sps:$4 sm:$0xff]   ;;  %v24800_v37 = vld [vmem:[%s28457_s11 + $0xee0] ss:$8 sps:$4 sm:$0xff]  }
 0x219   : > { %17740 = vmatprep.subr.bf16.mxu1 %v24733_v38  ;;  %v24803_v38 = vld [vmem:[%s28457_s11 + $0xfe0] ss:$8 sps:$4 sm:$0xff]  }
 0x21b   : > { %17700 = vmatpush1.bf16.msra.mxu0 %v24728_v39  ;;  %v24808_v39 = vld [vmem:[%s28457_s11 + $0xef4] ss:$8 sps:$4 sm:$0xff]  }
 0x21c   : > { %17741 = vmatpush1.bf16.msra.mxu1 %v24731_v40  ;;  %17701 = vmatprep.subr.bf16.mxu0 %v24736_v31  ;;  %v24811_v40 = vld [vmem:[%s28457_s11 + $0xff4] ss:$8 sps:$4 sm:$0xff]   ;;  %v24806_v31 = vld [vmem:[%s28457_s11 + $0xef0] ss:$8 sps:$4 sm:$0xff]  }
 0x21d   : > { %17742 = vmatprep.subr.bf16.mxu1 %v24739_v32  ;;  %v24809_v32 = vld [vmem:[%s28457_s11 + $0xff0] ss:$8 sps:$4 sm:$0xff]  }
 0x21f   : > { %17702 = vmatpush1.bf16.msra.mxu0 %v24734_v41  ;;  %v24818_v41 = vld [vmem:[%s28457_s11 + $0x1004] ss:$8 sps:$4 sm:$0xff]  }
 0x220   : > { %17743 = vmatpush1.bf16.msra.mxu1 %v24737_v42  ;;  %17703 = vmatprep.subr.bf16.mxu0 %v24742_v43  ;;  %v24821_v42 = vld [vmem:[%s28457_s11 + $0x1104] ss:$8 sps:$4 sm:$0xff]   ;;  %v24816_v43 = vld [vmem:[%s28457_s11 + $0x1000] ss:$8 sps:$4 sm:$0xff]  }
 0x221   : > { %17744 = vmatprep.subr.bf16.mxu1 %v24745_v44  ;;  %v24819_v44 = vld [vmem:[%s28457_s11 + $0x1100] ss:$8 sps:$4 sm:$0xff]  }
 0x223   : > { %17704 = vmatpush1.bf16.msra.mxu0 %v24740_v46  ;;  %v20974_v46 = vcombine.low %v29043_v1, %v29043_v1 }
 0x224   : > { %17745 = vmatpush1.bf16.msra.mxu1 %v24743_v47  ;;  %17705 = vmatprep.subr.bf16.mxu0 %v24748_v27  ;;  %v20976_v47 = vcombine.low %v29046_v30, %v29046_v30  ;;  %v29127_v27 = vld [vmem:[%s28474_s27 + $0x80] sm:$0xff] }
 0x225   : > { %17746 = vmatprep.subr.bf16.mxu1 %v24751_v48  ;;  %v17401_v55 = vpop.f32.mrb[12].mxu0  ;;  %v29130_v48 = vld [vmem:[%s28474_s27 + $0x88] sm:$0xff]  ;;  %v20979_v1 = vcombine.high %v29127_v27, %v29127_v27 }
 0x226   : > { %v17442_v56 = vpop.f32.mrb[12].mxu1  ;;  %v17402_v57 = vadd.f32 %v17401_v55, %v28994_v45  ;;  %v17403_v58 = vpop.f32.mrb[13].mxu0  ;;  %v24760_v45 = vld [vmem:[%s28457_s11 + $0xe74] ss:$8 sps:$4 sm:$0xff]   ;;  %v20981_v30 = vcombine.high %v29130_v48, %v29130_v48  ;;  %v24830_v55 = vld [vmem:[%s28457_s11 + $0x1024] ss:$8 sps:$4 sm:$0xff]  }
 0x227   : > { %v17444_v59 = vpop.f32.mrb[13].mxu1  ;;  %v17404_v60 = vadd.f32 %v17403_v58, %v28998_v49  ;;  %v17405_v61 = vpop.f32.mrb[14].mxu0  ;;  %17706 = vmatpush1.bf16.msra.mxu0 %v24746_v33  ;;  %v24758_v49 = vld [vmem:[%s28457_s11 + $0xe70] ss:$8 sps:$4 sm:$0xff]   ;;  %v24824_v33 = vld [vmem:[%s28457_s11 + $0x1014] ss:$8 sps:$4 sm:$0xff]  }
 0x228   : > { %v17446_v62 = vpop.f32.mrb[14].mxu1  ;;  %17747 = vmatpush1.bf16.msra.mxu1 %v24749_v50  ;;  %v29078_v63 = vadd.f32 %v17442_v56, %v17402_v57  ;;  %v17406_v0 = vpop.f32.mrb[15].mxu0  ;;  %17707 = vmatprep.subr.bf16.mxu0 %v24754_v51  ;;  %v24827_v50 = vld [vmem:[%s28457_s11 + $0x1114] ss:$8 sps:$4 sm:$0xff]   ;;  %v24822_v51 = vld [vmem:[%s28457_s11 + $0x1010] ss:$8 sps:$4 sm:$0xff]  }
 0x229   : > { %v17447_v2 = vpop.f32.mrb[15].mxu1  ;;  %17748 = vmatprep.subr.bf16.mxu1 %v24757_v52  ;;  %v29082_v5 = vadd.f32 %v17444_v59, %v17404_v60  ;;  %v24825_v52 = vld [vmem:[%s28457_s11 + $0x1110] ss:$8 sps:$4 sm:$0xff]   ;;  %v24833_v56 = vld [vmem:[%s28457_s11 + $0x1124] ss:$8 sps:$4 sm:$0xff]  }
 0x22a   : > { %v24836_v57 = vld [vmem:[%s28457_s11 + $0x1034] ss:$8 sps:$4 sm:$0xff]   ;;  %v24834_v59 = vld [vmem:[%s28457_s11 + $0x1030] ss:$8 sps:$4 sm:$0xff]   ;;  %v24842_v61 = vld [vmem:[%s28457_s11 + $0x1044] ss:$8 sps:$4 sm:$0xff]  }
 0x22b   : > { %17708 = vmatpush1.bf16.msra.mxu0 %v24752_v25  ;;  %v24828_v25 = vld [vmem:[%s28457_s11 + $0x1020] ss:$8 sps:$4 sm:$0xff]   ;;  %v24839_v58 = vld [vmem:[%s28457_s11 + $0x1134] ss:$8 sps:$4 sm:$0xff]   ;;  %v24837_v60 = vld [vmem:[%s28457_s11 + $0x1130] ss:$8 sps:$4 sm:$0xff]  }
 0x22c   : > { %17749 = vmatpush1.bf16.msra.mxu1 %v24755_v36  ;;  %17709 = vmatprep.subr.bf16.mxu0 %v24760_v45  ;;  %v24831_v36 = vld [vmem:[%s28457_s11 + $0x1120] ss:$8 sps:$4 sm:$0xff]   ;;  %v24845_v62 = vld [vmem:[%s28457_s11 + $0x1144] ss:$8 sps:$4 sm:$0xff]   ;;  %v24848_v45 = vld [vmem:[%s28457_s11 + $0x1054] ss:$8 sps:$4 sm:$0xff]  }
 0x22d   : > { %17750 = vmatprep.subr.bf16.mxu1 %v24763_v3  ;;  %v24840_v0 = vld [vmem:[%s28457_s11 + $0x1040] ss:$8 sps:$4 sm:$0xff]   ;;  %v24851_v3 = vld [vmem:[%s28457_s11 + $0x1154] ss:$8 sps:$4 sm:$0xff]  }
 0x22e   : > { %v24843_v2 = vld [vmem:[%s28457_s11 + $0x1140] ss:$8 sps:$4 sm:$0xff]  }
 0x22f   : > { %17710 = vmatpush1.bf16.msra.mxu0 %v24758_v49  ;;  %v24846_v49 = vld [vmem:[%s28457_s11 + $0x1050] ss:$8 sps:$4 sm:$0xff]  }
 0x230   : > { %17751 = vmatpush1.bf16.msra.mxu1 %v24761_v6  ;;  %17711 = vmatprep.subr.bf16.mxu0 %v24766_v7  ;;  %v24849_v6 = vld [vmem:[%s28457_s11 + $0x1150] ss:$8 sps:$4 sm:$0xff]   ;;  %v24854_v7 = vld [vmem:[%s28457_s11 + $0x1064] ss:$8 sps:$4 sm:$0xff]  }
 0x231   : > { %17752 = vmatprep.subr.bf16.mxu1 %v24769_v8  ;;  %v24857_v8 = vld [vmem:[%s28457_s11 + $0x1164] ss:$8 sps:$4 sm:$0xff]  }
 0x233   : > { %17712 = vmatpush1.bf16.msra.mxu0 %v24764_v11 }
 0x234   : > { %17753 = vmatpush1.bf16.msra.mxu1 %v24767_v12  ;;  %17713 = vmatprep.subr.bf16.mxu0 %v24772_v53  ;;  %v24852_v53 = vld [vmem:[%s28457_s11 + $0x1060] ss:$8 sps:$4 sm:$0xff]  }
 0x235   : > { %17754 = vmatprep.subr.bf16.mxu1 %v24775_v54  ;;  %v24855_v54 = vld [vmem:[%s28457_s11 + $0x1160] ss:$8 sps:$4 sm:$0xff]  }
 0x237   : > { %17714 = vmatpush1.bf16.msra.mxu0 %v24770_v13 }
 0x238   : > { %17755 = vmatpush1.bf16.msra.mxu1 %v24773_v14  ;;  %17715 = vmatprep.subr.bf16.mxu0 %v24778_v15 }
 0x239   : > { %17756 = vmatprep.subr.bf16.mxu1 %v24781_v16 }
 0x23b   : > { %17716 = vmatpush1.bf16.msra.mxu0 %v24776_v17 }
 0x23c   : > { %17757 = vmatpush1.bf16.msra.mxu1 %v24779_v18  ;;  %17717 = vmatprep.subr.bf16.mxu0 %v24784_v19 }
 0x23d   : > { %17758 = vmatprep.subr.bf16.mxu1 %v24787_v20 }
 0x23f   : > { %17718 = vmatpush1.bf16.msra.mxu0 %v24782_v21 }
 0x240   : > { %17759 = vmatpush1.bf16.msra.mxu1 %v24785_v22  ;;  %17719 = vmatprep.subr.bf16.mxu0 %v24790_v23  ;;  %v24863_v22 = vld [vmem:[%s28457_s11 + $0x1174] ss:$8 sps:$4 sm:$0xff]  }
 0x241   : > { %17760 = vmatprep.subr.bf16.mxu1 %v24793_v24  ;;  %v24861_v24 = vld [vmem:[%s28457_s11 + $0x1170] ss:$8 sps:$4 sm:$0xff]  }
 0x243   : > { %17720 = vmatpush1.bf16.msra.mxu0 %v24788_v28  ;;  %v24866_v28 = vld [vmem:[%s28457_s11 + $0x1084] ss:$8 sps:$4 sm:$0xff]  }
 0x244   : > { %17761 = vmatpush1.bf16.msra.mxu1 %v24791_v29  ;;  %17721 = vmatprep.subr.bf16.mxu0 %v24796_v4  ;;  %v24869_v29 = vld [vmem:[%s28457_s11 + $0x1184] ss:$8 sps:$4 sm:$0xff]   ;;  %v24864_v4 = vld [vmem:[%s28457_s11 + $0x1080] ss:$8 sps:$4 sm:$0xff]  }
 0x245   : > { %17762 = vmatprep.subr.bf16.mxu1 %v24799_v34  ;;  %v24867_v34 = vld [vmem:[%s28457_s11 + $0x1180] ss:$8 sps:$4 sm:$0xff]  }
 0x247   : > { %17722 = vmatpush1.bf16.msra.mxu0 %v24794_v9  ;;  %v24872_v9 = vld [vmem:[%s28457_s11 + $0x1094] ss:$8 sps:$4 sm:$0xff]  }
 0x248   : > { %17763 = vmatpush1.bf16.msra.mxu1 %v24797_v10  ;;  %17723 = vmatprep.subr.bf16.mxu0 %v24802_v26  ;;  %v24875_v10 = vld [vmem:[%s28457_s11 + $0x1194] ss:$8 sps:$4 sm:$0xff]   ;;  %v24870_v26 = vld [vmem:[%s28457_s11 + $0x1090] ss:$8 sps:$4 sm:$0xff]  }
 0x249   : > { %17764 = vmatprep.subr.bf16.mxu1 %v24805_v35  ;;  %v24873_v35 = vld [vmem:[%s28457_s11 + $0x1190] ss:$8 sps:$4 sm:$0xff]  }
 0x24b   : > { %17724 = vmatpush1.bf16.msra.mxu0 %v24800_v37  ;;  %v24878_v37 = vld [vmem:[%s28457_s11 + $0x10a4] ss:$8 sps:$4 sm:$0xff]  }
 0x24c   : > { %17765 = vmatpush1.bf16.msra.mxu1 %v24803_v38  ;;  %17725 = vmatprep.subr.bf16.mxu0 %v24808_v39  ;;  %v24881_v38 = vld [vmem:[%s28457_s11 + $0x11a4] ss:$8 sps:$4 sm:$0xff]   ;;  %v24876_v39 = vld [vmem:[%s28457_s11 + $0x10a0] ss:$8 sps:$4 sm:$0xff]  }
 0x24d   : > { %17766 = vmatprep.subr.bf16.mxu1 %v24811_v40  ;;  %v24879_v40 = vld [vmem:[%s28457_s11 + $0x11a0] ss:$8 sps:$4 sm:$0xff]  }
 0x24f   : > { %17726 = vmatpush1.bf16.msra.mxu0 %v24806_v31  ;;  %v24884_v31 = vld [vmem:[%s28457_s11 + $0x10b4] ss:$8 sps:$4 sm:$0xff]  }
 0x250   : > { %17767 = vmatpush1.bf16.msra.mxu1 %v24809_v32  ;;  %17777 = vmatprep.subr.bf16.mxu0 %v24818_v41  ;;  %v24887_v32 = vld [vmem:[%s28457_s11 + $0x11b4] ss:$8 sps:$4 sm:$0xff]   ;;  %v24882_v41 = vld [vmem:[%s28457_s11 + $0x10b0] ss:$8 sps:$4 sm:$0xff]  }
 0x251   : > { %17818 = vmatprep.subr.bf16.mxu1 %v24821_v42  ;;  %v24885_v42 = vld [vmem:[%s28457_s11 + $0x11b0] ss:$8 sps:$4 sm:$0xff]  }
 0x252   : > { %17728 = vmatmul.mubr.bf16.vlgmr.msra.gmra.mrb[28].mxu0 %v20974_v46  ;;  %v24888_v46 = vld [vmem:[%s28457_s11 + $0x10c0] ss:$8 sps:$4 sm:$0xff]  }
 0x253   : > { %17769 = vmatmul.mubr.bf16.vlgmr.msra.gmra.mrb[28].mxu1 %v20976_v47  ;;  %17778 = vmatpush1.bf16.msra.mxu0 %v24816_v43  ;;  %v24890_v43 = vld [vmem:[%s28457_s11 + $0x10c4] ss:$8 sps:$4 sm:$0xff]   ;;  %v24891_v47 = vld [vmem:[%s28457_s11 + $0x11c0] ss:$8 sps:$4 sm:$0xff]  }
 0x254   : > { %17819 = vmatpush1.bf16.msra.mxu1 %v24819_v44  ;;  %17779 = vmatprep.subr.bf16.mxu0 %v24824_v33  ;;  %v24893_v44 = vld [vmem:[%s28457_s11 + $0x11c4] ss:$8 sps:$4 sm:$0xff]   ;;  %v24896_v33 = vld [vmem:[%s28457_s11 + $0x10d4] ss:$8 sps:$4 sm:$0xff]  }
 0x255   : > { %17820 = vmatprep.subr.bf16.mxu1 %v24827_v50  ;;  %17809 = vmatprep.mubr.bf16.mxu0 %v20979_v1  ;;  %v24899_v50 = vld [vmem:[%s28457_s11 + $0x11d4] ss:$8 sps:$4 sm:$0xff]   ;;  %v24894_v1 = vld [vmem:[%s28457_s11 + $0x10d0] ss:$8 sps:$4 sm:$0xff]  }
 0x256   : > { %17850 = vmatprep.mubr.bf16.mxu1 %v20981_v30  ;;  %v24897_v30 = vld [vmem:[%s28457_s11 + $0x11d0] ss:$8 sps:$4 sm:$0xff]  }
 0x257   : > { %17780 = vmatpush1.bf16.msra.mxu0 %v24822_v51  ;;  %v24902_v51 = vld [vmem:[%s28457_s11 + $0x10e4] ss:$8 sps:$4 sm:$0xff]  }
 0x258   : > { %17821 = vmatpush1.bf16.msra.mxu1 %v24825_v52  ;;  %17781 = vmatprep.subr.bf16.mxu0 %v24830_v55  ;;  %v24905_v52 = vld [vmem:[%s28457_s11 + $0x11e4] ss:$8 sps:$4 sm:$0xff]   ;;  %v24900_v55 = vld [vmem:[%s28457_s11 + $0x10e0] ss:$8 sps:$4 sm:$0xff]  }
 0x259   : > { %17822 = vmatprep.subr.bf16.mxu1 %v24833_v56  ;;  %v24903_v56 = vld [vmem:[%s28457_s11 + $0x11e0] ss:$8 sps:$4 sm:$0xff]  }
 0x25b   : > { %17782 = vmatpush1.bf16.msra.mxu0 %v24828_v25  ;;  %v24908_v25 = vld [vmem:[%s28457_s11 + $0x10f4] ss:$8 sps:$4 sm:$0xff]  }
 0x25c   : > { %17823 = vmatpush1.bf16.msra.mxu1 %v24831_v36  ;;  %17783 = vmatprep.subr.bf16.mxu0 %v24836_v57  ;;  %v24911_v36 = vld [vmem:[%s28457_s11 + $0x11f4] ss:$8 sps:$4 sm:$0xff]   ;;  %v24906_v57 = vld [vmem:[%s28457_s11 + $0x10f0] ss:$8 sps:$4 sm:$0xff]  }
 0x25d   : > { %17824 = vmatprep.subr.bf16.mxu1 %v24839_v58  ;;  %v24909_v58 = vld [vmem:[%s28457_s11 + $0x11f0] ss:$8 sps:$4 sm:$0xff]  }
 0x25f   : > { %17784 = vmatpush1.bf16.msra.mxu0 %v24834_v59  ;;  %v24918_v59 = vld [vmem:[%s28457_s11 + $0x1204] ss:$8 sps:$4 sm:$0xff]  }
 0x260   : > { %17825 = vmatpush1.bf16.msra.mxu1 %v24837_v60  ;;  %17785 = vmatprep.subr.bf16.mxu0 %v24842_v61  ;;  %v24921_v60 = vld [vmem:[%s28457_s11 + $0x1304] ss:$8 sps:$4 sm:$0xff]   ;;  %v24916_v61 = vld [vmem:[%s28457_s11 + $0x1200] ss:$8 sps:$4 sm:$0xff]  }
 0x261   : > { %17826 = vmatprep.subr.bf16.mxu1 %v24845_v62  ;;  %v24919_v62 = vld [vmem:[%s28457_s11 + $0x1300] ss:$8 sps:$4 sm:$0xff]  }
 0x263   : > { %17786 = vmatpush1.bf16.msra.mxu0 %v24840_v0  ;;  %v20978_v0 = vcombine.low %v29127_v27, %v29127_v27 }
 0x264   : > { %17827 = vmatpush1.bf16.msra.mxu1 %v24843_v2  ;;  %17787 = vmatprep.subr.bf16.mxu0 %v24848_v45  ;;  %v20980_v2 = vcombine.low %v29130_v48, %v29130_v48  ;;  %v29211_v45 = vld [vmem:[%s28474_s27 + $0x90] sm:$0xff] }
 0x265   : > { %17828 = vmatprep.subr.bf16.mxu1 %v24851_v3  ;;  %v17483_v11 = vpop.f32.mrb[16].mxu0  ;;  %v29214_v3 = vld [vmem:[%s28474_s27 + $0x98] sm:$0xff]  ;;  %v20983_v27 = vcombine.high %v29211_v45, %v29211_v45 }
 0x266   : > { %v17524_v12 = vpop.f32.mrb[16].mxu1  ;;  %v17484_v13 = vadd.f32 %v17483_v11, %v29078_v63  ;;  %v17485_v14 = vpop.f32.mrb[17].mxu0  ;;  %v24860_v63 = vld [vmem:[%s28457_s11 + $0x1074] ss:$8 sps:$4 sm:$0xff]   ;;  %v20985_v48 = vcombine.high %v29214_v3, %v29214_v3  ;;  %v24930_v11 = vld [vmem:[%s28457_s11 + $0x1224] ss:$8 sps:$4 sm:$0xff]  }
 0x267   : > { %v17526_v15 = vpop.f32.mrb[17].mxu1  ;;  %v17486_v16 = vadd.f32 %v17485_v14, %v29082_v5  ;;  %v17487_v17 = vpop.f32.mrb[18].mxu0  ;;  %17788 = vmatpush1.bf16.msra.mxu0 %v24846_v49  ;;  %v24858_v5 = vld [vmem:[%s28457_s11 + $0x1070] ss:$8 sps:$4 sm:$0xff]   ;;  %v24924_v49 = vld [vmem:[%s28457_s11 + $0x1214] ss:$8 sps:$4 sm:$0xff]  }
 0x268   : > { %v17528_v18 = vpop.f32.mrb[18].mxu1  ;;  %17829 = vmatpush1.bf16.msra.mxu1 %v24849_v6  ;;  %v29162_v19 = vadd.f32 %v17524_v12, %v17484_v13  ;;  %v17488_v20 = vpop.f32.mrb[19].mxu0  ;;  %17789 = vmatprep.subr.bf16.mxu0 %v24854_v7  ;;  %v24927_v6 = vld [vmem:[%s28457_s11 + $0x1314] ss:$8 sps:$4 sm:$0xff]   ;;  %v24922_v7 = vld [vmem:[%s28457_s11 + $0x1210] ss:$8 sps:$4 sm:$0xff]  }
 0x269   : > { %v17529_v21 = vpop.f32.mrb[19].mxu1  ;;  %17830 = vmatprep.subr.bf16.mxu1 %v24857_v8  ;;  %v29166_v23 = vadd.f32 %v17526_v15, %v17486_v16  ;;  %v24925_v8 = vld [vmem:[%s28457_s11 + $0x1310] ss:$8 sps:$4 sm:$0xff]   ;;  %v24933_v12 = vld [vmem:[%s28457_s11 + $0x1324] ss:$8 sps:$4 sm:$0xff]  }
 0x26a   : > { %v24936_v13 = vld [vmem:[%s28457_s11 + $0x1234] ss:$8 sps:$4 sm:$0xff]   ;;  %v24934_v15 = vld [vmem:[%s28457_s11 + $0x1230] ss:$8 sps:$4 sm:$0xff]   ;;  %v24942_v17 = vld [vmem:[%s28457_s11 + $0x1244] ss:$8 sps:$4 sm:$0xff]  }
 0x26b   : > { %17790 = vmatpush1.bf16.msra.mxu0 %v24852_v53  ;;  %v24928_v53 = vld [vmem:[%s28457_s11 + $0x1220] ss:$8 sps:$4 sm:$0xff]   ;;  %v24939_v14 = vld [vmem:[%s28457_s11 + $0x1334] ss:$8 sps:$4 sm:$0xff]   ;;  %v24937_v16 = vld [vmem:[%s28457_s11 + $0x1330] ss:$8 sps:$4 sm:$0xff]  }
 0x26c   : > { %17831 = vmatpush1.bf16.msra.mxu1 %v24855_v54  ;;  %17791 = vmatprep.subr.bf16.mxu0 %v24860_v63  ;;  %v24931_v54 = vld [vmem:[%s28457_s11 + $0x1320] ss:$8 sps:$4 sm:$0xff]   ;;  %v24945_v18 = vld [vmem:[%s28457_s11 + $0x1344] ss:$8 sps:$4 sm:$0xff]   ;;  %v24948_v63 = vld [vmem:[%s28457_s11 + $0x1254] ss:$8 sps:$4 sm:$0xff]  }
 0x26d   : > { %17832 = vmatprep.subr.bf16.mxu1 %v24863_v22  ;;  %v24940_v20 = vld [vmem:[%s28457_s11 + $0x1240] ss:$8 sps:$4 sm:$0xff]   ;;  %v24951_v22 = vld [vmem:[%s28457_s11 + $0x1354] ss:$8 sps:$4 sm:$0xff]  }
 0x26e   : > { %v24943_v21 = vld [vmem:[%s28457_s11 + $0x1340] ss:$8 sps:$4 sm:$0xff]  }
 0x26f   : > { %17792 = vmatpush1.bf16.msra.mxu0 %v24858_v5  ;;  %v24946_v5 = vld [vmem:[%s28457_s11 + $0x1250] ss:$8 sps:$4 sm:$0xff]  }
 0x270   : > { %17833 = vmatpush1.bf16.msra.mxu1 %v24861_v24  ;;  %17793 = vmatprep.subr.bf16.mxu0 %v24866_v28  ;;  %v24949_v24 = vld [vmem:[%s28457_s11 + $0x1350] ss:$8 sps:$4 sm:$0xff]   ;;  %v24954_v28 = vld [vmem:[%s28457_s11 + $0x1264] ss:$8 sps:$4 sm:$0xff]  }
 0x271   : > { %17834 = vmatprep.subr.bf16.mxu1 %v24869_v29  ;;  %v24957_v29 = vld [vmem:[%s28457_s11 + $0x1364] ss:$8 sps:$4 sm:$0xff]  }
 0x273   : > { %17794 = vmatpush1.bf16.msra.mxu0 %v24864_v4 }
 0x274   : > { %17835 = vmatpush1.bf16.msra.mxu1 %v24867_v34  ;;  %17795 = vmatprep.subr.bf16.mxu0 %v24872_v9  ;;  %v24952_v9 = vld [vmem:[%s28457_s11 + $0x1260] ss:$8 sps:$4 sm:$0xff]  }
 0x275   : > { %17836 = vmatprep.subr.bf16.mxu1 %v24875_v10  ;;  %v24955_v10 = vld [vmem:[%s28457_s11 + $0x1360] ss:$8 sps:$4 sm:$0xff]  }
 0x277   : > { %17796 = vmatpush1.bf16.msra.mxu0 %v24870_v26 }
 0x278   : > { %17837 = vmatpush1.bf16.msra.mxu1 %v24873_v35  ;;  %17797 = vmatprep.subr.bf16.mxu0 %v24878_v37 }
 0x279   : > { %17838 = vmatprep.subr.bf16.mxu1 %v24881_v38 }
 0x27b   : > { %17798 = vmatpush1.bf16.msra.mxu0 %v24876_v39 }
 0x27c   : > { %17839 = vmatpush1.bf16.msra.mxu1 %v24879_v40  ;;  %17799 = vmatprep.subr.bf16.mxu0 %v24884_v31 }
 0x27d   : > { %17840 = vmatprep.subr.bf16.mxu1 %v24887_v32 }
 0x27f   : > { %17800 = vmatpush1.bf16.msra.mxu0 %v24882_v41 }
 0x280   : > { %17841 = vmatpush1.bf16.msra.mxu1 %v24885_v42  ;;  %17801 = vmatprep.subr.bf16.mxu0 %v24890_v43  ;;  %v24963_v42 = vld [vmem:[%s28457_s11 + $0x1374] ss:$8 sps:$4 sm:$0xff]  }
 0x281   : > { %17842 = vmatprep.subr.bf16.mxu1 %v24893_v44  ;;  %v24961_v44 = vld [vmem:[%s28457_s11 + $0x1370] ss:$8 sps:$4 sm:$0xff]  }
 0x283   : > { %17802 = vmatpush1.bf16.msra.mxu0 %v24888_v46  ;;  %v24966_v46 = vld [vmem:[%s28457_s11 + $0x1284] ss:$8 sps:$4 sm:$0xff]  }
 0x284   : > { %17843 = vmatpush1.bf16.msra.mxu1 %v24891_v47  ;;  %17803 = vmatprep.subr.bf16.mxu0 %v24896_v33  ;;  %v24969_v47 = vld [vmem:[%s28457_s11 + $0x1384] ss:$8 sps:$4 sm:$0xff]   ;;  %v24964_v33 = vld [vmem:[%s28457_s11 + $0x1280] ss:$8 sps:$4 sm:$0xff]  }
 0x285   : > { %17844 = vmatprep.subr.bf16.mxu1 %v24899_v50  ;;  %v24967_v50 = vld [vmem:[%s28457_s11 + $0x1380] ss:$8 sps:$4 sm:$0xff]  }
 0x287   : > { %17804 = vmatpush1.bf16.msra.mxu0 %v24894_v1  ;;  %v24972_v1 = vld [vmem:[%s28457_s11 + $0x1294] ss:$8 sps:$4 sm:$0xff]  }
 0x288   : > { %17845 = vmatpush1.bf16.msra.mxu1 %v24897_v30  ;;  %17805 = vmatprep.subr.bf16.mxu0 %v24902_v51  ;;  %v24975_v30 = vld [vmem:[%s28457_s11 + $0x1394] ss:$8 sps:$4 sm:$0xff]   ;;  %v24970_v51 = vld [vmem:[%s28457_s11 + $0x1290] ss:$8 sps:$4 sm:$0xff]  }
 0x289   : > { %17846 = vmatprep.subr.bf16.mxu1 %v24905_v52  ;;  %v24973_v52 = vld [vmem:[%s28457_s11 + $0x1390] ss:$8 sps:$4 sm:$0xff]  }
 0x28b   : > { %17806 = vmatpush1.bf16.msra.mxu0 %v24900_v55  ;;  %v24978_v55 = vld [vmem:[%s28457_s11 + $0x12a4] ss:$8 sps:$4 sm:$0xff]  }
 0x28c   : > { %17847 = vmatpush1.bf16.msra.mxu1 %v24903_v56  ;;  %17807 = vmatprep.subr.bf16.mxu0 %v24908_v25  ;;  %v24981_v56 = vld [vmem:[%s28457_s11 + $0x13a4] ss:$8 sps:$4 sm:$0xff]   ;;  %v24976_v25 = vld [vmem:[%s28457_s11 + $0x12a0] ss:$8 sps:$4 sm:$0xff]  }
 0x28d   : > { %17848 = vmatprep.subr.bf16.mxu1 %v24911_v36  ;;  %v24979_v36 = vld [vmem:[%s28457_s11 + $0x13a0] ss:$8 sps:$4 sm:$0xff]  }
 0x28f   : > { %17808 = vmatpush1.bf16.msra.mxu0 %v24906_v57  ;;  %v24984_v57 = vld [vmem:[%s28457_s11 + $0x12b4] ss:$8 sps:$4 sm:$0xff]  }
 0x290   : > { %17849 = vmatpush1.bf16.msra.mxu1 %v24909_v58  ;;  %17859 = vmatprep.subr.bf16.mxu0 %v24918_v59  ;;  %v24987_v58 = vld [vmem:[%s28457_s11 + $0x13b4] ss:$8 sps:$4 sm:$0xff]   ;;  %v24982_v59 = vld [vmem:[%s28457_s11 + $0x12b0] ss:$8 sps:$4 sm:$0xff]  }
 0x291   : > { %17900 = vmatprep.subr.bf16.mxu1 %v24921_v60  ;;  %v24985_v60 = vld [vmem:[%s28457_s11 + $0x13b0] ss:$8 sps:$4 sm:$0xff]  }
 0x292   : > { %17810 = vmatmul.mubr.bf16.vlgmr.msra.gmra.mrb[32].mxu0 %v20978_v0  ;;  %v24988_v0 = vld [vmem:[%s28457_s11 + $0x12c0] ss:$8 sps:$4 sm:$0xff]  }
 0x293   : > { %17851 = vmatmul.mubr.bf16.vlgmr.msra.gmra.mrb[32].mxu1 %v20980_v2  ;;  %17860 = vmatpush1.bf16.msra.mxu0 %v24916_v61  ;;  %v24990_v61 = vld [vmem:[%s28457_s11 + $0x12c4] ss:$8 sps:$4 sm:$0xff]   ;;  %v24991_v2 = vld [vmem:[%s28457_s11 + $0x13c0] ss:$8 sps:$4 sm:$0xff]  }
 0x294   : > { %17901 = vmatpush1.bf16.msra.mxu1 %v24919_v62  ;;  %17861 = vmatprep.subr.bf16.mxu0 %v24924_v49  ;;  %v24993_v62 = vld [vmem:[%s28457_s11 + $0x13c4] ss:$8 sps:$4 sm:$0xff]   ;;  %v24996_v49 = vld [vmem:[%s28457_s11 + $0x12d4] ss:$8 sps:$4 sm:$0xff]  }
 0x295   : > { %17902 = vmatprep.subr.bf16.mxu1 %v24927_v6  ;;  %17891 = vmatprep.mubr.bf16.mxu0 %v20983_v27  ;;  %v24999_v6 = vld [vmem:[%s28457_s11 + $0x13d4] ss:$8 sps:$4 sm:$0xff]   ;;  %v24994_v27 = vld [vmem:[%s28457_s11 + $0x12d0] ss:$8 sps:$4 sm:$0xff]  }
 0x296   : > { %17932 = vmatprep.mubr.bf16.mxu1 %v20985_v48  ;;  %v24997_v48 = vld [vmem:[%s28457_s11 + $0x13d0] ss:$8 sps:$4 sm:$0xff]  }
 0x297   : > { %17862 = vmatpush1.bf16.msra.mxu0 %v24922_v7  ;;  %v25002_v7 = vld [vmem:[%s28457_s11 + $0x12e4] ss:$8 sps:$4 sm:$0xff]  }
 0x298   : > { %17903 = vmatpush1.bf16.msra.mxu1 %v24925_v8  ;;  %17863 = vmatprep.subr.bf16.mxu0 %v24930_v11  ;;  %v25005_v8 = vld [vmem:[%s28457_s11 + $0x13e4] ss:$8 sps:$4 sm:$0xff]   ;;  %v25000_v11 = vld [vmem:[%s28457_s11 + $0x12e0] ss:$8 sps:$4 sm:$0xff]  }
 0x299   : > { %17904 = vmatprep.subr.bf16.mxu1 %v24933_v12  ;;  %v25003_v12 = vld [vmem:[%s28457_s11 + $0x13e0] ss:$8 sps:$4 sm:$0xff]  }
 0x29b   : > { %17864 = vmatpush1.bf16.msra.mxu0 %v24928_v53  ;;  %v25008_v53 = vld [vmem:[%s28457_s11 + $0x12f4] ss:$8 sps:$4 sm:$0xff]  }
 0x29c   : > { %17905 = vmatpush1.bf16.msra.mxu1 %v24931_v54  ;;  %17865 = vmatprep.subr.bf16.mxu0 %v24936_v13  ;;  %v25011_v54 = vld [vmem:[%s28457_s11 + $0x13f4] ss:$8 sps:$4 sm:$0xff]   ;;  %v25006_v13 = vld [vmem:[%s28457_s11 + $0x12f0] ss:$8 sps:$4 sm:$0xff]  }
 0x29d   : > { %17906 = vmatprep.subr.bf16.mxu1 %v24939_v14  ;;  %v25009_v14 = vld [vmem:[%s28457_s11 + $0x13f0] ss:$8 sps:$4 sm:$0xff]  }
 0x29f   : > { %17866 = vmatpush1.bf16.msra.mxu0 %v24934_v15  ;;  %v25018_v15 = vld [vmem:[%s28457_s11 + $0x1404] ss:$8 sps:$4 sm:$0xff]  }
 0x2a0   : > { %17907 = vmatpush1.bf16.msra.mxu1 %v24937_v16  ;;  %17867 = vmatprep.subr.bf16.mxu0 %v24942_v17  ;;  %v25021_v16 = vld [vmem:[%s28457_s11 + $0x1504] ss:$8 sps:$4 sm:$0xff]   ;;  %v25016_v17 = vld [vmem:[%s28457_s11 + $0x1400] ss:$8 sps:$4 sm:$0xff]  }
 0x2a1   : > { %17908 = vmatprep.subr.bf16.mxu1 %v24945_v18  ;;  %v25019_v18 = vld [vmem:[%s28457_s11 + $0x1500] ss:$8 sps:$4 sm:$0xff]  }
 0x2a3   : > { %17868 = vmatpush1.bf16.msra.mxu0 %v24940_v20  ;;  %v20982_v20 = vcombine.low %v29211_v45, %v29211_v45 }
 0x2a4   : > { %17909 = vmatpush1.bf16.msra.mxu1 %v24943_v21  ;;  %17869 = vmatprep.subr.bf16.mxu0 %v24948_v63  ;;  %v20984_v21 = vcombine.low %v29214_v3, %v29214_v3  ;;  %v29295_v63 = vld [vmem:[%s28474_s27 + $0xa0] sm:$0xff] }
 0x2a5   : > { %17910 = vmatprep.subr.bf16.mxu1 %v24951_v22  ;;  %v17565_v4 = vpop.f32.mrb[20].mxu0  ;;  %v29298_v22 = vld [vmem:[%s28474_s27 + $0xa8] sm:$0xff]  ;;  %v20987_v45 = vcombine.high %v29295_v63, %v29295_v63 }
 0x2a6   : > { %v17606_v34 = vpop.f32.mrb[20].mxu1  ;;  %v17566_v26 = vadd.f32 %v17565_v4, %v29162_v19  ;;  %v17567_v35 = vpop.f32.mrb[21].mxu0  ;;  %v24960_v19 = vld [vmem:[%s28457_s11 + $0x1274] ss:$8 sps:$4 sm:$0xff]   ;;  %v20989_v3 = vcombine.high %v29298_v22, %v29298_v22  ;;  %v25030_v4 = vld [vmem:[%s28457_s11 + $0x1424] ss:$8 sps:$4 sm:$0xff]  }
 0x2a7   : > { %v17608_v37 = vpop.f32.mrb[21].mxu1  ;;  %v17568_v38 = vadd.f32 %v17567_v35, %v29166_v23  ;;  %v17569_v39 = vpop.f32.mrb[22].mxu0  ;;  %17870 = vmatpush1.bf16.msra.mxu0 %v24946_v5  ;;  %v24958_v23 = vld [vmem:[%s28457_s11 + $0x1270] ss:$8 sps:$4 sm:$0xff]   ;;  %v25024_v5 = vld [vmem:[%s28457_s11 + $0x1414] ss:$8 sps:$4 sm:$0xff]  }
 0x2a8   : > { %v17610_v40 = vpop.f32.mrb[22].mxu1  ;;  %17911 = vmatpush1.bf16.msra.mxu1 %v24949_v24  ;;  %v29246_v31 = vadd.f32 %v17606_v34, %v17566_v26  ;;  %v17570_v32 = vpop.f32.mrb[23].mxu0  ;;  %17871 = vmatprep.subr.bf16.mxu0 %v24954_v28  ;;  %v25027_v24 = vld [vmem:[%s28457_s11 + $0x1514] ss:$8 sps:$4 sm:$0xff]   ;;  %v25022_v28 = vld [vmem:[%s28457_s11 + $0x1410] ss:$8 sps:$4 sm:$0xff]  }
 0x2a9   : > { %v17611_v41 = vpop.f32.mrb[23].mxu1  ;;  %17912 = vmatprep.subr.bf16.mxu1 %v24957_v29  ;;  %v29250_v43 = vadd.f32 %v17608_v37, %v17568_v38  ;;  %v25025_v29 = vld [vmem:[%s28457_s11 + $0x1510] ss:$8 sps:$4 sm:$0xff]   ;;  %v25033_v34 = vld [vmem:[%s28457_s11 + $0x1524] ss:$8 sps:$4 sm:$0xff]  }
 0x2aa   : > { %v25036_v26 = vld [vmem:[%s28457_s11 + $0x1434] ss:$8 sps:$4 sm:$0xff]   ;;  %v25034_v37 = vld [vmem:[%s28457_s11 + $0x1430] ss:$8 sps:$4 sm:$0xff]   ;;  %v25042_v39 = vld [vmem:[%s28457_s11 + $0x1444] ss:$8 sps:$4 sm:$0xff]  }
 0x2ab   : > { %17872 = vmatpush1.bf16.msra.mxu0 %v24952_v9  ;;  %v25028_v9 = vld [vmem:[%s28457_s11 + $0x1420] ss:$8 sps:$4 sm:$0xff]   ;;  %v25039_v35 = vld [vmem:[%s28457_s11 + $0x1534] ss:$8 sps:$4 sm:$0xff]   ;;  %v25037_v38 = vld [vmem:[%s28457_s11 + $0x1530] ss:$8 sps:$4 sm:$0xff]  }
 0x2ac   : > { %17913 = vmatpush1.bf16.msra.mxu1 %v24955_v10  ;;  %17873 = vmatprep.subr.bf16.mxu0 %v24960_v19  ;;  %v25031_v10 = vld [vmem:[%s28457_s11 + $0x1520] ss:$8 sps:$4 sm:$0xff]   ;;  %v25045_v40 = vld [vmem:[%s28457_s11 + $0x1544] ss:$8 sps:$4 sm:$0xff]   ;;  %v25048_v19 = vld [vmem:[%s28457_s11 + $0x1454] ss:$8 sps:$4 sm:$0xff]  }
 0x2ad   : > { %17914 = vmatprep.subr.bf16.mxu1 %v24963_v42  ;;  %v25040_v32 = vld [vmem:[%s28457_s11 + $0x1440] ss:$8 sps:$4 sm:$0xff]   ;;  %v25051_v42 = vld [vmem:[%s28457_s11 + $0x1554] ss:$8 sps:$4 sm:$0xff]  }
 0x2ae   : > { %v25043_v41 = vld [vmem:[%s28457_s11 + $0x1540] ss:$8 sps:$4 sm:$0xff]  }
 0x2af   : > { %17874 = vmatpush1.bf16.msra.mxu0 %v24958_v23  ;;  %v25046_v23 = vld [vmem:[%s28457_s11 + $0x1450] ss:$8 sps:$4 sm:$0xff]  }
 0x2b0   : > { %17915 = vmatpush1.bf16.msra.mxu1 %v24961_v44  ;;  %17875 = vmatprep.subr.bf16.mxu0 %v24966_v46  ;;  %v25049_v44 = vld [vmem:[%s28457_s11 + $0x1550] ss:$8 sps:$4 sm:$0xff]   ;;  %v25054_v46 = vld [vmem:[%s28457_s11 + $0x1464] ss:$8 sps:$4 sm:$0xff]  }
 0x2b1   : > { %17916 = vmatprep.subr.bf16.mxu1 %v24969_v47  ;;  %v25057_v47 = vld [vmem:[%s28457_s11 + $0x1564] ss:$8 sps:$4 sm:$0xff]  }
 0x2b3   : > { %17876 = vmatpush1.bf16.msra.mxu0 %v24964_v33 }
 0x2b4   : > { %17917 = vmatpush1.bf16.msra.mxu1 %v24967_v50  ;;  %17877 = vmatprep.subr.bf16.mxu0 %v24972_v1  ;;  %v25052_v1 = vld [vmem:[%s28457_s11 + $0x1460] ss:$8 sps:$4 sm:$0xff]  }
 0x2b5   : > { %17918 = vmatprep.subr.bf16.mxu1 %v24975_v30  ;;  %v25055_v30 = vld [vmem:[%s28457_s11 + $0x1560] ss:$8 sps:$4 sm:$0xff]  }
 0x2b7   : > { %17878 = vmatpush1.bf16.msra.mxu0 %v24970_v51 }
 0x2b8   : > { %17919 = vmatpush1.bf16.msra.mxu1 %v24973_v52  ;;  %17879 = vmatprep.subr.bf16.mxu0 %v24978_v55 }
 0x2b9   : > { %17920 = vmatprep.subr.bf16.mxu1 %v24981_v56 }
 0x2bb   : > { %17880 = vmatpush1.bf16.msra.mxu0 %v24976_v25 }
 0x2bc   : > { %17921 = vmatpush1.bf16.msra.mxu1 %v24979_v36  ;;  %17881 = vmatprep.subr.bf16.mxu0 %v24984_v57 }
 0x2bd   : > { %17922 = vmatprep.subr.bf16.mxu1 %v24987_v58 }
 0x2bf   : > { %17882 = vmatpush1.bf16.msra.mxu0 %v24982_v59 }
 0x2c0   : > { %17923 = vmatpush1.bf16.msra.mxu1 %v24985_v60  ;;  %17883 = vmatprep.subr.bf16.mxu0 %v24990_v61  ;;  %v25063_v60 = vld [vmem:[%s28457_s11 + $0x1574] ss:$8 sps:$4 sm:$0xff]  }
 0x2c1   : > { %17924 = vmatprep.subr.bf16.mxu1 %v24993_v62  ;;  %v25061_v62 = vld [vmem:[%s28457_s11 + $0x1570] ss:$8 sps:$4 sm:$0xff]  }
 0x2c3   : > { %17884 = vmatpush1.bf16.msra.mxu0 %v24988_v0  ;;  %v25066_v0 = vld [vmem:[%s28457_s11 + $0x1484] ss:$8 sps:$4 sm:$0xff]  }
 0x2c4   : > { %17925 = vmatpush1.bf16.msra.mxu1 %v24991_v2  ;;  %17885 = vmatprep.subr.bf16.mxu0 %v24996_v49  ;;  %v25069_v2 = vld [vmem:[%s28457_s11 + $0x1584] ss:$8 sps:$4 sm:$0xff]   ;;  %v25064_v49 = vld [vmem:[%s28457_s11 + $0x1480] ss:$8 sps:$4 sm:$0xff]  }
 0x2c5   : > { %17926 = vmatprep.subr.bf16.mxu1 %v24999_v6  ;;  %v25067_v6 = vld [vmem:[%s28457_s11 + $0x1580] ss:$8 sps:$4 sm:$0xff]  }
 0x2c7   : > { %17886 = vmatpush1.bf16.msra.mxu0 %v24994_v27  ;;  %v25072_v27 = vld [vmem:[%s28457_s11 + $0x1494] ss:$8 sps:$4 sm:$0xff]  }
 0x2c8   : > { %17927 = vmatpush1.bf16.msra.mxu1 %v24997_v48  ;;  %17887 = vmatprep.subr.bf16.mxu0 %v25002_v7  ;;  %v25075_v48 = vld [vmem:[%s28457_s11 + $0x1594] ss:$8 sps:$4 sm:$0xff]   ;;  %v25070_v7 = vld [vmem:[%s28457_s11 + $0x1490] ss:$8 sps:$4 sm:$0xff]  }
 0x2c9   : > { %17928 = vmatprep.subr.bf16.mxu1 %v25005_v8  ;;  %v25073_v8 = vld [vmem:[%s28457_s11 + $0x1590] ss:$8 sps:$4 sm:$0xff]  }
 0x2cb   : > { %17888 = vmatpush1.bf16.msra.mxu0 %v25000_v11  ;;  %v25078_v11 = vld [vmem:[%s28457_s11 + $0x14a4] ss:$8 sps:$4 sm:$0xff]  }
 0x2cc   : > { %17929 = vmatpush1.bf16.msra.mxu1 %v25003_v12  ;;  %17889 = vmatprep.subr.bf16.mxu0 %v25008_v53  ;;  %v25081_v12 = vld [vmem:[%s28457_s11 + $0x15a4] ss:$8 sps:$4 sm:$0xff]   ;;  %v25076_v53 = vld [vmem:[%s28457_s11 + $0x14a0] ss:$8 sps:$4 sm:$0xff]  }
 0x2cd   : > { %17930 = vmatprep.subr.bf16.mxu1 %v25011_v54  ;;  %v25079_v54 = vld [vmem:[%s28457_s11 + $0x15a0] ss:$8 sps:$4 sm:$0xff]  }
 0x2cf   : > { %17890 = vmatpush1.bf16.msra.mxu0 %v25006_v13  ;;  %v25084_v13 = vld [vmem:[%s28457_s11 + $0x14b4] ss:$8 sps:$4 sm:$0xff]  }
 0x2d0   : > { %17931 = vmatpush1.bf16.msra.mxu1 %v25009_v14  ;;  %17941 = vmatprep.subr.bf16.mxu0 %v25018_v15  ;;  %v25087_v14 = vld [vmem:[%s28457_s11 + $0x15b4] ss:$8 sps:$4 sm:$0xff]   ;;  %v25082_v15 = vld [vmem:[%s28457_s11 + $0x14b0] ss:$8 sps:$4 sm:$0xff]  }
 0x2d1   : > { %17982 = vmatprep.subr.bf16.mxu1 %v25021_v16  ;;  %v25085_v16 = vld [vmem:[%s28457_s11 + $0x15b0] ss:$8 sps:$4 sm:$0xff]  }
 0x2d2   : > { %17892 = vmatmul.mubr.bf16.vlgmr.msra.gmra.mrb[36].mxu0 %v20982_v20  ;;  %v25088_v20 = vld [vmem:[%s28457_s11 + $0x14c0] ss:$8 sps:$4 sm:$0xff]  }
 0x2d3   : > { %17933 = vmatmul.mubr.bf16.vlgmr.msra.gmra.mrb[36].mxu1 %v20984_v21  ;;  %17942 = vmatpush1.bf16.msra.mxu0 %v25016_v17  ;;  %v25090_v17 = vld [vmem:[%s28457_s11 + $0x14c4] ss:$8 sps:$4 sm:$0xff]   ;;  %v25091_v21 = vld [vmem:[%s28457_s11 + $0x15c0] ss:$8 sps:$4 sm:$0xff]  }
 0x2d4   : > { %17983 = vmatpush1.bf16.msra.mxu1 %v25019_v18  ;;  %17943 = vmatprep.subr.bf16.mxu0 %v25024_v5  ;;  %v25093_v18 = vld [vmem:[%s28457_s11 + $0x15c4] ss:$8 sps:$4 sm:$0xff]   ;;  %v25096_v5 = vld [vmem:[%s28457_s11 + $0x14d4] ss:$8 sps:$4 sm:$0xff]  }
 0x2d5   : > { %17984 = vmatprep.subr.bf16.mxu1 %v25027_v24  ;;  %17973 = vmatprep.mubr.bf16.mxu0 %v20987_v45  ;;  %v25099_v24 = vld [vmem:[%s28457_s11 + $0x15d4] ss:$8 sps:$4 sm:$0xff]   ;;  %v25094_v45 = vld [vmem:[%s28457_s11 + $0x14d0] ss:$8 sps:$4 sm:$0xff]  }
 0x2d6   : > { %18014 = vmatprep.mubr.bf16.mxu1 %v20989_v3  ;;  %v25097_v3 = vld [vmem:[%s28457_s11 + $0x15d0] ss:$8 sps:$4 sm:$0xff]  }
 0x2d7   : > { %17944 = vmatpush1.bf16.msra.mxu0 %v25022_v28  ;;  %v25102_v28 = vld [vmem:[%s28457_s11 + $0x14e4] ss:$8 sps:$4 sm:$0xff]  }
 0x2d8   : > { %17985 = vmatpush1.bf16.msra.mxu1 %v25025_v29  ;;  %17945 = vmatprep.subr.bf16.mxu0 %v25030_v4  ;;  %v25105_v29 = vld [vmem:[%s28457_s11 + $0x15e4] ss:$8 sps:$4 sm:$0xff]   ;;  %v25100_v4 = vld [vmem:[%s28457_s11 + $0x14e0] ss:$8 sps:$4 sm:$0xff]  }
 0x2d9   : > { %17986 = vmatprep.subr.bf16.mxu1 %v25033_v34  ;;  %v25103_v34 = vld [vmem:[%s28457_s11 + $0x15e0] ss:$8 sps:$4 sm:$0xff]  }
 0x2db   : > { %17946 = vmatpush1.bf16.msra.mxu0 %v25028_v9  ;;  %v25108_v9 = vld [vmem:[%s28457_s11 + $0x14f4] ss:$8 sps:$4 sm:$0xff]  }
 0x2dc   : > { %17987 = vmatpush1.bf16.msra.mxu1 %v25031_v10  ;;  %17947 = vmatprep.subr.bf16.mxu0 %v25036_v26  ;;  %v25111_v10 = vld [vmem:[%s28457_s11 + $0x15f4] ss:$8 sps:$4 sm:$0xff]   ;;  %v25106_v26 = vld [vmem:[%s28457_s11 + $0x14f0] ss:$8 sps:$4 sm:$0xff]  }
 0x2dd   : > { %17988 = vmatprep.subr.bf16.mxu1 %v25039_v35  ;;  %v25109_v35 = vld [vmem:[%s28457_s11 + $0x15f0] ss:$8 sps:$4 sm:$0xff]  }
 0x2df   : > { %17948 = vmatpush1.bf16.msra.mxu0 %v25034_v37  ;;  %v25118_v37 = vld [vmem:[%s28457_s11 + $0x1604] ss:$8 sps:$4 sm:$0xff]  }
 0x2e0   : > { %17989 = vmatpush1.bf16.msra.mxu1 %v25037_v38  ;;  %17949 = vmatprep.subr.bf16.mxu0 %v25042_v39  ;;  %v25121_v38 = vld [vmem:[%s28457_s11 + $0x1704] ss:$8 sps:$4 sm:$0xff]   ;;  %v25116_v39 = vld [vmem:[%s28457_s11 + $0x1600] ss:$8 sps:$4 sm:$0xff]  }
 0x2e1   : > { %17990 = vmatprep.subr.bf16.mxu1 %v25045_v40  ;;  %v25119_v40 = vld [vmem:[%s28457_s11 + $0x1700] ss:$8 sps:$4 sm:$0xff]  }
 0x2e3   : > { %17950 = vmatpush1.bf16.msra.mxu0 %v25040_v32  ;;  %v20986_v32 = vcombine.low %v29295_v63, %v29295_v63 }
 0x2e4   : > { %17991 = vmatpush1.bf16.msra.mxu1 %v25043_v41  ;;  %17951 = vmatprep.subr.bf16.mxu0 %v25048_v19  ;;  %v20988_v41 = vcombine.low %v29298_v22, %v29298_v22  ;;  %v29379_v19 = vld [vmem:[%s28474_s27 + $0xb0] sm:$0xff] }
 0x2e5   : > { %17992 = vmatprep.subr.bf16.mxu1 %v25051_v42  ;;  %v17647_v33 = vpop.f32.mrb[24].mxu0  ;;  %v29382_v42 = vld [vmem:[%s28474_s27 + $0xb8] sm:$0xff]  ;;  %v20991_v63 = vcombine.high %v29379_v19, %v29379_v19 }
 0x2e6   : > { %v17688_v50 = vpop.f32.mrb[24].mxu1  ;;  %v17648_v51 = vadd.f32 %v17647_v33, %v29246_v31  ;;  %v17649_v52 = vpop.f32.mrb[25].mxu0  ;;  %v25060_v31 = vld [vmem:[%s28457_s11 + $0x1474] ss:$8 sps:$4 sm:$0xff]   ;;  %v20993_v22 = vcombine.high %v29382_v42, %v29382_v42  ;;  %v25130_v33 = vld [vmem:[%s28457_s11 + $0x1624] ss:$8 sps:$4 sm:$0xff]  }
 0x2e7   : > { %v17690_v55 = vpop.f32.mrb[25].mxu1  ;;  %v17650_v56 = vadd.f32 %v17649_v52, %v29250_v43  ;;  %v17651_v25 = vpop.f32.mrb[26].mxu0  ;;  %17952 = vmatpush1.bf16.msra.mxu0 %v25046_v23  ;;  %v25058_v43 = vld [vmem:[%s28457_s11 + $0x1470] ss:$8 sps:$4 sm:$0xff]   ;;  %v25124_v23 = vld [vmem:[%s28457_s11 + $0x1614] ss:$8 sps:$4 sm:$0xff]  }
 0x2e8   : > { %v17692_v36 = vpop.f32.mrb[26].mxu1  ;;  %17993 = vmatpush1.bf16.msra.mxu1 %v25049_v44  ;;  %v29330_v57 = vadd.f32 %v17688_v50, %v17648_v51  ;;  %v17652_v58 = vpop.f32.mrb[27].mxu0  ;;  %17953 = vmatprep.subr.bf16.mxu0 %v25054_v46  ;;  %v25127_v44 = vld [vmem:[%s28457_s11 + $0x1714] ss:$8 sps:$4 sm:$0xff]   ;;  %v25122_v46 = vld [vmem:[%s28457_s11 + $0x1610] ss:$8 sps:$4 sm:$0xff]  }
 0x2e9   : > { %v17693_v59 = vpop.f32.mrb[27].mxu1  ;;  %17994 = vmatprep.subr.bf16.mxu1 %v25057_v47  ;;  %v29334_v61 = vadd.f32 %v17690_v55, %v17650_v56  ;;  %v25125_v47 = vld [vmem:[%s28457_s11 + $0x1710] ss:$8 sps:$4 sm:$0xff]   ;;  %v25133_v50 = vld [vmem:[%s28457_s11 + $0x1724] ss:$8 sps:$4 sm:$0xff]  }
 0x2ea   : > { %v25136_v51 = vld [vmem:[%s28457_s11 + $0x1634] ss:$8 sps:$4 sm:$0xff]   ;;  %v25134_v55 = vld [vmem:[%s28457_s11 + $0x1630] ss:$8 sps:$4 sm:$0xff]   ;;  %v25142_v25 = vld [vmem:[%s28457_s11 + $0x1644] ss:$8 sps:$4 sm:$0xff]  }
 0x2eb   : > { %17954 = vmatpush1.bf16.msra.mxu0 %v25052_v1  ;;  %v25128_v1 = vld [vmem:[%s28457_s11 + $0x1620] ss:$8 sps:$4 sm:$0xff]   ;;  %v25139_v52 = vld [vmem:[%s28457_s11 + $0x1734] ss:$8 sps:$4 sm:$0xff]   ;;  %v25137_v56 = vld [vmem:[%s28457_s11 + $0x1730] ss:$8 sps:$4 sm:$0xff]  }
 0x2ec   : > { %17995 = vmatpush1.bf16.msra.mxu1 %v25055_v30  ;;  %17955 = vmatprep.subr.bf16.mxu0 %v25060_v31  ;;  %v25131_v30 = vld [vmem:[%s28457_s11 + $0x1720] ss:$8 sps:$4 sm:$0xff]   ;;  %v25145_v36 = vld [vmem:[%s28457_s11 + $0x1744] ss:$8 sps:$4 sm:$0xff]   ;;  %v25148_v31 = vld [vmem:[%s28457_s11 + $0x1654] ss:$8 sps:$4 sm:$0xff]  }
 0x2ed   : > { %17996 = vmatprep.subr.bf16.mxu1 %v25063_v60  ;;  %v25140_v58 = vld [vmem:[%s28457_s11 + $0x1640] ss:$8 sps:$4 sm:$0xff]   ;;  %v25151_v60 = vld [vmem:[%s28457_s11 + $0x1754] ss:$8 sps:$4 sm:$0xff]  }
 0x2ee   : > { %v25143_v59 = vld [vmem:[%s28457_s11 + $0x1740] ss:$8 sps:$4 sm:$0xff]  }
 0x2ef   : > { %17956 = vmatpush1.bf16.msra.mxu0 %v25058_v43  ;;  %v25146_v43 = vld [vmem:[%s28457_s11 + $0x1650] ss:$8 sps:$4 sm:$0xff]  }
 0x2f0   : > { %17997 = vmatpush1.bf16.msra.mxu1 %v25061_v62  ;;  %17957 = vmatprep.subr.bf16.mxu0 %v25066_v0  ;;  %v25149_v62 = vld [vmem:[%s28457_s11 + $0x1750] ss:$8 sps:$4 sm:$0xff]   ;;  %v25154_v0 = vld [vmem:[%s28457_s11 + $0x1664] ss:$8 sps:$4 sm:$0xff]  }
 0x2f1   : > { %17998 = vmatprep.subr.bf16.mxu1 %v25069_v2  ;;  %v25157_v2 = vld [vmem:[%s28457_s11 + $0x1764] ss:$8 sps:$4 sm:$0xff]  }
 0x2f3   : > { %17958 = vmatpush1.bf16.msra.mxu0 %v25064_v49 }
 0x2f4   : > { %17999 = vmatpush1.bf16.msra.mxu1 %v25067_v6  ;;  %17959 = vmatprep.subr.bf16.mxu0 %v25072_v27  ;;  %v25152_v27 = vld [vmem:[%s28457_s11 + $0x1660] ss:$8 sps:$4 sm:$0xff]  }
 0x2f5   : > { %18000 = vmatprep.subr.bf16.mxu1 %v25075_v48  ;;  %v25155_v48 = vld [vmem:[%s28457_s11 + $0x1760] ss:$8 sps:$4 sm:$0xff]  }
 0x2f7   : > { %17960 = vmatpush1.bf16.msra.mxu0 %v25070_v7 }
 0x2f8   : > { %18001 = vmatpush1.bf16.msra.mxu1 %v25073_v8  ;;  %17961 = vmatprep.subr.bf16.mxu0 %v25078_v11 }
 0x2f9   : > { %18002 = vmatprep.subr.bf16.mxu1 %v25081_v12 }
 0x2fb   : > { %17962 = vmatpush1.bf16.msra.mxu0 %v25076_v53 }
 0x2fc   : > { %18003 = vmatpush1.bf16.msra.mxu1 %v25079_v54  ;;  %17963 = vmatprep.subr.bf16.mxu0 %v25084_v13 }
 0x2fd   : > { %18004 = vmatprep.subr.bf16.mxu1 %v25087_v14 }
 0x2ff   : > { %17964 = vmatpush1.bf16.msra.mxu0 %v25082_v15 }
 0x300   : > { %18005 = vmatpush1.bf16.msra.mxu1 %v25085_v16  ;;  %17965 = vmatprep.subr.bf16.mxu0 %v25090_v17  ;;  %v25163_v16 = vld [vmem:[%s28457_s11 + $0x1774] ss:$8 sps:$4 sm:$0xff]  }
 0x301   : > { %18006 = vmatprep.subr.bf16.mxu1 %v25093_v18  ;;  %v25161_v18 = vld [vmem:[%s28457_s11 + $0x1770] ss:$8 sps:$4 sm:$0xff]  }
 0x303   : > { %17966 = vmatpush1.bf16.msra.mxu0 %v25088_v20  ;;  %v25166_v20 = vld [vmem:[%s28457_s11 + $0x1684] ss:$8 sps:$4 sm:$0xff]  }
 0x304   : > { %18007 = vmatpush1.bf16.msra.mxu1 %v25091_v21  ;;  %17967 = vmatprep.subr.bf16.mxu0 %v25096_v5  ;;  %v25169_v21 = vld [vmem:[%s28457_s11 + $0x1784] ss:$8 sps:$4 sm:$0xff]   ;;  %v25164_v5 = vld [vmem:[%s28457_s11 + $0x1680] ss:$8 sps:$4 sm:$0xff]  }
 0x305   : > { %18008 = vmatprep.subr.bf16.mxu1 %v25099_v24  ;;  %v25167_v24 = vld [vmem:[%s28457_s11 + $0x1780] ss:$8 sps:$4 sm:$0xff]  }
 0x307   : > { %17968 = vmatpush1.bf16.msra.mxu0 %v25094_v45  ;;  %v25172_v45 = vld [vmem:[%s28457_s11 + $0x1694] ss:$8 sps:$4 sm:$0xff]  }
 0x308   : > { %18009 = vmatpush1.bf16.msra.mxu1 %v25097_v3  ;;  %17969 = vmatprep.subr.bf16.mxu0 %v25102_v28  ;;  %v25175_v3 = vld [vmem:[%s28457_s11 + $0x1794] ss:$8 sps:$4 sm:$0xff]   ;;  %v25170_v28 = vld [vmem:[%s28457_s11 + $0x1690] ss:$8 sps:$4 sm:$0xff]  }
 0x309   : > { %18010 = vmatprep.subr.bf16.mxu1 %v25105_v29  ;;  %v25173_v29 = vld [vmem:[%s28457_s11 + $0x1790] ss:$8 sps:$4 sm:$0xff]  }
 0x30b   : > { %17970 = vmatpush1.bf16.msra.mxu0 %v25100_v4  ;;  %v25178_v4 = vld [vmem:[%s28457_s11 + $0x16a4] ss:$8 sps:$4 sm:$0xff]  }
 0x30c   : > { %18011 = vmatpush1.bf16.msra.mxu1 %v25103_v34  ;;  %17971 = vmatprep.subr.bf16.mxu0 %v25108_v9  ;;  %v25181_v34 = vld [vmem:[%s28457_s11 + $0x17a4] ss:$8 sps:$4 sm:$0xff]   ;;  %v25176_v9 = vld [vmem:[%s28457_s11 + $0x16a0] ss:$8 sps:$4 sm:$0xff]  }
 0x30d   : > { %18012 = vmatprep.subr.bf16.mxu1 %v25111_v10  ;;  %v25179_v10 = vld [vmem:[%s28457_s11 + $0x17a0] ss:$8 sps:$4 sm:$0xff]  }
 0x30f   : > { %17972 = vmatpush1.bf16.msra.mxu0 %v25106_v26  ;;  %v25184_v26 = vld [vmem:[%s28457_s11 + $0x16b4] ss:$8 sps:$4 sm:$0xff]  }
 0x310   : > { %18013 = vmatpush1.bf16.msra.mxu1 %v25109_v35  ;;  %18023 = vmatprep.subr.bf16.mxu0 %v25118_v37  ;;  %v25187_v35 = vld [vmem:[%s28457_s11 + $0x17b4] ss:$8 sps:$4 sm:$0xff]   ;;  %v25182_v37 = vld [vmem:[%s28457_s11 + $0x16b0] ss:$8 sps:$4 sm:$0xff]  }
 0x311   : > { %18064 = vmatprep.subr.bf16.mxu1 %v25121_v38  ;;  %v25185_v38 = vld [vmem:[%s28457_s11 + $0x17b0] ss:$8 sps:$4 sm:$0xff]  }
 0x312   : > { %17974 = vmatmul.mubr.bf16.vlgmr.msra.gmra.mrb[40].mxu0 %v20986_v32  ;;  %v25188_v32 = vld [vmem:[%s28457_s11 + $0x16c0] ss:$8 sps:$4 sm:$0xff]  }
 0x313   : > { %18015 = vmatmul.mubr.bf16.vlgmr.msra.gmra.mrb[40].mxu1 %v20988_v41  ;;  %18024 = vmatpush1.bf16.msra.mxu0 %v25116_v39  ;;  %v25190_v39 = vld [vmem:[%s28457_s11 + $0x16c4] ss:$8 sps:$4 sm:$0xff]   ;;  %v25191_v41 = vld [vmem:[%s28457_s11 + $0x17c0] ss:$8 sps:$4 sm:$0xff]  }
 0x314   : > { %18065 = vmatpush1.bf16.msra.mxu1 %v25119_v40  ;;  %18025 = vmatprep.subr.bf16.mxu0 %v25124_v23  ;;  %v25193_v40 = vld [vmem:[%s28457_s11 + $0x17c4] ss:$8 sps:$4 sm:$0xff]   ;;  %v25196_v23 = vld [vmem:[%s28457_s11 + $0x16d4] ss:$8 sps:$4 sm:$0xff]  }
 0x315   : > { %18066 = vmatprep.subr.bf16.mxu1 %v25127_v44  ;;  %18055 = vmatprep.mubr.bf16.mxu0 %v20991_v63  ;;  %v25199_v44 = vld [vmem:[%s28457_s11 + $0x17d4] ss:$8 sps:$4 sm:$0xff]   ;;  %v25194_v63 = vld [vmem:[%s28457_s11 + $0x16d0] ss:$8 sps:$4 sm:$0xff]  }
 0x316   : > { %18096 = vmatprep.mubr.bf16.mxu1 %v20993_v22  ;;  %v25197_v22 = vld [vmem:[%s28457_s11 + $0x17d0] ss:$8 sps:$4 sm:$0xff]  }
 0x317   : > { %18026 = vmatpush1.bf16.msra.mxu0 %v25122_v46  ;;  %v25202_v46 = vld [vmem:[%s28457_s11 + $0x16e4] ss:$8 sps:$4 sm:$0xff]  }
 0x318   : > { %18067 = vmatpush1.bf16.msra.mxu1 %v25125_v47  ;;  %18027 = vmatprep.subr.bf16.mxu0 %v25130_v33  ;;  %v25205_v47 = vld [vmem:[%s28457_s11 + $0x17e4] ss:$8 sps:$4 sm:$0xff]   ;;  %v25200_v33 = vld [vmem:[%s28457_s11 + $0x16e0] ss:$8 sps:$4 sm:$0xff]  }
 0x319   : > { %18068 = vmatprep.subr.bf16.mxu1 %v25133_v50  ;;  %v25203_v50 = vld [vmem:[%s28457_s11 + $0x17e0] ss:$8 sps:$4 sm:$0xff]  }
 0x31b   : > { %18028 = vmatpush1.bf16.msra.mxu0 %v25128_v1  ;;  %v25208_v1 = vld [vmem:[%s28457_s11 + $0x16f4] ss:$8 sps:$4 sm:$0xff]  }
 0x31c   : > { %18069 = vmatpush1.bf16.msra.mxu1 %v25131_v30  ;;  %18029 = vmatprep.subr.bf16.mxu0 %v25136_v51  ;;  %v25211_v30 = vld [vmem:[%s28457_s11 + $0x17f4] ss:$8 sps:$4 sm:$0xff]   ;;  %v25206_v51 = vld [vmem:[%s28457_s11 + $0x16f0] ss:$8 sps:$4 sm:$0xff]  }
 0x31d   : > { %18070 = vmatprep.subr.bf16.mxu1 %v25139_v52  ;;  %v25209_v52 = vld [vmem:[%s28457_s11 + $0x17f0] ss:$8 sps:$4 sm:$0xff]  }
 0x31f   : > { %18030 = vmatpush1.bf16.msra.mxu0 %v25134_v55  ;;  %v25218_v55 = vld [vmem:[%s28457_s11 + $0x1804] ss:$8 sps:$4 sm:$0xff]  }
 0x320   : > { %18071 = vmatpush1.bf16.msra.mxu1 %v25137_v56  ;;  %18031 = vmatprep.subr.bf16.mxu0 %v25142_v25  ;;  %v25221_v56 = vld [vmem:[%s28457_s11 + $0x1904] ss:$8 sps:$4 sm:$0xff]   ;;  %v25216_v25 = vld [vmem:[%s28457_s11 + $0x1800] ss:$8 sps:$4 sm:$0xff]  }
 0x321   : > { %18072 = vmatprep.subr.bf16.mxu1 %v25145_v36  ;;  %v25219_v36 = vld [vmem:[%s28457_s11 + $0x1900] ss:$8 sps:$4 sm:$0xff]  }
 0x323   : > { %18032 = vmatpush1.bf16.msra.mxu0 %v25140_v58  ;;  %v20990_v58 = vcombine.low %v29379_v19, %v29379_v19 }
 0x324   : > { %18073 = vmatpush1.bf16.msra.mxu1 %v25143_v59  ;;  %18033 = vmatprep.subr.bf16.mxu0 %v25148_v31  ;;  %v20992_v59 = vcombine.low %v29382_v42, %v29382_v42  ;;  %v29463_v31 = vld [vmem:[%s28474_s27 + $0xc0] sm:$0xff] }
 0x325   : > { %18074 = vmatprep.subr.bf16.mxu1 %v25151_v60  ;;  %v17729_v49 = vpop.f32.mrb[28].mxu0  ;;  %v29466_v60 = vld [vmem:[%s28474_s27 + $0xc8] sm:$0xff]  ;;  %v20995_v19 = vcombine.high %v29463_v31, %v29463_v31 }
 0x326   : > { %v17770_v6 = vpop.f32.mrb[28].mxu1  ;;  %v17730_v7 = vadd.f32 %v17729_v49, %v29330_v57  ;;  %v17731_v8 = vpop.f32.mrb[29].mxu0  ;;  %v25160_v57 = vld [vmem:[%s28457_s11 + $0x1674] ss:$8 sps:$4 sm:$0xff]   ;;  %v20997_v42 = vcombine.high %v29466_v60, %v29466_v60  ;;  %v25230_v49 = vld [vmem:[%s28457_s11 + $0x1824] ss:$8 sps:$4 sm:$0xff]  }
 0x327   : > { %v17772_v11 = vpop.f32.mrb[29].mxu1  ;;  %v17732_v12 = vadd.f32 %v17731_v8, %v29334_v61  ;;  %v17733_v53 = vpop.f32.mrb[30].mxu0  ;;  %18034 = vmatpush1.bf16.msra.mxu0 %v25146_v43  ;;  %v25158_v61 = vld [vmem:[%s28457_s11 + $0x1670] ss:$8 sps:$4 sm:$0xff]   ;;  %v25224_v43 = vld [vmem:[%s28457_s11 + $0x1814] ss:$8 sps:$4 sm:$0xff]  }
 0x328   : > { %v17774_v54 = vpop.f32.mrb[30].mxu1  ;;  %18075 = vmatpush1.bf16.msra.mxu1 %v25149_v62  ;;  %v29414_v13 = vadd.f32 %v17770_v6, %v17730_v7  ;;  %v17734_v14 = vpop.f32.mrb[31].mxu0  ;;  %18035 = vmatprep.subr.bf16.mxu0 %v25154_v0  ;;  %v25227_v62 = vld [vmem:[%s28457_s11 + $0x1914] ss:$8 sps:$4 sm:$0xff]   ;;  %v25222_v0 = vld [vmem:[%s28457_s11 + $0x1810] ss:$8 sps:$4 sm:$0xff]  }
 0x329   : > { %v17775_v15 = vpop.f32.mrb[31].mxu1  ;;  %18076 = vmatprep.subr.bf16.mxu1 %v25157_v2  ;;  %v29418_v17 = vadd.f32 %v17772_v11, %v17732_v12  ;;  %v25225_v2 = vld [vmem:[%s28457_s11 + $0x1910] ss:$8 sps:$4 sm:$0xff]   ;;  %v25233_v6 = vld [vmem:[%s28457_s11 + $0x1924] ss:$8 sps:$4 sm:$0xff]  }
 0x32a   : > { %v25236_v7 = vld [vmem:[%s28457_s11 + $0x1834] ss:$8 sps:$4 sm:$0xff]   ;;  %v25234_v11 = vld [vmem:[%s28457_s11 + $0x1830] ss:$8 sps:$4 sm:$0xff]   ;;  %v25242_v53 = vld [vmem:[%s28457_s11 + $0x1844] ss:$8 sps:$4 sm:$0xff]  }
 0x32b   : > { %18036 = vmatpush1.bf16.msra.mxu0 %v25152_v27  ;;  %v25228_v27 = vld [vmem:[%s28457_s11 + $0x1820] ss:$8 sps:$4 sm:$0xff]   ;;  %v25239_v8 = vld [vmem:[%s28457_s11 + $0x1934] ss:$8 sps:$4 sm:$0xff]   ;;  %v25237_v12 = vld [vmem:[%s28457_s11 + $0x1930] ss:$8 sps:$4 sm:$0xff]  }
 0x32c   : > { %18077 = vmatpush1.bf16.msra.mxu1 %v25155_v48  ;;  %18037 = vmatprep.subr.bf16.mxu0 %v25160_v57  ;;  %v25231_v48 = vld [vmem:[%s28457_s11 + $0x1920] ss:$8 sps:$4 sm:$0xff]   ;;  %v25245_v54 = vld [vmem:[%s28457_s11 + $0x1944] ss:$8 sps:$4 sm:$0xff]   ;;  %v25248_v57 = vld [vmem:[%s28457_s11 + $0x1854] ss:$8 sps:$4 sm:$0xff]  }
 0x32d   : > { %18078 = vmatprep.subr.bf16.mxu1 %v25163_v16  ;;  %v25240_v14 = vld [vmem:[%s28457_s11 + $0x1840] ss:$8 sps:$4 sm:$0xff]   ;;  %v25251_v16 = vld [vmem:[%s28457_s11 + $0x1954] ss:$8 sps:$4 sm:$0xff]  }
 0x32e   : > { %v25243_v15 = vld [vmem:[%s28457_s11 + $0x1940] ss:$8 sps:$4 sm:$0xff]  }
 0x32f   : > { %18038 = vmatpush1.bf16.msra.mxu0 %v25158_v61  ;;  %v25246_v61 = vld [vmem:[%s28457_s11 + $0x1850] ss:$8 sps:$4 sm:$0xff]  }
 0x330   : > { %18079 = vmatpush1.bf16.msra.mxu1 %v25161_v18  ;;  %18039 = vmatprep.subr.bf16.mxu0 %v25166_v20  ;;  %v25249_v18 = vld [vmem:[%s28457_s11 + $0x1950] ss:$8 sps:$4 sm:$0xff]   ;;  %v25254_v20 = vld [vmem:[%s28457_s11 + $0x1864] ss:$8 sps:$4 sm:$0xff]  }
 0x331   : > { %18080 = vmatprep.subr.bf16.mxu1 %v25169_v21  ;;  %v25257_v21 = vld [vmem:[%s28457_s11 + $0x1964] ss:$8 sps:$4 sm:$0xff]  }
 0x333   : > { %18040 = vmatpush1.bf16.msra.mxu0 %v25164_v5 }
 0x334   : > { %18081 = vmatpush1.bf16.msra.mxu1 %v25167_v24  ;;  %18041 = vmatprep.subr.bf16.mxu0 %v25172_v45  ;;  %v25252_v45 = vld [vmem:[%s28457_s11 + $0x1860] ss:$8 sps:$4 sm:$0xff]  }
 0x335   : > { %18082 = vmatprep.subr.bf16.mxu1 %v25175_v3  ;;  %v25255_v3 = vld [vmem:[%s28457_s11 + $0x1960] ss:$8 sps:$4 sm:$0xff]  }
 0x337   : > { %18042 = vmatpush1.bf16.msra.mxu0 %v25170_v28 }
 0x338   : > { %18083 = vmatpush1.bf16.msra.mxu1 %v25173_v29  ;;  %18043 = vmatprep.subr.bf16.mxu0 %v25178_v4 }
 0x339   : > { %18084 = vmatprep.subr.bf16.mxu1 %v25181_v34 }
 0x33b   : > { %18044 = vmatpush1.bf16.msra.mxu0 %v25176_v9 }
 0x33c   : > { %18085 = vmatpush1.bf16.msra.mxu1 %v25179_v10  ;;  %18045 = vmatprep.subr.bf16.mxu0 %v25184_v26 }
 0x33d   : > { %18086 = vmatprep.subr.bf16.mxu1 %v25187_v35 }
 0x33f   : > { %18046 = vmatpush1.bf16.msra.mxu0 %v25182_v37 }
 0x340   : > { %18087 = vmatpush1.bf16.msra.mxu1 %v25185_v38  ;;  %18047 = vmatprep.subr.bf16.mxu0 %v25190_v39  ;;  %v25263_v38 = vld [vmem:[%s28457_s11 + $0x1974] ss:$8 sps:$4 sm:$0xff]  }
 0x341   : > { %18088 = vmatprep.subr.bf16.mxu1 %v25193_v40  ;;  %v25261_v40 = vld [vmem:[%s28457_s11 + $0x1970] ss:$8 sps:$4 sm:$0xff]  }
 0x343   : > { %18048 = vmatpush1.bf16.msra.mxu0 %v25188_v32  ;;  %v25266_v32 = vld [vmem:[%s28457_s11 + $0x1884] ss:$8 sps:$4 sm:$0xff]  }
 0x344   : > { %18089 = vmatpush1.bf16.msra.mxu1 %v25191_v41  ;;  %18049 = vmatprep.subr.bf16.mxu0 %v25196_v23  ;;  %v25269_v41 = vld [vmem:[%s28457_s11 + $0x1984] ss:$8 sps:$4 sm:$0xff]   ;;  %v25264_v23 = vld [vmem:[%s28457_s11 + $0x1880] ss:$8 sps:$4 sm:$0xff]  }
 0x345   : > { %18090 = vmatprep.subr.bf16.mxu1 %v25199_v44  ;;  %v25267_v44 = vld [vmem:[%s28457_s11 + $0x1980] ss:$8 sps:$4 sm:$0xff]  }
 0x347   : > { %18050 = vmatpush1.bf16.msra.mxu0 %v25194_v63  ;;  %v25272_v63 = vld [vmem:[%s28457_s11 + $0x1894] ss:$8 sps:$4 sm:$0xff]  }
 0x348   : > { %18091 = vmatpush1.bf16.msra.mxu1 %v25197_v22  ;;  %18051 = vmatprep.subr.bf16.mxu0 %v25202_v46  ;;  %v25275_v22 = vld [vmem:[%s28457_s11 + $0x1994] ss:$8 sps:$4 sm:$0xff]   ;;  %v25270_v46 = vld [vmem:[%s28457_s11 + $0x1890] ss:$8 sps:$4 sm:$0xff]  }
 0x349   : > { %18092 = vmatprep.subr.bf16.mxu1 %v25205_v47  ;;  %v25273_v47 = vld [vmem:[%s28457_s11 + $0x1990] ss:$8 sps:$4 sm:$0xff]  }
 0x34b   : > { %18052 = vmatpush1.bf16.msra.mxu0 %v25200_v33  ;;  %v25278_v33 = vld [vmem:[%s28457_s11 + $0x18a4] ss:$8 sps:$4 sm:$0xff]  }
 0x34c   : > { %18093 = vmatpush1.bf16.msra.mxu1 %v25203_v50  ;;  %18053 = vmatprep.subr.bf16.mxu0 %v25208_v1  ;;  %v25281_v50 = vld [vmem:[%s28457_s11 + $0x19a4] ss:$8 sps:$4 sm:$0xff]   ;;  %v25276_v1 = vld [vmem:[%s28457_s11 + $0x18a0] ss:$8 sps:$4 sm:$0xff]  }
 0x34d   : > { %18094 = vmatprep.subr.bf16.mxu1 %v25211_v30  ;;  %v25279_v30 = vld [vmem:[%s28457_s11 + $0x19a0] ss:$8 sps:$4 sm:$0xff]  }
 0x34f   : > { %18054 = vmatpush1.bf16.msra.mxu0 %v25206_v51  ;;  %v25284_v51 = vld [vmem:[%s28457_s11 + $0x18b4] ss:$8 sps:$4 sm:$0xff]  }
 0x350   : > { %18095 = vmatpush1.bf16.msra.mxu1 %v25209_v52  ;;  %18105 = vmatprep.subr.bf16.mxu0 %v25218_v55  ;;  %v25287_v52 = vld [vmem:[%s28457_s11 + $0x19b4] ss:$8 sps:$4 sm:$0xff]   ;;  %v25282_v55 = vld [vmem:[%s28457_s11 + $0x18b0] ss:$8 sps:$4 sm:$0xff]  }
 0x351   : > { %18146 = vmatprep.subr.bf16.mxu1 %v25221_v56  ;;  %v25285_v56 = vld [vmem:[%s28457_s11 + $0x19b0] ss:$8 sps:$4 sm:$0xff]  }
 0x352   : > { %18056 = vmatmul.mubr.bf16.vlgmr.msra.gmra.mrb[44].mxu0 %v20990_v58  ;;  %v25288_v58 = vld [vmem:[%s28457_s11 + $0x18c0] ss:$8 sps:$4 sm:$0xff]  }
 0x353   : > { %18097 = vmatmul.mubr.bf16.vlgmr.msra.gmra.mrb[44].mxu1 %v20992_v59  ;;  %18106 = vmatpush1.bf16.msra.mxu0 %v25216_v25  ;;  %v25290_v25 = vld [vmem:[%s28457_s11 + $0x18c4] ss:$8 sps:$4 sm:$0xff]   ;;  %v25291_v59 = vld [vmem:[%s28457_s11 + $0x19c0] ss:$8 sps:$4 sm:$0xff]  }
 0x354   : > { %18147 = vmatpush1.bf16.msra.mxu1 %v25219_v36  ;;  %18107 = vmatprep.subr.bf16.mxu0 %v25224_v43  ;;  %v25293_v36 = vld [vmem:[%s28457_s11 + $0x19c4] ss:$8 sps:$4 sm:$0xff]   ;;  %v25296_v43 = vld [vmem:[%s28457_s11 + $0x18d4] ss:$8 sps:$4 sm:$0xff]  }
 0x355   : > { %18148 = vmatprep.subr.bf16.mxu1 %v25227_v62  ;;  %18137 = vmatprep.mubr.bf16.mxu0 %v20995_v19  ;;  %v25299_v62 = vld [vmem:[%s28457_s11 + $0x19d4] ss:$8 sps:$4 sm:$0xff]   ;;  %v25294_v19 = vld [vmem:[%s28457_s11 + $0x18d0] ss:$8 sps:$4 sm:$0xff]  }
 0x356   : > { %18178 = vmatprep.mubr.bf16.mxu1 %v20997_v42  ;;  %v25297_v42 = vld [vmem:[%s28457_s11 + $0x19d0] ss:$8 sps:$4 sm:$0xff]  }
 0x357   : > { %18108 = vmatpush1.bf16.msra.mxu0 %v25222_v0  ;;  %v25302_v0 = vld [vmem:[%s28457_s11 + $0x18e4] ss:$8 sps:$4 sm:$0xff]  }
 0x358   : > { %18149 = vmatpush1.bf16.msra.mxu1 %v25225_v2  ;;  %18109 = vmatprep.subr.bf16.mxu0 %v25230_v49  ;;  %v25305_v2 = vld [vmem:[%s28457_s11 + $0x19e4] ss:$8 sps:$4 sm:$0xff]   ;;  %v25300_v49 = vld [vmem:[%s28457_s11 + $0x18e0] ss:$8 sps:$4 sm:$0xff]  }
 0x359   : > { %18150 = vmatprep.subr.bf16.mxu1 %v25233_v6  ;;  %v25303_v6 = vld [vmem:[%s28457_s11 + $0x19e0] ss:$8 sps:$4 sm:$0xff]  }
 0x35b   : > { %18110 = vmatpush1.bf16.msra.mxu0 %v25228_v27  ;;  %v25308_v27 = vld [vmem:[%s28457_s11 + $0x18f4] ss:$8 sps:$4 sm:$0xff]  }
 0x35c   : > { %18151 = vmatpush1.bf16.msra.mxu1 %v25231_v48  ;;  %18111 = vmatprep.subr.bf16.mxu0 %v25236_v7  ;;  %v25311_v48 = vld [vmem:[%s28457_s11 + $0x19f4] ss:$8 sps:$4 sm:$0xff]   ;;  %v25306_v7 = vld [vmem:[%s28457_s11 + $0x18f0] ss:$8 sps:$4 sm:$0xff]  }
 0x35d   : > { %18152 = vmatprep.subr.bf16.mxu1 %v25239_v8  ;;  %v25309_v8 = vld [vmem:[%s28457_s11 + $0x19f0] ss:$8 sps:$4 sm:$0xff]  }
 0x35f   : > { %18112 = vmatpush1.bf16.msra.mxu0 %v25234_v11  ;;  %v25318_v11 = vld [vmem:[%s28457_s11 + $0x1a04] ss:$8 sps:$4 sm:$0xff]  }
 0x360   : > { %18153 = vmatpush1.bf16.msra.mxu1 %v25237_v12  ;;  %18113 = vmatprep.subr.bf16.mxu0 %v25242_v53  ;;  %v25321_v12 = vld [vmem:[%s28457_s11 + $0x1b04] ss:$8 sps:$4 sm:$0xff]   ;;  %v25316_v53 = vld [vmem:[%s28457_s11 + $0x1a00] ss:$8 sps:$4 sm:$0xff]  }
 0x361   : > { %18154 = vmatprep.subr.bf16.mxu1 %v25245_v54  ;;  %v25319_v54 = vld [vmem:[%s28457_s11 + $0x1b00] ss:$8 sps:$4 sm:$0xff]  }
 0x363   : > { %18114 = vmatpush1.bf16.msra.mxu0 %v25240_v14  ;;  %v20994_v14 = vcombine.low %v29463_v31, %v29463_v31 }
 0x364   : > { %18155 = vmatpush1.bf16.msra.mxu1 %v25243_v15  ;;  %18115 = vmatprep.subr.bf16.mxu0 %v25248_v57  ;;  %v20996_v15 = vcombine.low %v29466_v60, %v29466_v60  ;;  %v29547_v57 = vld [vmem:[%s28474_s27 + $0xd0] sm:$0xff] }
 0x365   : > { %18156 = vmatprep.subr.bf16.mxu1 %v25251_v16  ;;  %v17811_v5 = vpop.f32.mrb[32].mxu0  ;;  %v29550_v16 = vld [vmem:[%s28474_s27 + $0xd8] sm:$0xff]  ;;  %v20999_v31 = vcombine.high %v29547_v57, %v29547_v57 }
 0x366   : > { %v17852_v24 = vpop.f32.mrb[32].mxu1  ;;  %v17812_v28 = vadd.f32 %v17811_v5, %v29414_v13  ;;  %v17813_v29 = vpop.f32.mrb[33].mxu0  ;;  %v25260_v13 = vld [vmem:[%s28457_s11 + $0x1874] ss:$8 sps:$4 sm:$0xff]   ;;  %v21001_v60 = vcombine.high %v29550_v16, %v29550_v16  ;;  %v25330_v5 = vld [vmem:[%s28457_s11 + $0x1a24] ss:$8 sps:$4 sm:$0xff]  }
 0x367   : > { %v17854_v4 = vpop.f32.mrb[33].mxu1  ;;  %v17814_v34 = vadd.f32 %v17813_v29, %v29418_v17  ;;  %v17815_v9 = vpop.f32.mrb[34].mxu0  ;;  %18116 = vmatpush1.bf16.msra.mxu0 %v25246_v61  ;;  %v25258_v17 = vld [vmem:[%s28457_s11 + $0x1870] ss:$8 sps:$4 sm:$0xff]   ;;  %v25324_v61 = vld [vmem:[%s28457_s11 + $0x1a14] ss:$8 sps:$4 sm:$0xff]  }
 0x368   : > { %v17856_v10 = vpop.f32.mrb[34].mxu1  ;;  %18157 = vmatpush1.bf16.msra.mxu1 %v25249_v18  ;;  %v29498_v26 = vadd.f32 %v17852_v24, %v17812_v28  ;;  %v17816_v35 = vpop.f32.mrb[35].mxu0  ;;  %18117 = vmatprep.subr.bf16.mxu0 %v25254_v20  ;;  %v25327_v18 = vld [vmem:[%s28457_s11 + $0x1b14] ss:$8 sps:$4 sm:$0xff]   ;;  %v25322_v20 = vld [vmem:[%s28457_s11 + $0x1a10] ss:$8 sps:$4 sm:$0xff]  }
 0x369   : > { %v17857_v37 = vpop.f32.mrb[35].mxu1  ;;  %18158 = vmatprep.subr.bf16.mxu1 %v25257_v21  ;;  %v29502_v39 = vadd.f32 %v17854_v4, %v17814_v34  ;;  %v25325_v21 = vld [vmem:[%s28457_s11 + $0x1b10] ss:$8 sps:$4 sm:$0xff]   ;;  %v25333_v24 = vld [vmem:[%s28457_s11 + $0x1b24] ss:$8 sps:$4 sm:$0xff]  }
 0x36a   : > { %v25336_v28 = vld [vmem:[%s28457_s11 + $0x1a34] ss:$8 sps:$4 sm:$0xff]   ;;  %v25334_v4 = vld [vmem:[%s28457_s11 + $0x1a30] ss:$8 sps:$4 sm:$0xff]   ;;  %v25342_v9 = vld [vmem:[%s28457_s11 + $0x1a44] ss:$8 sps:$4 sm:$0xff]  }
 0x36b   : > { %18118 = vmatpush1.bf16.msra.mxu0 %v25252_v45  ;;  %v25328_v45 = vld [vmem:[%s28457_s11 + $0x1a20] ss:$8 sps:$4 sm:$0xff]   ;;  %v25339_v29 = vld [vmem:[%s28457_s11 + $0x1b34] ss:$8 sps:$4 sm:$0xff]   ;;  %v25337_v34 = vld [vmem:[%s28457_s11 + $0x1b30] ss:$8 sps:$4 sm:$0xff]  }
 0x36c   : > { %18159 = vmatpush1.bf16.msra.mxu1 %v25255_v3  ;;  %18119 = vmatprep.subr.bf16.mxu0 %v25260_v13  ;;  %v25331_v3 = vld [vmem:[%s28457_s11 + $0x1b20] ss:$8 sps:$4 sm:$0xff]   ;;  %v25345_v10 = vld [vmem:[%s28457_s11 + $0x1b44] ss:$8 sps:$4 sm:$0xff]   ;;  %v25348_v13 = vld [vmem:[%s28457_s11 + $0x1a54] ss:$8 sps:$4 sm:$0xff]  }
 0x36d   : > { %18160 = vmatprep.subr.bf16.mxu1 %v25263_v38  ;;  %v25340_v35 = vld [vmem:[%s28457_s11 + $0x1a40] ss:$8 sps:$4 sm:$0xff]   ;;  %v25351_v38 = vld [vmem:[%s28457_s11 + $0x1b54] ss:$8 sps:$4 sm:$0xff]  }
 0x36e   : > { %v25343_v37 = vld [vmem:[%s28457_s11 + $0x1b40] ss:$8 sps:$4 sm:$0xff]  }
 0x36f   : > { %18120 = vmatpush1.bf16.msra.mxu0 %v25258_v17  ;;  %v25346_v17 = vld [vmem:[%s28457_s11 + $0x1a50] ss:$8 sps:$4 sm:$0xff]  }
 0x370   : > { %18161 = vmatpush1.bf16.msra.mxu1 %v25261_v40  ;;  %18121 = vmatprep.subr.bf16.mxu0 %v25266_v32  ;;  %v25349_v40 = vld [vmem:[%s28457_s11 + $0x1b50] ss:$8 sps:$4 sm:$0xff]   ;;  %v25354_v32 = vld [vmem:[%s28457_s11 + $0x1a64] ss:$8 sps:$4 sm:$0xff]  }
 0x371   : > { %18162 = vmatprep.subr.bf16.mxu1 %v25269_v41  ;;  %v25357_v41 = vld [vmem:[%s28457_s11 + $0x1b64] ss:$8 sps:$4 sm:$0xff]  }
 0x373   : > { %18122 = vmatpush1.bf16.msra.mxu0 %v25264_v23 }
 0x374   : > { %18163 = vmatpush1.bf16.msra.mxu1 %v25267_v44  ;;  %18123 = vmatprep.subr.bf16.mxu0 %v25272_v63  ;;  %v25352_v63 = vld [vmem:[%s28457_s11 + $0x1a60] ss:$8 sps:$4 sm:$0xff]  }
 0x375   : > { %18164 = vmatprep.subr.bf16.mxu1 %v25275_v22  ;;  %v25355_v22 = vld [vmem:[%s28457_s11 + $0x1b60] ss:$8 sps:$4 sm:$0xff]  }
 0x377   : > { %18124 = vmatpush1.bf16.msra.mxu0 %v25270_v46 }
 0x378   : > { %18165 = vmatpush1.bf16.msra.mxu1 %v25273_v47  ;;  %18125 = vmatprep.subr.bf16.mxu0 %v25278_v33 }
 0x379   : > { %18166 = vmatprep.subr.bf16.mxu1 %v25281_v50 }
 0x37b   : > { %18126 = vmatpush1.bf16.msra.mxu0 %v25276_v1 }
 0x37c   : > { %18167 = vmatpush1.bf16.msra.mxu1 %v25279_v30  ;;  %18127 = vmatprep.subr.bf16.mxu0 %v25284_v51 }
 0x37d   : > { %18168 = vmatprep.subr.bf16.mxu1 %v25287_v52 }
 0x37f   : > { %18128 = vmatpush1.bf16.msra.mxu0 %v25282_v55 }
 0x380   : > { %18169 = vmatpush1.bf16.msra.mxu1 %v25285_v56  ;;  %18129 = vmatprep.subr.bf16.mxu0 %v25290_v25  ;;  %v25363_v56 = vld [vmem:[%s28457_s11 + $0x1b74] ss:$8 sps:$4 sm:$0xff]  }
 0x381   : > { %18170 = vmatprep.subr.bf16.mxu1 %v25293_v36  ;;  %v25361_v36 = vld [vmem:[%s28457_s11 + $0x1b70] ss:$8 sps:$4 sm:$0xff]  }
 0x383   : > { %18130 = vmatpush1.bf16.msra.mxu0 %v25288_v58  ;;  %v25366_v58 = vld [vmem:[%s28457_s11 + $0x1a84] ss:$8 sps:$4 sm:$0xff]  }
 0x384   : > { %18171 = vmatpush1.bf16.msra.mxu1 %v25291_v59  ;;  %18131 = vmatprep.subr.bf16.mxu0 %v25296_v43  ;;  %v25369_v59 = vld [vmem:[%s28457_s11 + $0x1b84] ss:$8 sps:$4 sm:$0xff]   ;;  %v25364_v43 = vld [vmem:[%s28457_s11 + $0x1a80] ss:$8 sps:$4 sm:$0xff]  }
 0x385   : > { %18172 = vmatprep.subr.bf16.mxu1 %v25299_v62  ;;  %v25367_v62 = vld [vmem:[%s28457_s11 + $0x1b80] ss:$8 sps:$4 sm:$0xff]  }
 0x387   : > { %18132 = vmatpush1.bf16.msra.mxu0 %v25294_v19  ;;  %v25372_v19 = vld [vmem:[%s28457_s11 + $0x1a94] ss:$8 sps:$4 sm:$0xff]  }
 0x388   : > { %18173 = vmatpush1.bf16.msra.mxu1 %v25297_v42  ;;  %18133 = vmatprep.subr.bf16.mxu0 %v25302_v0  ;;  %v25375_v42 = vld [vmem:[%s28457_s11 + $0x1b94] ss:$8 sps:$4 sm:$0xff]   ;;  %v25370_v0 = vld [vmem:[%s28457_s11 + $0x1a90] ss:$8 sps:$4 sm:$0xff]  }
 0x389   : > { %18174 = vmatprep.subr.bf16.mxu1 %v25305_v2  ;;  %v25373_v2 = vld [vmem:[%s28457_s11 + $0x1b90] ss:$8 sps:$4 sm:$0xff]  }
 0x38b   : > { %18134 = vmatpush1.bf16.msra.mxu0 %v25300_v49  ;;  %v25378_v49 = vld [vmem:[%s28457_s11 + $0x1aa4] ss:$8 sps:$4 sm:$0xff]  }
 0x38c   : > { %18175 = vmatpush1.bf16.msra.mxu1 %v25303_v6  ;;  %18135 = vmatprep.subr.bf16.mxu0 %v25308_v27  ;;  %v25381_v6 = vld [vmem:[%s28457_s11 + $0x1ba4] ss:$8 sps:$4 sm:$0xff]   ;;  %v25376_v27 = vld [vmem:[%s28457_s11 + $0x1aa0] ss:$8 sps:$4 sm:$0xff]  }
 0x38d   : > { %18176 = vmatprep.subr.bf16.mxu1 %v25311_v48  ;;  %v25379_v48 = vld [vmem:[%s28457_s11 + $0x1ba0] ss:$8 sps:$4 sm:$0xff]  }
 0x38f   : > { %18136 = vmatpush1.bf16.msra.mxu0 %v25306_v7  ;;  %v25384_v7 = vld [vmem:[%s28457_s11 + $0x1ab4] ss:$8 sps:$4 sm:$0xff]  }
 0x390   : > { %18177 = vmatpush1.bf16.msra.mxu1 %v25309_v8  ;;  %18187 = vmatprep.subr.bf16.mxu0 %v25318_v11  ;;  %v25387_v8 = vld [vmem:[%s28457_s11 + $0x1bb4] ss:$8 sps:$4 sm:$0xff]   ;;  %v25382_v11 = vld [vmem:[%s28457_s11 + $0x1ab0] ss:$8 sps:$4 sm:$0xff]  }
 0x391   : > { %18228 = vmatprep.subr.bf16.mxu1 %v25321_v12  ;;  %v25385_v12 = vld [vmem:[%s28457_s11 + $0x1bb0] ss:$8 sps:$4 sm:$0xff]  }
 0x392   : > { %18138 = vmatmul.mubr.bf16.vlgmr.msra.gmra.mrb[48].mxu0 %v20994_v14  ;;  %v25388_v14 = vld [vmem:[%s28457_s11 + $0x1ac0] ss:$8 sps:$4 sm:$0xff]  }
 0x393   : > { %18179 = vmatmul.mubr.bf16.vlgmr.msra.gmra.mrb[48].mxu1 %v20996_v15  ;;  %18188 = vmatpush1.bf16.msra.mxu0 %v25316_v53  ;;  %v25390_v53 = vld [vmem:[%s28457_s11 + $0x1ac4] ss:$8 sps:$4 sm:$0xff]   ;;  %v25391_v15 = vld [vmem:[%s28457_s11 + $0x1bc0] ss:$8 sps:$4 sm:$0xff]  }
 0x394   : > { %18229 = vmatpush1.bf16.msra.mxu1 %v25319_v54  ;;  %18189 = vmatprep.subr.bf16.mxu0 %v25324_v61  ;;  %v25393_v54 = vld [vmem:[%s28457_s11 + $0x1bc4] ss:$8 sps:$4 sm:$0xff]   ;;  %v25396_v61 = vld [vmem:[%s28457_s11 + $0x1ad4] ss:$8 sps:$4 sm:$0xff]  }
 0x395   : > { %18230 = vmatprep.subr.bf16.mxu1 %v25327_v18  ;;  %18219 = vmatprep.mubr.bf16.mxu0 %v20999_v31  ;;  %v25399_v18 = vld [vmem:[%s28457_s11 + $0x1bd4] ss:$8 sps:$4 sm:$0xff]   ;;  %v25394_v31 = vld [vmem:[%s28457_s11 + $0x1ad0] ss:$8 sps:$4 sm:$0xff]  }
 0x396   : > { %18260 = vmatprep.mubr.bf16.mxu1 %v21001_v60  ;;  %v25397_v60 = vld [vmem:[%s28457_s11 + $0x1bd0] ss:$8 sps:$4 sm:$0xff]  }
 0x397   : > { %18190 = vmatpush1.bf16.msra.mxu0 %v25322_v20  ;;  %v25402_v20 = vld [vmem:[%s28457_s11 + $0x1ae4] ss:$8 sps:$4 sm:$0xff]  }
 0x398   : > { %18231 = vmatpush1.bf16.msra.mxu1 %v25325_v21  ;;  %18191 = vmatprep.subr.bf16.mxu0 %v25330_v5  ;;  %v25405_v21 = vld [vmem:[%s28457_s11 + $0x1be4] ss:$8 sps:$4 sm:$0xff]   ;;  %v25400_v5 = vld [vmem:[%s28457_s11 + $0x1ae0] ss:$8 sps:$4 sm:$0xff]  }
 0x399   : > { %18232 = vmatprep.subr.bf16.mxu1 %v25333_v24  ;;  %v25403_v24 = vld [vmem:[%s28457_s11 + $0x1be0] ss:$8 sps:$4 sm:$0xff]  }
 0x39b   : > { %18192 = vmatpush1.bf16.msra.mxu0 %v25328_v45  ;;  %v25408_v45 = vld [vmem:[%s28457_s11 + $0x1af4] ss:$8 sps:$4 sm:$0xff]  }
 0x39c   : > { %18233 = vmatpush1.bf16.msra.mxu1 %v25331_v3  ;;  %18193 = vmatprep.subr.bf16.mxu0 %v25336_v28  ;;  %v25411_v3 = vld [vmem:[%s28457_s11 + $0x1bf4] ss:$8 sps:$4 sm:$0xff]   ;;  %v25406_v28 = vld [vmem:[%s28457_s11 + $0x1af0] ss:$8 sps:$4 sm:$0xff]  }
 0x39d   : > { %18234 = vmatprep.subr.bf16.mxu1 %v25339_v29  ;;  %v25409_v29 = vld [vmem:[%s28457_s11 + $0x1bf0] ss:$8 sps:$4 sm:$0xff]  }
 0x39f   : > { %18194 = vmatpush1.bf16.msra.mxu0 %v25334_v4  ;;  %v25418_v4 = vld [vmem:[%s28457_s11 + $0x1c04] ss:$8 sps:$4 sm:$0xff]  }
 0x3a0   : > { %18235 = vmatpush1.bf16.msra.mxu1 %v25337_v34  ;;  %18195 = vmatprep.subr.bf16.mxu0 %v25342_v9  ;;  %v25421_v34 = vld [vmem:[%s28457_s11 + $0x1d04] ss:$8 sps:$4 sm:$0xff]   ;;  %v25416_v9 = vld [vmem:[%s28457_s11 + $0x1c00] ss:$8 sps:$4 sm:$0xff]  }
 0x3a1   : > { %18236 = vmatprep.subr.bf16.mxu1 %v25345_v10  ;;  %v25419_v10 = vld [vmem:[%s28457_s11 + $0x1d00] ss:$8 sps:$4 sm:$0xff]  }
 0x3a3   : > { %18196 = vmatpush1.bf16.msra.mxu0 %v25340_v35  ;;  %v20998_v35 = vcombine.low %v29547_v57, %v29547_v57 }
 0x3a4   : > { %18237 = vmatpush1.bf16.msra.mxu1 %v25343_v37  ;;  %18197 = vmatprep.subr.bf16.mxu0 %v25348_v13  ;;  %v21000_v37 = vcombine.low %v29550_v16, %v29550_v16  ;;  %v29631_v13 = vld [vmem:[%s28474_s27 + $0xe0] sm:$0xff] }
 0x3a5   : > { %18238 = vmatprep.subr.bf16.mxu1 %v25351_v38  ;;  %v17893_v23 = vpop.f32.mrb[36].mxu0  ;;  %v29634_v38 = vld [vmem:[%s28474_s27 + $0xe8] sm:$0xff]  ;;  %v21003_v57 = vcombine.high %v29631_v13, %v29631_v13 }
 0x3a6   : > { %v17934_v44 = vpop.f32.mrb[36].mxu1  ;;  %v17894_v46 = vadd.f32 %v17893_v23, %v29498_v26  ;;  %v17895_v47 = vpop.f32.mrb[37].mxu0  ;;  %v25360_v26 = vld [vmem:[%s28457_s11 + $0x1a74] ss:$8 sps:$4 sm:$0xff]   ;;  %v21005_v16 = vcombine.high %v29634_v38, %v29634_v38  ;;  %v25430_v23 = vld [vmem:[%s28457_s11 + $0x1c24] ss:$8 sps:$4 sm:$0xff]  }
 0x3a7   : > { %v17936_v33 = vpop.f32.mrb[37].mxu1  ;;  %v17896_v50 = vadd.f32 %v17895_v47, %v29502_v39  ;;  %v17897_v1 = vpop.f32.mrb[38].mxu0  ;;  %18198 = vmatpush1.bf16.msra.mxu0 %v25346_v17  ;;  %v25358_v39 = vld [vmem:[%s28457_s11 + $0x1a70] ss:$8 sps:$4 sm:$0xff]   ;;  %v25424_v17 = vld [vmem:[%s28457_s11 + $0x1c14] ss:$8 sps:$4 sm:$0xff]  }
 0x3a8   : > { %v17938_v30 = vpop.f32.mrb[38].mxu1  ;;  %18239 = vmatpush1.bf16.msra.mxu1 %v25349_v40  ;;  %v29582_v51 = vadd.f32 %v17934_v44, %v17894_v46  ;;  %v17898_v52 = vpop.f32.mrb[39].mxu0  ;;  %18199 = vmatprep.subr.bf16.mxu0 %v25354_v32  ;;  %v25427_v40 = vld [vmem:[%s28457_s11 + $0x1d14] ss:$8 sps:$4 sm:$0xff]   ;;  %v25422_v32 = vld [vmem:[%s28457_s11 + $0x1c10] ss:$8 sps:$4 sm:$0xff]  }
 0x3a9   : > { %v17939_v55 = vpop.f32.mrb[39].mxu1  ;;  %18240 = vmatprep.subr.bf16.mxu1 %v25357_v41  ;;  %v29586_v25 = vadd.f32 %v17936_v33, %v17896_v50  ;;  %v25425_v41 = vld [vmem:[%s28457_s11 + $0x1d10] ss:$8 sps:$4 sm:$0xff]   ;;  %v25433_v44 = vld [vmem:[%s28457_s11 + $0x1d24] ss:$8 sps:$4 sm:$0xff]  }
 0x3aa   : > { %v25436_v46 = vld [vmem:[%s28457_s11 + $0x1c34] ss:$8 sps:$4 sm:$0xff]   ;;  %v25434_v33 = vld [vmem:[%s28457_s11 + $0x1c30] ss:$8 sps:$4 sm:$0xff]   ;;  %v25442_v1 = vld [vmem:[%s28457_s11 + $0x1c44] ss:$8 sps:$4 sm:$0xff]  }
 0x3ab   : > { %18200 = vmatpush1.bf16.msra.mxu0 %v25352_v63  ;;  %v25428_v63 = vld [vmem:[%s28457_s11 + $0x1c20] ss:$8 sps:$4 sm:$0xff]   ;;  %v25439_v47 = vld [vmem:[%s28457_s11 + $0x1d34] ss:$8 sps:$4 sm:$0xff]   ;;  %v25437_v50 = vld [vmem:[%s28457_s11 + $0x1d30] ss:$8 sps:$4 sm:$0xff]  }
 0x3ac   : > { %18241 = vmatpush1.bf16.msra.mxu1 %v25355_v22  ;;  %18201 = vmatprep.subr.bf16.mxu0 %v25360_v26  ;;  %v25431_v22 = vld [vmem:[%s28457_s11 + $0x1d20] ss:$8 sps:$4 sm:$0xff]   ;;  %v25445_v30 = vld [vmem:[%s28457_s11 + $0x1d44] ss:$8 sps:$4 sm:$0xff]   ;;  %v25448_v26 = vld [vmem:[%s28457_s11 + $0x1c54] ss:$8 sps:$4 sm:$0xff]  }
 0x3ad   : > { %18242 = vmatprep.subr.bf16.mxu1 %v25363_v56  ;;  %v25440_v52 = vld [vmem:[%s28457_s11 + $0x1c40] ss:$8 sps:$4 sm:$0xff]   ;;  %v25451_v56 = vld [vmem:[%s28457_s11 + $0x1d54] ss:$8 sps:$4 sm:$0xff]  }
 0x3ae   : > { %v25443_v55 = vld [vmem:[%s28457_s11 + $0x1d40] ss:$8 sps:$4 sm:$0xff]  }
 0x3af   : > { %18202 = vmatpush1.bf16.msra.mxu0 %v25358_v39  ;;  %v25446_v39 = vld [vmem:[%s28457_s11 + $0x1c50] ss:$8 sps:$4 sm:$0xff]  }
 0x3b0   : > { %18243 = vmatpush1.bf16.msra.mxu1 %v25361_v36  ;;  %18203 = vmatprep.subr.bf16.mxu0 %v25366_v58  ;;  %v25449_v36 = vld [vmem:[%s28457_s11 + $0x1d50] ss:$8 sps:$4 sm:$0xff]   ;;  %v25454_v58 = vld [vmem:[%s28457_s11 + $0x1c64] ss:$8 sps:$4 sm:$0xff]  }
 0x3b1   : > { %18244 = vmatprep.subr.bf16.mxu1 %v25369_v59  ;;  %v25457_v59 = vld [vmem:[%s28457_s11 + $0x1d64] ss:$8 sps:$4 sm:$0xff]  }
 0x3b3   : > { %18204 = vmatpush1.bf16.msra.mxu0 %v25364_v43 }
 0x3b4   : > { %18245 = vmatpush1.bf16.msra.mxu1 %v25367_v62  ;;  %18205 = vmatprep.subr.bf16.mxu0 %v25372_v19  ;;  %v25452_v19 = vld [vmem:[%s28457_s11 + $0x1c60] ss:$8 sps:$4 sm:$0xff]  }
 0x3b5   : > { %18246 = vmatprep.subr.bf16.mxu1 %v25375_v42  ;;  %v25455_v42 = vld [vmem:[%s28457_s11 + $0x1d60] ss:$8 sps:$4 sm:$0xff]  }
 0x3b7   : > { %18206 = vmatpush1.bf16.msra.mxu0 %v25370_v0 }
 0x3b8   : > { %18247 = vmatpush1.bf16.msra.mxu1 %v25373_v2  ;;  %18207 = vmatprep.subr.bf16.mxu0 %v25378_v49 }
 0x3b9   : > { %18248 = vmatprep.subr.bf16.mxu1 %v25381_v6 }
 0x3bb   : > { %18208 = vmatpush1.bf16.msra.mxu0 %v25376_v27 }
 0x3bc   : > { %18249 = vmatpush1.bf16.msra.mxu1 %v25379_v48  ;;  %18209 = vmatprep.subr.bf16.mxu0 %v25384_v7 }
 0x3bd   : > { %18250 = vmatprep.subr.bf16.mxu1 %v25387_v8 }
 0x3bf   : > { %18210 = vmatpush1.bf16.msra.mxu0 %v25382_v11 }
 0x3c0   : > { %18251 = vmatpush1.bf16.msra.mxu1 %v25385_v12  ;;  %18211 = vmatprep.subr.bf16.mxu0 %v25390_v53  ;;  %v25463_v12 = vld [vmem:[%s28457_s11 + $0x1d74] ss:$8 sps:$4 sm:$0xff]  }
 0x3c1   : > { %18252 = vmatprep.subr.bf16.mxu1 %v25393_v54  ;;  %v25461_v54 = vld [vmem:[%s28457_s11 + $0x1d70] ss:$8 sps:$4 sm:$0xff]  }
 0x3c3   : > { %18212 = vmatpush1.bf16.msra.mxu0 %v25388_v14  ;;  %v25466_v14 = vld [vmem:[%s28457_s11 + $0x1c84] ss:$8 sps:$4 sm:$0xff]  }
 0x3c4   : > { %18253 = vmatpush1.bf16.msra.mxu1 %v25391_v15  ;;  %18213 = vmatprep.subr.bf16.mxu0 %v25396_v61  ;;  %v25469_v15 = vld [vmem:[%s28457_s11 + $0x1d84] ss:$8 sps:$4 sm:$0xff]   ;;  %v25464_v61 = vld [vmem:[%s28457_s11 + $0x1c80] ss:$8 sps:$4 sm:$0xff]  }
 0x3c5   : > { %18254 = vmatprep.subr.bf16.mxu1 %v25399_v18  ;;  %v25467_v18 = vld [vmem:[%s28457_s11 + $0x1d80] ss:$8 sps:$4 sm:$0xff]  }
 0x3c7   : > { %18214 = vmatpush1.bf16.msra.mxu0 %v25394_v31  ;;  %v25472_v31 = vld [vmem:[%s28457_s11 + $0x1c94] ss:$8 sps:$4 sm:$0xff]  }
 0x3c8   : > { %18255 = vmatpush1.bf16.msra.mxu1 %v25397_v60  ;;  %18215 = vmatprep.subr.bf16.mxu0 %v25402_v20  ;;  %v25475_v60 = vld [vmem:[%s28457_s11 + $0x1d94] ss:$8 sps:$4 sm:$0xff]   ;;  %v25470_v20 = vld [vmem:[%s28457_s11 + $0x1c90] ss:$8 sps:$4 sm:$0xff]  }
 0x3c9   : > { %18256 = vmatprep.subr.bf16.mxu1 %v25405_v21  ;;  %v25473_v21 = vld [vmem:[%s28457_s11 + $0x1d90] ss:$8 sps:$4 sm:$0xff]  }
 0x3cb   : > { %18216 = vmatpush1.bf16.msra.mxu0 %v25400_v5  ;;  %v25478_v5 = vld [vmem:[%s28457_s11 + $0x1ca4] ss:$8 sps:$4 sm:$0xff]  }
 0x3cc   : > { %18257 = vmatpush1.bf16.msra.mxu1 %v25403_v24  ;;  %18217 = vmatprep.subr.bf16.mxu0 %v25408_v45  ;;  %v25481_v24 = vld [vmem:[%s28457_s11 + $0x1da4] ss:$8 sps:$4 sm:$0xff]   ;;  %v25476_v45 = vld [vmem:[%s28457_s11 + $0x1ca0] ss:$8 sps:$4 sm:$0xff]  }
 0x3cd   : > { %18258 = vmatprep.subr.bf16.mxu1 %v25411_v3  ;;  %v25479_v3 = vld [vmem:[%s28457_s11 + $0x1da0] ss:$8 sps:$4 sm:$0xff]  }
 0x3cf   : > { %18218 = vmatpush1.bf16.msra.mxu0 %v25406_v28  ;;  %v25484_v28 = vld [vmem:[%s28457_s11 + $0x1cb4] ss:$8 sps:$4 sm:$0xff]  }
 0x3d0   : > { %18259 = vmatpush1.bf16.msra.mxu1 %v25409_v29  ;;  %18269 = vmatprep.subr.bf16.mxu0 %v25418_v4  ;;  %v25487_v29 = vld [vmem:[%s28457_s11 + $0x1db4] ss:$8 sps:$4 sm:$0xff]   ;;  %v25482_v4 = vld [vmem:[%s28457_s11 + $0x1cb0] ss:$8 sps:$4 sm:$0xff]  }
 0x3d1   : > { %18310 = vmatprep.subr.bf16.mxu1 %v25421_v34  ;;  %v25485_v34 = vld [vmem:[%s28457_s11 + $0x1db0] ss:$8 sps:$4 sm:$0xff]  }
 0x3d2   : > { %18220 = vmatmul.mubr.bf16.vlgmr.msra.gmra.mrb[52].mxu0 %v20998_v35  ;;  %v25488_v35 = vld [vmem:[%s28457_s11 + $0x1cc0] ss:$8 sps:$4 sm:$0xff]  }
 0x3d3   : > { %18261 = vmatmul.mubr.bf16.vlgmr.msra.gmra.mrb[52].mxu1 %v21000_v37  ;;  %18270 = vmatpush1.bf16.msra.mxu0 %v25416_v9  ;;  %v25490_v9 = vld [vmem:[%s28457_s11 + $0x1cc4] ss:$8 sps:$4 sm:$0xff]   ;;  %v25491_v37 = vld [vmem:[%s28457_s11 + $0x1dc0] ss:$8 sps:$4 sm:$0xff]  }
 0x3d4   : > { %18311 = vmatpush1.bf16.msra.mxu1 %v25419_v10  ;;  %18271 = vmatprep.subr.bf16.mxu0 %v25424_v17  ;;  %v25493_v10 = vld [vmem:[%s28457_s11 + $0x1dc4] ss:$8 sps:$4 sm:$0xff]   ;;  %v25496_v17 = vld [vmem:[%s28457_s11 + $0x1cd4] ss:$8 sps:$4 sm:$0xff]  }
 0x3d5   : > { %18312 = vmatprep.subr.bf16.mxu1 %v25427_v40  ;;  %18301 = vmatprep.mubr.bf16.mxu0 %v21003_v57  ;;  %v25499_v40 = vld [vmem:[%s28457_s11 + $0x1dd4] ss:$8 sps:$4 sm:$0xff]   ;;  %v25494_v57 = vld [vmem:[%s28457_s11 + $0x1cd0] ss:$8 sps:$4 sm:$0xff]  }
 0x3d6   : > { %18342 = vmatprep.mubr.bf16.mxu1 %v21005_v16  ;;  %v25497_v16 = vld [vmem:[%s28457_s11 + $0x1dd0] ss:$8 sps:$4 sm:$0xff]  }
 0x3d7   : > { %18272 = vmatpush1.bf16.msra.mxu0 %v25422_v32  ;;  %v25502_v32 = vld [vmem:[%s28457_s11 + $0x1ce4] ss:$8 sps:$4 sm:$0xff]  }
 0x3d8   : > { %18313 = vmatpush1.bf16.msra.mxu1 %v25425_v41  ;;  %18273 = vmatprep.subr.bf16.mxu0 %v25430_v23  ;;  %v25505_v41 = vld [vmem:[%s28457_s11 + $0x1de4] ss:$8 sps:$4 sm:$0xff]   ;;  %v25500_v23 = vld [vmem:[%s28457_s11 + $0x1ce0] ss:$8 sps:$4 sm:$0xff]  }
 0x3d9   : > { %18314 = vmatprep.subr.bf16.mxu1 %v25433_v44  ;;  %v25503_v44 = vld [vmem:[%s28457_s11 + $0x1de0] ss:$8 sps:$4 sm:$0xff]  }
 0x3db   : > { %18274 = vmatpush1.bf16.msra.mxu0 %v25428_v63  ;;  %v25508_v63 = vld [vmem:[%s28457_s11 + $0x1cf4] ss:$8 sps:$4 sm:$0xff]  }
 0x3dc   : > { %18315 = vmatpush1.bf16.msra.mxu1 %v25431_v22  ;;  %18275 = vmatprep.subr.bf16.mxu0 %v25436_v46  ;;  %v25511_v22 = vld [vmem:[%s28457_s11 + $0x1df4] ss:$8 sps:$4 sm:$0xff]   ;;  %v25506_v46 = vld [vmem:[%s28457_s11 + $0x1cf0] ss:$8 sps:$4 sm:$0xff]  }
 0x3dd   : > { %18316 = vmatprep.subr.bf16.mxu1 %v25439_v47  ;;  %v25509_v47 = vld [vmem:[%s28457_s11 + $0x1df0] ss:$8 sps:$4 sm:$0xff]  }
 0x3df   : > { %18276 = vmatpush1.bf16.msra.mxu0 %v25434_v33  ;;  %v25518_v33 = vld [vmem:[%s28457_s11 + $0x1e04] ss:$8 sps:$4 sm:$0xff]  }
 0x3e0   : > { %18317 = vmatpush1.bf16.msra.mxu1 %v25437_v50  ;;  %18277 = vmatprep.subr.bf16.mxu0 %v25442_v1  ;;  %v25521_v50 = vld [vmem:[%s28457_s11 + $0x1f04] ss:$8 sps:$4 sm:$0xff]   ;;  %v25516_v1 = vld [vmem:[%s28457_s11 + $0x1e00] ss:$8 sps:$4 sm:$0xff]  }
 0x3e1   : > { %18318 = vmatprep.subr.bf16.mxu1 %v25445_v30  ;;  %v25519_v30 = vld [vmem:[%s28457_s11 + $0x1f00] ss:$8 sps:$4 sm:$0xff]  }
 0x3e3   : > { %18278 = vmatpush1.bf16.msra.mxu0 %v25440_v52  ;;  %v21002_v52 = vcombine.low %v29631_v13, %v29631_v13 }
 0x3e4   : > { %18319 = vmatpush1.bf16.msra.mxu1 %v25443_v55  ;;  %18279 = vmatprep.subr.bf16.mxu0 %v25448_v26  ;;  %v21004_v55 = vcombine.low %v29634_v38, %v29634_v38  ;;  %v29715_v26 = vld [vmem:[%s28474_s27 + $0xf0] sm:$0xff] }
 0x3e5   : > { %18320 = vmatprep.subr.bf16.mxu1 %v25451_v56  ;;  %v17975_v43 = vpop.f32.mrb[40].mxu0  ;;  %v29718_v56 = vld [vmem:[%s28474_s27 + $0xf8] sm:$0xff]  ;;  %v21007_v13 = vcombine.high %v29715_v26, %v29715_v26 }
 0x3e6   : > { %v18016_v62 = vpop.f32.mrb[40].mxu1  ;;  %v17976_v0 = vadd.f32 %v17975_v43, %v29582_v51  ;;  %v17977_v2 = vpop.f32.mrb[41].mxu0  ;;  %v25460_v51 = vld [vmem:[%s28457_s11 + $0x1c74] ss:$8 sps:$4 sm:$0xff]   ;;  %v21009_v38 = vcombine.high %v29718_v56, %v29718_v56  ;;  %v25530_v43 = vld [vmem:[%s28457_s11 + $0x1e24] ss:$8 sps:$4 sm:$0xff]  }
 0x3e7   : > { %v18018_v49 = vpop.f32.mrb[41].mxu1  ;;  %v17978_v6 = vadd.f32 %v17977_v2, %v29586_v25  ;;  %v17979_v27 = vpop.f32.mrb[42].mxu0  ;;  %18280 = vmatpush1.bf16.msra.mxu0 %v25446_v39  ;;  %v25458_v25 = vld [vmem:[%s28457_s11 + $0x1c70] ss:$8 sps:$4 sm:$0xff]   ;;  %v25524_v39 = vld [vmem:[%s28457_s11 + $0x1e14] ss:$8 sps:$4 sm:$0xff]  }
 0x3e8   : > { %v18020_v48 = vpop.f32.mrb[42].mxu1  ;;  %18321 = vmatpush1.bf16.msra.mxu1 %v25449_v36  ;;  %v29666_v7 = vadd.f32 %v18016_v62, %v17976_v0  ;;  %v17980_v8 = vpop.f32.mrb[43].mxu0  ;;  %18281 = vmatprep.subr.bf16.mxu0 %v25454_v58  ;;  %v25527_v36 = vld [vmem:[%s28457_s11 + $0x1f14] ss:$8 sps:$4 sm:$0xff]   ;;  %v25522_v58 = vld [vmem:[%s28457_s11 + $0x1e10] ss:$8 sps:$4 sm:$0xff]  }
 0x3e9   : > { %v18021_v11 = vpop.f32.mrb[43].mxu1  ;;  %18322 = vmatprep.subr.bf16.mxu1 %v25457_v59  ;;  %v29670_v53 = vadd.f32 %v18018_v49, %v17978_v6  ;;  %v25525_v59 = vld [vmem:[%s28457_s11 + $0x1f10] ss:$8 sps:$4 sm:$0xff]   ;;  %v25533_v62 = vld [vmem:[%s28457_s11 + $0x1f24] ss:$8 sps:$4 sm:$0xff]  }
 0x3ea   : > { %v25536_v0 = vld [vmem:[%s28457_s11 + $0x1e34] ss:$8 sps:$4 sm:$0xff]   ;;  %v25534_v49 = vld [vmem:[%s28457_s11 + $0x1e30] ss:$8 sps:$4 sm:$0xff]   ;;  %v25542_v27 = vld [vmem:[%s28457_s11 + $0x1e44] ss:$8 sps:$4 sm:$0xff]  }
 0x3eb   : > { %18282 = vmatpush1.bf16.msra.mxu0 %v25452_v19  ;;  %v25528_v19 = vld [vmem:[%s28457_s11 + $0x1e20] ss:$8 sps:$4 sm:$0xff]   ;;  %v25539_v2 = vld [vmem:[%s28457_s11 + $0x1f34] ss:$8 sps:$4 sm:$0xff]   ;;  %v25537_v6 = vld [vmem:[%s28457_s11 + $0x1f30] ss:$8 sps:$4 sm:$0xff]  }
 0x3ec   : > { %18323 = vmatpush1.bf16.msra.mxu1 %v25455_v42  ;;  %18283 = vmatprep.subr.bf16.mxu0 %v25460_v51  ;;  %v25531_v42 = vld [vmem:[%s28457_s11 + $0x1f20] ss:$8 sps:$4 sm:$0xff]   ;;  %v25545_v48 = vld [vmem:[%s28457_s11 + $0x1f44] ss:$8 sps:$4 sm:$0xff]   ;;  %v25548_v51 = vld [vmem:[%s28457_s11 + $0x1e54] ss:$8 sps:$4 sm:$0xff]  }
 0x3ed   : > { %18324 = vmatprep.subr.bf16.mxu1 %v25463_v12  ;;  %v25540_v8 = vld [vmem:[%s28457_s11 + $0x1e40] ss:$8 sps:$4 sm:$0xff]   ;;  %v25551_v12 = vld [vmem:[%s28457_s11 + $0x1f54] ss:$8 sps:$4 sm:$0xff]  }
 0x3ee   : > { %v25543_v11 = vld [vmem:[%s28457_s11 + $0x1f40] ss:$8 sps:$4 sm:$0xff]  }
 0x3ef   : > { %18284 = vmatpush1.bf16.msra.mxu0 %v25458_v25  ;;  %v25546_v25 = vld [vmem:[%s28457_s11 + $0x1e50] ss:$8 sps:$4 sm:$0xff]  }
 0x3f0   : > { %18325 = vmatpush1.bf16.msra.mxu1 %v25461_v54  ;;  %18285 = vmatprep.subr.bf16.mxu0 %v25466_v14  ;;  %v25549_v54 = vld [vmem:[%s28457_s11 + $0x1f50] ss:$8 sps:$4 sm:$0xff]   ;;  %v25554_v14 = vld [vmem:[%s28457_s11 + $0x1e64] ss:$8 sps:$4 sm:$0xff]  }
 0x3f1   : > { %18326 = vmatprep.subr.bf16.mxu1 %v25469_v15  ;;  %v25557_v15 = vld [vmem:[%s28457_s11 + $0x1f64] ss:$8 sps:$4 sm:$0xff]  }
 0x3f3   : > { %18286 = vmatpush1.bf16.msra.mxu0 %v25464_v61 }
 0x3f4   : > { %18327 = vmatpush1.bf16.msra.mxu1 %v25467_v18  ;;  %18287 = vmatprep.subr.bf16.mxu0 %v25472_v31  ;;  %v25552_v31 = vld [vmem:[%s28457_s11 + $0x1e60] ss:$8 sps:$4 sm:$0xff]  }
 0x3f5   : > { %18328 = vmatprep.subr.bf16.mxu1 %v25475_v60  ;;  %v25555_v60 = vld [vmem:[%s28457_s11 + $0x1f60] ss:$8 sps:$4 sm:$0xff]  }
 0x3f7   : > { %18288 = vmatpush1.bf16.msra.mxu0 %v25470_v20 }
 0x3f8   : > { %18329 = vmatpush1.bf16.msra.mxu1 %v25473_v21  ;;  %18289 = vmatprep.subr.bf16.mxu0 %v25478_v5 }
 0x3f9   : > { %18330 = vmatprep.subr.bf16.mxu1 %v25481_v24 }
 0x3fb   : > { %18290 = vmatpush1.bf16.msra.mxu0 %v25476_v45 }
 0x3fc   : > { %18331 = vmatpush1.bf16.msra.mxu1 %v25479_v3  ;;  %18291 = vmatprep.subr.bf16.mxu0 %v25484_v28 }
 0x3fd   : > { %18332 = vmatprep.subr.bf16.mxu1 %v25487_v29 }
 0x3ff   : > { %18292 = vmatpush1.bf16.msra.mxu0 %v25482_v4 }
 0x400   : > { %18333 = vmatpush1.bf16.msra.mxu1 %v25485_v34  ;;  %18293 = vmatprep.subr.bf16.mxu0 %v25490_v9  ;;  %v25563_v34 = vld [vmem:[%s28457_s11 + $0x1f74] ss:$8 sps:$4 sm:$0xff]  }
 0x401   : > { %18334 = vmatprep.subr.bf16.mxu1 %v25493_v10  ;;  %v25561_v10 = vld [vmem:[%s28457_s11 + $0x1f70] ss:$8 sps:$4 sm:$0xff]  }
 0x403   : > { %18294 = vmatpush1.bf16.msra.mxu0 %v25488_v35  ;;  %v25566_v35 = vld [vmem:[%s28457_s11 + $0x1e84] ss:$8 sps:$4 sm:$0xff]  }
 0x404   : > { %18335 = vmatpush1.bf16.msra.mxu1 %v25491_v37  ;;  %18295 = vmatprep.subr.bf16.mxu0 %v25496_v17  ;;  %v25569_v37 = vld [vmem:[%s28457_s11 + $0x1f84] ss:$8 sps:$4 sm:$0xff]   ;;  %v25564_v17 = vld [vmem:[%s28457_s11 + $0x1e80] ss:$8 sps:$4 sm:$0xff]  }
 0x405   : > { %18336 = vmatprep.subr.bf16.mxu1 %v25499_v40  ;;  %v25567_v40 = vld [vmem:[%s28457_s11 + $0x1f80] ss:$8 sps:$4 sm:$0xff]  }
 0x407   : > { %18296 = vmatpush1.bf16.msra.mxu0 %v25494_v57  ;;  %v25572_v57 = vld [vmem:[%s28457_s11 + $0x1e94] ss:$8 sps:$4 sm:$0xff]  }
 0x408   : > { %18337 = vmatpush1.bf16.msra.mxu1 %v25497_v16  ;;  %18297 = vmatprep.subr.bf16.mxu0 %v25502_v32  ;;  %v25575_v16 = vld [vmem:[%s28457_s11 + $0x1f94] ss:$8 sps:$4 sm:$0xff]   ;;  %v25570_v32 = vld [vmem:[%s28457_s11 + $0x1e90] ss:$8 sps:$4 sm:$0xff]  }
 0x409   : > { %18338 = vmatprep.subr.bf16.mxu1 %v25505_v41  ;;  %v25573_v41 = vld [vmem:[%s28457_s11 + $0x1f90] ss:$8 sps:$4 sm:$0xff]  }
 0x40b   : > { %18298 = vmatpush1.bf16.msra.mxu0 %v25500_v23  ;;  %v25578_v23 = vld [vmem:[%s28457_s11 + $0x1ea4] ss:$8 sps:$4 sm:$0xff]  }
 0x40c   : > { %18339 = vmatpush1.bf16.msra.mxu1 %v25503_v44  ;;  %18299 = vmatprep.subr.bf16.mxu0 %v25508_v63  ;;  %v25581_v44 = vld [vmem:[%s28457_s11 + $0x1fa4] ss:$8 sps:$4 sm:$0xff]   ;;  %v25576_v63 = vld [vmem:[%s28457_s11 + $0x1ea0] ss:$8 sps:$4 sm:$0xff]  }
 0x40d   : > { %18340 = vmatprep.subr.bf16.mxu1 %v25511_v22  ;;  %v25579_v22 = vld [vmem:[%s28457_s11 + $0x1fa0] ss:$8 sps:$4 sm:$0xff]  }
 0x40f   : > { %18300 = vmatpush1.bf16.msra.mxu0 %v25506_v46  ;;  %v25584_v46 = vld [vmem:[%s28457_s11 + $0x1eb4] ss:$8 sps:$4 sm:$0xff]  }
 0x410   : > { %18341 = vmatpush1.bf16.msra.mxu1 %v25509_v47  ;;  %18351 = vmatprep.subr.bf16.mxu0 %v25518_v33  ;;  %v25587_v47 = vld [vmem:[%s28457_s11 + $0x1fb4] ss:$8 sps:$4 sm:$0xff]   ;;  %v25582_v33 = vld [vmem:[%s28457_s11 + $0x1eb0] ss:$8 sps:$4 sm:$0xff]  }
 0x411   : > { %18392 = vmatprep.subr.bf16.mxu1 %v25521_v50  ;;  %v25585_v50 = vld [vmem:[%s28457_s11 + $0x1fb0] ss:$8 sps:$4 sm:$0xff]  }
 0x412   : > { %18302 = vmatmul.mubr.bf16.vlgmr.msra.gmra.mrb[56].mxu0 %v21002_v52  ;;  %v25588_v52 = vld [vmem:[%s28457_s11 + $0x1ec0] ss:$8 sps:$4 sm:$0xff]  }
 0x413   : > { %18343 = vmatmul.mubr.bf16.vlgmr.msra.gmra.mrb[56].mxu1 %v21004_v55  ;;  %18352 = vmatpush1.bf16.msra.mxu0 %v25516_v1  ;;  %v25590_v1 = vld [vmem:[%s28457_s11 + $0x1ec4] ss:$8 sps:$4 sm:$0xff]   ;;  %v25591_v55 = vld [vmem:[%s28457_s11 + $0x1fc0] ss:$8 sps:$4 sm:$0xff]  }
 0x414   : > { %18393 = vmatpush1.bf16.msra.mxu1 %v25519_v30  ;;  %18353 = vmatprep.subr.bf16.mxu0 %v25524_v39  ;;  %v25593_v30 = vld [vmem:[%s28457_s11 + $0x1fc4] ss:$8 sps:$4 sm:$0xff]   ;;  %v25596_v39 = vld [vmem:[%s28457_s11 + $0x1ed4] ss:$8 sps:$4 sm:$0xff]  }
 0x415   : > { %18394 = vmatprep.subr.bf16.mxu1 %v25527_v36  ;;  %18383 = vmatprep.mubr.bf16.mxu0 %v21007_v13  ;;  %v25599_v36 = vld [vmem:[%s28457_s11 + $0x1fd4] ss:$8 sps:$4 sm:$0xff]   ;;  %v25594_v13 = vld [vmem:[%s28457_s11 + $0x1ed0] ss:$8 sps:$4 sm:$0xff]  }
 0x416   : > { %18424 = vmatprep.mubr.bf16.mxu1 %v21009_v38  ;;  %v25597_v38 = vld [vmem:[%s28457_s11 + $0x1fd0] ss:$8 sps:$4 sm:$0xff]  }
 0x417   : > { %18354 = vmatpush1.bf16.msra.mxu0 %v25522_v58  ;;  %v25602_v58 = vld [vmem:[%s28457_s11 + $0x1ee4] ss:$8 sps:$4 sm:$0xff]  }
 0x418   : > { %18395 = vmatpush1.bf16.msra.mxu1 %v25525_v59  ;;  %18355 = vmatprep.subr.bf16.mxu0 %v25530_v43  ;;  %v25605_v59 = vld [vmem:[%s28457_s11 + $0x1fe4] ss:$8 sps:$4 sm:$0xff]   ;;  %v25600_v43 = vld [vmem:[%s28457_s11 + $0x1ee0] ss:$8 sps:$4 sm:$0xff]  }
 0x419   : > { %18396 = vmatprep.subr.bf16.mxu1 %v25533_v62  ;;  %v25603_v62 = vld [vmem:[%s28457_s11 + $0x1fe0] ss:$8 sps:$4 sm:$0xff]  }
 0x41b   : > { %18356 = vmatpush1.bf16.msra.mxu0 %v25528_v19  ;;  %v25608_v19 = vld [vmem:[%s28457_s11 + $0x1ef4] ss:$8 sps:$4 sm:$0xff]  }
 0x41c   : > { %18397 = vmatpush1.bf16.msra.mxu1 %v25531_v42  ;;  %18357 = vmatprep.subr.bf16.mxu0 %v25536_v0  ;;  %v25611_v42 = vld [vmem:[%s28457_s11 + $0x1ff4] ss:$8 sps:$4 sm:$0xff]   ;;  %v25606_v0 = vld [vmem:[%s28457_s11 + $0x1ef0] ss:$8 sps:$4 sm:$0xff]  }
 0x41d   : > { %18398 = vmatprep.subr.bf16.mxu1 %v25539_v2  ;;  %v25609_v2 = vld [vmem:[%s28457_s11 + $0x1ff0] ss:$8 sps:$4 sm:$0xff]  }
 0x41f   : > { %18358 = vmatpush1.bf16.msra.mxu0 %v25534_v49  ;;  %v25618_v49 = vld [vmem:[%s28457_s11 + $0x2004] ss:$8 sps:$4 sm:$0xff]  }
 0x420   : > { %18399 = vmatpush1.bf16.msra.mxu1 %v25537_v6  ;;  %18359 = vmatprep.subr.bf16.mxu0 %v25542_v27  ;;  %v25621_v6 = vld [vmem:[%s28457_s11 + $0x2104] ss:$8 sps:$4 sm:$0xff]   ;;  %v25616_v27 = vld [vmem:[%s28457_s11 + $0x2000] ss:$8 sps:$4 sm:$0xff]  }
 0x421   : > { %18400 = vmatprep.subr.bf16.mxu1 %v25545_v48  ;;  %v25619_v48 = vld [vmem:[%s28457_s11 + $0x2100] ss:$8 sps:$4 sm:$0xff]  }
 0x423   : > { %18360 = vmatpush1.bf16.msra.mxu0 %v25540_v8  ;;  %v21006_v8 = vcombine.low %v29715_v26, %v29715_v26 }
 0x424   : > { %18401 = vmatpush1.bf16.msra.mxu1 %v25543_v11  ;;  %18361 = vmatprep.subr.bf16.mxu0 %v25548_v51  ;;  %v21008_v11 = vcombine.low %v29718_v56, %v29718_v56  ;;  %v29799_v51 = vld [vmem:[%s28474_s27 + $0x100] sm:$0xff] }
 0x425   : > { %18402 = vmatprep.subr.bf16.mxu1 %v25551_v12  ;;  %v18057_v61 = vpop.f32.mrb[44].mxu0  ;;  %v29802_v12 = vld [vmem:[%s28474_s27 + $0x108] sm:$0xff]  ;;  %v21011_v26 = vcombine.high %v29799_v51, %v29799_v51 }
 0x426   : > { %v18098_v18 = vpop.f32.mrb[44].mxu1  ;;  %v18058_v20 = vadd.f32 %v18057_v61, %v29666_v7  ;;  %v18059_v21 = vpop.f32.mrb[45].mxu0  ;;  %v25560_v7 = vld [vmem:[%s28457_s11 + $0x1e74] ss:$8 sps:$4 sm:$0xff]   ;;  %v21013_v56 = vcombine.high %v29802_v12, %v29802_v12  ;;  %v25630_v61 = vld [vmem:[%s28457_s11 + $0x2024] ss:$8 sps:$4 sm:$0xff]  }
 0x427   : > { %v18100_v5 = vpop.f32.mrb[45].mxu1  ;;  %v18060_v24 = vadd.f32 %v18059_v21, %v29670_v53  ;;  %v18061_v45 = vpop.f32.mrb[46].mxu0  ;;  %18362 = vmatpush1.bf16.msra.mxu0 %v25546_v25  ;;  %v25558_v53 = vld [vmem:[%s28457_s11 + $0x1e70] ss:$8 sps:$4 sm:$0xff]   ;;  %v25624_v25 = vld [vmem:[%s28457_s11 + $0x2014] ss:$8 sps:$4 sm:$0xff]  }
 0x428   : > { %v18102_v3 = vpop.f32.mrb[46].mxu1  ;;  %18403 = vmatpush1.bf16.msra.mxu1 %v25549_v54  ;;  %v29750_v28 = vadd.f32 %v18098_v18, %v18058_v20  ;;  %v18062_v29 = vpop.f32.mrb[47].mxu0  ;;  %18363 = vmatprep.subr.bf16.mxu0 %v25554_v14  ;;  %v25627_v54 = vld [vmem:[%s28457_s11 + $0x2114] ss:$8 sps:$4 sm:$0xff]   ;;  %v25622_v14 = vld [vmem:[%s28457_s11 + $0x2010] ss:$8 sps:$4 sm:$0xff]  }
 0x429   : > { %v18103_v4 = vpop.f32.mrb[47].mxu1  ;;  %18404 = vmatprep.subr.bf16.mxu1 %v25557_v15  ;;  %v29754_v9 = vadd.f32 %v18100_v5, %v18060_v24  ;;  %v25625_v15 = vld [vmem:[%s28457_s11 + $0x2110] ss:$8 sps:$4 sm:$0xff]   ;;  %v25633_v18 = vld [vmem:[%s28457_s11 + $0x2124] ss:$8 sps:$4 sm:$0xff]  }
 0x42a   : > { %v25636_v20 = vld [vmem:[%s28457_s11 + $0x2034] ss:$8 sps:$4 sm:$0xff]   ;;  %v25634_v5 = vld [vmem:[%s28457_s11 + $0x2030] ss:$8 sps:$4 sm:$0xff]   ;;  %v25642_v45 = vld [vmem:[%s28457_s11 + $0x2044] ss:$8 sps:$4 sm:$0xff]  }
 0x42b   : > { %18364 = vmatpush1.bf16.msra.mxu0 %v25552_v31  ;;  %v25628_v31 = vld [vmem:[%s28457_s11 + $0x2020] ss:$8 sps:$4 sm:$0xff]   ;;  %v25639_v21 = vld [vmem:[%s28457_s11 + $0x2134] ss:$8 sps:$4 sm:$0xff]   ;;  %v25637_v24 = vld [vmem:[%s28457_s11 + $0x2130] ss:$8 sps:$4 sm:$0xff]  }
 0x42c   : > { %18405 = vmatpush1.bf16.msra.mxu1 %v25555_v60  ;;  %18365 = vmatprep.subr.bf16.mxu0 %v25560_v7  ;;  %v25631_v60 = vld [vmem:[%s28457_s11 + $0x2120] ss:$8 sps:$4 sm:$0xff]   ;;  %v25645_v3 = vld [vmem:[%s28457_s11 + $0x2144] ss:$8 sps:$4 sm:$0xff]   ;;  %v25648_v7 = vld [vmem:[%s28457_s11 + $0x2054] ss:$8 sps:$4 sm:$0xff]  }
 0x42d   : > { %18406 = vmatprep.subr.bf16.mxu1 %v25563_v34  ;;  %v25640_v29 = vld [vmem:[%s28457_s11 + $0x2040] ss:$8 sps:$4 sm:$0xff]   ;;  %v25651_v34 = vld [vmem:[%s28457_s11 + $0x2154] ss:$8 sps:$4 sm:$0xff]  }
 0x42e   : > { %v25643_v4 = vld [vmem:[%s28457_s11 + $0x2140] ss:$8 sps:$4 sm:$0xff]  }
 0x42f   : > { %18366 = vmatpush1.bf16.msra.mxu0 %v25558_v53  ;;  %v25646_v53 = vld [vmem:[%s28457_s11 + $0x2050] ss:$8 sps:$4 sm:$0xff]  }
 0x430   : > { %18407 = vmatpush1.bf16.msra.mxu1 %v25561_v10  ;;  %18367 = vmatprep.subr.bf16.mxu0 %v25566_v35  ;;  %v25649_v10 = vld [vmem:[%s28457_s11 + $0x2150] ss:$8 sps:$4 sm:$0xff]   ;;  %v25654_v35 = vld [vmem:[%s28457_s11 + $0x2064] ss:$8 sps:$4 sm:$0xff]  }
 0x431   : > { %18408 = vmatprep.subr.bf16.mxu1 %v25569_v37  ;;  %v25657_v37 = vld [vmem:[%s28457_s11 + $0x2164] ss:$8 sps:$4 sm:$0xff]  }
 0x433   : > { %18368 = vmatpush1.bf16.msra.mxu0 %v25564_v17 }
 0x434   : > { %18409 = vmatpush1.bf16.msra.mxu1 %v25567_v40  ;;  %18369 = vmatprep.subr.bf16.mxu0 %v25572_v57  ;;  %v25652_v57 = vld [vmem:[%s28457_s11 + $0x2060] ss:$8 sps:$4 sm:$0xff]  }
 0x435   : > { %18410 = vmatprep.subr.bf16.mxu1 %v25575_v16  ;;  %v25655_v16 = vld [vmem:[%s28457_s11 + $0x2160] ss:$8 sps:$4 sm:$0xff]  }
 0x437   : > { %18370 = vmatpush1.bf16.msra.mxu0 %v25570_v32 }
 0x438   : > { %18411 = vmatpush1.bf16.msra.mxu1 %v25573_v41  ;;  %18371 = vmatprep.subr.bf16.mxu0 %v25578_v23 }
 0x439   : > { %18412 = vmatprep.subr.bf16.mxu1 %v25581_v44 }
 0x43b   : > { %18372 = vmatpush1.bf16.msra.mxu0 %v25576_v63 }
 0x43c   : > { %18413 = vmatpush1.bf16.msra.mxu1 %v25579_v22  ;;  %18373 = vmatprep.subr.bf16.mxu0 %v25584_v46 }
 0x43d   : > { %18414 = vmatprep.subr.bf16.mxu1 %v25587_v47 }
 0x43f   : > { %18374 = vmatpush1.bf16.msra.mxu0 %v25582_v33 }
 0x440   : > { %18415 = vmatpush1.bf16.msra.mxu1 %v25585_v50  ;;  %18375 = vmatprep.subr.bf16.mxu0 %v25590_v1  ;;  %v25663_v50 = vld [vmem:[%s28457_s11 + $0x2174] ss:$8 sps:$4 sm:$0xff]  }
 0x441   : > { %18416 = vmatprep.subr.bf16.mxu1 %v25593_v30  ;;  %v25661_v30 = vld [vmem:[%s28457_s11 + $0x2170] ss:$8 sps:$4 sm:$0xff]  }
 0x443   : > { %18376 = vmatpush1.bf16.msra.mxu0 %v25588_v52  ;;  %v25666_v52 = vld [vmem:[%s28457_s11 + $0x2084] ss:$8 sps:$4 sm:$0xff]  }
 0x444   : > { %18417 = vmatpush1.bf16.msra.mxu1 %v25591_v55  ;;  %18377 = vmatprep.subr.bf16.mxu0 %v25596_v39  ;;  %v25669_v55 = vld [vmem:[%s28457_s11 + $0x2184] ss:$8 sps:$4 sm:$0xff]   ;;  %v25664_v39 = vld [vmem:[%s28457_s11 + $0x2080] ss:$8 sps:$4 sm:$0xff]  }
 0x445   : > { %18418 = vmatprep.subr.bf16.mxu1 %v25599_v36  ;;  %v25667_v36 = vld [vmem:[%s28457_s11 + $0x2180] ss:$8 sps:$4 sm:$0xff]  }
 0x447   : > { %18378 = vmatpush1.bf16.msra.mxu0 %v25594_v13  ;;  %v25672_v13 = vld [vmem:[%s28457_s11 + $0x2094] ss:$8 sps:$4 sm:$0xff]  }
 0x448   : > { %18419 = vmatpush1.bf16.msra.mxu1 %v25597_v38  ;;  %18379 = vmatprep.subr.bf16.mxu0 %v25602_v58  ;;  %v25675_v38 = vld [vmem:[%s28457_s11 + $0x2194] ss:$8 sps:$4 sm:$0xff]   ;;  %v25670_v58 = vld [vmem:[%s28457_s11 + $0x2090] ss:$8 sps:$4 sm:$0xff]  }
 0x449   : > { %18420 = vmatprep.subr.bf16.mxu1 %v25605_v59  ;;  %v25673_v59 = vld [vmem:[%s28457_s11 + $0x2190] ss:$8 sps:$4 sm:$0xff]  }
 0x44b   : > { %18380 = vmatpush1.bf16.msra.mxu0 %v25600_v43  ;;  %v25678_v43 = vld [vmem:[%s28457_s11 + $0x20a4] ss:$8 sps:$4 sm:$0xff]  }
 0x44c   : > { %18421 = vmatpush1.bf16.msra.mxu1 %v25603_v62  ;;  %18381 = vmatprep.subr.bf16.mxu0 %v25608_v19  ;;  %v25681_v62 = vld [vmem:[%s28457_s11 + $0x21a4] ss:$8 sps:$4 sm:$0xff]   ;;  %v25676_v19 = vld [vmem:[%s28457_s11 + $0x20a0] ss:$8 sps:$4 sm:$0xff]  }
 0x44d   : > { %18422 = vmatprep.subr.bf16.mxu1 %v25611_v42  ;;  %v25679_v42 = vld [vmem:[%s28457_s11 + $0x21a0] ss:$8 sps:$4 sm:$0xff]  }
 0x44f   : > { %18382 = vmatpush1.bf16.msra.mxu0 %v25606_v0  ;;  %v25684_v0 = vld [vmem:[%s28457_s11 + $0x20b4] ss:$8 sps:$4 sm:$0xff]  }
 0x450   : > { %18423 = vmatpush1.bf16.msra.mxu1 %v25609_v2  ;;  %18433 = vmatprep.subr.bf16.mxu0 %v25618_v49  ;;  %v25687_v2 = vld [vmem:[%s28457_s11 + $0x21b4] ss:$8 sps:$4 sm:$0xff]   ;;  %v25682_v49 = vld [vmem:[%s28457_s11 + $0x20b0] ss:$8 sps:$4 sm:$0xff]  }
 0x451   : > { %18474 = vmatprep.subr.bf16.mxu1 %v25621_v6  ;;  %v25685_v6 = vld [vmem:[%s28457_s11 + $0x21b0] ss:$8 sps:$4 sm:$0xff]  }
 0x452   : > { %18384 = vmatmul.mubr.bf16.vlgmr.msra.gmra.mrb[60].mxu0 %v21006_v8  ;;  %v25688_v8 = vld [vmem:[%s28457_s11 + $0x20c0] ss:$8 sps:$4 sm:$0xff]  }
 0x453   : > { %18425 = vmatmul.mubr.bf16.vlgmr.msra.gmra.mrb[60].mxu1 %v21008_v11  ;;  %18434 = vmatpush1.bf16.msra.mxu0 %v25616_v27  ;;  %v25690_v27 = vld [vmem:[%s28457_s11 + $0x20c4] ss:$8 sps:$4 sm:$0xff]   ;;  %v25691_v11 = vld [vmem:[%s28457_s11 + $0x21c0] ss:$8 sps:$4 sm:$0xff]  }
 0x454   : > { %18475 = vmatpush1.bf16.msra.mxu1 %v25619_v48  ;;  %18435 = vmatprep.subr.bf16.mxu0 %v25624_v25  ;;  %v25693_v48 = vld [vmem:[%s28457_s11 + $0x21c4] ss:$8 sps:$4 sm:$0xff]   ;;  %v25696_v25 = vld [vmem:[%s28457_s11 + $0x20d4] ss:$8 sps:$4 sm:$0xff]  }
 0x455   : > { %18476 = vmatprep.subr.bf16.mxu1 %v25627_v54  ;;  %18465 = vmatprep.mubr.bf16.mxu0 %v21011_v26  ;;  %v25699_v54 = vld [vmem:[%s28457_s11 + $0x21d4] ss:$8 sps:$4 sm:$0xff]   ;;  %v25694_v26 = vld [vmem:[%s28457_s11 + $0x20d0] ss:$8 sps:$4 sm:$0xff]  }
 0x456   : > { %18506 = vmatprep.mubr.bf16.mxu1 %v21013_v56  ;;  %v25697_v56 = vld [vmem:[%s28457_s11 + $0x21d0] ss:$8 sps:$4 sm:$0xff]  }
 0x457   : > { %18436 = vmatpush1.bf16.msra.mxu0 %v25622_v14  ;;  %v25702_v14 = vld [vmem:[%s28457_s11 + $0x20e4] ss:$8 sps:$4 sm:$0xff]  }
 0x458   : > { %18477 = vmatpush1.bf16.msra.mxu1 %v25625_v15  ;;  %18437 = vmatprep.subr.bf16.mxu0 %v25630_v61  ;;  %v25705_v15 = vld [vmem:[%s28457_s11 + $0x21e4] ss:$8 sps:$4 sm:$0xff]   ;;  %v25700_v61 = vld [vmem:[%s28457_s11 + $0x20e0] ss:$8 sps:$4 sm:$0xff]  }
 0x459   : > { %18478 = vmatprep.subr.bf16.mxu1 %v25633_v18  ;;  %v25703_v18 = vld [vmem:[%s28457_s11 + $0x21e0] ss:$8 sps:$4 sm:$0xff]  }
 0x45b   : > { %18438 = vmatpush1.bf16.msra.mxu0 %v25628_v31  ;;  %v25708_v31 = vld [vmem:[%s28457_s11 + $0x20f4] ss:$8 sps:$4 sm:$0xff]  }
 0x45c   : > { %18479 = vmatpush1.bf16.msra.mxu1 %v25631_v60  ;;  %18439 = vmatprep.subr.bf16.mxu0 %v25636_v20  ;;  %v25711_v60 = vld [vmem:[%s28457_s11 + $0x21f4] ss:$8 sps:$4 sm:$0xff]   ;;  %v25706_v20 = vld [vmem:[%s28457_s11 + $0x20f0] ss:$8 sps:$4 sm:$0xff]  }
 0x45d   : > { %18480 = vmatprep.subr.bf16.mxu1 %v25639_v21  ;;  %v25709_v21 = vld [vmem:[%s28457_s11 + $0x21f0] ss:$8 sps:$4 sm:$0xff]  }
 0x45f   : > { %18440 = vmatpush1.bf16.msra.mxu0 %v25634_v5  ;;  %v25718_v5 = vld [vmem:[%s28457_s11 + $0x2204] ss:$8 sps:$4 sm:$0xff]  }
 0x460   : > { %18481 = vmatpush1.bf16.msra.mxu1 %v25637_v24  ;;  %18441 = vmatprep.subr.bf16.mxu0 %v25642_v45  ;;  %v25721_v24 = vld [vmem:[%s28457_s11 + $0x2304] ss:$8 sps:$4 sm:$0xff]   ;;  %v25716_v45 = vld [vmem:[%s28457_s11 + $0x2200] ss:$8 sps:$4 sm:$0xff]  }
 0x461   : > { %18482 = vmatprep.subr.bf16.mxu1 %v25645_v3  ;;  %v25719_v3 = vld [vmem:[%s28457_s11 + $0x2300] ss:$8 sps:$4 sm:$0xff]  }
 0x463   : > { %18442 = vmatpush1.bf16.msra.mxu0 %v25640_v29  ;;  %v21010_v29 = vcombine.low %v29799_v51, %v29799_v51 }
 0x464   : > { %18483 = vmatpush1.bf16.msra.mxu1 %v25643_v4  ;;  %18443 = vmatprep.subr.bf16.mxu0 %v25648_v7  ;;  %v21012_v4 = vcombine.low %v29802_v12, %v29802_v12  ;;  %v29883_v7 = vld [vmem:[%s28474_s27 + $0x110] sm:$0xff] }
 0x465   : > { %18484 = vmatprep.subr.bf16.mxu1 %v25651_v34  ;;  %v18139_v17 = vpop.f32.mrb[48].mxu0  ;;  %v29886_v34 = vld [vmem:[%s28474_s27 + $0x118] sm:$0xff]  ;;  %v21015_v51 = vcombine.high %v29883_v7, %v29883_v7 }
 0x466   : > { %v18180_v40 = vpop.f32.mrb[48].mxu1  ;;  %v18140_v32 = vadd.f32 %v18139_v17, %v29750_v28  ;;  %v18141_v41 = vpop.f32.mrb[49].mxu0  ;;  %v25660_v28 = vld [vmem:[%s28457_s11 + $0x2074] ss:$8 sps:$4 sm:$0xff]   ;;  %v21017_v12 = vcombine.high %v29886_v34, %v29886_v34  ;;  %v25730_v17 = vld [vmem:[%s28457_s11 + $0x2224] ss:$8 sps:$4 sm:$0xff]  }
 0x467   : > { %v18182_v23 = vpop.f32.mrb[49].mxu1  ;;  %v18142_v44 = vadd.f32 %v18141_v41, %v29754_v9  ;;  %v18143_v63 = vpop.f32.mrb[50].mxu0  ;;  %18444 = vmatpush1.bf16.msra.mxu0 %v25646_v53  ;;  %v25658_v9 = vld [vmem:[%s28457_s11 + $0x2070] ss:$8 sps:$4 sm:$0xff]   ;;  %v25724_v53 = vld [vmem:[%s28457_s11 + $0x2214] ss:$8 sps:$4 sm:$0xff]  }
 0x468   : > { %v18184_v22 = vpop.f32.mrb[50].mxu1  ;;  %18485 = vmatpush1.bf16.msra.mxu1 %v25649_v10  ;;  %v29834_v46 = vadd.f32 %v18180_v40, %v18140_v32  ;;  %v18144_v47 = vpop.f32.mrb[51].mxu0  ;;  %18445 = vmatprep.subr.bf16.mxu0 %v25654_v35  ;;  %v25727_v10 = vld [vmem:[%s28457_s11 + $0x2314] ss:$8 sps:$4 sm:$0xff]   ;;  %v25722_v35 = vld [vmem:[%s28457_s11 + $0x2210] ss:$8 sps:$4 sm:$0xff]  }
 0x469   : > { %v18185_v33 = vpop.f32.mrb[51].mxu1  ;;  %18486 = vmatprep.subr.bf16.mxu1 %v25657_v37  ;;  %v29838_v1 = vadd.f32 %v18182_v23, %v18142_v44  ;;  %v25725_v37 = vld [vmem:[%s28457_s11 + $0x2310] ss:$8 sps:$4 sm:$0xff]   ;;  %v25733_v40 = vld [vmem:[%s28457_s11 + $0x2324] ss:$8 sps:$4 sm:$0xff]  }
 0x46a   : > { %v25736_v32 = vld [vmem:[%s28457_s11 + $0x2234] ss:$8 sps:$4 sm:$0xff]   ;;  %v25734_v23 = vld [vmem:[%s28457_s11 + $0x2230] ss:$8 sps:$4 sm:$0xff]   ;;  %v25742_v63 = vld [vmem:[%s28457_s11 + $0x2244] ss:$8 sps:$4 sm:$0xff]  }
 0x46b   : > { %18446 = vmatpush1.bf16.msra.mxu0 %v25652_v57  ;;  %v25728_v57 = vld [vmem:[%s28457_s11 + $0x2220] ss:$8 sps:$4 sm:$0xff]   ;;  %v25739_v41 = vld [vmem:[%s28457_s11 + $0x2334] ss:$8 sps:$4 sm:$0xff]   ;;  %v25737_v44 = vld [vmem:[%s28457_s11 + $0x2330] ss:$8 sps:$4 sm:$0xff]  }
 0x46c   : > { %18487 = vmatpush1.bf16.msra.mxu1 %v25655_v16  ;;  %18447 = vmatprep.subr.bf16.mxu0 %v25660_v28  ;;  %v25731_v16 = vld [vmem:[%s28457_s11 + $0x2320] ss:$8 sps:$4 sm:$0xff]   ;;  %v25745_v22 = vld [vmem:[%s28457_s11 + $0x2344] ss:$8 sps:$4 sm:$0xff]   ;;  %v25748_v28 = vld [vmem:[%s28457_s11 + $0x2254] ss:$8 sps:$4 sm:$0xff]  }
 0x46d   : > { %18488 = vmatprep.subr.bf16.mxu1 %v25663_v50  ;;  %v25740_v47 = vld [vmem:[%s28457_s11 + $0x2240] ss:$8 sps:$4 sm:$0xff]   ;;  %v25751_v50 = vld [vmem:[%s28457_s11 + $0x2354] ss:$8 sps:$4 sm:$0xff]  }
 0x46e   : > { %v25743_v33 = vld [vmem:[%s28457_s11 + $0x2340] ss:$8 sps:$4 sm:$0xff]  }
 0x46f   : > { %18448 = vmatpush1.bf16.msra.mxu0 %v25658_v9  ;;  %v25746_v9 = vld [vmem:[%s28457_s11 + $0x2250] ss:$8 sps:$4 sm:$0xff]  }
 0x470   : > { %18489 = vmatpush1.bf16.msra.mxu1 %v25661_v30  ;;  %18449 = vmatprep.subr.bf16.mxu0 %v25666_v52  ;;  %v25749_v30 = vld [vmem:[%s28457_s11 + $0x2350] ss:$8 sps:$4 sm:$0xff]   ;;  %v25754_v52 = vld [vmem:[%s28457_s11 + $0x2264] ss:$8 sps:$4 sm:$0xff]  }
 0x471   : > { %18490 = vmatprep.subr.bf16.mxu1 %v25669_v55  ;;  %v25757_v55 = vld [vmem:[%s28457_s11 + $0x2364] ss:$8 sps:$4 sm:$0xff]  }
 0x473   : > { %18450 = vmatpush1.bf16.msra.mxu0 %v25664_v39 }
 0x474   : > { %18491 = vmatpush1.bf16.msra.mxu1 %v25667_v36  ;;  %18451 = vmatprep.subr.bf16.mxu0 %v25672_v13  ;;  %v25752_v13 = vld [vmem:[%s28457_s11 + $0x2260] ss:$8 sps:$4 sm:$0xff]  }
 0x475   : > { %18492 = vmatprep.subr.bf16.mxu1 %v25675_v38  ;;  %v25755_v38 = vld [vmem:[%s28457_s11 + $0x2360] ss:$8 sps:$4 sm:$0xff]  }
 0x477   : > { %18452 = vmatpush1.bf16.msra.mxu0 %v25670_v58 }
 0x478   : > { %18493 = vmatpush1.bf16.msra.mxu1 %v25673_v59  ;;  %18453 = vmatprep.subr.bf16.mxu0 %v25678_v43 }
 0x479   : > { %18494 = vmatprep.subr.bf16.mxu1 %v25681_v62 }
 0x47b   : > { %18454 = vmatpush1.bf16.msra.mxu0 %v25676_v19 }
 0x47c   : > { %18495 = vmatpush1.bf16.msra.mxu1 %v25679_v42  ;;  %18455 = vmatprep.subr.bf16.mxu0 %v25684_v0 }
 0x47d   : > { %18496 = vmatprep.subr.bf16.mxu1 %v25687_v2 }
 0x47f   : > { %18456 = vmatpush1.bf16.msra.mxu0 %v25682_v49 }
 0x480   : > { %18497 = vmatpush1.bf16.msra.mxu1 %v25685_v6  ;;  %18457 = vmatprep.subr.bf16.mxu0 %v25690_v27  ;;  %v25763_v6 = vld [vmem:[%s28457_s11 + $0x2374] ss:$8 sps:$4 sm:$0xff]  }
 0x481   : > { %18498 = vmatprep.subr.bf16.mxu1 %v25693_v48  ;;  %v25761_v48 = vld [vmem:[%s28457_s11 + $0x2370] ss:$8 sps:$4 sm:$0xff]  }
 0x483   : > { %18458 = vmatpush1.bf16.msra.mxu0 %v25688_v8  ;;  %v25766_v8 = vld [vmem:[%s28457_s11 + $0x2284] ss:$8 sps:$4 sm:$0xff]  }
 0x484   : > { %18499 = vmatpush1.bf16.msra.mxu1 %v25691_v11  ;;  %18459 = vmatprep.subr.bf16.mxu0 %v25696_v25  ;;  %v25769_v11 = vld [vmem:[%s28457_s11 + $0x2384] ss:$8 sps:$4 sm:$0xff]   ;;  %v25764_v25 = vld [vmem:[%s28457_s11 + $0x2280] ss:$8 sps:$4 sm:$0xff]  }
 0x485   : > { %18500 = vmatprep.subr.bf16.mxu1 %v25699_v54  ;;  %v25767_v54 = vld [vmem:[%s28457_s11 + $0x2380] ss:$8 sps:$4 sm:$0xff]  }
 0x487   : > { %18460 = vmatpush1.bf16.msra.mxu0 %v25694_v26  ;;  %v25772_v26 = vld [vmem:[%s28457_s11 + $0x2294] ss:$8 sps:$4 sm:$0xff]  }
 0x488   : > { %18501 = vmatpush1.bf16.msra.mxu1 %v25697_v56  ;;  %18461 = vmatprep.subr.bf16.mxu0 %v25702_v14  ;;  %v25775_v56 = vld [vmem:[%s28457_s11 + $0x2394] ss:$8 sps:$4 sm:$0xff]   ;;  %v25770_v14 = vld [vmem:[%s28457_s11 + $0x2290] ss:$8 sps:$4 sm:$0xff]  }
 0x489   : > { %18502 = vmatprep.subr.bf16.mxu1 %v25705_v15  ;;  %v25773_v15 = vld [vmem:[%s28457_s11 + $0x2390] ss:$8 sps:$4 sm:$0xff]  }
 0x48b   : > { %18462 = vmatpush1.bf16.msra.mxu0 %v25700_v61  ;;  %v25778_v61 = vld [vmem:[%s28457_s11 + $0x22a4] ss:$8 sps:$4 sm:$0xff]  }
 0x48c   : > { %18503 = vmatpush1.bf16.msra.mxu1 %v25703_v18  ;;  %18463 = vmatprep.subr.bf16.mxu0 %v25708_v31  ;;  %v25781_v18 = vld [vmem:[%s28457_s11 + $0x23a4] ss:$8 sps:$4 sm:$0xff]   ;;  %v25776_v31 = vld [vmem:[%s28457_s11 + $0x22a0] ss:$8 sps:$4 sm:$0xff]  }
 0x48d   : > { %18504 = vmatprep.subr.bf16.mxu1 %v25711_v60  ;;  %v25779_v60 = vld [vmem:[%s28457_s11 + $0x23a0] ss:$8 sps:$4 sm:$0xff]  }
 0x48f   : > { %18464 = vmatpush1.bf16.msra.mxu0 %v25706_v20  ;;  %v25784_v20 = vld [vmem:[%s28457_s11 + $0x22b4] ss:$8 sps:$4 sm:$0xff]  }
 0x490   : > { %18505 = vmatpush1.bf16.msra.mxu1 %v25709_v21  ;;  %18515 = vmatprep.subr.bf16.mxu0 %v25718_v5  ;;  %v25787_v21 = vld [vmem:[%s28457_s11 + $0x23b4] ss:$8 sps:$4 sm:$0xff]   ;;  %v25782_v5 = vld [vmem:[%s28457_s11 + $0x22b0] ss:$8 sps:$4 sm:$0xff]  }
 0x491   : > { %18556 = vmatprep.subr.bf16.mxu1 %v25721_v24  ;;  %v25785_v24 = vld [vmem:[%s28457_s11 + $0x23b0] ss:$8 sps:$4 sm:$0xff]  }
 0x492   : > { %18466 = vmatmul.mubr.bf16.vlgmr.msra.gmra.mrb[64].mxu0 %v21010_v29  ;;  %v25788_v29 = vld [vmem:[%s28457_s11 + $0x22c0] ss:$8 sps:$4 sm:$0xff]  }
 0x493   : > { %18507 = vmatmul.mubr.bf16.vlgmr.msra.gmra.mrb[64].mxu1 %v21012_v4  ;;  %18516 = vmatpush1.bf16.msra.mxu0 %v25716_v45  ;;  %v25790_v45 = vld [vmem:[%s28457_s11 + $0x22c4] ss:$8 sps:$4 sm:$0xff]   ;;  %v25791_v4 = vld [vmem:[%s28457_s11 + $0x23c0] ss:$8 sps:$4 sm:$0xff]  }
 0x494   : > { %18557 = vmatpush1.bf16.msra.mxu1 %v25719_v3  ;;  %18517 = vmatprep.subr.bf16.mxu0 %v25724_v53  ;;  %v25793_v3 = vld [vmem:[%s28457_s11 + $0x23c4] ss:$8 sps:$4 sm:$0xff]   ;;  %v25796_v53 = vld [vmem:[%s28457_s11 + $0x22d4] ss:$8 sps:$4 sm:$0xff]  }
 0x495   : > { %18558 = vmatprep.subr.bf16.mxu1 %v25727_v10  ;;  %18547 = vmatprep.mubr.bf16.mxu0 %v21015_v51  ;;  %v25799_v10 = vld [vmem:[%s28457_s11 + $0x23d4] ss:$8 sps:$4 sm:$0xff]   ;;  %v25794_v51 = vld [vmem:[%s28457_s11 + $0x22d0] ss:$8 sps:$4 sm:$0xff]  }
 0x496   : > { %18588 = vmatprep.mubr.bf16.mxu1 %v21017_v12  ;;  %v25797_v12 = vld [vmem:[%s28457_s11 + $0x23d0] ss:$8 sps:$4 sm:$0xff]  }
 0x497   : > { %18518 = vmatpush1.bf16.msra.mxu0 %v25722_v35  ;;  %v25802_v35 = vld [vmem:[%s28457_s11 + $0x22e4] ss:$8 sps:$4 sm:$0xff]  }
 0x498   : > { %18559 = vmatpush1.bf16.msra.mxu1 %v25725_v37  ;;  %18519 = vmatprep.subr.bf16.mxu0 %v25730_v17  ;;  %v25805_v37 = vld [vmem:[%s28457_s11 + $0x23e4] ss:$8 sps:$4 sm:$0xff]   ;;  %v25800_v17 = vld [vmem:[%s28457_s11 + $0x22e0] ss:$8 sps:$4 sm:$0xff]  }
 0x499   : > { %18560 = vmatprep.subr.bf16.mxu1 %v25733_v40  ;;  %v25803_v40 = vld [vmem:[%s28457_s11 + $0x23e0] ss:$8 sps:$4 sm:$0xff]  }
 0x49b   : > { %18520 = vmatpush1.bf16.msra.mxu0 %v25728_v57  ;;  %v25808_v57 = vld [vmem:[%s28457_s11 + $0x22f4] ss:$8 sps:$4 sm:$0xff]  }
 0x49c   : > { %18561 = vmatpush1.bf16.msra.mxu1 %v25731_v16  ;;  %18521 = vmatprep.subr.bf16.mxu0 %v25736_v32  ;;  %v25811_v16 = vld [vmem:[%s28457_s11 + $0x23f4] ss:$8 sps:$4 sm:$0xff]   ;;  %v25806_v32 = vld [vmem:[%s28457_s11 + $0x22f0] ss:$8 sps:$4 sm:$0xff]  }
 0x49d   : > { %18562 = vmatprep.subr.bf16.mxu1 %v25739_v41  ;;  %v25809_v41 = vld [vmem:[%s28457_s11 + $0x23f0] ss:$8 sps:$4 sm:$0xff]  }
 0x49f   : > { %18522 = vmatpush1.bf16.msra.mxu0 %v25734_v23  ;;  %v25818_v23 = vld [vmem:[%s28457_s11 + $0x2404] ss:$8 sps:$4 sm:$0xff]  }
 0x4a0   : > { %18563 = vmatpush1.bf16.msra.mxu1 %v25737_v44  ;;  %18523 = vmatprep.subr.bf16.mxu0 %v25742_v63  ;;  %v25821_v44 = vld [vmem:[%s28457_s11 + $0x2504] ss:$8 sps:$4 sm:$0xff]   ;;  %v25816_v63 = vld [vmem:[%s28457_s11 + $0x2400] ss:$8 sps:$4 sm:$0xff]  }
 0x4a1   : > { %18564 = vmatprep.subr.bf16.mxu1 %v25745_v22  ;;  %v25819_v22 = vld [vmem:[%s28457_s11 + $0x2500] ss:$8 sps:$4 sm:$0xff]  }
 0x4a3   : > { %18524 = vmatpush1.bf16.msra.mxu0 %v25740_v47  ;;  %v21014_v47 = vcombine.low %v29883_v7, %v29883_v7 }
 0x4a4   : > { %18565 = vmatpush1.bf16.msra.mxu1 %v25743_v33  ;;  %18525 = vmatprep.subr.bf16.mxu0 %v25748_v28  ;;  %v21016_v33 = vcombine.low %v29886_v34, %v29886_v34  ;;  %v29967_v28 = vld [vmem:[%s28474_s27 + $0x120] sm:$0xff] }
 0x4a5   : > { %18566 = vmatprep.subr.bf16.mxu1 %v25751_v50  ;;  %v18221_v39 = vpop.f32.mrb[52].mxu0  ;;  %v29970_v50 = vld [vmem:[%s28474_s27 + $0x128] sm:$0xff]  ;;  %v21019_v7 = vcombine.high %v29967_v28, %v29967_v28 }
 0x4a6   : > { %v18262_v36 = vpop.f32.mrb[52].mxu1  ;;  %v18222_v58 = vadd.f32 %v18221_v39, %v29834_v46  ;;  %v18223_v59 = vpop.f32.mrb[53].mxu0  ;;  %v25760_v46 = vld [vmem:[%s28457_s11 + $0x2274] ss:$8 sps:$4 sm:$0xff]   ;;  %v21021_v34 = vcombine.high %v29970_v50, %v29970_v50  ;;  %v25830_v39 = vld [vmem:[%s28457_s11 + $0x2424] ss:$8 sps:$4 sm:$0xff]  }
 0x4a7   : > { %v18264_v43 = vpop.f32.mrb[53].mxu1  ;;  %v18224_v62 = vadd.f32 %v18223_v59, %v29838_v1  ;;  %v18225_v19 = vpop.f32.mrb[54].mxu0  ;;  %18526 = vmatpush1.bf16.msra.mxu0 %v25746_v9  ;;  %v25758_v1 = vld [vmem:[%s28457_s11 + $0x2270] ss:$8 sps:$4 sm:$0xff]   ;;  %v25824_v9 = vld [vmem:[%s28457_s11 + $0x2414] ss:$8 sps:$4 sm:$0xff]  }
 0x4a8   : > { %v18266_v42 = vpop.f32.mrb[54].mxu1  ;;  %18567 = vmatpush1.bf16.msra.mxu1 %v25749_v30  ;;  %v29918_v0 = vadd.f32 %v18262_v36, %v18222_v58  ;;  %v18226_v2 = vpop.f32.mrb[55].mxu0  ;;  %18527 = vmatprep.subr.bf16.mxu0 %v25754_v52  ;;  %v25827_v30 = vld [vmem:[%s28457_s11 + $0x2514] ss:$8 sps:$4 sm:$0xff]   ;;  %v25822_v52 = vld [vmem:[%s28457_s11 + $0x2410] ss:$8 sps:$4 sm:$0xff]  }
 0x4a9   : > { %v18267_v49 = vpop.f32.mrb[55].mxu1  ;;  %18568 = vmatprep.subr.bf16.mxu1 %v25757_v55  ;;  %v29922_v27 = vadd.f32 %v18264_v43, %v18224_v62  ;;  %v25825_v55 = vld [vmem:[%s28457_s11 + $0x2510] ss:$8 sps:$4 sm:$0xff]   ;;  %v25833_v36 = vld [vmem:[%s28457_s11 + $0x2524] ss:$8 sps:$4 sm:$0xff]  }
 0x4aa   : > { %v25836_v58 = vld [vmem:[%s28457_s11 + $0x2434] ss:$8 sps:$4 sm:$0xff]   ;;  %v25834_v43 = vld [vmem:[%s28457_s11 + $0x2430] ss:$8 sps:$4 sm:$0xff]   ;;  %v25842_v19 = vld [vmem:[%s28457_s11 + $0x2444] ss:$8 sps:$4 sm:$0xff]  }
 0x4ab   : > { %18528 = vmatpush1.bf16.msra.mxu0 %v25752_v13  ;;  %v25828_v13 = vld [vmem:[%s28457_s11 + $0x2420] ss:$8 sps:$4 sm:$0xff]   ;;  %v25839_v59 = vld [vmem:[%s28457_s11 + $0x2534] ss:$8 sps:$4 sm:$0xff]   ;;  %v25837_v62 = vld [vmem:[%s28457_s11 + $0x2530] ss:$8 sps:$4 sm:$0xff]  }
 0x4ac   : > { %18569 = vmatpush1.bf16.msra.mxu1 %v25755_v38  ;;  %18529 = vmatprep.subr.bf16.mxu0 %v25760_v46  ;;  %v25831_v38 = vld [vmem:[%s28457_s11 + $0x2520] ss:$8 sps:$4 sm:$0xff]   ;;  %v25845_v42 = vld [vmem:[%s28457_s11 + $0x2544] ss:$8 sps:$4 sm:$0xff]   ;;  %v25848_v46 = vld [vmem:[%s28457_s11 + $0x2454] ss:$8 sps:$4 sm:$0xff]  }
 0x4ad   : > { %18570 = vmatprep.subr.bf16.mxu1 %v25763_v6  ;;  %v25840_v2 = vld [vmem:[%s28457_s11 + $0x2440] ss:$8 sps:$4 sm:$0xff]   ;;  %v25851_v6 = vld [vmem:[%s28457_s11 + $0x2554] ss:$8 sps:$4 sm:$0xff]  }
 0x4ae   : > { %v25843_v49 = vld [vmem:[%s28457_s11 + $0x2540] ss:$8 sps:$4 sm:$0xff]  }
 0x4af   : > { %18530 = vmatpush1.bf16.msra.mxu0 %v25758_v1  ;;  %v25846_v1 = vld [vmem:[%s28457_s11 + $0x2450] ss:$8 sps:$4 sm:$0xff]  }
 0x4b0   : > { %18571 = vmatpush1.bf16.msra.mxu1 %v25761_v48  ;;  %18531 = vmatprep.subr.bf16.mxu0 %v25766_v8  ;;  %v25849_v48 = vld [vmem:[%s28457_s11 + $0x2550] ss:$8 sps:$4 sm:$0xff]   ;;  %v25854_v8 = vld [vmem:[%s28457_s11 + $0x2464] ss:$8 sps:$4 sm:$0xff]  }
 0x4b1   : > { %18572 = vmatprep.subr.bf16.mxu1 %v25769_v11  ;;  %v25857_v11 = vld [vmem:[%s28457_s11 + $0x2564] ss:$8 sps:$4 sm:$0xff]  }
 0x4b3   : > { %18532 = vmatpush1.bf16.msra.mxu0 %v25764_v25 }
 0x4b4   : > { %18573 = vmatpush1.bf16.msra.mxu1 %v25767_v54  ;;  %18533 = vmatprep.subr.bf16.mxu0 %v25772_v26  ;;  %v25852_v26 = vld [vmem:[%s28457_s11 + $0x2460] ss:$8 sps:$4 sm:$0xff]  }
 0x4b5   : > { %18574 = vmatprep.subr.bf16.mxu1 %v25775_v56  ;;  %v25855_v56 = vld [vmem:[%s28457_s11 + $0x2560] ss:$8 sps:$4 sm:$0xff]  }
 0x4b7   : > { %18534 = vmatpush1.bf16.msra.mxu0 %v25770_v14 }
 0x4b8   : > { %18575 = vmatpush1.bf16.msra.mxu1 %v25773_v15  ;;  %18535 = vmatprep.subr.bf16.mxu0 %v25778_v61 }
 0x4b9   : > { %18576 = vmatprep.subr.bf16.mxu1 %v25781_v18 }
 0x4bb   : > { %18536 = vmatpush1.bf16.msra.mxu0 %v25776_v31 }
 0x4bc   : > { %18577 = vmatpush1.bf16.msra.mxu1 %v25779_v60  ;;  %18537 = vmatprep.subr.bf16.mxu0 %v25784_v20 }
 0x4bd   : > { %18578 = vmatprep.subr.bf16.mxu1 %v25787_v21 }
 0x4bf   : > { %18538 = vmatpush1.bf16.msra.mxu0 %v25782_v5 }
 0x4c0   : > { %18579 = vmatpush1.bf16.msra.mxu1 %v25785_v24  ;;  %18539 = vmatprep.subr.bf16.mxu0 %v25790_v45  ;;  %v25863_v24 = vld [vmem:[%s28457_s11 + $0x2574] ss:$8 sps:$4 sm:$0xff]  }
 0x4c1   : > { %18580 = vmatprep.subr.bf16.mxu1 %v25793_v3  ;;  %v25861_v3 = vld [vmem:[%s28457_s11 + $0x2570] ss:$8 sps:$4 sm:$0xff]  }
 0x4c3   : > { %18540 = vmatpush1.bf16.msra.mxu0 %v25788_v29  ;;  %v25866_v29 = vld [vmem:[%s28457_s11 + $0x2484] ss:$8 sps:$4 sm:$0xff]  }
 0x4c4   : > { %18581 = vmatpush1.bf16.msra.mxu1 %v25791_v4  ;;  %18541 = vmatprep.subr.bf16.mxu0 %v25796_v53  ;;  %v25869_v4 = vld [vmem:[%s28457_s11 + $0x2584] ss:$8 sps:$4 sm:$0xff]   ;;  %v25864_v53 = vld [vmem:[%s28457_s11 + $0x2480] ss:$8 sps:$4 sm:$0xff]  }
 0x4c5   : > { %18582 = vmatprep.subr.bf16.mxu1 %v25799_v10  ;;  %v25867_v10 = vld [vmem:[%s28457_s11 + $0x2580] ss:$8 sps:$4 sm:$0xff]  }
 0x4c7   : > { %18542 = vmatpush1.bf16.msra.mxu0 %v25794_v51  ;;  %v25872_v51 = vld [vmem:[%s28457_s11 + $0x2494] ss:$8 sps:$4 sm:$0xff]  }
 0x4c8   : > { %18583 = vmatpush1.bf16.msra.mxu1 %v25797_v12  ;;  %18543 = vmatprep.subr.bf16.mxu0 %v25802_v35  ;;  %v25875_v12 = vld [vmem:[%s28457_s11 + $0x2594] ss:$8 sps:$4 sm:$0xff]   ;;  %v25870_v35 = vld [vmem:[%s28457_s11 + $0x2490] ss:$8 sps:$4 sm:$0xff]  }
 0x4c9   : > { %18584 = vmatprep.subr.bf16.mxu1 %v25805_v37  ;;  %v25873_v37 = vld [vmem:[%s28457_s11 + $0x2590] ss:$8 sps:$4 sm:$0xff]  }
 0x4cb   : > { %18544 = vmatpush1.bf16.msra.mxu0 %v25800_v17  ;;  %v25878_v17 = vld [vmem:[%s28457_s11 + $0x24a4] ss:$8 sps:$4 sm:$0xff]  }
 0x4cc   : > { %18585 = vmatpush1.bf16.msra.mxu1 %v25803_v40  ;;  %18545 = vmatprep.subr.bf16.mxu0 %v25808_v57  ;;  %v25881_v40 = vld [vmem:[%s28457_s11 + $0x25a4] ss:$8 sps:$4 sm:$0xff]   ;;  %v25876_v57 = vld [vmem:[%s28457_s11 + $0x24a0] ss:$8 sps:$4 sm:$0xff]  }
 0x4cd   : > { %18586 = vmatprep.subr.bf16.mxu1 %v25811_v16  ;;  %v25879_v16 = vld [vmem:[%s28457_s11 + $0x25a0] ss:$8 sps:$4 sm:$0xff]  }
 0x4cf   : > { %18546 = vmatpush1.bf16.msra.mxu0 %v25806_v32  ;;  %v25884_v32 = vld [vmem:[%s28457_s11 + $0x24b4] ss:$8 sps:$4 sm:$0xff]  }
 0x4d0   : > { %18587 = vmatpush1.bf16.msra.mxu1 %v25809_v41  ;;  %18597 = vmatprep.subr.bf16.mxu0 %v25818_v23  ;;  %v25887_v41 = vld [vmem:[%s28457_s11 + $0x25b4] ss:$8 sps:$4 sm:$0xff]   ;;  %v25882_v23 = vld [vmem:[%s28457_s11 + $0x24b0] ss:$8 sps:$4 sm:$0xff]  }
 0x4d1   : > { %18638 = vmatprep.subr.bf16.mxu1 %v25821_v44  ;;  %v25885_v44 = vld [vmem:[%s28457_s11 + $0x25b0] ss:$8 sps:$4 sm:$0xff]  }
 0x4d2   : > { %18548 = vmatmul.mubr.bf16.vlgmr.msra.gmra.mrb[68].mxu0 %v21014_v47  ;;  %v25888_v47 = vld [vmem:[%s28457_s11 + $0x24c0] ss:$8 sps:$4 sm:$0xff]  }
 0x4d3   : > { %18589 = vmatmul.mubr.bf16.vlgmr.msra.gmra.mrb[68].mxu1 %v21016_v33  ;;  %18598 = vmatpush1.bf16.msra.mxu0 %v25816_v63  ;;  %v25890_v63 = vld [vmem:[%s28457_s11 + $0x24c4] ss:$8 sps:$4 sm:$0xff]   ;;  %v25891_v33 = vld [vmem:[%s28457_s11 + $0x25c0] ss:$8 sps:$4 sm:$0xff]  }
 0x4d4   : > { %18639 = vmatpush1.bf16.msra.mxu1 %v25819_v22  ;;  %18599 = vmatprep.subr.bf16.mxu0 %v25824_v9  ;;  %v25893_v22 = vld [vmem:[%s28457_s11 + $0x25c4] ss:$8 sps:$4 sm:$0xff]   ;;  %v25896_v9 = vld [vmem:[%s28457_s11 + $0x24d4] ss:$8 sps:$4 sm:$0xff]  }
 0x4d5   : > { %18640 = vmatprep.subr.bf16.mxu1 %v25827_v30  ;;  %18629 = vmatprep.mubr.bf16.mxu0 %v21019_v7  ;;  %v25899_v30 = vld [vmem:[%s28457_s11 + $0x25d4] ss:$8 sps:$4 sm:$0xff]   ;;  %v25894_v7 = vld [vmem:[%s28457_s11 + $0x24d0] ss:$8 sps:$4 sm:$0xff]  }
 0x4d6   : > { %18670 = vmatprep.mubr.bf16.mxu1 %v21021_v34  ;;  %v25897_v34 = vld [vmem:[%s28457_s11 + $0x25d0] ss:$8 sps:$4 sm:$0xff]  }
 0x4d7   : > { %18600 = vmatpush1.bf16.msra.mxu0 %v25822_v52  ;;  %v25902_v52 = vld [vmem:[%s28457_s11 + $0x24e4] ss:$8 sps:$4 sm:$0xff]  }
 0x4d8   : > { %18641 = vmatpush1.bf16.msra.mxu1 %v25825_v55  ;;  %18601 = vmatprep.subr.bf16.mxu0 %v25830_v39  ;;  %v25905_v55 = vld [vmem:[%s28457_s11 + $0x25e4] ss:$8 sps:$4 sm:$0xff]   ;;  %v25900_v39 = vld [vmem:[%s28457_s11 + $0x24e0] ss:$8 sps:$4 sm:$0xff]  }
 0x4d9   : > { %18642 = vmatprep.subr.bf16.mxu1 %v25833_v36  ;;  %v25903_v36 = vld [vmem:[%s28457_s11 + $0x25e0] ss:$8 sps:$4 sm:$0xff]  }
 0x4db   : > { %18602 = vmatpush1.bf16.msra.mxu0 %v25828_v13  ;;  %v25908_v13 = vld [vmem:[%s28457_s11 + $0x24f4] ss:$8 sps:$4 sm:$0xff]  }
 0x4dc   : > { %18643 = vmatpush1.bf16.msra.mxu1 %v25831_v38  ;;  %18603 = vmatprep.subr.bf16.mxu0 %v25836_v58  ;;  %v25911_v38 = vld [vmem:[%s28457_s11 + $0x25f4] ss:$8 sps:$4 sm:$0xff]   ;;  %v25906_v58 = vld [vmem:[%s28457_s11 + $0x24f0] ss:$8 sps:$4 sm:$0xff]  }
 0x4dd   : > { %18644 = vmatprep.subr.bf16.mxu1 %v25839_v59  ;;  %v25909_v59 = vld [vmem:[%s28457_s11 + $0x25f0] ss:$8 sps:$4 sm:$0xff]  }
 0x4df   : > { %18604 = vmatpush1.bf16.msra.mxu0 %v25834_v43  ;;  %v25918_v43 = vld [vmem:[%s28457_s11 + $0x2604] ss:$8 sps:$4 sm:$0xff]  }
 0x4e0   : > { %18645 = vmatpush1.bf16.msra.mxu1 %v25837_v62  ;;  %18605 = vmatprep.subr.bf16.mxu0 %v25842_v19  ;;  %v25921_v62 = vld [vmem:[%s28457_s11 + $0x2704] ss:$8 sps:$4 sm:$0xff]   ;;  %v25916_v19 = vld [vmem:[%s28457_s11 + $0x2600] ss:$8 sps:$4 sm:$0xff]  }
 0x4e1   : > { %18646 = vmatprep.subr.bf16.mxu1 %v25845_v42  ;;  %v25919_v42 = vld [vmem:[%s28457_s11 + $0x2700] ss:$8 sps:$4 sm:$0xff]  }
 0x4e3   : > { %18606 = vmatpush1.bf16.msra.mxu0 %v25840_v2  ;;  %v21018_v2 = vcombine.low %v29967_v28, %v29967_v28 }
 0x4e4   : > { %18647 = vmatpush1.bf16.msra.mxu1 %v25843_v49  ;;  %18607 = vmatprep.subr.bf16.mxu0 %v25848_v46  ;;  %v21020_v49 = vcombine.low %v29970_v50, %v29970_v50  ;;  %v30051_v46 = vld [vmem:[%s28474_s27 + $0x130] sm:$0xff] }
 0x4e5   : > { %18648 = vmatprep.subr.bf16.mxu1 %v25851_v6  ;;  %v18303_v25 = vpop.f32.mrb[56].mxu0  ;;  %v30054_v6 = vld [vmem:[%s28474_s27 + $0x138] sm:$0xff]  ;;  %v21023_v28 = vcombine.high %v30051_v46, %v30051_v46 }
 0x4e6   : > { %v18344_v54 = vpop.f32.mrb[56].mxu1  ;;  %v18304_v14 = vadd.f32 %v18303_v25, %v29918_v0  ;;  %v18305_v15 = vpop.f32.mrb[57].mxu0  ;;  %v25860_v0 = vld [vmem:[%s28457_s11 + $0x2474] ss:$8 sps:$4 sm:$0xff]   ;;  %v21025_v50 = vcombine.high %v30054_v6, %v30054_v6  ;;  %v25930_v25 = vld [vmem:[%s28457_s11 + $0x2624] ss:$8 sps:$4 sm:$0xff]  }
 0x4e7   : > { %v18346_v61 = vpop.f32.mrb[57].mxu1  ;;  %v18306_v18 = vadd.f32 %v18305_v15, %v29922_v27  ;;  %v18307_v31 = vpop.f32.mrb[58].mxu0  ;;  %18608 = vmatpush1.bf16.msra.mxu0 %v25846_v1  ;;  %v25858_v27 = vld [vmem:[%s28457_s11 + $0x2470] ss:$8 sps:$4 sm:$0xff]   ;;  %v25924_v1 = vld [vmem:[%s28457_s11 + $0x2614] ss:$8 sps:$4 sm:$0xff]  }
 0x4e8   : > { %v18348_v60 = vpop.f32.mrb[58].mxu1  ;;  %18649 = vmatpush1.bf16.msra.mxu1 %v25849_v48  ;;  %v30002_v20 = vadd.f32 %v18344_v54, %v18304_v14  ;;  %v18308_v21 = vpop.f32.mrb[59].mxu0  ;;  %18609 = vmatprep.subr.bf16.mxu0 %v25854_v8  ;;  %v25927_v48 = vld [vmem:[%s28457_s11 + $0x2714] ss:$8 sps:$4 sm:$0xff]   ;;  %v25922_v8 = vld [vmem:[%s28457_s11 + $0x2610] ss:$8 sps:$4 sm:$0xff]  }
 0x4e9   : > { %v18349_v5 = vpop.f32.mrb[59].mxu1  ;;  %18650 = vmatprep.subr.bf16.mxu1 %v25857_v11  ;;  %v30006_v45 = vadd.f32 %v18346_v61, %v18306_v18  ;;  %v25925_v11 = vld [vmem:[%s28457_s11 + $0x2710] ss:$8 sps:$4 sm:$0xff]   ;;  %v25933_v54 = vld [vmem:[%s28457_s11 + $0x2724] ss:$8 sps:$4 sm:$0xff]  }
 0x4ea   : > { %v25936_v14 = vld [vmem:[%s28457_s11 + $0x2634] ss:$8 sps:$4 sm:$0xff]   ;;  %v25934_v61 = vld [vmem:[%s28457_s11 + $0x2630] ss:$8 sps:$4 sm:$0xff]   ;;  %v25942_v31 = vld [vmem:[%s28457_s11 + $0x2644] ss:$8 sps:$4 sm:$0xff]  }
 0x4eb   : > { %18610 = vmatpush1.bf16.msra.mxu0 %v25852_v26  ;;  %v25928_v26 = vld [vmem:[%s28457_s11 + $0x2620] ss:$8 sps:$4 sm:$0xff]   ;;  %v25939_v15 = vld [vmem:[%s28457_s11 + $0x2734] ss:$8 sps:$4 sm:$0xff]   ;;  %v25937_v18 = vld [vmem:[%s28457_s11 + $0x2730] ss:$8 sps:$4 sm:$0xff]  }
 0x4ec   : > { %18651 = vmatpush1.bf16.msra.mxu1 %v25855_v56  ;;  %18611 = vmatprep.subr.bf16.mxu0 %v25860_v0  ;;  %v25931_v56 = vld [vmem:[%s28457_s11 + $0x2720] ss:$8 sps:$4 sm:$0xff]   ;;  %v25945_v60 = vld [vmem:[%s28457_s11 + $0x2744] ss:$8 sps:$4 sm:$0xff]   ;;  %v25948_v0 = vld [vmem:[%s28457_s11 + $0x2654] ss:$8 sps:$4 sm:$0xff]  }
 0x4ed   : > { %18652 = vmatprep.subr.bf16.mxu1 %v25863_v24  ;;  %v25940_v21 = vld [vmem:[%s28457_s11 + $0x2640] ss:$8 sps:$4 sm:$0xff]   ;;  %v25951_v24 = vld [vmem:[%s28457_s11 + $0x2754] ss:$8 sps:$4 sm:$0xff]  }
 0x4ee   : > { %v25943_v5 = vld [vmem:[%s28457_s11 + $0x2740] ss:$8 sps:$4 sm:$0xff]  }
 0x4ef   : > { %18612 = vmatpush1.bf16.msra.mxu0 %v25858_v27  ;;  %v25946_v27 = vld [vmem:[%s28457_s11 + $0x2650] ss:$8 sps:$4 sm:$0xff]  }
 0x4f0   : > { %18653 = vmatpush1.bf16.msra.mxu1 %v25861_v3  ;;  %18613 = vmatprep.subr.bf16.mxu0 %v25866_v29  ;;  %v25949_v3 = vld [vmem:[%s28457_s11 + $0x2750] ss:$8 sps:$4 sm:$0xff]   ;;  %v25954_v29 = vld [vmem:[%s28457_s11 + $0x2664] ss:$8 sps:$4 sm:$0xff]  }
 0x4f1   : > { %18654 = vmatprep.subr.bf16.mxu1 %v25869_v4  ;;  %v25957_v4 = vld [vmem:[%s28457_s11 + $0x2764] ss:$8 sps:$4 sm:$0xff]  }
 0x4f3   : > { %18614 = vmatpush1.bf16.msra.mxu0 %v25864_v53 }
 0x4f4   : > { %18655 = vmatpush1.bf16.msra.mxu1 %v25867_v10  ;;  %18615 = vmatprep.subr.bf16.mxu0 %v25872_v51  ;;  %v25952_v51 = vld [vmem:[%s28457_s11 + $0x2660] ss:$8 sps:$4 sm:$0xff]  }
 0x4f5   : > { %18656 = vmatprep.subr.bf16.mxu1 %v25875_v12  ;;  %v25955_v12 = vld [vmem:[%s28457_s11 + $0x2760] ss:$8 sps:$4 sm:$0xff]  }
 0x4f7   : > { %18616 = vmatpush1.bf16.msra.mxu0 %v25870_v35 }
 0x4f8   : > { %18657 = vmatpush1.bf16.msra.mxu1 %v25873_v37  ;;  %18617 = vmatprep.subr.bf16.mxu0 %v25878_v17 }
 0x4f9   : > { %18658 = vmatprep.subr.bf16.mxu1 %v25881_v40 }
 0x4fb   : > { %18618 = vmatpush1.bf16.msra.mxu0 %v25876_v57 }
 0x4fc   : > { %18659 = vmatpush1.bf16.msra.mxu1 %v25879_v16  ;;  %18619 = vmatprep.subr.bf16.mxu0 %v25884_v32 }
 0x4fd   : > { %18660 = vmatprep.subr.bf16.mxu1 %v25887_v41 }
 0x4ff   : > { %18620 = vmatpush1.bf16.msra.mxu0 %v25882_v23 }
 0x500   : > { %18661 = vmatpush1.bf16.msra.mxu1 %v25885_v44  ;;  %18621 = vmatprep.subr.bf16.mxu0 %v25890_v63  ;;  %v25963_v44 = vld [vmem:[%s28457_s11 + $0x2774] ss:$8 sps:$4 sm:$0xff]  }
 0x501   : > { %18662 = vmatprep.subr.bf16.mxu1 %v25893_v22  ;;  %v25961_v22 = vld [vmem:[%s28457_s11 + $0x2770] ss:$8 sps:$4 sm:$0xff]  }
 0x503   : > { %18622 = vmatpush1.bf16.msra.mxu0 %v25888_v47  ;;  %v25966_v47 = vld [vmem:[%s28457_s11 + $0x2684] ss:$8 sps:$4 sm:$0xff]  }
 0x504   : > { %18663 = vmatpush1.bf16.msra.mxu1 %v25891_v33  ;;  %18623 = vmatprep.subr.bf16.mxu0 %v25896_v9  ;;  %v25969_v33 = vld [vmem:[%s28457_s11 + $0x2784] ss:$8 sps:$4 sm:$0xff]   ;;  %v25964_v9 = vld [vmem:[%s28457_s11 + $0x2680] ss:$8 sps:$4 sm:$0xff]  }
 0x505   : > { %18664 = vmatprep.subr.bf16.mxu1 %v25899_v30  ;;  %v25967_v30 = vld [vmem:[%s28457_s11 + $0x2780] ss:$8 sps:$4 sm:$0xff]  }
 0x507   : > { %18624 = vmatpush1.bf16.msra.mxu0 %v25894_v7  ;;  %v25972_v7 = vld [vmem:[%s28457_s11 + $0x2694] ss:$8 sps:$4 sm:$0xff]  }
 0x508   : > { %18665 = vmatpush1.bf16.msra.mxu1 %v25897_v34  ;;  %18625 = vmatprep.subr.bf16.mxu0 %v25902_v52  ;;  %v25975_v34 = vld [vmem:[%s28457_s11 + $0x2794] ss:$8 sps:$4 sm:$0xff]   ;;  %v25970_v52 = vld [vmem:[%s28457_s11 + $0x2690] ss:$8 sps:$4 sm:$0xff]  }
 0x509   : > { %18666 = vmatprep.subr.bf16.mxu1 %v25905_v55  ;;  %v25973_v55 = vld [vmem:[%s28457_s11 + $0x2790] ss:$8 sps:$4 sm:$0xff]  }
 0x50b   : > { %18626 = vmatpush1.bf16.msra.mxu0 %v25900_v39  ;;  %v25978_v39 = vld [vmem:[%s28457_s11 + $0x26a4] ss:$8 sps:$4 sm:$0xff]  }
 0x50c   : > { %18667 = vmatpush1.bf16.msra.mxu1 %v25903_v36  ;;  %18627 = vmatprep.subr.bf16.mxu0 %v25908_v13  ;;  %v25981_v36 = vld [vmem:[%s28457_s11 + $0x27a4] ss:$8 sps:$4 sm:$0xff]   ;;  %v25976_v13 = vld [vmem:[%s28457_s11 + $0x26a0] ss:$8 sps:$4 sm:$0xff]  }
 0x50d   : > { %18668 = vmatprep.subr.bf16.mxu1 %v25911_v38  ;;  %v25979_v38 = vld [vmem:[%s28457_s11 + $0x27a0] ss:$8 sps:$4 sm:$0xff]  }
 0x50f   : > { %18628 = vmatpush1.bf16.msra.mxu0 %v25906_v58  ;;  %v25984_v58 = vld [vmem:[%s28457_s11 + $0x26b4] ss:$8 sps:$4 sm:$0xff]  }
 0x510   : > { %18669 = vmatpush1.bf16.msra.mxu1 %v25909_v59  ;;  %18679 = vmatprep.subr.bf16.mxu0 %v25918_v43  ;;  %v25987_v59 = vld [vmem:[%s28457_s11 + $0x27b4] ss:$8 sps:$4 sm:$0xff]   ;;  %v25982_v43 = vld [vmem:[%s28457_s11 + $0x26b0] ss:$8 sps:$4 sm:$0xff]  }
 0x511   : > { %18720 = vmatprep.subr.bf16.mxu1 %v25921_v62  ;;  %v25985_v62 = vld [vmem:[%s28457_s11 + $0x27b0] ss:$8 sps:$4 sm:$0xff]  }
 0x512   : > { %18630 = vmatmul.mubr.bf16.vlgmr.msra.gmra.mrb[72].mxu0 %v21018_v2  ;;  %v25988_v2 = vld [vmem:[%s28457_s11 + $0x26c0] ss:$8 sps:$4 sm:$0xff]  }
 0x513   : > { %18671 = vmatmul.mubr.bf16.vlgmr.msra.gmra.mrb[72].mxu1 %v21020_v49  ;;  %18680 = vmatpush1.bf16.msra.mxu0 %v25916_v19  ;;  %v25990_v19 = vld [vmem:[%s28457_s11 + $0x26c4] ss:$8 sps:$4 sm:$0xff]   ;;  %v25991_v49 = vld [vmem:[%s28457_s11 + $0x27c0] ss:$8 sps:$4 sm:$0xff]  }
 0x514   : > { %18721 = vmatpush1.bf16.msra.mxu1 %v25919_v42  ;;  %18681 = vmatprep.subr.bf16.mxu0 %v25924_v1  ;;  %v25993_v42 = vld [vmem:[%s28457_s11 + $0x27c4] ss:$8 sps:$4 sm:$0xff]   ;;  %v25996_v1 = vld [vmem:[%s28457_s11 + $0x26d4] ss:$8 sps:$4 sm:$0xff]  }
 0x515   : > { %18722 = vmatprep.subr.bf16.mxu1 %v25927_v48  ;;  %18711 = vmatprep.mubr.bf16.mxu0 %v21023_v28  ;;  %v25999_v48 = vld [vmem:[%s28457_s11 + $0x27d4] ss:$8 sps:$4 sm:$0xff]   ;;  %v25994_v28 = vld [vmem:[%s28457_s11 + $0x26d0] ss:$8 sps:$4 sm:$0xff]  }
 0x516   : > { %18752 = vmatprep.mubr.bf16.mxu1 %v21025_v50  ;;  %v25997_v50 = vld [vmem:[%s28457_s11 + $0x27d0] ss:$8 sps:$4 sm:$0xff]  }
 0x517   : > { %18682 = vmatpush1.bf16.msra.mxu0 %v25922_v8  ;;  %v26002_v8 = vld [vmem:[%s28457_s11 + $0x26e4] ss:$8 sps:$4 sm:$0xff]  }
 0x518   : > { %18723 = vmatpush1.bf16.msra.mxu1 %v25925_v11  ;;  %18683 = vmatprep.subr.bf16.mxu0 %v25930_v25  ;;  %v26005_v11 = vld [vmem:[%s28457_s11 + $0x27e4] ss:$8 sps:$4 sm:$0xff]   ;;  %v26000_v25 = vld [vmem:[%s28457_s11 + $0x26e0] ss:$8 sps:$4 sm:$0xff]  }
 0x519   : > { %18724 = vmatprep.subr.bf16.mxu1 %v25933_v54  ;;  %v26003_v54 = vld [vmem:[%s28457_s11 + $0x27e0] ss:$8 sps:$4 sm:$0xff]  }
 0x51b   : > { %18684 = vmatpush1.bf16.msra.mxu0 %v25928_v26  ;;  %v26008_v26 = vld [vmem:[%s28457_s11 + $0x26f4] ss:$8 sps:$4 sm:$0xff]  }
 0x51c   : > { %18725 = vmatpush1.bf16.msra.mxu1 %v25931_v56  ;;  %18685 = vmatprep.subr.bf16.mxu0 %v25936_v14  ;;  %v26011_v56 = vld [vmem:[%s28457_s11 + $0x27f4] ss:$8 sps:$4 sm:$0xff]   ;;  %v26006_v14 = vld [vmem:[%s28457_s11 + $0x26f0] ss:$8 sps:$4 sm:$0xff]  }
 0x51d   : > { %18726 = vmatprep.subr.bf16.mxu1 %v25939_v15  ;;  %v26009_v15 = vld [vmem:[%s28457_s11 + $0x27f0] ss:$8 sps:$4 sm:$0xff]  }
 0x51f   : > { %18686 = vmatpush1.bf16.msra.mxu0 %v25934_v61  ;;  %v26018_v61 = vld [vmem:[%s28457_s11 + $0x2804] ss:$8 sps:$4 sm:$0xff]  }
 0x520   : > { %18727 = vmatpush1.bf16.msra.mxu1 %v25937_v18  ;;  %18687 = vmatprep.subr.bf16.mxu0 %v25942_v31  ;;  %v26021_v18 = vld [vmem:[%s28457_s11 + $0x2904] ss:$8 sps:$4 sm:$0xff]   ;;  %v26016_v31 = vld [vmem:[%s28457_s11 + $0x2800] ss:$8 sps:$4 sm:$0xff]  }
 0x521   : > { %18728 = vmatprep.subr.bf16.mxu1 %v25945_v60  ;;  %v26019_v60 = vld [vmem:[%s28457_s11 + $0x2900] ss:$8 sps:$4 sm:$0xff]  }
 0x523   : > { %18688 = vmatpush1.bf16.msra.mxu0 %v25940_v21  ;;  %v21022_v21 = vcombine.low %v30051_v46, %v30051_v46 }
 0x524   : > { %18729 = vmatpush1.bf16.msra.mxu1 %v25943_v5  ;;  %18689 = vmatprep.subr.bf16.mxu0 %v25948_v0  ;;  %v21024_v5 = vcombine.low %v30054_v6, %v30054_v6  ;;  %v30135_v0 = vld [vmem:[%s28474_s27 + $0x140] sm:$0xff] }
 0x525   : > { %18730 = vmatprep.subr.bf16.mxu1 %v25951_v24  ;;  %v18385_v53 = vpop.f32.mrb[60].mxu0  ;;  %v30138_v24 = vld [vmem:[%s28474_s27 + $0x148] sm:$0xff]  ;;  %v21027_v46 = vcombine.high %v30135_v0, %v30135_v0 }
 0x526   : > { %v18426_v10 = vpop.f32.mrb[60].mxu1  ;;  %v18386_v35 = vadd.f32 %v18385_v53, %v30002_v20  ;;  %v18387_v37 = vpop.f32.mrb[61].mxu0  ;;  %v25960_v20 = vld [vmem:[%s28457_s11 + $0x2674] ss:$8 sps:$4 sm:$0xff]   ;;  %v21029_v6 = vcombine.high %v30138_v24, %v30138_v24  ;;  %v26030_v53 = vld [vmem:[%s28457_s11 + $0x2824] ss:$8 sps:$4 sm:$0xff]  }
 0x527   : > { %v18428_v17 = vpop.f32.mrb[61].mxu1  ;;  %v18388_v40 = vadd.f32 %v18387_v37, %v30006_v45  ;;  %v18389_v57 = vpop.f32.mrb[62].mxu0  ;;  %18690 = vmatpush1.bf16.msra.mxu0 %v25946_v27  ;;  %v25958_v45 = vld [vmem:[%s28457_s11 + $0x2670] ss:$8 sps:$4 sm:$0xff]   ;;  %v26024_v27 = vld [vmem:[%s28457_s11 + $0x2814] ss:$8 sps:$4 sm:$0xff]  }
 0x528   : > { %v18430_v16 = vpop.f32.mrb[62].mxu1  ;;  %18731 = vmatpush1.bf16.msra.mxu1 %v25949_v3  ;;  %v30086_v32 = vadd.f32 %v18426_v10, %v18386_v35  ;;  %v18390_v41 = vpop.f32.mrb[63].mxu0  ;;  %18691 = vmatprep.subr.bf16.mxu0 %v25954_v29  ;;  %v26027_v3 = vld [vmem:[%s28457_s11 + $0x2914] ss:$8 sps:$4 sm:$0xff]   ;;  %v26022_v29 = vld [vmem:[%s28457_s11 + $0x2810] ss:$8 sps:$4 sm:$0xff]  }
 0x529   : > { %v18431_v23 = vpop.f32.mrb[63].mxu1  ;;  %18732 = vmatprep.subr.bf16.mxu1 %v25957_v4  ;;  %v30090_v63 = vadd.f32 %v18428_v17, %v18388_v40  ;;  %v26025_v4 = vld [vmem:[%s28457_s11 + $0x2910] ss:$8 sps:$4 sm:$0xff]   ;;  %v26033_v10 = vld [vmem:[%s28457_s11 + $0x2924] ss:$8 sps:$4 sm:$0xff]  }
 0x52a   : > { %v26036_v35 = vld [vmem:[%s28457_s11 + $0x2834] ss:$8 sps:$4 sm:$0xff]   ;;  %v26034_v17 = vld [vmem:[%s28457_s11 + $0x2830] ss:$8 sps:$4 sm:$0xff]   ;;  %v26042_v57 = vld [vmem:[%s28457_s11 + $0x2844] ss:$8 sps:$4 sm:$0xff]  }
 0x52b   : > { %18692 = vmatpush1.bf16.msra.mxu0 %v25952_v51  ;;  %v26028_v51 = vld [vmem:[%s28457_s11 + $0x2820] ss:$8 sps:$4 sm:$0xff]   ;;  %v26039_v37 = vld [vmem:[%s28457_s11 + $0x2934] ss:$8 sps:$4 sm:$0xff]   ;;  %v26037_v40 = vld [vmem:[%s28457_s11 + $0x2930] ss:$8 sps:$4 sm:$0xff]  }
 0x52c   : > { %18733 = vmatpush1.bf16.msra.mxu1 %v25955_v12  ;;  %18693 = vmatprep.subr.bf16.mxu0 %v25960_v20  ;;  %v26031_v12 = vld [vmem:[%s28457_s11 + $0x2920] ss:$8 sps:$4 sm:$0xff]   ;;  %v26045_v16 = vld [vmem:[%s28457_s11 + $0x2944] ss:$8 sps:$4 sm:$0xff]   ;;  %v26048_v20 = vld [vmem:[%s28457_s11 + $0x2854] ss:$8 sps:$4 sm:$0xff]  }
 0x52d   : > { %18734 = vmatprep.subr.bf16.mxu1 %v25963_v44  ;;  %v26040_v41 = vld [vmem:[%s28457_s11 + $0x2840] ss:$8 sps:$4 sm:$0xff]   ;;  %v26051_v44 = vld [vmem:[%s28457_s11 + $0x2954] ss:$8 sps:$4 sm:$0xff]  }
 0x52e   : > { %v26043_v23 = vld [vmem:[%s28457_s11 + $0x2940] ss:$8 sps:$4 sm:$0xff]  }
 0x52f   : > { %18694 = vmatpush1.bf16.msra.mxu0 %v25958_v45  ;;  %v26046_v45 = vld [vmem:[%s28457_s11 + $0x2850] ss:$8 sps:$4 sm:$0xff]  }
 0x530   : > { %18735 = vmatpush1.bf16.msra.mxu1 %v25961_v22  ;;  %18695 = vmatprep.subr.bf16.mxu0 %v25966_v47  ;;  %v26049_v22 = vld [vmem:[%s28457_s11 + $0x2950] ss:$8 sps:$4 sm:$0xff]   ;;  %v26054_v47 = vld [vmem:[%s28457_s11 + $0x2864] ss:$8 sps:$4 sm:$0xff]  }
 0x531   : > { %18736 = vmatprep.subr.bf16.mxu1 %v25969_v33  ;;  %v26057_v33 = vld [vmem:[%s28457_s11 + $0x2964] ss:$8 sps:$4 sm:$0xff]  }
 0x533   : > { %18696 = vmatpush1.bf16.msra.mxu0 %v25964_v9 }
 0x534   : > { %18737 = vmatpush1.bf16.msra.mxu1 %v25967_v30  ;;  %18697 = vmatprep.subr.bf16.mxu0 %v25972_v7  ;;  %v26052_v7 = vld [vmem:[%s28457_s11 + $0x2860] ss:$8 sps:$4 sm:$0xff]  }
 0x535   : > { %18738 = vmatprep.subr.bf16.mxu1 %v25975_v34  ;;  %v26055_v34 = vld [vmem:[%s28457_s11 + $0x2960] ss:$8 sps:$4 sm:$0xff]  }
 0x537   : > { %18698 = vmatpush1.bf16.msra.mxu0 %v25970_v52 }
 0x538   : > { %18739 = vmatpush1.bf16.msra.mxu1 %v25973_v55  ;;  %18699 = vmatprep.subr.bf16.mxu0 %v25978_v39 }
 0x539   : > { %18740 = vmatprep.subr.bf16.mxu1 %v25981_v36 }
 0x53b   : > { %18700 = vmatpush1.bf16.msra.mxu0 %v25976_v13 }
 0x53c   : > { %18741 = vmatpush1.bf16.msra.mxu1 %v25979_v38  ;;  %18701 = vmatprep.subr.bf16.mxu0 %v25984_v58 }
 0x53d   : > { %18742 = vmatprep.subr.bf16.mxu1 %v25987_v59 }
 0x53f   : > { %18702 = vmatpush1.bf16.msra.mxu0 %v25982_v43 }
 0x540   : > { %18743 = vmatpush1.bf16.msra.mxu1 %v25985_v62  ;;  %18703 = vmatprep.subr.bf16.mxu0 %v25990_v19  ;;  %v26063_v62 = vld [vmem:[%s28457_s11 + $0x2974] ss:$8 sps:$4 sm:$0xff]  }
 0x541   : > { %18744 = vmatprep.subr.bf16.mxu1 %v25993_v42  ;;  %v26061_v42 = vld [vmem:[%s28457_s11 + $0x2970] ss:$8 sps:$4 sm:$0xff]  }
 0x543   : > { %18704 = vmatpush1.bf16.msra.mxu0 %v25988_v2  ;;  %v26066_v2 = vld [vmem:[%s28457_s11 + $0x2884] ss:$8 sps:$4 sm:$0xff]  }
 0x544   : > { %18745 = vmatpush1.bf16.msra.mxu1 %v25991_v49  ;;  %18705 = vmatprep.subr.bf16.mxu0 %v25996_v1  ;;  %v26069_v49 = vld [vmem:[%s28457_s11 + $0x2984] ss:$8 sps:$4 sm:$0xff]   ;;  %v26064_v1 = vld [vmem:[%s28457_s11 + $0x2880] ss:$8 sps:$4 sm:$0xff]  }
 0x545   : > { %18746 = vmatprep.subr.bf16.mxu1 %v25999_v48  ;;  %v26067_v48 = vld [vmem:[%s28457_s11 + $0x2980] ss:$8 sps:$4 sm:$0xff]  }
 0x547   : > { %18706 = vmatpush1.bf16.msra.mxu0 %v25994_v28  ;;  %v26072_v28 = vld [vmem:[%s28457_s11 + $0x2894] ss:$8 sps:$4 sm:$0xff]  }
 0x548   : > { %18747 = vmatpush1.bf16.msra.mxu1 %v25997_v50  ;;  %18707 = vmatprep.subr.bf16.mxu0 %v26002_v8  ;;  %v26075_v50 = vld [vmem:[%s28457_s11 + $0x2994] ss:$8 sps:$4 sm:$0xff]   ;;  %v26070_v8 = vld [vmem:[%s28457_s11 + $0x2890] ss:$8 sps:$4 sm:$0xff]  }
 0x549   : > { %18748 = vmatprep.subr.bf16.mxu1 %v26005_v11  ;;  %v26073_v11 = vld [vmem:[%s28457_s11 + $0x2990] ss:$8 sps:$4 sm:$0xff]  }
 0x54b   : > { %18708 = vmatpush1.bf16.msra.mxu0 %v26000_v25  ;;  %v26078_v25 = vld [vmem:[%s28457_s11 + $0x28a4] ss:$8 sps:$4 sm:$0xff]  }
 0x54c   : > { %18749 = vmatpush1.bf16.msra.mxu1 %v26003_v54  ;;  %18709 = vmatprep.subr.bf16.mxu0 %v26008_v26  ;;  %v26081_v54 = vld [vmem:[%s28457_s11 + $0x29a4] ss:$8 sps:$4 sm:$0xff]   ;;  %v26076_v26 = vld [vmem:[%s28457_s11 + $0x28a0] ss:$8 sps:$4 sm:$0xff]  }
 0x54d   : > { %18750 = vmatprep.subr.bf16.mxu1 %v26011_v56  ;;  %v26079_v56 = vld [vmem:[%s28457_s11 + $0x29a0] ss:$8 sps:$4 sm:$0xff]  }
 0x54f   : > { %18710 = vmatpush1.bf16.msra.mxu0 %v26006_v14  ;;  %v26084_v14 = vld [vmem:[%s28457_s11 + $0x28b4] ss:$8 sps:$4 sm:$0xff]  }
 0x550   : > { %18751 = vmatpush1.bf16.msra.mxu1 %v26009_v15  ;;  %18761 = vmatprep.subr.bf16.mxu0 %v26018_v61  ;;  %v26087_v15 = vld [vmem:[%s28457_s11 + $0x29b4] ss:$8 sps:$4 sm:$0xff]   ;;  %v26082_v61 = vld [vmem:[%s28457_s11 + $0x28b0] ss:$8 sps:$4 sm:$0xff]  }
 0x551   : > { %18802 = vmatprep.subr.bf16.mxu1 %v26021_v18  ;;  %v26085_v18 = vld [vmem:[%s28457_s11 + $0x29b0] ss:$8 sps:$4 sm:$0xff]  }
 0x552   : > { %18712 = vmatmul.mubr.bf16.vlgmr.msra.gmra.mrb[76].mxu0 %v21022_v21  ;;  %v26088_v21 = vld [vmem:[%s28457_s11 + $0x28c0] ss:$8 sps:$4 sm:$0xff]  }
 0x553   : > { %18753 = vmatmul.mubr.bf16.vlgmr.msra.gmra.mrb[76].mxu1 %v21024_v5  ;;  %18762 = vmatpush1.bf16.msra.mxu0 %v26016_v31  ;;  %v26090_v31 = vld [vmem:[%s28457_s11 + $0x28c4] ss:$8 sps:$4 sm:$0xff]   ;;  %v26091_v5 = vld [vmem:[%s28457_s11 + $0x29c0] ss:$8 sps:$4 sm:$0xff]  }
 0x554   : > { %18803 = vmatpush1.bf16.msra.mxu1 %v26019_v60  ;;  %18763 = vmatprep.subr.bf16.mxu0 %v26024_v27  ;;  %v26093_v60 = vld [vmem:[%s28457_s11 + $0x29c4] ss:$8 sps:$4 sm:$0xff]   ;;  %v26096_v27 = vld [vmem:[%s28457_s11 + $0x28d4] ss:$8 sps:$4 sm:$0xff]  }
 0x555   : > { %18804 = vmatprep.subr.bf16.mxu1 %v26027_v3  ;;  %18793 = vmatprep.mubr.bf16.mxu0 %v21027_v46  ;;  %v26099_v3 = vld [vmem:[%s28457_s11 + $0x29d4] ss:$8 sps:$4 sm:$0xff]   ;;  %v26094_v46 = vld [vmem:[%s28457_s11 + $0x28d0] ss:$8 sps:$4 sm:$0xff]  }
 0x556   : > { %18834 = vmatprep.mubr.bf16.mxu1 %v21029_v6  ;;  %v26097_v6 = vld [vmem:[%s28457_s11 + $0x29d0] ss:$8 sps:$4 sm:$0xff]  }
 0x557   : > { %18764 = vmatpush1.bf16.msra.mxu0 %v26022_v29  ;;  %v26102_v29 = vld [vmem:[%s28457_s11 + $0x28e4] ss:$8 sps:$4 sm:$0xff]  }
 0x558   : > { %18805 = vmatpush1.bf16.msra.mxu1 %v26025_v4  ;;  %18765 = vmatprep.subr.bf16.mxu0 %v26030_v53  ;;  %v26105_v4 = vld [vmem:[%s28457_s11 + $0x29e4] ss:$8 sps:$4 sm:$0xff]   ;;  %v26100_v53 = vld [vmem:[%s28457_s11 + $0x28e0] ss:$8 sps:$4 sm:$0xff]  }
 0x559   : > { %18806 = vmatprep.subr.bf16.mxu1 %v26033_v10  ;;  %v26103_v10 = vld [vmem:[%s28457_s11 + $0x29e0] ss:$8 sps:$4 sm:$0xff]  }
 0x55b   : > { %18766 = vmatpush1.bf16.msra.mxu0 %v26028_v51  ;;  %v26108_v51 = vld [vmem:[%s28457_s11 + $0x28f4] ss:$8 sps:$4 sm:$0xff]  }
 0x55c   : > { %18807 = vmatpush1.bf16.msra.mxu1 %v26031_v12  ;;  %18767 = vmatprep.subr.bf16.mxu0 %v26036_v35  ;;  %v26111_v12 = vld [vmem:[%s28457_s11 + $0x29f4] ss:$8 sps:$4 sm:$0xff]   ;;  %v26106_v35 = vld [vmem:[%s28457_s11 + $0x28f0] ss:$8 sps:$4 sm:$0xff]  }
 0x55d   : > { %18808 = vmatprep.subr.bf16.mxu1 %v26039_v37  ;;  %v26109_v37 = vld [vmem:[%s28457_s11 + $0x29f0] ss:$8 sps:$4 sm:$0xff]  }
 0x55f   : > { %18768 = vmatpush1.bf16.msra.mxu0 %v26034_v17  ;;  %v26118_v17 = vld [vmem:[%s28457_s11 + $0x2a04] ss:$8 sps:$4 sm:$0xff]  }
 0x560   : > { %18809 = vmatpush1.bf16.msra.mxu1 %v26037_v40  ;;  %18769 = vmatprep.subr.bf16.mxu0 %v26042_v57  ;;  %v26121_v40 = vld [vmem:[%s28457_s11 + $0x2b04] ss:$8 sps:$4 sm:$0xff]   ;;  %v26116_v57 = vld [vmem:[%s28457_s11 + $0x2a00] ss:$8 sps:$4 sm:$0xff]  }
 0x561   : > { %18810 = vmatprep.subr.bf16.mxu1 %v26045_v16  ;;  %v26119_v16 = vld [vmem:[%s28457_s11 + $0x2b00] ss:$8 sps:$4 sm:$0xff]  }
 0x563   : > { %18770 = vmatpush1.bf16.msra.mxu0 %v26040_v41  ;;  %v21026_v41 = vcombine.low %v30135_v0, %v30135_v0 }
 0x564   : > { %18811 = vmatpush1.bf16.msra.mxu1 %v26043_v23  ;;  %18771 = vmatprep.subr.bf16.mxu0 %v26048_v20  ;;  %v21028_v23 = vcombine.low %v30138_v24, %v30138_v24  ;;  %v30219_v20 = vld [vmem:[%s28474_s27 + $0x150] sm:$0xff] }
 0x565   : > { %18812 = vmatprep.subr.bf16.mxu1 %v26051_v44  ;;  %v18467_v9 = vpop.f32.mrb[64].mxu0  ;;  %v30222_v44 = vld [vmem:[%s28474_s27 + $0x158] sm:$0xff]  ;;  %v21031_v0 = vcombine.high %v30219_v20, %v30219_v20 }
 0x566   : > { %v18508_v30 = vpop.f32.mrb[64].mxu1  ;;  %v18468_v52 = vadd.f32 %v18467_v9, %v30086_v32  ;;  %v18469_v55 = vpop.f32.mrb[65].mxu0  ;;  %v26060_v32 = vld [vmem:[%s28457_s11 + $0x2874] ss:$8 sps:$4 sm:$0xff]   ;;  %v21033_v24 = vcombine.high %v30222_v44, %v30222_v44  ;;  %v26130_v9 = vld [vmem:[%s28457_s11 + $0x2a24] ss:$8 sps:$4 sm:$0xff]  }
 0x567   : > { %v18510_v39 = vpop.f32.mrb[65].mxu1  ;;  %v18470_v36 = vadd.f32 %v18469_v55, %v30090_v63  ;;  %v18471_v13 = vpop.f32.mrb[66].mxu0  ;;  %18772 = vmatpush1.bf16.msra.mxu0 %v26046_v45  ;;  %v26058_v63 = vld [vmem:[%s28457_s11 + $0x2870] ss:$8 sps:$4 sm:$0xff]   ;;  %v26124_v45 = vld [vmem:[%s28457_s11 + $0x2a14] ss:$8 sps:$4 sm:$0xff]  }
 0x568   : > { %v18512_v38 = vpop.f32.mrb[66].mxu1  ;;  %18813 = vmatpush1.bf16.msra.mxu1 %v26049_v22  ;;  %v30170_v58 = vadd.f32 %v18508_v30, %v18468_v52  ;;  %v18472_v59 = vpop.f32.mrb[67].mxu0  ;;  %18773 = vmatprep.subr.bf16.mxu0 %v26054_v47  ;;  %v26127_v22 = vld [vmem:[%s28457_s11 + $0x2b14] ss:$8 sps:$4 sm:$0xff]   ;;  %v26122_v47 = vld [vmem:[%s28457_s11 + $0x2a10] ss:$8 sps:$4 sm:$0xff]  }
 0x569   : > { %v18513_v43 = vpop.f32.mrb[67].mxu1  ;;  %18814 = vmatprep.subr.bf16.mxu1 %v26057_v33  ;;  %v30174_v19 = vadd.f32 %v18510_v39, %v18470_v36  ;;  %v26125_v33 = vld [vmem:[%s28457_s11 + $0x2b10] ss:$8 sps:$4 sm:$0xff]   ;;  %v26133_v30 = vld [vmem:[%s28457_s11 + $0x2b24] ss:$8 sps:$4 sm:$0xff]  }
 0x56a   : > { %v26136_v52 = vld [vmem:[%s28457_s11 + $0x2a34] ss:$8 sps:$4 sm:$0xff]   ;;  %v26134_v39 = vld [vmem:[%s28457_s11 + $0x2a30] ss:$8 sps:$4 sm:$0xff]   ;;  %v26142_v13 = vld [vmem:[%s28457_s11 + $0x2a44] ss:$8 sps:$4 sm:$0xff]  }
 0x56b   : > { %18774 = vmatpush1.bf16.msra.mxu0 %v26052_v7  ;;  %v26128_v7 = vld [vmem:[%s28457_s11 + $0x2a20] ss:$8 sps:$4 sm:$0xff]   ;;  %v26139_v55 = vld [vmem:[%s28457_s11 + $0x2b34] ss:$8 sps:$4 sm:$0xff]   ;;  %v26137_v36 = vld [vmem:[%s28457_s11 + $0x2b30] ss:$8 sps:$4 sm:$0xff]  }
 0x56c   : > { %18815 = vmatpush1.bf16.msra.mxu1 %v26055_v34  ;;  %18775 = vmatprep.subr.bf16.mxu0 %v26060_v32  ;;  %v26131_v34 = vld [vmem:[%s28457_s11 + $0x2b20] ss:$8 sps:$4 sm:$0xff]   ;;  %v26145_v38 = vld [vmem:[%s28457_s11 + $0x2b44] ss:$8 sps:$4 sm:$0xff]   ;;  %v26148_v32 = vld [vmem:[%s28457_s11 + $0x2a54] ss:$8 sps:$4 sm:$0xff]  }
 0x56d   : > { %18816 = vmatprep.subr.bf16.mxu1 %v26063_v62  ;;  %v26140_v59 = vld [vmem:[%s28457_s11 + $0x2a40] ss:$8 sps:$4 sm:$0xff]   ;;  %v26151_v62 = vld [vmem:[%s28457_s11 + $0x2b54] ss:$8 sps:$4 sm:$0xff]  }
 0x56e   : > { %v26143_v43 = vld [vmem:[%s28457_s11 + $0x2b40] ss:$8 sps:$4 sm:$0xff]  }
 0x56f   : > { %18776 = vmatpush1.bf16.msra.mxu0 %v26058_v63  ;;  %v26146_v63 = vld [vmem:[%s28457_s11 + $0x2a50] ss:$8 sps:$4 sm:$0xff]  }
 0x570   : > { %18817 = vmatpush1.bf16.msra.mxu1 %v26061_v42  ;;  %18777 = vmatprep.subr.bf16.mxu0 %v26066_v2  ;;  %v26149_v42 = vld [vmem:[%s28457_s11 + $0x2b50] ss:$8 sps:$4 sm:$0xff]   ;;  %v26154_v2 = vld [vmem:[%s28457_s11 + $0x2a64] ss:$8 sps:$4 sm:$0xff]  }
 0x571   : > { %18818 = vmatprep.subr.bf16.mxu1 %v26069_v49  ;;  %v26157_v49 = vld [vmem:[%s28457_s11 + $0x2b64] ss:$8 sps:$4 sm:$0xff]  }
 0x573   : > { %18778 = vmatpush1.bf16.msra.mxu0 %v26064_v1 }
 0x574   : > { %18819 = vmatpush1.bf16.msra.mxu1 %v26067_v48  ;;  %18779 = vmatprep.subr.bf16.mxu0 %v26072_v28  ;;  %v26152_v28 = vld [vmem:[%s28457_s11 + $0x2a60] ss:$8 sps:$4 sm:$0xff]  }
 0x575   : > { %18820 = vmatprep.subr.bf16.mxu1 %v26075_v50  ;;  %v26155_v50 = vld [vmem:[%s28457_s11 + $0x2b60] ss:$8 sps:$4 sm:$0xff]  }
 0x577   : > { %18780 = vmatpush1.bf16.msra.mxu0 %v26070_v8 }
 0x578   : > { %18821 = vmatpush1.bf16.msra.mxu1 %v26073_v11  ;;  %18781 = vmatprep.subr.bf16.mxu0 %v26078_v25 }
 0x579   : > { %18822 = vmatprep.subr.bf16.mxu1 %v26081_v54 }
 0x57b   : > { %18782 = vmatpush1.bf16.msra.mxu0 %v26076_v26 }
 0x57c   : > { %18823 = vmatpush1.bf16.msra.mxu1 %v26079_v56  ;;  %18783 = vmatprep.subr.bf16.mxu0 %v26084_v14 }
 0x57d   : > { %18824 = vmatprep.subr.bf16.mxu1 %v26087_v15 }
 0x57f   : > { %18784 = vmatpush1.bf16.msra.mxu0 %v26082_v61 }
 0x580   : > { %18825 = vmatpush1.bf16.msra.mxu1 %v26085_v18  ;;  %18785 = vmatprep.subr.bf16.mxu0 %v26090_v31  ;;  %v26163_v18 = vld [vmem:[%s28457_s11 + $0x2b74] ss:$8 sps:$4 sm:$0xff]  }
 0x581   : > { %18826 = vmatprep.subr.bf16.mxu1 %v26093_v60  ;;  %v26161_v60 = vld [vmem:[%s28457_s11 + $0x2b70] ss:$8 sps:$4 sm:$0xff]  }
 0x583   : > { %18786 = vmatpush1.bf16.msra.mxu0 %v26088_v21  ;;  %v26166_v21 = vld [vmem:[%s28457_s11 + $0x2a84] ss:$8 sps:$4 sm:$0xff]  }
 0x584   : > { %18827 = vmatpush1.bf16.msra.mxu1 %v26091_v5  ;;  %18787 = vmatprep.subr.bf16.mxu0 %v26096_v27  ;;  %v26169_v5 = vld [vmem:[%s28457_s11 + $0x2b84] ss:$8 sps:$4 sm:$0xff]   ;;  %v26164_v27 = vld [vmem:[%s28457_s11 + $0x2a80] ss:$8 sps:$4 sm:$0xff]  }
 0x585   : > { %18828 = vmatprep.subr.bf16.mxu1 %v26099_v3  ;;  %v26167_v3 = vld [vmem:[%s28457_s11 + $0x2b80] ss:$8 sps:$4 sm:$0xff]  }
 0x587   : > { %18788 = vmatpush1.bf16.msra.mxu0 %v26094_v46  ;;  %v26172_v46 = vld [vmem:[%s28457_s11 + $0x2a94] ss:$8 sps:$4 sm:$0xff]  }
 0x588   : > { %18829 = vmatpush1.bf16.msra.mxu1 %v26097_v6  ;;  %18789 = vmatprep.subr.bf16.mxu0 %v26102_v29  ;;  %v26175_v6 = vld [vmem:[%s28457_s11 + $0x2b94] ss:$8 sps:$4 sm:$0xff]   ;;  %v26170_v29 = vld [vmem:[%s28457_s11 + $0x2a90] ss:$8 sps:$4 sm:$0xff]  }
 0x589   : > { %18830 = vmatprep.subr.bf16.mxu1 %v26105_v4  ;;  %v26173_v4 = vld [vmem:[%s28457_s11 + $0x2b90] ss:$8 sps:$4 sm:$0xff]  }
 0x58b   : > { %18790 = vmatpush1.bf16.msra.mxu0 %v26100_v53  ;;  %v26178_v53 = vld [vmem:[%s28457_s11 + $0x2aa4] ss:$8 sps:$4 sm:$0xff]  }
 0x58c   : > { %18831 = vmatpush1.bf16.msra.mxu1 %v26103_v10  ;;  %18791 = vmatprep.subr.bf16.mxu0 %v26108_v51  ;;  %v26181_v10 = vld [vmem:[%s28457_s11 + $0x2ba4] ss:$8 sps:$4 sm:$0xff]   ;;  %v26176_v51 = vld [vmem:[%s28457_s11 + $0x2aa0] ss:$8 sps:$4 sm:$0xff]  }
 0x58d   : > { %18832 = vmatprep.subr.bf16.mxu1 %v26111_v12  ;;  %v26179_v12 = vld [vmem:[%s28457_s11 + $0x2ba0] ss:$8 sps:$4 sm:$0xff]  }
 0x58f   : > { %18792 = vmatpush1.bf16.msra.mxu0 %v26106_v35  ;;  %v26184_v35 = vld [vmem:[%s28457_s11 + $0x2ab4] ss:$8 sps:$4 sm:$0xff]  }
 0x590   : > { %18833 = vmatpush1.bf16.msra.mxu1 %v26109_v37  ;;  %18843 = vmatprep.subr.bf16.mxu0 %v26118_v17  ;;  %v26187_v37 = vld [vmem:[%s28457_s11 + $0x2bb4] ss:$8 sps:$4 sm:$0xff]   ;;  %v26182_v17 = vld [vmem:[%s28457_s11 + $0x2ab0] ss:$8 sps:$4 sm:$0xff]  }
 0x591   : > { %18884 = vmatprep.subr.bf16.mxu1 %v26121_v40  ;;  %v26185_v40 = vld [vmem:[%s28457_s11 + $0x2bb0] ss:$8 sps:$4 sm:$0xff]  }
 0x592   : > { %18794 = vmatmul.mubr.bf16.vlgmr.msra.gmra.mrb[80].mxu0 %v21026_v41  ;;  %v26188_v41 = vld [vmem:[%s28457_s11 + $0x2ac0] ss:$8 sps:$4 sm:$0xff]  }
 0x593   : > { %18835 = vmatmul.mubr.bf16.vlgmr.msra.gmra.mrb[80].mxu1 %v21028_v23  ;;  %18844 = vmatpush1.bf16.msra.mxu0 %v26116_v57  ;;  %v26190_v57 = vld [vmem:[%s28457_s11 + $0x2ac4] ss:$8 sps:$4 sm:$0xff]   ;;  %v26191_v23 = vld [vmem:[%s28457_s11 + $0x2bc0] ss:$8 sps:$4 sm:$0xff]  }
 0x594   : > { %18885 = vmatpush1.bf16.msra.mxu1 %v26119_v16  ;;  %18845 = vmatprep.subr.bf16.mxu0 %v26124_v45  ;;  %v26193_v16 = vld [vmem:[%s28457_s11 + $0x2bc4] ss:$8 sps:$4 sm:$0xff]   ;;  %v26196_v45 = vld [vmem:[%s28457_s11 + $0x2ad4] ss:$8 sps:$4 sm:$0xff]  }
 0x595   : > { %18886 = vmatprep.subr.bf16.mxu1 %v26127_v22  ;;  %18875 = vmatprep.mubr.bf16.mxu0 %v21031_v0  ;;  %v26199_v22 = vld [vmem:[%s28457_s11 + $0x2bd4] ss:$8 sps:$4 sm:$0xff]   ;;  %v26194_v0 = vld [vmem:[%s28457_s11 + $0x2ad0] ss:$8 sps:$4 sm:$0xff]  }
 0x596   : > { %18916 = vmatprep.mubr.bf16.mxu1 %v21033_v24  ;;  %v26197_v24 = vld [vmem:[%s28457_s11 + $0x2bd0] ss:$8 sps:$4 sm:$0xff]  }
 0x597   : > { %18846 = vmatpush1.bf16.msra.mxu0 %v26122_v47  ;;  %v26202_v47 = vld [vmem:[%s28457_s11 + $0x2ae4] ss:$8 sps:$4 sm:$0xff]  }
 0x598   : > { %18887 = vmatpush1.bf16.msra.mxu1 %v26125_v33  ;;  %18847 = vmatprep.subr.bf16.mxu0 %v26130_v9  ;;  %v26205_v33 = vld [vmem:[%s28457_s11 + $0x2be4] ss:$8 sps:$4 sm:$0xff]   ;;  %v26200_v9 = vld [vmem:[%s28457_s11 + $0x2ae0] ss:$8 sps:$4 sm:$0xff]  }
 0x599   : > { %18888 = vmatprep.subr.bf16.mxu1 %v26133_v30  ;;  %v26203_v30 = vld [vmem:[%s28457_s11 + $0x2be0] ss:$8 sps:$4 sm:$0xff]  }
 0x59b   : > { %18848 = vmatpush1.bf16.msra.mxu0 %v26128_v7  ;;  %v26208_v7 = vld [vmem:[%s28457_s11 + $0x2af4] ss:$8 sps:$4 sm:$0xff]  }
 0x59c   : > { %18889 = vmatpush1.bf16.msra.mxu1 %v26131_v34  ;;  %18849 = vmatprep.subr.bf16.mxu0 %v26136_v52  ;;  %v26211_v34 = vld [vmem:[%s28457_s11 + $0x2bf4] ss:$8 sps:$4 sm:$0xff]   ;;  %v26206_v52 = vld [vmem:[%s28457_s11 + $0x2af0] ss:$8 sps:$4 sm:$0xff]  }
 0x59d   : > { %18890 = vmatprep.subr.bf16.mxu1 %v26139_v55  ;;  %v26209_v55 = vld [vmem:[%s28457_s11 + $0x2bf0] ss:$8 sps:$4 sm:$0xff]  }
 0x59f   : > { %18850 = vmatpush1.bf16.msra.mxu0 %v26134_v39  ;;  %v26218_v39 = vld [vmem:[%s28457_s11 + $0x2c04] ss:$8 sps:$4 sm:$0xff]  }
 0x5a0   : > { %18891 = vmatpush1.bf16.msra.mxu1 %v26137_v36  ;;  %18851 = vmatprep.subr.bf16.mxu0 %v26142_v13  ;;  %v26221_v36 = vld [vmem:[%s28457_s11 + $0x2d04] ss:$8 sps:$4 sm:$0xff]   ;;  %v26216_v13 = vld [vmem:[%s28457_s11 + $0x2c00] ss:$8 sps:$4 sm:$0xff]  }
 0x5a1   : > { %18892 = vmatprep.subr.bf16.mxu1 %v26145_v38  ;;  %v26219_v38 = vld [vmem:[%s28457_s11 + $0x2d00] ss:$8 sps:$4 sm:$0xff]  }
 0x5a3   : > { %18852 = vmatpush1.bf16.msra.mxu0 %v26140_v59  ;;  %v21030_v59 = vcombine.low %v30219_v20, %v30219_v20 }
 0x5a4   : > { %18893 = vmatpush1.bf16.msra.mxu1 %v26143_v43  ;;  %18853 = vmatprep.subr.bf16.mxu0 %v26148_v32  ;;  %v21032_v43 = vcombine.low %v30222_v44, %v30222_v44  ;;  %v30303_v32 = vld [vmem:[%s28474_s27 + $0x160] sm:$0xff] }
 0x5a5   : > { %18894 = vmatprep.subr.bf16.mxu1 %v26151_v62  ;;  %v18549_v1 = vpop.f32.mrb[68].mxu0  ;;  %v30306_v62 = vld [vmem:[%s28474_s27 + $0x168] sm:$0xff]  ;;  %v21035_v20 = vcombine.high %v30303_v32, %v30303_v32 }
 0x5a6   : > { %v18590_v48 = vpop.f32.mrb[68].mxu1  ;;  %v18550_v8 = vadd.f32 %v18549_v1, %v30170_v58  ;;  %v18551_v11 = vpop.f32.mrb[69].mxu0  ;;  %v26160_v58 = vld [vmem:[%s28457_s11 + $0x2a74] ss:$8 sps:$4 sm:$0xff]   ;;  %v21037_v44 = vcombine.high %v30306_v62, %v30306_v62  ;;  %v26230_v1 = vld [vmem:[%s28457_s11 + $0x2c24] ss:$8 sps:$4 sm:$0xff]  }
 0x5a7   : > { %v18592_v25 = vpop.f32.mrb[69].mxu1  ;;  %v18552_v54 = vadd.f32 %v18551_v11, %v30174_v19  ;;  %v18553_v26 = vpop.f32.mrb[70].mxu0  ;;  %18854 = vmatpush1.bf16.msra.mxu0 %v26146_v63  ;;  %v26158_v19 = vld [vmem:[%s28457_s11 + $0x2a70] ss:$8 sps:$4 sm:$0xff]   ;;  %v26224_v63 = vld [vmem:[%s28457_s11 + $0x2c14] ss:$8 sps:$4 sm:$0xff]  }
 0x5a8   : > { %v18594_v56 = vpop.f32.mrb[70].mxu1  ;;  %18895 = vmatpush1.bf16.msra.mxu1 %v26149_v42  ;;  %v30254_v14 = vadd.f32 %v18590_v48, %v18550_v8  ;;  %v18554_v15 = vpop.f32.mrb[71].mxu0  ;;  %18855 = vmatprep.subr.bf16.mxu0 %v26154_v2  ;;  %v26227_v42 = vld [vmem:[%s28457_s11 + $0x2d14] ss:$8 sps:$4 sm:$0xff]   ;;  %v26222_v2 = vld [vmem:[%s28457_s11 + $0x2c10] ss:$8 sps:$4 sm:$0xff]  }
 0x5a9   : > { %v18595_v61 = vpop.f32.mrb[71].mxu1  ;;  %18896 = vmatprep.subr.bf16.mxu1 %v26157_v49  ;;  %v30258_v31 = vadd.f32 %v18592_v25, %v18552_v54  ;;  %v26225_v49 = vld [vmem:[%s28457_s11 + $0x2d10] ss:$8 sps:$4 sm:$0xff]   ;;  %v26233_v48 = vld [vmem:[%s28457_s11 + $0x2d24] ss:$8 sps:$4 sm:$0xff]  }
 0x5aa   : > { %v26236_v8 = vld [vmem:[%s28457_s11 + $0x2c34] ss:$8 sps:$4 sm:$0xff]   ;;  %v26234_v25 = vld [vmem:[%s28457_s11 + $0x2c30] ss:$8 sps:$4 sm:$0xff]   ;;  %v26242_v26 = vld [vmem:[%s28457_s11 + $0x2c44] ss:$8 sps:$4 sm:$0xff]  }
 0x5ab   : > { %18856 = vmatpush1.bf16.msra.mxu0 %v26152_v28  ;;  %v26228_v28 = vld [vmem:[%s28457_s11 + $0x2c20] ss:$8 sps:$4 sm:$0xff]   ;;  %v26239_v11 = vld [vmem:[%s28457_s11 + $0x2d34] ss:$8 sps:$4 sm:$0xff]   ;;  %v26237_v54 = vld [vmem:[%s28457_s11 + $0x2d30] ss:$8 sps:$4 sm:$0xff]  }
 0x5ac   : > { %18897 = vmatpush1.bf16.msra.mxu1 %v26155_v50  ;;  %18857 = vmatprep.subr.bf16.mxu0 %v26160_v58  ;;  %v26231_v50 = vld [vmem:[%s28457_s11 + $0x2d20] ss:$8 sps:$4 sm:$0xff]   ;;  %v26245_v56 = vld [vmem:[%s28457_s11 + $0x2d44] ss:$8 sps:$4 sm:$0xff]   ;;  %v26248_v58 = vld [vmem:[%s28457_s11 + $0x2c54] ss:$8 sps:$4 sm:$0xff]  }
 0x5ad   : > { %18898 = vmatprep.subr.bf16.mxu1 %v26163_v18  ;;  %v26240_v15 = vld [vmem:[%s28457_s11 + $0x2c40] ss:$8 sps:$4 sm:$0xff]   ;;  %v26251_v18 = vld [vmem:[%s28457_s11 + $0x2d54] ss:$8 sps:$4 sm:$0xff]  }
 0x5ae   : > { %v26243_v61 = vld [vmem:[%s28457_s11 + $0x2d40] ss:$8 sps:$4 sm:$0xff]  }
 0x5af   : > { %18858 = vmatpush1.bf16.msra.mxu0 %v26158_v19  ;;  %v26246_v19 = vld [vmem:[%s28457_s11 + $0x2c50] ss:$8 sps:$4 sm:$0xff]  }
 0x5b0   : > { %18899 = vmatpush1.bf16.msra.mxu1 %v26161_v60  ;;  %18859 = vmatprep.subr.bf16.mxu0 %v26166_v21  ;;  %v26249_v60 = vld [vmem:[%s28457_s11 + $0x2d50] ss:$8 sps:$4 sm:$0xff]   ;;  %v26254_v21 = vld [vmem:[%s28457_s11 + $0x2c64] ss:$8 sps:$4 sm:$0xff]  }
 0x5b1   : > { %18900 = vmatprep.subr.bf16.mxu1 %v26169_v5  ;;  %v26257_v5 = vld [vmem:[%s28457_s11 + $0x2d64] ss:$8 sps:$4 sm:$0xff]  }
 0x5b3   : > { %18860 = vmatpush1.bf16.msra.mxu0 %v26164_v27 }
 0x5b4   : > { %18901 = vmatpush1.bf16.msra.mxu1 %v26167_v3  ;;  %18861 = vmatprep.subr.bf16.mxu0 %v26172_v46  ;;  %v26252_v46 = vld [vmem:[%s28457_s11 + $0x2c60] ss:$8 sps:$4 sm:$0xff]  }
 0x5b5   : > { %18902 = vmatprep.subr.bf16.mxu1 %v26175_v6  ;;  %v26255_v6 = vld [vmem:[%s28457_s11 + $0x2d60] ss:$8 sps:$4 sm:$0xff]  }
 0x5b7   : > { %18862 = vmatpush1.bf16.msra.mxu0 %v26170_v29 }
 0x5b8   : > { %18903 = vmatpush1.bf16.msra.mxu1 %v26173_v4  ;;  %18863 = vmatprep.subr.bf16.mxu0 %v26178_v53 }
 0x5b9   : > { %18904 = vmatprep.subr.bf16.mxu1 %v26181_v10 }
 0x5bb   : > { %18864 = vmatpush1.bf16.msra.mxu0 %v26176_v51 }
 0x5bc   : > { %18905 = vmatpush1.bf16.msra.mxu1 %v26179_v12  ;;  %18865 = vmatprep.subr.bf16.mxu0 %v26184_v35 }
 0x5bd   : > { %18906 = vmatprep.subr.bf16.mxu1 %v26187_v37 }
 0x5bf   : > { %18866 = vmatpush1.bf16.msra.mxu0 %v26182_v17 }
 0x5c0   : > { %18907 = vmatpush1.bf16.msra.mxu1 %v26185_v40  ;;  %18867 = vmatprep.subr.bf16.mxu0 %v26190_v57  ;;  %v26263_v40 = vld [vmem:[%s28457_s11 + $0x2d74] ss:$8 sps:$4 sm:$0xff]  }
 0x5c1   : > { %18908 = vmatprep.subr.bf16.mxu1 %v26193_v16  ;;  %v26261_v16 = vld [vmem:[%s28457_s11 + $0x2d70] ss:$8 sps:$4 sm:$0xff]  }
 0x5c3   : > { %18868 = vmatpush1.bf16.msra.mxu0 %v26188_v41  ;;  %v26266_v41 = vld [vmem:[%s28457_s11 + $0x2c84] ss:$8 sps:$4 sm:$0xff]  }
 0x5c4   : > { %18909 = vmatpush1.bf16.msra.mxu1 %v26191_v23  ;;  %18869 = vmatprep.subr.bf16.mxu0 %v26196_v45  ;;  %v26269_v23 = vld [vmem:[%s28457_s11 + $0x2d84] ss:$8 sps:$4 sm:$0xff]   ;;  %v26264_v45 = vld [vmem:[%s28457_s11 + $0x2c80] ss:$8 sps:$4 sm:$0xff]  }
 0x5c5   : > { %18910 = vmatprep.subr.bf16.mxu1 %v26199_v22  ;;  %v26267_v22 = vld [vmem:[%s28457_s11 + $0x2d80] ss:$8 sps:$4 sm:$0xff]  }
 0x5c7   : > { %18870 = vmatpush1.bf16.msra.mxu0 %v26194_v0  ;;  %v26272_v0 = vld [vmem:[%s28457_s11 + $0x2c94] ss:$8 sps:$4 sm:$0xff]  }
 0x5c8   : > { %18911 = vmatpush1.bf16.msra.mxu1 %v26197_v24  ;;  %18871 = vmatprep.subr.bf16.mxu0 %v26202_v47  ;;  %v26275_v24 = vld [vmem:[%s28457_s11 + $0x2d94] ss:$8 sps:$4 sm:$0xff]   ;;  %v26270_v47 = vld [vmem:[%s28457_s11 + $0x2c90] ss:$8 sps:$4 sm:$0xff]  }
 0x5c9   : > { %18912 = vmatprep.subr.bf16.mxu1 %v26205_v33  ;;  %v26273_v33 = vld [vmem:[%s28457_s11 + $0x2d90] ss:$8 sps:$4 sm:$0xff]  }
 0x5cb   : > { %18872 = vmatpush1.bf16.msra.mxu0 %v26200_v9  ;;  %v26278_v9 = vld [vmem:[%s28457_s11 + $0x2ca4] ss:$8 sps:$4 sm:$0xff]  }
 0x5cc   : > { %18913 = vmatpush1.bf16.msra.mxu1 %v26203_v30  ;;  %18873 = vmatprep.subr.bf16.mxu0 %v26208_v7  ;;  %v26281_v30 = vld [vmem:[%s28457_s11 + $0x2da4] ss:$8 sps:$4 sm:$0xff]   ;;  %v26276_v7 = vld [vmem:[%s28457_s11 + $0x2ca0] ss:$8 sps:$4 sm:$0xff]  }
 0x5cd   : > { %18914 = vmatprep.subr.bf16.mxu1 %v26211_v34  ;;  %v26279_v34 = vld [vmem:[%s28457_s11 + $0x2da0] ss:$8 sps:$4 sm:$0xff]  }
 0x5cf   : > { %18874 = vmatpush1.bf16.msra.mxu0 %v26206_v52  ;;  %v26284_v52 = vld [vmem:[%s28457_s11 + $0x2cb4] ss:$8 sps:$4 sm:$0xff]  }
 0x5d0   : > { %18915 = vmatpush1.bf16.msra.mxu1 %v26209_v55  ;;  %18925 = vmatprep.subr.bf16.mxu0 %v26218_v39  ;;  %v26287_v55 = vld [vmem:[%s28457_s11 + $0x2db4] ss:$8 sps:$4 sm:$0xff]   ;;  %v26282_v39 = vld [vmem:[%s28457_s11 + $0x2cb0] ss:$8 sps:$4 sm:$0xff]  }
 0x5d1   : > { %18966 = vmatprep.subr.bf16.mxu1 %v26221_v36  ;;  %v26285_v36 = vld [vmem:[%s28457_s11 + $0x2db0] ss:$8 sps:$4 sm:$0xff]  }
 0x5d2   : > { %18876 = vmatmul.mubr.bf16.vlgmr.msra.gmra.mrb[84].mxu0 %v21030_v59  ;;  %v26288_v59 = vld [vmem:[%s28457_s11 + $0x2cc0] ss:$8 sps:$4 sm:$0xff]  }
 0x5d3   : > { %18917 = vmatmul.mubr.bf16.vlgmr.msra.gmra.mrb[84].mxu1 %v21032_v43  ;;  %18926 = vmatpush1.bf16.msra.mxu0 %v26216_v13  ;;  %v26290_v13 = vld [vmem:[%s28457_s11 + $0x2cc4] ss:$8 sps:$4 sm:$0xff]   ;;  %v26291_v43 = vld [vmem:[%s28457_s11 + $0x2dc0] ss:$8 sps:$4 sm:$0xff]  }
 0x5d4   : > { %18967 = vmatpush1.bf16.msra.mxu1 %v26219_v38  ;;  %18927 = vmatprep.subr.bf16.mxu0 %v26224_v63  ;;  %v26293_v38 = vld [vmem:[%s28457_s11 + $0x2dc4] ss:$8 sps:$4 sm:$0xff]   ;;  %v26296_v63 = vld [vmem:[%s28457_s11 + $0x2cd4] ss:$8 sps:$4 sm:$0xff]  }
 0x5d5   : > { %18968 = vmatprep.subr.bf16.mxu1 %v26227_v42  ;;  %18957 = vmatprep.mubr.bf16.mxu0 %v21035_v20  ;;  %v26299_v42 = vld [vmem:[%s28457_s11 + $0x2dd4] ss:$8 sps:$4 sm:$0xff]   ;;  %v26294_v20 = vld [vmem:[%s28457_s11 + $0x2cd0] ss:$8 sps:$4 sm:$0xff]  }
 0x5d6   : > { %18998 = vmatprep.mubr.bf16.mxu1 %v21037_v44  ;;  %v26297_v44 = vld [vmem:[%s28457_s11 + $0x2dd0] ss:$8 sps:$4 sm:$0xff]  }
 0x5d7   : > { %18928 = vmatpush1.bf16.msra.mxu0 %v26222_v2  ;;  %v26302_v2 = vld [vmem:[%s28457_s11 + $0x2ce4] ss:$8 sps:$4 sm:$0xff]  }
 0x5d8   : > { %18969 = vmatpush1.bf16.msra.mxu1 %v26225_v49  ;;  %18929 = vmatprep.subr.bf16.mxu0 %v26230_v1  ;;  %v26305_v49 = vld [vmem:[%s28457_s11 + $0x2de4] ss:$8 sps:$4 sm:$0xff]   ;;  %v26300_v1 = vld [vmem:[%s28457_s11 + $0x2ce0] ss:$8 sps:$4 sm:$0xff]  }
 0x5d9   : > { %18970 = vmatprep.subr.bf16.mxu1 %v26233_v48  ;;  %v26303_v48 = vld [vmem:[%s28457_s11 + $0x2de0] ss:$8 sps:$4 sm:$0xff]  }
 0x5db   : > { %18930 = vmatpush1.bf16.msra.mxu0 %v26228_v28  ;;  %v26308_v28 = vld [vmem:[%s28457_s11 + $0x2cf4] ss:$8 sps:$4 sm:$0xff]  }
 0x5dc   : > { %18971 = vmatpush1.bf16.msra.mxu1 %v26231_v50  ;;  %18931 = vmatprep.subr.bf16.mxu0 %v26236_v8  ;;  %v26311_v50 = vld [vmem:[%s28457_s11 + $0x2df4] ss:$8 sps:$4 sm:$0xff]   ;;  %v26306_v8 = vld [vmem:[%s28457_s11 + $0x2cf0] ss:$8 sps:$4 sm:$0xff]  }
 0x5dd   : > { %18972 = vmatprep.subr.bf16.mxu1 %v26239_v11  ;;  %v26309_v11 = vld [vmem:[%s28457_s11 + $0x2df0] ss:$8 sps:$4 sm:$0xff]  }
 0x5df   : > { %18932 = vmatpush1.bf16.msra.mxu0 %v26234_v25  ;;  %v26318_v25 = vld [vmem:[%s28457_s11 + $0x2e04] ss:$8 sps:$4 sm:$0xff]  }
 0x5e0   : > { %18973 = vmatpush1.bf16.msra.mxu1 %v26237_v54  ;;  %18933 = vmatprep.subr.bf16.mxu0 %v26242_v26  ;;  %v26321_v54 = vld [vmem:[%s28457_s11 + $0x2f04] ss:$8 sps:$4 sm:$0xff]   ;;  %v21034_v26 = vcombine.low %v30303_v32, %v30303_v32 }
 0x5e1   : > { %18974 = vmatprep.subr.bf16.mxu1 %v26245_v56  ;;  %v21036_v56 = vcombine.low %v30306_v62, %v30306_v62 }
 0x5e3   : > { %18934 = vmatpush1.bf16.msra.mxu0 %v26240_v15  ;;  %v30385_v15 = vld [vmem:[%s28474_s27 + $0x170] sm:$0xff] }
 0x5e4   : > { %18975 = vmatpush1.bf16.msra.mxu1 %v26243_v61  ;;  %18935 = vmatprep.subr.bf16.mxu0 %v26248_v58  ;;  %v30388_v61 = vld [vmem:[%s28474_s27 + $0x178] sm:$0xff]  ;;  %v21039_v32 = vcombine.high %v30385_v15, %v30385_v15 }
 0x5e5   : > { %18976 = vmatprep.subr.bf16.mxu1 %v26251_v18  ;;  %v18631_v27 = vpop.f32.mrb[72].mxu0  ;;  %v26316_v58 = vld [vmem:[%s28457_s11 + $0x2e00] ss:$8 sps:$4 sm:$0xff]   ;;  %v21041_v62 = vcombine.high %v30388_v61, %v30388_v61 }
 0x5e6   : > { %v18672_v3 = vpop.f32.mrb[72].mxu1  ;;  %v18632_v29 = vadd.f32 %v18631_v27, %v30254_v14  ;;  %v18633_v4 = vpop.f32.mrb[73].mxu0  ;;  %v26260_v14 = vld [vmem:[%s28457_s11 + $0x2c74] ss:$8 sps:$4 sm:$0xff]   ;;  %v26319_v18 = vld [vmem:[%s28457_s11 + $0x2f00] ss:$8 sps:$4 sm:$0xff]  }
 0x5e7   : > { %v18674_v53 = vpop.f32.mrb[73].mxu1  ;;  %v18634_v10 = vadd.f32 %v18633_v4, %v30258_v31  ;;  %v18635_v51 = vpop.f32.mrb[74].mxu0  ;;  %18936 = vmatpush1.bf16.msra.mxu0 %v26246_v19  ;;  %v26258_v31 = vld [vmem:[%s28457_s11 + $0x2c70] ss:$8 sps:$4 sm:$0xff]   ;;  %v26324_v19 = vld [vmem:[%s28457_s11 + $0x2e14] ss:$8 sps:$4 sm:$0xff]  }
 0x5e8   : > { %v18676_v12 = vpop.f32.mrb[74].mxu1  ;;  %18977 = vmatpush1.bf16.msra.mxu1 %v26249_v60  ;;  %v30338_v35 = vadd.f32 %v18672_v3, %v18632_v29  ;;  %v18636_v37 = vpop.f32.mrb[75].mxu0  ;;  %18937 = vmatprep.subr.bf16.mxu0 %v26254_v21  ;;  %v26327_v60 = vld [vmem:[%s28457_s11 + $0x2f14] ss:$8 sps:$4 sm:$0xff]   ;;  %v26322_v21 = vld [vmem:[%s28457_s11 + $0x2e10] ss:$8 sps:$4 sm:$0xff]  }
 0x5e9   : > { %v18677_v17 = vpop.f32.mrb[75].mxu1  ;;  %18978 = vmatprep.subr.bf16.mxu1 %v26257_v5  ;;  %v30342_v57 = vadd.f32 %v18674_v53, %v18634_v10  ;;  %v26325_v5 = vld [vmem:[%s28457_s11 + $0x2f10] ss:$8 sps:$4 sm:$0xff]   ;;  %v26330_v27 = vld [vmem:[%s28457_s11 + $0x2e24] ss:$8 sps:$4 sm:$0xff]  }
 0x5ea   : > { %v26333_v3 = vld [vmem:[%s28457_s11 + $0x2f24] ss:$8 sps:$4 sm:$0xff]   ;;  %v26336_v29 = vld [vmem:[%s28457_s11 + $0x2e34] ss:$8 sps:$4 sm:$0xff]   ;;  %v26334_v53 = vld [vmem:[%s28457_s11 + $0x2e30] ss:$8 sps:$4 sm:$0xff]  }
 0x5eb   : > { %18938 = vmatpush1.bf16.msra.mxu0 %v26252_v46  ;;  %v26328_v46 = vld [vmem:[%s28457_s11 + $0x2e20] ss:$8 sps:$4 sm:$0xff]   ;;  %v26339_v4 = vld [vmem:[%s28457_s11 + $0x2f34] ss:$8 sps:$4 sm:$0xff]   ;;  %v26337_v10 = vld [vmem:[%s28457_s11 + $0x2f30] ss:$8 sps:$4 sm:$0xff]  }
 0x5ec   : > { %18979 = vmatpush1.bf16.msra.mxu1 %v26255_v6  ;;  %18939 = vmatprep.subr.bf16.mxu0 %v26260_v14  ;;  %v26331_v6 = vld [vmem:[%s28457_s11 + $0x2f20] ss:$8 sps:$4 sm:$0xff]   ;;  %v26342_v51 = vld [vmem:[%s28457_s11 + $0x2e44] ss:$8 sps:$4 sm:$0xff]   ;;  %v26348_v14 = vld [vmem:[%s28457_s11 + $0x2e54] ss:$8 sps:$4 sm:$0xff]  }
 0x5ed   : > { %18980 = vmatprep.subr.bf16.mxu1 %v26263_v40  ;;  %v26345_v12 = vld [vmem:[%s28457_s11 + $0x2f44] ss:$8 sps:$4 sm:$0xff]   ;;  %v26340_v37 = vld [vmem:[%s28457_s11 + $0x2e40] ss:$8 sps:$4 sm:$0xff]   ;;  %v26351_v40 = vld [vmem:[%s28457_s11 + $0x2f54] ss:$8 sps:$4 sm:$0xff]  }
 0x5ee   : > { %v26343_v17 = vld [vmem:[%s28457_s11 + $0x2f40] ss:$8 sps:$4 sm:$0xff]  }
 0x5ef   : > { %18940 = vmatpush1.bf16.msra.mxu0 %v26258_v31  ;;  %v26346_v31 = vld [vmem:[%s28457_s11 + $0x2e50] ss:$8 sps:$4 sm:$0xff]  }
 0x5f0   : > { %18981 = vmatpush1.bf16.msra.mxu1 %v26261_v16  ;;  %18941 = vmatprep.subr.bf16.mxu0 %v26266_v41  ;;  %v26349_v16 = vld [vmem:[%s28457_s11 + $0x2f50] ss:$8 sps:$4 sm:$0xff]   ;;  %v26354_v41 = vld [vmem:[%s28457_s11 + $0x2e64] ss:$8 sps:$4 sm:$0xff]  }
 0x5f1   : > { %18982 = vmatprep.subr.bf16.mxu1 %v26269_v23  ;;  %v26357_v23 = vld [vmem:[%s28457_s11 + $0x2f64] ss:$8 sps:$4 sm:$0xff]  }
 0x5f3   : > { %18942 = vmatpush1.bf16.msra.mxu0 %v26264_v45 }
 0x5f4   : > { %18983 = vmatpush1.bf16.msra.mxu1 %v26267_v22  ;;  %18943 = vmatprep.subr.bf16.mxu0 %v26272_v0 }
 0x5f5   : > { %18984 = vmatprep.subr.bf16.mxu1 %v26275_v24 }
 0x5f7   : > { %18944 = vmatpush1.bf16.msra.mxu0 %v26270_v47 }
 0x5f8   : > { %18985 = vmatpush1.bf16.msra.mxu1 %v26273_v33  ;;  %18945 = vmatprep.subr.bf16.mxu0 %v26278_v9 }
 0x5f9   : > { %18986 = vmatprep.subr.bf16.mxu1 %v26281_v30 }
 0x5fb   : > { %18946 = vmatpush1.bf16.msra.mxu0 %v26276_v7  ;;  %v26352_v7 = vld [vmem:[%s28457_s11 + $0x2e60] ss:$8 sps:$4 sm:$0xff]  }
 0x5fc   : > { %18987 = vmatpush1.bf16.msra.mxu1 %v26279_v34  ;;  %18947 = vmatprep.subr.bf16.mxu0 %v26284_v52  ;;  %v26355_v34 = vld [vmem:[%s28457_s11 + $0x2f60] ss:$8 sps:$4 sm:$0xff]  }
 0x5fd   : > { %18988 = vmatprep.subr.bf16.mxu1 %v26287_v55 }
 0x5ff   : > { %18948 = vmatpush1.bf16.msra.mxu0 %v26282_v39 }
 0x600   : > { %18989 = vmatpush1.bf16.msra.mxu1 %v26285_v36  ;;  %18949 = vmatprep.subr.bf16.mxu0 %v26290_v13  ;;  %v26358_v13 = vld [vmem:[%s28457_s11 + $0x2e70] ss:$8 sps:$4 sm:$0xff]  }
 0x601   : > { %18990 = vmatprep.subr.bf16.mxu1 %v26293_v38  ;;  %v26361_v38 = vld [vmem:[%s28457_s11 + $0x2f70] ss:$8 sps:$4 sm:$0xff]  }
 0x603   : > { %18950 = vmatpush1.bf16.msra.mxu0 %v26288_v59  ;;  %v26366_v59 = vld [vmem:[%s28457_s11 + $0x2e84] ss:$8 sps:$4 sm:$0xff]  }
 0x604   : > { %18991 = vmatpush1.bf16.msra.mxu1 %v26291_v43  ;;  %18951 = vmatprep.subr.bf16.mxu0 %v26296_v63  ;;  %v26369_v43 = vld [vmem:[%s28457_s11 + $0x2f84] ss:$8 sps:$4 sm:$0xff]   ;;  %v26364_v63 = vld [vmem:[%s28457_s11 + $0x2e80] ss:$8 sps:$4 sm:$0xff]  }
 0x605   : > { %18992 = vmatprep.subr.bf16.mxu1 %v26299_v42  ;;  %v26367_v42 = vld [vmem:[%s28457_s11 + $0x2f80] ss:$8 sps:$4 sm:$0xff]  }
 0x607   : > { %18952 = vmatpush1.bf16.msra.mxu0 %v26294_v20  ;;  %v26372_v20 = vld [vmem:[%s28457_s11 + $0x2e94] ss:$8 sps:$4 sm:$0xff]  }
 0x608   : > { %18993 = vmatpush1.bf16.msra.mxu1 %v26297_v44  ;;  %18953 = vmatprep.subr.bf16.mxu0 %v26302_v2  ;;  %v26375_v44 = vld [vmem:[%s28457_s11 + $0x2f94] ss:$8 sps:$4 sm:$0xff]   ;;  %v26370_v2 = vld [vmem:[%s28457_s11 + $0x2e90] ss:$8 sps:$4 sm:$0xff]  }
 0x609   : > { %18994 = vmatprep.subr.bf16.mxu1 %v26305_v49  ;;  %v26373_v49 = vld [vmem:[%s28457_s11 + $0x2f90] ss:$8 sps:$4 sm:$0xff]  }
 0x60b   : > { %18954 = vmatpush1.bf16.msra.mxu0 %v26300_v1  ;;  %v26378_v1 = vld [vmem:[%s28457_s11 + $0x2ea4] ss:$8 sps:$4 sm:$0xff]  }
 0x60c   : > { %18995 = vmatpush1.bf16.msra.mxu1 %v26303_v48  ;;  %18955 = vmatprep.subr.bf16.mxu0 %v26308_v28  ;;  %v26381_v48 = vld [vmem:[%s28457_s11 + $0x2fa4] ss:$8 sps:$4 sm:$0xff]   ;;  %v26376_v28 = vld [vmem:[%s28457_s11 + $0x2ea0] ss:$8 sps:$4 sm:$0xff]  }
 0x60d   : > { %18996 = vmatprep.subr.bf16.mxu1 %v26311_v50  ;;  %v26379_v50 = vld [vmem:[%s28457_s11 + $0x2fa0] ss:$8 sps:$4 sm:$0xff]  }
 0x60f   : > { %18956 = vmatpush1.bf16.msra.mxu0 %v26306_v8  ;;  %v26384_v8 = vld [vmem:[%s28457_s11 + $0x2eb4] ss:$8 sps:$4 sm:$0xff]  }
 0x610   : > { %18997 = vmatpush1.bf16.msra.mxu1 %v26309_v11  ;;  %19007 = vmatprep.subr.bf16.mxu0 %v26318_v25  ;;  %v26387_v11 = vld [vmem:[%s28457_s11 + $0x2fb4] ss:$8 sps:$4 sm:$0xff]   ;;  %v26382_v25 = vld [vmem:[%s28457_s11 + $0x2eb0] ss:$8 sps:$4 sm:$0xff]  }
 0x611   : > { %19048 = vmatprep.subr.bf16.mxu1 %v26321_v54  ;;  %v26385_v54 = vld [vmem:[%s28457_s11 + $0x2fb0] ss:$8 sps:$4 sm:$0xff]  }
 0x612   : > { %18958 = vmatmul.mubr.bf16.vlgmr.msra.gmra.mrb[88].mxu0 %v21034_v26  ;;  %v26390_v26 = vld [vmem:[%s28457_s11 + $0x2ec4] ss:$8 sps:$4 sm:$0xff]  }
 0x613   : > { %18999 = vmatmul.mubr.bf16.vlgmr.msra.gmra.mrb[88].mxu1 %v21036_v56  ;;  %19008 = vmatpush1.bf16.msra.mxu0 %v26316_v58  ;;  %v26393_v56 = vld [vmem:[%s28457_s11 + $0x2fc4] ss:$8 sps:$4 sm:$0xff]   ;;  %v26388_v58 = vld [vmem:[%s28457_s11 + $0x2ec0] ss:$8 sps:$4 sm:$0xff]  }
 0x614   : > { %19049 = vmatpush1.bf16.msra.mxu1 %v26319_v18  ;;  %19009 = vmatprep.subr.bf16.mxu0 %v26324_v19  ;;  %v26391_v18 = vld [vmem:[%s28457_s11 + $0x2fc0] ss:$8 sps:$4 sm:$0xff]   ;;  %v26396_v19 = vld [vmem:[%s28457_s11 + $0x2ed4] ss:$8 sps:$4 sm:$0xff]  }
 0x615   : > { %19050 = vmatprep.subr.bf16.mxu1 %v26327_v60  ;;  %19039 = vmatprep.mubr.bf16.mxu0 %v21039_v32  ;;  %v26399_v60 = vld [vmem:[%s28457_s11 + $0x2fd4] ss:$8 sps:$4 sm:$0xff]   ;;  %v26394_v32 = vld [vmem:[%s28457_s11 + $0x2ed0] ss:$8 sps:$4 sm:$0xff]  }
 0x616   : > { %19080 = vmatprep.mubr.bf16.mxu1 %v21041_v62  ;;  %v26397_v62 = vld [vmem:[%s28457_s11 + $0x2fd0] ss:$8 sps:$4 sm:$0xff]  }
 0x617   : > { %19010 = vmatpush1.bf16.msra.mxu0 %v26322_v21  ;;  %v26402_v21 = vld [vmem:[%s28457_s11 + $0x2ee4] ss:$8 sps:$4 sm:$0xff]  }
 0x618   : > { %19051 = vmatpush1.bf16.msra.mxu1 %v26325_v5  ;;  %19011 = vmatprep.subr.bf16.mxu0 %v26330_v27  ;;  %v26405_v5 = vld [vmem:[%s28457_s11 + $0x2fe4] ss:$8 sps:$4 sm:$0xff]   ;;  %v26400_v27 = vld [vmem:[%s28457_s11 + $0x2ee0] ss:$8 sps:$4 sm:$0xff]  }
 0x619   : > { %19052 = vmatprep.subr.bf16.mxu1 %v26333_v3  ;;  %v26403_v3 = vld [vmem:[%s28457_s11 + $0x2fe0] ss:$8 sps:$4 sm:$0xff]  }
 0x61b   : > { %19012 = vmatpush1.bf16.msra.mxu0 %v26328_v46  ;;  %v26408_v46 = vld [vmem:[%s28457_s11 + $0x2ef4] ss:$8 sps:$4 sm:$0xff]  }
 0x61c   : > { %19053 = vmatpush1.bf16.msra.mxu1 %v26331_v6  ;;  %19013 = vmatprep.subr.bf16.mxu0 %v26336_v29  ;;  %v26411_v6 = vld [vmem:[%s28457_s11 + $0x2ff4] ss:$8 sps:$4 sm:$0xff]   ;;  %v26406_v29 = vld [vmem:[%s28457_s11 + $0x2ef0] ss:$8 sps:$4 sm:$0xff]  }
 0x61d   : > { %19054 = vmatprep.subr.bf16.mxu1 %v26339_v4  ;;  %v26409_v4 = vld [vmem:[%s28457_s11 + $0x2ff0] ss:$8 sps:$4 sm:$0xff]  }
 0x61f   : > { %19014 = vmatpush1.bf16.msra.mxu0 %v26334_v53  ;;  %v26418_v53 = vld [vmem:[%s28457_s11 + $0x3004] ss:$8 sps:$4 sm:$0xff]  }
 0x620   : > { %19055 = vmatpush1.bf16.msra.mxu1 %v26337_v10  ;;  %19015 = vmatprep.subr.bf16.mxu0 %v26342_v51  ;;  %v26421_v10 = vld [vmem:[%s28457_s11 + $0x3104] ss:$8 sps:$4 sm:$0xff]   ;;  %v21038_v51 = vcombine.low %v30385_v15, %v30385_v15 }
 0x621   : > { %19056 = vmatprep.subr.bf16.mxu1 %v26345_v12  ;;  %v21040_v12 = vcombine.low %v30388_v61, %v30388_v61 }
 0x623   : > { %19016 = vmatpush1.bf16.msra.mxu0 %v26340_v37  ;;  %v30469_v37 = vld [vmem:[%s28474_s27 + $0x180] sm:$0xff] }
 0x624   : > { %19057 = vmatpush1.bf16.msra.mxu1 %v26343_v17  ;;  %19017 = vmatprep.subr.bf16.mxu0 %v26348_v14  ;;  %v30472_v17 = vld [vmem:[%s28474_s27 + $0x188] sm:$0xff]  ;;  %v26416_v14 = vld [vmem:[%s28457_s11 + $0x3000] ss:$8 sps:$4 sm:$0xff]   ;;  %v21043_v15 = vcombine.high %v30469_v37, %v30469_v37 }
 0x625   : > { %19058 = vmatprep.subr.bf16.mxu1 %v26351_v40  ;;  %v18713_v45 = vpop.f32.mrb[76].mxu0  ;;  %v26419_v40 = vld [vmem:[%s28457_s11 + $0x3100] ss:$8 sps:$4 sm:$0xff]   ;;  %v21045_v61 = vcombine.high %v30472_v17, %v30472_v17 }
 0x626   : > { %v18754_v22 = vpop.f32.mrb[76].mxu1  ;;  %v18714_v0 = vadd.f32 %v18713_v45, %v30338_v35  ;;  %v18715_v24 = vpop.f32.mrb[77].mxu0  ;;  %v26360_v35 = vld [vmem:[%s28457_s11 + $0x2e74] ss:$8 sps:$4 sm:$0xff]   ;;  %v26430_v45 = vld [vmem:[%s28457_s11 + $0x3024] ss:$8 sps:$4 sm:$0xff]  }
 0x627   : > { %v18756_v47 = vpop.f32.mrb[77].mxu1  ;;  %v18716_v33 = vadd.f32 %v18715_v24, %v30342_v57  ;;  %v18717_v9 = vpop.f32.mrb[78].mxu0  ;;  %19018 = vmatpush1.bf16.msra.mxu0 %v26346_v31  ;;  %v26363_v57 = vld [vmem:[%s28457_s11 + $0x2f74] ss:$8 sps:$4 sm:$0xff]   ;;  %v26431_v24 = vld [vmem:[%s28457_s11 + $0x3120] ss:$8 sps:$4 sm:$0xff]  }
 0x628   : > { %v18758_v30 = vpop.f32.mrb[78].mxu1  ;;  %19059 = vmatpush1.bf16.msra.mxu1 %v26349_v16  ;;  %v30422_v52 = vadd.f32 %v18754_v22, %v18714_v0  ;;  %v18718_v55 = vpop.f32.mrb[79].mxu0  ;;  %19019 = vmatprep.subr.bf16.mxu0 %v26354_v41  ;;  %v26424_v31 = vld [vmem:[%s28457_s11 + $0x3014] ss:$8 sps:$4 sm:$0xff]   ;;  %v26422_v41 = vld [vmem:[%s28457_s11 + $0x3010] ss:$8 sps:$4 sm:$0xff]  }
 0x629   : > { %v18759_v39 = vpop.f32.mrb[79].mxu1  ;;  %19060 = vmatprep.subr.bf16.mxu1 %v26357_v23  ;;  %v30426_v36 = vadd.f32 %v18756_v47, %v18716_v33  ;;  %v26427_v16 = vld [vmem:[%s28457_s11 + $0x3114] ss:$8 sps:$4 sm:$0xff]   ;;  %v26425_v23 = vld [vmem:[%s28457_s11 + $0x3110] ss:$8 sps:$4 sm:$0xff]  }
 0x62a   : > { %v26433_v22 = vld [vmem:[%s28457_s11 + $0x3124] ss:$8 sps:$4 sm:$0xff]   ;;  %v26428_v0 = vld [vmem:[%s28457_s11 + $0x3020] ss:$8 sps:$4 sm:$0xff]   ;;  %v26436_v47 = vld [vmem:[%s28457_s11 + $0x3034] ss:$8 sps:$4 sm:$0xff]  }
 0x62b   : > { %19020 = vmatpush1.bf16.msra.mxu0 %v26352_v7  ;;  %v26439_v33 = vld [vmem:[%s28457_s11 + $0x3134] ss:$8 sps:$4 sm:$0xff]   ;;  %v26434_v9 = vld [vmem:[%s28457_s11 + $0x3030] ss:$8 sps:$4 sm:$0xff]   ;;  %v26442_v7 = vld [vmem:[%s28457_s11 + $0x3044] ss:$8 sps:$4 sm:$0xff]  }
 0x62c   : > { %19061 = vmatpush1.bf16.msra.mxu1 %v26355_v34  ;;  %19021 = vmatprep.subr.bf16.mxu0 %v26360_v35  ;;  %v26437_v30 = vld [vmem:[%s28457_s11 + $0x3130] ss:$8 sps:$4 sm:$0xff]   ;;  %v26445_v34 = vld [vmem:[%s28457_s11 + $0x3144] ss:$8 sps:$4 sm:$0xff]   ;;  %v26440_v55 = vld [vmem:[%s28457_s11 + $0x3040] ss:$8 sps:$4 sm:$0xff]  }
 0x62d   : > { %19062 = vmatprep.subr.bf16.mxu1 %v26363_v57  ;;  %v26443_v39 = vld [vmem:[%s28457_s11 + $0x3140] ss:$8 sps:$4 sm:$0xff]   ;;  %v26448_v35 = vld [vmem:[%s28457_s11 + $0x3054] ss:$8 sps:$4 sm:$0xff]  }
 0x62e   : > { %v26451_v57 = vld [vmem:[%s28457_s11 + $0x3154] ss:$8 sps:$4 sm:$0xff]  }
 0x62f   : > { %19022 = vmatpush1.bf16.msra.mxu0 %v26358_v13  ;;  %v26446_v13 = vld [vmem:[%s28457_s11 + $0x3050] ss:$8 sps:$4 sm:$0xff]  }
 0x630   : > { %19063 = vmatpush1.bf16.msra.mxu1 %v26361_v38  ;;  %19023 = vmatprep.subr.bf16.mxu0 %v26366_v59  ;;  %v26449_v38 = vld [vmem:[%s28457_s11 + $0x3150] ss:$8 sps:$4 sm:$0xff]   ;;  %v26454_v59 = vld [vmem:[%s28457_s11 + $0x3064] ss:$8 sps:$4 sm:$0xff]  }
 0x631   : > { %19064 = vmatprep.subr.bf16.mxu1 %v26369_v43  ;;  %v26457_v43 = vld [vmem:[%s28457_s11 + $0x3164] ss:$8 sps:$4 sm:$0xff]  }
 0x633   : > { %19024 = vmatpush1.bf16.msra.mxu0 %v26364_v63 }
 0x634   : > { %19065 = vmatpush1.bf16.msra.mxu1 %v26367_v42  ;;  %19025 = vmatprep.subr.bf16.mxu0 %v26372_v20 }
 0x635   : > { %19066 = vmatprep.subr.bf16.mxu1 %v26375_v44 }
 0x637   : > { %19026 = vmatpush1.bf16.msra.mxu0 %v26370_v2 }
 0x638   : > { %19067 = vmatpush1.bf16.msra.mxu1 %v26373_v49  ;;  %19027 = vmatprep.subr.bf16.mxu0 %v26378_v1 }
 0x639   : > { %19068 = vmatprep.subr.bf16.mxu1 %v26381_v48 }
 0x63b   : > { %19028 = vmatpush1.bf16.msra.mxu0 %v26376_v28  ;;  %v26452_v28 = vld [vmem:[%s28457_s11 + $0x3060] ss:$8 sps:$4 sm:$0xff]  }
 0x63c   : > { %19069 = vmatpush1.bf16.msra.mxu1 %v26379_v50  ;;  %19029 = vmatprep.subr.bf16.mxu0 %v26384_v8  ;;  %v26455_v50 = vld [vmem:[%s28457_s11 + $0x3160] ss:$8 sps:$4 sm:$0xff]  }
 0x63d   : > { %19070 = vmatprep.subr.bf16.mxu1 %v26387_v11 }
 0x63f   : > { %19030 = vmatpush1.bf16.msra.mxu0 %v26382_v25 }
 0x640   : > { %19071 = vmatpush1.bf16.msra.mxu1 %v26385_v54  ;;  %19031 = vmatprep.subr.bf16.mxu0 %v26390_v26  ;;  %v26458_v26 = vld [vmem:[%s28457_s11 + $0x3070] ss:$8 sps:$4 sm:$0xff]  }
 0x641   : > { %19072 = vmatprep.subr.bf16.mxu1 %v26393_v56  ;;  %v26461_v56 = vld [vmem:[%s28457_s11 + $0x3170] ss:$8 sps:$4 sm:$0xff]  }
 0x643   : > { %19032 = vmatpush1.bf16.msra.mxu0 %v26388_v58  ;;  %v26466_v58 = vld [vmem:[%s28457_s11 + $0x3084] ss:$8 sps:$4 sm:$0xff]  }
 0x644   : > { %19073 = vmatpush1.bf16.msra.mxu1 %v26391_v18  ;;  %19033 = vmatprep.subr.bf16.mxu0 %v26396_v19  ;;  %v26469_v18 = vld [vmem:[%s28457_s11 + $0x3184] ss:$8 sps:$4 sm:$0xff]   ;;  %v26464_v19 = vld [vmem:[%s28457_s11 + $0x3080] ss:$8 sps:$4 sm:$0xff]  }
 0x645   : > { %19074 = vmatprep.subr.bf16.mxu1 %v26399_v60  ;;  %v26467_v60 = vld [vmem:[%s28457_s11 + $0x3180] ss:$8 sps:$4 sm:$0xff]  }
 0x647   : > { %19034 = vmatpush1.bf16.msra.mxu0 %v26394_v32  ;;  %v26472_v32 = vld [vmem:[%s28457_s11 + $0x3094] ss:$8 sps:$4 sm:$0xff]  }
 0x648   : > { %19075 = vmatpush1.bf16.msra.mxu1 %v26397_v62  ;;  %19035 = vmatprep.subr.bf16.mxu0 %v26402_v21  ;;  %v26475_v62 = vld [vmem:[%s28457_s11 + $0x3194] ss:$8 sps:$4 sm:$0xff]   ;;  %v26470_v21 = vld [vmem:[%s28457_s11 + $0x3090] ss:$8 sps:$4 sm:$0xff]  }
 0x649   : > { %19076 = vmatprep.subr.bf16.mxu1 %v26405_v5  ;;  %v26473_v5 = vld [vmem:[%s28457_s11 + $0x3190] ss:$8 sps:$4 sm:$0xff]  }
 0x64b   : > { %19036 = vmatpush1.bf16.msra.mxu0 %v26400_v27  ;;  %v26478_v27 = vld [vmem:[%s28457_s11 + $0x30a4] ss:$8 sps:$4 sm:$0xff]  }
 0x64c   : > { %19077 = vmatpush1.bf16.msra.mxu1 %v26403_v3  ;;  %19037 = vmatprep.subr.bf16.mxu0 %v26408_v46  ;;  %v26481_v3 = vld [vmem:[%s28457_s11 + $0x31a4] ss:$8 sps:$4 sm:$0xff]   ;;  %v26476_v46 = vld [vmem:[%s28457_s11 + $0x30a0] ss:$8 sps:$4 sm:$0xff]  }
 0x64d   : > { %19078 = vmatprep.subr.bf16.mxu1 %v26411_v6  ;;  %v26479_v6 = vld [vmem:[%s28457_s11 + $0x31a0] ss:$8 sps:$4 sm:$0xff]  }
 0x64f   : > { %19038 = vmatpush1.bf16.msra.mxu0 %v26406_v29  ;;  %v26484_v29 = vld [vmem:[%s28457_s11 + $0x30b4] ss:$8 sps:$4 sm:$0xff]  }
 0x650   : > { %19079 = vmatpush1.bf16.msra.mxu1 %v26409_v4  ;;  %19089 = vmatprep.subr.bf16.mxu0 %v26418_v53  ;;  %v26487_v4 = vld [vmem:[%s28457_s11 + $0x31b4] ss:$8 sps:$4 sm:$0xff]   ;;  %v26482_v53 = vld [vmem:[%s28457_s11 + $0x30b0] ss:$8 sps:$4 sm:$0xff]  }
 0x651   : > { %19130 = vmatprep.subr.bf16.mxu1 %v26421_v10  ;;  %v26485_v10 = vld [vmem:[%s28457_s11 + $0x31b0] ss:$8 sps:$4 sm:$0xff]  }
 0x652   : > { %19040 = vmatmul.mubr.bf16.vlgmr.msra.gmra.mrb[92].mxu0 %v21038_v51  ;;  %v26490_v51 = vld [vmem:[%s28457_s11 + $0x30c4] ss:$8 sps:$4 sm:$0xff]  }
 0x653   : > { %19081 = vmatmul.mubr.bf16.vlgmr.msra.gmra.mrb[92].mxu1 %v21040_v12  ;;  %19090 = vmatpush1.bf16.msra.mxu0 %v26416_v14  ;;  %v26493_v12 = vld [vmem:[%s28457_s11 + $0x31c4] ss:$8 sps:$4 sm:$0xff]   ;;  %v26488_v14 = vld [vmem:[%s28457_s11 + $0x30c0] ss:$8 sps:$4 sm:$0xff]  }
 0x654   : > { %19131 = vmatpush1.bf16.msra.mxu1 %v26419_v40  ;;  %19091 = vmatprep.subr.bf16.mxu0 %v26424_v31  ;;  %v26491_v40 = vld [vmem:[%s28457_s11 + $0x31c0] ss:$8 sps:$4 sm:$0xff]   ;;  %v26496_v31 = vld [vmem:[%s28457_s11 + $0x30d4] ss:$8 sps:$4 sm:$0xff]  }
 0x655   : > { %19132 = vmatprep.subr.bf16.mxu1 %v26427_v16  ;;  %19121 = vmatprep.mubr.bf16.mxu0 %v21043_v15  ;;  %v26499_v16 = vld [vmem:[%s28457_s11 + $0x31d4] ss:$8 sps:$4 sm:$0xff]   ;;  %v26494_v15 = vld [vmem:[%s28457_s11 + $0x30d0] ss:$8 sps:$4 sm:$0xff]  }
 0x656   : > { %19162 = vmatprep.mubr.bf16.mxu1 %v21045_v61  ;;  %v26497_v61 = vld [vmem:[%s28457_s11 + $0x31d0] ss:$8 sps:$4 sm:$0xff]  }
 0x657   : > { %19092 = vmatpush1.bf16.msra.mxu0 %v26422_v41  ;;  %v26502_v41 = vld [vmem:[%s28457_s11 + $0x30e4] ss:$8 sps:$4 sm:$0xff]  }
 0x658   : > { %19133 = vmatpush1.bf16.msra.mxu1 %v26425_v23  ;;  %19093 = vmatprep.subr.bf16.mxu0 %v26430_v45  ;;  %v26505_v23 = vld [vmem:[%s28457_s11 + $0x31e4] ss:$8 sps:$4 sm:$0xff]   ;;  %v26500_v45 = vld [vmem:[%s28457_s11 + $0x30e0] ss:$8 sps:$4 sm:$0xff]  }
 0x659   : > { %19134 = vmatprep.subr.bf16.mxu1 %v26433_v22  ;;  %v26503_v22 = vld [vmem:[%s28457_s11 + $0x31e0] ss:$8 sps:$4 sm:$0xff]  }
 0x65b   : > { %19094 = vmatpush1.bf16.msra.mxu0 %v26428_v0  ;;  %v26508_v0 = vld [vmem:[%s28457_s11 + $0x30f4] ss:$8 sps:$4 sm:$0xff]  }
 0x65c   : > { %19135 = vmatpush1.bf16.msra.mxu1 %v26431_v24  ;;  %19095 = vmatprep.subr.bf16.mxu0 %v26436_v47  ;;  %v26511_v24 = vld [vmem:[%s28457_s11 + $0x31f4] ss:$8 sps:$4 sm:$0xff]   ;;  %v26506_v47 = vld [vmem:[%s28457_s11 + $0x30f0] ss:$8 sps:$4 sm:$0xff]  }
 0x65d   : > { %19136 = vmatprep.subr.bf16.mxu1 %v26439_v33  ;;  %v26509_v33 = vld [vmem:[%s28457_s11 + $0x31f0] ss:$8 sps:$4 sm:$0xff]  }
 0x65f   : > { %19096 = vmatpush1.bf16.msra.mxu0 %v26434_v9  ;;  %v26518_v9 = vld [vmem:[%s28457_s11 + $0x3204] ss:$8 sps:$4 sm:$0xff]  }
 0x660   : > { %19137 = vmatpush1.bf16.msra.mxu1 %v26437_v30  ;;  %19097 = vmatprep.subr.bf16.mxu0 %v26442_v7  ;;  %v26521_v30 = vld [vmem:[%s28457_s11 + $0x3304] ss:$8 sps:$4 sm:$0xff]   ;;  %v21042_v7 = vcombine.low %v30469_v37, %v30469_v37 }
 0x661   : > { %19138 = vmatprep.subr.bf16.mxu1 %v26445_v34  ;;  %v21044_v34 = vcombine.low %v30472_v17, %v30472_v17 }
 0x663   : > { %19098 = vmatpush1.bf16.msra.mxu0 %v26440_v55  ;;  %v30553_v55 = vld [vmem:[%s28474_s27 + $0x190] sm:$0xff] }
 0x664   : > { %19139 = vmatpush1.bf16.msra.mxu1 %v26443_v39  ;;  %19099 = vmatprep.subr.bf16.mxu0 %v26448_v35  ;;  %v30556_v39 = vld [vmem:[%s28474_s27 + $0x198] sm:$0xff]  ;;  %v21047_v37 = vcombine.high %v30553_v55, %v30553_v55 }
 0x665   : > { %19140 = vmatprep.subr.bf16.mxu1 %v26451_v57  ;;  %v18795_v63 = vpop.f32.mrb[80].mxu0  ;;  %v26516_v35 = vld [vmem:[%s28457_s11 + $0x3200] ss:$8 sps:$4 sm:$0xff]   ;;  %v21049_v17 = vcombine.high %v30556_v39, %v30556_v39 }
 0x666   : > { %v18836_v42 = vpop.f32.mrb[80].mxu1  ;;  %v18796_v20 = vadd.f32 %v18795_v63, %v30422_v52  ;;  %v18797_v44 = vpop.f32.mrb[81].mxu0  ;;  %v26460_v52 = vld [vmem:[%s28457_s11 + $0x3074] ss:$8 sps:$4 sm:$0xff]   ;;  %v26519_v57 = vld [vmem:[%s28457_s11 + $0x3300] ss:$8 sps:$4 sm:$0xff]  }
 0x667   : > { %v18838_v2 = vpop.f32.mrb[81].mxu1  ;;  %v18798_v49 = vadd.f32 %v18797_v44, %v30426_v36  ;;  %v18799_v1 = vpop.f32.mrb[82].mxu0  ;;  %19100 = vmatpush1.bf16.msra.mxu0 %v26446_v13  ;;  %v26463_v36 = vld [vmem:[%s28457_s11 + $0x3174] ss:$8 sps:$4 sm:$0xff]   ;;  %v26530_v63 = vld [vmem:[%s28457_s11 + $0x3224] ss:$8 sps:$4 sm:$0xff]  }
 0x668   : > { %v18840_v48 = vpop.f32.mrb[82].mxu1  ;;  %19141 = vmatpush1.bf16.msra.mxu1 %v26449_v38  ;;  %v30506_v8 = vadd.f32 %v18836_v42, %v18796_v20  ;;  %v18800_v11 = vpop.f32.mrb[83].mxu0  ;;  %19101 = vmatprep.subr.bf16.mxu0 %v26454_v59  ;;  %v26524_v13 = vld [vmem:[%s28457_s11 + $0x3214] ss:$8 sps:$4 sm:$0xff]   ;;  %v26522_v59 = vld [vmem:[%s28457_s11 + $0x3210] ss:$8 sps:$4 sm:$0xff]  }
 0x669   : > { %v18841_v25 = vpop.f32.mrb[83].mxu1  ;;  %19142 = vmatprep.subr.bf16.mxu1 %v26457_v43  ;;  %v30510_v54 = vadd.f32 %v18838_v2, %v18798_v49  ;;  %v26527_v38 = vld [vmem:[%s28457_s11 + $0x3314] ss:$8 sps:$4 sm:$0xff]   ;;  %v26525_v43 = vld [vmem:[%s28457_s11 + $0x3310] ss:$8 sps:$4 sm:$0xff]  }
 0x66a   : > { %v26533_v42 = vld [vmem:[%s28457_s11 + $0x3324] ss:$8 sps:$4 sm:$0xff]   ;;  %v26528_v20 = vld [vmem:[%s28457_s11 + $0x3220] ss:$8 sps:$4 sm:$0xff]   ;;  %v26536_v2 = vld [vmem:[%s28457_s11 + $0x3234] ss:$8 sps:$4 sm:$0xff]  }
 0x66b   : > { %19102 = vmatpush1.bf16.msra.mxu0 %v26452_v28  ;;  %v26531_v44 = vld [vmem:[%s28457_s11 + $0x3320] ss:$8 sps:$4 sm:$0xff]   ;;  %v26539_v49 = vld [vmem:[%s28457_s11 + $0x3334] ss:$8 sps:$4 sm:$0xff]   ;;  %v26534_v1 = vld [vmem:[%s28457_s11 + $0x3230] ss:$8 sps:$4 sm:$0xff]  }
 0x66c   : > { %19143 = vmatpush1.bf16.msra.mxu1 %v26455_v50  ;;  %19103 = vmatprep.subr.bf16.mxu0 %v26460_v52  ;;  %v26537_v48 = vld [vmem:[%s28457_s11 + $0x3330] ss:$8 sps:$4 sm:$0xff]   ;;  %v26542_v28 = vld [vmem:[%s28457_s11 + $0x3244] ss:$8 sps:$4 sm:$0xff]   ;;  %v26540_v11 = vld [vmem:[%s28457_s11 + $0x3240] ss:$8 sps:$4 sm:$0xff]  }
 0x66d   : > { %19144 = vmatprep.subr.bf16.mxu1 %v26463_v36  ;;  %v26545_v50 = vld [vmem:[%s28457_s11 + $0x3344] ss:$8 sps:$4 sm:$0xff]   ;;  %v26543_v25 = vld [vmem:[%s28457_s11 + $0x3340] ss:$8 sps:$4 sm:$0xff]   ;;  %v26548_v52 = vld [vmem:[%s28457_s11 + $0x3254] ss:$8 sps:$4 sm:$0xff]  }
 0x66e   : > { %v26551_v36 = vld [vmem:[%s28457_s11 + $0x3354] ss:$8 sps:$4 sm:$0xff]  }
 0x66f   : > { %19104 = vmatpush1.bf16.msra.mxu0 %v26458_v26  ;;  %v26546_v26 = vld [vmem:[%s28457_s11 + $0x3250] ss:$8 sps:$4 sm:$0xff]  }
 0x670   : > { %19145 = vmatpush1.bf16.msra.mxu1 %v26461_v56  ;;  %19105 = vmatprep.subr.bf16.mxu0 %v26466_v58  ;;  %v26549_v56 = vld [vmem:[%s28457_s11 + $0x3350] ss:$8 sps:$4 sm:$0xff]   ;;  %v26554_v58 = vld [vmem:[%s28457_s11 + $0x3264] ss:$8 sps:$4 sm:$0xff]  }
 0x671   : > { %19146 = vmatprep.subr.bf16.mxu1 %v26469_v18  ;;  %v26557_v18 = vld [vmem:[%s28457_s11 + $0x3364] ss:$8 sps:$4 sm:$0xff]  }
 0x673   : > { %19106 = vmatpush1.bf16.msra.mxu0 %v26464_v19 }
 0x674   : > { %19147 = vmatpush1.bf16.msra.mxu1 %v26467_v60  ;;  %19107 = vmatprep.subr.bf16.mxu0 %v26472_v32 }
 0x675   : > { %19148 = vmatprep.subr.bf16.mxu1 %v26475_v62 }
 0x677   : > { %19108 = vmatpush1.bf16.msra.mxu0 %v26470_v21 }
 0x678   : > { %19149 = vmatpush1.bf16.msra.mxu1 %v26473_v5  ;;  %19109 = vmatprep.subr.bf16.mxu0 %v26478_v27 }
 0x679   : > { %19150 = vmatprep.subr.bf16.mxu1 %v26481_v3 }
 0x67b   : > { %19110 = vmatpush1.bf16.msra.mxu0 %v26476_v46  ;;  %v26552_v46 = vld [vmem:[%s28457_s11 + $0x3260] ss:$8 sps:$4 sm:$0xff]  }
 0x67c   : > { %19151 = vmatpush1.bf16.msra.mxu1 %v26479_v6  ;;  %19111 = vmatprep.subr.bf16.mxu0 %v26484_v29  ;;  %v26555_v6 = vld [vmem:[%s28457_s11 + $0x3360] ss:$8 sps:$4 sm:$0xff]  }
 0x67d   : > { %19152 = vmatprep.subr.bf16.mxu1 %v26487_v4 }
 0x67f   : > { %19112 = vmatpush1.bf16.msra.mxu0 %v26482_v53 }
 0x680   : > { %19153 = vmatpush1.bf16.msra.mxu1 %v26485_v10  ;;  %19113 = vmatprep.subr.bf16.mxu0 %v26490_v51  ;;  %v26558_v51 = vld [vmem:[%s28457_s11 + $0x3270] ss:$8 sps:$4 sm:$0xff]  }
 0x681   : > { %19154 = vmatprep.subr.bf16.mxu1 %v26493_v12  ;;  %v26561_v12 = vld [vmem:[%s28457_s11 + $0x3370] ss:$8 sps:$4 sm:$0xff]  }
 0x683   : > { %19114 = vmatpush1.bf16.msra.mxu0 %v26488_v14  ;;  %v26566_v14 = vld [vmem:[%s28457_s11 + $0x3284] ss:$8 sps:$4 sm:$0xff]  }
 0x684   : > { %19155 = vmatpush1.bf16.msra.mxu1 %v26491_v40  ;;  %19115 = vmatprep.subr.bf16.mxu0 %v26496_v31  ;;  %v26569_v40 = vld [vmem:[%s28457_s11 + $0x3384] ss:$8 sps:$4 sm:$0xff]   ;;  %v26564_v31 = vld [vmem:[%s28457_s11 + $0x3280] ss:$8 sps:$4 sm:$0xff]  }
 0x685   : > { %19156 = vmatprep.subr.bf16.mxu1 %v26499_v16  ;;  %v26567_v16 = vld [vmem:[%s28457_s11 + $0x3380] ss:$8 sps:$4 sm:$0xff]  }
 0x687   : > { %19116 = vmatpush1.bf16.msra.mxu0 %v26494_v15  ;;  %v26572_v15 = vld [vmem:[%s28457_s11 + $0x3294] ss:$8 sps:$4 sm:$0xff]  }
 0x688   : > { %19157 = vmatpush1.bf16.msra.mxu1 %v26497_v61  ;;  %19117 = vmatprep.subr.bf16.mxu0 %v26502_v41  ;;  %v26575_v61 = vld [vmem:[%s28457_s11 + $0x3394] ss:$8 sps:$4 sm:$0xff]   ;;  %v26570_v41 = vld [vmem:[%s28457_s11 + $0x3290] ss:$8 sps:$4 sm:$0xff]  }
 0x689   : > { %19158 = vmatprep.subr.bf16.mxu1 %v26505_v23  ;;  %v26573_v23 = vld [vmem:[%s28457_s11 + $0x3390] ss:$8 sps:$4 sm:$0xff]  }
 0x68b   : > { %19118 = vmatpush1.bf16.msra.mxu0 %v26500_v45  ;;  %v26578_v45 = vld [vmem:[%s28457_s11 + $0x32a4] ss:$8 sps:$4 sm:$0xff]  }
 0x68c   : > { %19159 = vmatpush1.bf16.msra.mxu1 %v26503_v22  ;;  %19119 = vmatprep.subr.bf16.mxu0 %v26508_v0  ;;  %v26581_v22 = vld [vmem:[%s28457_s11 + $0x33a4] ss:$8 sps:$4 sm:$0xff]   ;;  %v26576_v0 = vld [vmem:[%s28457_s11 + $0x32a0] ss:$8 sps:$4 sm:$0xff]  }
 0x68d   : > { %19160 = vmatprep.subr.bf16.mxu1 %v26511_v24  ;;  %v26579_v24 = vld [vmem:[%s28457_s11 + $0x33a0] ss:$8 sps:$4 sm:$0xff]  }
 0x68f   : > { %19120 = vmatpush1.bf16.msra.mxu0 %v26506_v47  ;;  %v26584_v47 = vld [vmem:[%s28457_s11 + $0x32b4] ss:$8 sps:$4 sm:$0xff]  }
 0x690   : > { %19161 = vmatpush1.bf16.msra.mxu1 %v26509_v33  ;;  %19171 = vmatprep.subr.bf16.mxu0 %v26518_v9  ;;  %v26587_v33 = vld [vmem:[%s28457_s11 + $0x33b4] ss:$8 sps:$4 sm:$0xff]   ;;  %v26582_v9 = vld [vmem:[%s28457_s11 + $0x32b0] ss:$8 sps:$4 sm:$0xff]  }
 0x691   : > { %19212 = vmatprep.subr.bf16.mxu1 %v26521_v30  ;;  %v26585_v30 = vld [vmem:[%s28457_s11 + $0x33b0] ss:$8 sps:$4 sm:$0xff]  }
 0x692   : > { %19122 = vmatmul.mubr.bf16.vlgmr.msra.gmra.mrb[96].mxu0 %v21042_v7  ;;  %v26590_v7 = vld [vmem:[%s28457_s11 + $0x32c4] ss:$8 sps:$4 sm:$0xff]  }
 0x693   : > { %19163 = vmatmul.mubr.bf16.vlgmr.msra.gmra.mrb[96].mxu1 %v21044_v34  ;;  %19172 = vmatpush1.bf16.msra.mxu0 %v26516_v35  ;;  %v26593_v34 = vld [vmem:[%s28457_s11 + $0x33c4] ss:$8 sps:$4 sm:$0xff]   ;;  %v26588_v35 = vld [vmem:[%s28457_s11 + $0x32c0] ss:$8 sps:$4 sm:$0xff]  }
 0x694   : > { %19213 = vmatpush1.bf16.msra.mxu1 %v26519_v57  ;;  %19173 = vmatprep.subr.bf16.mxu0 %v26524_v13  ;;  %v26591_v57 = vld [vmem:[%s28457_s11 + $0x33c0] ss:$8 sps:$4 sm:$0xff]   ;;  %v26596_v13 = vld [vmem:[%s28457_s11 + $0x32d4] ss:$8 sps:$4 sm:$0xff]  }
 0x695   : > { %19214 = vmatprep.subr.bf16.mxu1 %v26527_v38  ;;  %19203 = vmatprep.mubr.bf16.mxu0 %v21047_v37  ;;  %v26599_v38 = vld [vmem:[%s28457_s11 + $0x33d4] ss:$8 sps:$4 sm:$0xff]   ;;  %v26594_v37 = vld [vmem:[%s28457_s11 + $0x32d0] ss:$8 sps:$4 sm:$0xff]  }
 0x696   : > { %19244 = vmatprep.mubr.bf16.mxu1 %v21049_v17  ;;  %v26597_v17 = vld [vmem:[%s28457_s11 + $0x33d0] ss:$8 sps:$4 sm:$0xff]  }
 0x697   : > { %19174 = vmatpush1.bf16.msra.mxu0 %v26522_v59  ;;  %v26602_v59 = vld [vmem:[%s28457_s11 + $0x32e4] ss:$8 sps:$4 sm:$0xff]  }
 0x698   : > { %19215 = vmatpush1.bf16.msra.mxu1 %v26525_v43  ;;  %19175 = vmatprep.subr.bf16.mxu0 %v26530_v63  ;;  %v26605_v43 = vld [vmem:[%s28457_s11 + $0x33e4] ss:$8 sps:$4 sm:$0xff]   ;;  %v26600_v63 = vld [vmem:[%s28457_s11 + $0x32e0] ss:$8 sps:$4 sm:$0xff]  }
 0x699   : > { %19216 = vmatprep.subr.bf16.mxu1 %v26533_v42  ;;  %v26603_v42 = vld [vmem:[%s28457_s11 + $0x33e0] ss:$8 sps:$4 sm:$0xff]  }
 0x69b   : > { %19176 = vmatpush1.bf16.msra.mxu0 %v26528_v20  ;;  %v26608_v20 = vld [vmem:[%s28457_s11 + $0x32f4] ss:$8 sps:$4 sm:$0xff]  }
 0x69c   : > { %19217 = vmatpush1.bf16.msra.mxu1 %v26531_v44  ;;  %19177 = vmatprep.subr.bf16.mxu0 %v26536_v2  ;;  %v26611_v44 = vld [vmem:[%s28457_s11 + $0x33f4] ss:$8 sps:$4 sm:$0xff]   ;;  %v26606_v2 = vld [vmem:[%s28457_s11 + $0x32f0] ss:$8 sps:$4 sm:$0xff]  }
 0x69d   : > { %19218 = vmatprep.subr.bf16.mxu1 %v26539_v49  ;;  %v26609_v49 = vld [vmem:[%s28457_s11 + $0x33f0] ss:$8 sps:$4 sm:$0xff]  }
 0x69f   : > { %19178 = vmatpush1.bf16.msra.mxu0 %v26534_v1  ;;  %v26618_v1 = vld [vmem:[%s28457_s11 + $0x3404] ss:$8 sps:$4 sm:$0xff]  }
 0x6a0   : > { %19219 = vmatpush1.bf16.msra.mxu1 %v26537_v48  ;;  %19179 = vmatprep.subr.bf16.mxu0 %v26542_v28  ;;  %v26621_v48 = vld [vmem:[%s28457_s11 + $0x3504] ss:$8 sps:$4 sm:$0xff]   ;;  %v21046_v28 = vcombine.low %v30553_v55, %v30553_v55 }
 0x6a1   : > { %19220 = vmatprep.subr.bf16.mxu1 %v26545_v50  ;;  %v21048_v50 = vcombine.low %v30556_v39, %v30556_v39 }
 0x6a3   : > { %19180 = vmatpush1.bf16.msra.mxu0 %v26540_v11  ;;  %v30637_v11 = vld [vmem:[%s28474_s27 + $0x1a0] sm:$0xff] }
 0x6a4   : > { %19221 = vmatpush1.bf16.msra.mxu1 %v26543_v25  ;;  %19181 = vmatprep.subr.bf16.mxu0 %v26548_v52  ;;  %v30640_v25 = vld [vmem:[%s28474_s27 + $0x1a8] sm:$0xff]  ;;  %v26616_v52 = vld [vmem:[%s28457_s11 + $0x3400] ss:$8 sps:$4 sm:$0xff]   ;;  %v21051_v55 = vcombine.high %v30637_v11, %v30637_v11 }
 0x6a5   : > { %19222 = vmatprep.subr.bf16.mxu1 %v26551_v36  ;;  %v18877_v19 = vpop.f32.mrb[84].mxu0  ;;  %v26619_v36 = vld [vmem:[%s28457_s11 + $0x3500] ss:$8 sps:$4 sm:$0xff]   ;;  %v21053_v39 = vcombine.high %v30640_v25, %v30640_v25 }
 0x6a6   : > { %v18918_v60 = vpop.f32.mrb[84].mxu1  ;;  %v18878_v32 = vadd.f32 %v18877_v19, %v30506_v8  ;;  %v18879_v62 = vpop.f32.mrb[85].mxu0  ;;  %v26560_v8 = vld [vmem:[%s28457_s11 + $0x3274] ss:$8 sps:$4 sm:$0xff]   ;;  %v26630_v19 = vld [vmem:[%s28457_s11 + $0x3424] ss:$8 sps:$4 sm:$0xff]  }
 0x6a7   : > { %v18920_v21 = vpop.f32.mrb[85].mxu1  ;;  %v18880_v5 = vadd.f32 %v18879_v62, %v30510_v54  ;;  %v18881_v27 = vpop.f32.mrb[86].mxu0  ;;  %19182 = vmatpush1.bf16.msra.mxu0 %v26546_v26  ;;  %v26563_v54 = vld [vmem:[%s28457_s11 + $0x3374] ss:$8 sps:$4 sm:$0xff]   ;;  %v26631_v62 = vld [vmem:[%s28457_s11 + $0x3520] ss:$8 sps:$4 sm:$0xff]  }
 0x6a8   : > { %v18922_v3 = vpop.f32.mrb[86].mxu1  ;;  %19223 = vmatpush1.bf16.msra.mxu1 %v26549_v56  ;;  %v30590_v29 = vadd.f32 %v18918_v60, %v18878_v32  ;;  %v18882_v4 = vpop.f32.mrb[87].mxu0  ;;  %19183 = vmatprep.subr.bf16.mxu0 %v26554_v58  ;;  %v26624_v26 = vld [vmem:[%s28457_s11 + $0x3414] ss:$8 sps:$4 sm:$0xff]   ;;  %v26622_v58 = vld [vmem:[%s28457_s11 + $0x3410] ss:$8 sps:$4 sm:$0xff]  }
 0x6a9   : > { %v18923_v53 = vpop.f32.mrb[87].mxu1  ;;  %19224 = vmatprep.subr.bf16.mxu1 %v26557_v18  ;;  %v30594_v10 = vadd.f32 %v18920_v21, %v18880_v5  ;;  %v26627_v56 = vld [vmem:[%s28457_s11 + $0x3514] ss:$8 sps:$4 sm:$0xff]   ;;  %v26625_v18 = vld [vmem:[%s28457_s11 + $0x3510] ss:$8 sps:$4 sm:$0xff]  }
 0x6aa   : > { %v26633_v60 = vld [vmem:[%s28457_s11 + $0x3524] ss:$8 sps:$4 sm:$0xff]   ;;  %v26628_v32 = vld [vmem:[%s28457_s11 + $0x3420] ss:$8 sps:$4 sm:$0xff]   ;;  %v26636_v21 = vld [vmem:[%s28457_s11 + $0x3434] ss:$8 sps:$4 sm:$0xff]  }
 0x6ab   : > { %19184 = vmatpush1.bf16.msra.mxu0 %v26552_v46  ;;  %v26639_v5 = vld [vmem:[%s28457_s11 + $0x3534] ss:$8 sps:$4 sm:$0xff]   ;;  %v26634_v27 = vld [vmem:[%s28457_s11 + $0x3430] ss:$8 sps:$4 sm:$0xff]   ;;  %v26642_v46 = vld [vmem:[%s28457_s11 + $0x3444] ss:$8 sps:$4 sm:$0xff]  }
 0x6ac   : > { %19225 = vmatpush1.bf16.msra.mxu1 %v26555_v6  ;;  %19185 = vmatprep.subr.bf16.mxu0 %v26560_v8  ;;  %v26637_v3 = vld [vmem:[%s28457_s11 + $0x3530] ss:$8 sps:$4 sm:$0xff]   ;;  %v26645_v6 = vld [vmem:[%s28457_s11 + $0x3544] ss:$8 sps:$4 sm:$0xff]   ;;  %v26640_v4 = vld [vmem:[%s28457_s11 + $0x3440] ss:$8 sps:$4 sm:$0xff]  }
 0x6ad   : > { %19226 = vmatprep.subr.bf16.mxu1 %v26563_v54  ;;  %v26643_v53 = vld [vmem:[%s28457_s11 + $0x3540] ss:$8 sps:$4 sm:$0xff]   ;;  %v26648_v8 = vld [vmem:[%s28457_s11 + $0x3454] ss:$8 sps:$4 sm:$0xff]  }
 0x6ae   : > { %v26651_v54 = vld [vmem:[%s28457_s11 + $0x3554] ss:$8 sps:$4 sm:$0xff]  }
 0x6af   : > { %19186 = vmatpush1.bf16.msra.mxu0 %v26558_v51  ;;  %v26646_v51 = vld [vmem:[%s28457_s11 + $0x3450] ss:$8 sps:$4 sm:$0xff]  }
 0x6b0   : > { %19227 = vmatpush1.bf16.msra.mxu1 %v26561_v12  ;;  %19187 = vmatprep.subr.bf16.mxu0 %v26566_v14  ;;  %v26649_v12 = vld [vmem:[%s28457_s11 + $0x3550] ss:$8 sps:$4 sm:$0xff]   ;;  %v26654_v14 = vld [vmem:[%s28457_s11 + $0x3464] ss:$8 sps:$4 sm:$0xff]  }
 0x6b1   : > { %19228 = vmatprep.subr.bf16.mxu1 %v26569_v40  ;;  %v26657_v40 = vld [vmem:[%s28457_s11 + $0x3564] ss:$8 sps:$4 sm:$0xff]  }
 0x6b3   : > { %19188 = vmatpush1.bf16.msra.mxu0 %v26564_v31 }
 0x6b4   : > { %19229 = vmatpush1.bf16.msra.mxu1 %v26567_v16  ;;  %19189 = vmatprep.subr.bf16.mxu0 %v26572_v15 }
 0x6b5   : > { %19230 = vmatprep.subr.bf16.mxu1 %v26575_v61 }
 0x6b7   : > { %19190 = vmatpush1.bf16.msra.mxu0 %v26570_v41 }
 0x6b8   : > { %19231 = vmatpush1.bf16.msra.mxu1 %v26573_v23  ;;  %19191 = vmatprep.subr.bf16.mxu0 %v26578_v45 }
 0x6b9   : > { %19232 = vmatprep.subr.bf16.mxu1 %v26581_v22 }
 0x6bb   : > { %19192 = vmatpush1.bf16.msra.mxu0 %v26576_v0  ;;  %v26652_v0 = vld [vmem:[%s28457_s11 + $0x3460] ss:$8 sps:$4 sm:$0xff]  }
 0x6bc   : > { %19233 = vmatpush1.bf16.msra.mxu1 %v26579_v24  ;;  %19193 = vmatprep.subr.bf16.mxu0 %v26584_v47  ;;  %v26655_v24 = vld [vmem:[%s28457_s11 + $0x3560] ss:$8 sps:$4 sm:$0xff]  }
 0x6bd   : > { %19234 = vmatprep.subr.bf16.mxu1 %v26587_v33 }
 0x6bf   : > { %19194 = vmatpush1.bf16.msra.mxu0 %v26582_v9 }
 0x6c0   : > { %19235 = vmatpush1.bf16.msra.mxu1 %v26585_v30  ;;  %19195 = vmatprep.subr.bf16.mxu0 %v26590_v7  ;;  %v26658_v7 = vld [vmem:[%s28457_s11 + $0x3470] ss:$8 sps:$4 sm:$0xff]  }
 0x6c1   : > { %19236 = vmatprep.subr.bf16.mxu1 %v26593_v34  ;;  %v26661_v34 = vld [vmem:[%s28457_s11 + $0x3570] ss:$8 sps:$4 sm:$0xff]  }
 0x6c3   : > { %19196 = vmatpush1.bf16.msra.mxu0 %v26588_v35  ;;  %v26666_v35 = vld [vmem:[%s28457_s11 + $0x3484] ss:$8 sps:$4 sm:$0xff]  }
 0x6c4   : > { %19237 = vmatpush1.bf16.msra.mxu1 %v26591_v57  ;;  %19197 = vmatprep.subr.bf16.mxu0 %v26596_v13  ;;  %v26669_v57 = vld [vmem:[%s28457_s11 + $0x3584] ss:$8 sps:$4 sm:$0xff]   ;;  %v26664_v13 = vld [vmem:[%s28457_s11 + $0x3480] ss:$8 sps:$4 sm:$0xff]  }
 0x6c5   : > { %19238 = vmatprep.subr.bf16.mxu1 %v26599_v38  ;;  %v26667_v38 = vld [vmem:[%s28457_s11 + $0x3580] ss:$8 sps:$4 sm:$0xff]  }
 0x6c7   : > { %19198 = vmatpush1.bf16.msra.mxu0 %v26594_v37  ;;  %v26672_v37 = vld [vmem:[%s28457_s11 + $0x3494] ss:$8 sps:$4 sm:$0xff]  }
 0x6c8   : > { %19239 = vmatpush1.bf16.msra.mxu1 %v26597_v17  ;;  %19199 = vmatprep.subr.bf16.mxu0 %v26602_v59  ;;  %v26675_v17 = vld [vmem:[%s28457_s11 + $0x3594] ss:$8 sps:$4 sm:$0xff]   ;;  %v26670_v59 = vld [vmem:[%s28457_s11 + $0x3490] ss:$8 sps:$4 sm:$0xff]  }
 0x6c9   : > { %19240 = vmatprep.subr.bf16.mxu1 %v26605_v43  ;;  %v26673_v43 = vld [vmem:[%s28457_s11 + $0x3590] ss:$8 sps:$4 sm:$0xff]  }
 0x6cb   : > { %19200 = vmatpush1.bf16.msra.mxu0 %v26600_v63  ;;  %v26678_v63 = vld [vmem:[%s28457_s11 + $0x34a4] ss:$8 sps:$4 sm:$0xff]  }
 0x6cc   : > { %19241 = vmatpush1.bf16.msra.mxu1 %v26603_v42  ;;  %19201 = vmatprep.subr.bf16.mxu0 %v26608_v20  ;;  %v26681_v42 = vld [vmem:[%s28457_s11 + $0x35a4] ss:$8 sps:$4 sm:$0xff]   ;;  %v26676_v20 = vld [vmem:[%s28457_s11 + $0x34a0] ss:$8 sps:$4 sm:$0xff]  }
 0x6cd   : > { %19242 = vmatprep.subr.bf16.mxu1 %v26611_v44  ;;  %v26679_v44 = vld [vmem:[%s28457_s11 + $0x35a0] ss:$8 sps:$4 sm:$0xff]  }
 0x6cf   : > { %19202 = vmatpush1.bf16.msra.mxu0 %v26606_v2  ;;  %v26684_v2 = vld [vmem:[%s28457_s11 + $0x34b4] ss:$8 sps:$4 sm:$0xff]  }
 0x6d0   : > { %19243 = vmatpush1.bf16.msra.mxu1 %v26609_v49  ;;  %19253 = vmatprep.subr.bf16.mxu0 %v26618_v1  ;;  %v26687_v49 = vld [vmem:[%s28457_s11 + $0x35b4] ss:$8 sps:$4 sm:$0xff]   ;;  %v26682_v1 = vld [vmem:[%s28457_s11 + $0x34b0] ss:$8 sps:$4 sm:$0xff]  }
 0x6d1   : > { %19294 = vmatprep.subr.bf16.mxu1 %v26621_v48  ;;  %v26685_v48 = vld [vmem:[%s28457_s11 + $0x35b0] ss:$8 sps:$4 sm:$0xff]  }
 0x6d2   : > { %19204 = vmatmul.mubr.bf16.vlgmr.msra.gmra.mrb[100].mxu0 %v21046_v28  ;;  %v26690_v28 = vld [vmem:[%s28457_s11 + $0x34c4] ss:$8 sps:$4 sm:$0xff]  }
 0x6d3   : > { %19245 = vmatmul.mubr.bf16.vlgmr.msra.gmra.mrb[100].mxu1 %v21048_v50  ;;  %19254 = vmatpush1.bf16.msra.mxu0 %v26616_v52  ;;  %v26693_v50 = vld [vmem:[%s28457_s11 + $0x35c4] ss:$8 sps:$4 sm:$0xff]   ;;  %v26688_v52 = vld [vmem:[%s28457_s11 + $0x34c0] ss:$8 sps:$4 sm:$0xff]  }
 0x6d4   : > { %19295 = vmatpush1.bf16.msra.mxu1 %v26619_v36  ;;  %19255 = vmatprep.subr.bf16.mxu0 %v26624_v26  ;;  %v26691_v36 = vld [vmem:[%s28457_s11 + $0x35c0] ss:$8 sps:$4 sm:$0xff]   ;;  %v26696_v26 = vld [vmem:[%s28457_s11 + $0x34d4] ss:$8 sps:$4 sm:$0xff]  }
 0x6d5   : > { %19296 = vmatprep.subr.bf16.mxu1 %v26627_v56  ;;  %19285 = vmatprep.mubr.bf16.mxu0 %v21051_v55  ;;  %v26699_v56 = vld [vmem:[%s28457_s11 + $0x35d4] ss:$8 sps:$4 sm:$0xff]   ;;  %v26694_v55 = vld [vmem:[%s28457_s11 + $0x34d0] ss:$8 sps:$4 sm:$0xff]  }
 0x6d6   : > { %19326 = vmatprep.mubr.bf16.mxu1 %v21053_v39  ;;  %v26697_v39 = vld [vmem:[%s28457_s11 + $0x35d0] ss:$8 sps:$4 sm:$0xff]  }
 0x6d7   : > { %19256 = vmatpush1.bf16.msra.mxu0 %v26622_v58  ;;  %v26702_v58 = vld [vmem:[%s28457_s11 + $0x34e4] ss:$8 sps:$4 sm:$0xff]  }
 0x6d8   : > { %19297 = vmatpush1.bf16.msra.mxu1 %v26625_v18  ;;  %19257 = vmatprep.subr.bf16.mxu0 %v26630_v19  ;;  %v26705_v18 = vld [vmem:[%s28457_s11 + $0x35e4] ss:$8 sps:$4 sm:$0xff]   ;;  %v26700_v19 = vld [vmem:[%s28457_s11 + $0x34e0] ss:$8 sps:$4 sm:$0xff]  }
 0x6d9   : > { %19298 = vmatprep.subr.bf16.mxu1 %v26633_v60  ;;  %v26703_v60 = vld [vmem:[%s28457_s11 + $0x35e0] ss:$8 sps:$4 sm:$0xff]  }
 0x6db   : > { %19258 = vmatpush1.bf16.msra.mxu0 %v26628_v32  ;;  %v26708_v32 = vld [vmem:[%s28457_s11 + $0x34f4] ss:$8 sps:$4 sm:$0xff]  }
 0x6dc   : > { %19299 = vmatpush1.bf16.msra.mxu1 %v26631_v62  ;;  %19259 = vmatprep.subr.bf16.mxu0 %v26636_v21  ;;  %v26711_v62 = vld [vmem:[%s28457_s11 + $0x35f4] ss:$8 sps:$4 sm:$0xff]   ;;  %v26706_v21 = vld [vmem:[%s28457_s11 + $0x34f0] ss:$8 sps:$4 sm:$0xff]  }
 0x6dd   : > { %19300 = vmatprep.subr.bf16.mxu1 %v26639_v5  ;;  %v26709_v5 = vld [vmem:[%s28457_s11 + $0x35f0] ss:$8 sps:$4 sm:$0xff]  }
 0x6df   : > { %19260 = vmatpush1.bf16.msra.mxu0 %v26634_v27  ;;  %v26718_v27 = vld [vmem:[%s28457_s11 + $0x3604] ss:$8 sps:$4 sm:$0xff]  }
 0x6e0   : > { %19301 = vmatpush1.bf16.msra.mxu1 %v26637_v3  ;;  %19261 = vmatprep.subr.bf16.mxu0 %v26642_v46  ;;  %v26721_v3 = vld [vmem:[%s28457_s11 + $0x3704] ss:$8 sps:$4 sm:$0xff]   ;;  %v21050_v46 = vcombine.low %v30637_v11, %v30637_v11 }
 0x6e1   : > { %19302 = vmatprep.subr.bf16.mxu1 %v26645_v6  ;;  %v21052_v6 = vcombine.low %v30640_v25, %v30640_v25 }
 0x6e3   : > { %19262 = vmatpush1.bf16.msra.mxu0 %v26640_v4  ;;  %v30721_v4 = vld [vmem:[%s28474_s27 + $0x1b0] sm:$0xff] }
 0x6e4   : > { %19303 = vmatpush1.bf16.msra.mxu1 %v26643_v53  ;;  %19263 = vmatprep.subr.bf16.mxu0 %v26648_v8  ;;  %v30724_v53 = vld [vmem:[%s28474_s27 + $0x1b8] sm:$0xff]  ;;  %v21055_v11 = vcombine.high %v30721_v4, %v30721_v4 }
 0x6e5   : > { %19304 = vmatprep.subr.bf16.mxu1 %v26651_v54  ;;  %v18959_v31 = vpop.f32.mrb[88].mxu0  ;;  %v26716_v8 = vld [vmem:[%s28457_s11 + $0x3600] ss:$8 sps:$4 sm:$0xff]   ;;  %v21057_v25 = vcombine.high %v30724_v53, %v30724_v53 }
 0x6e6   : > { %v19000_v16 = vpop.f32.mrb[88].mxu1  ;;  %v18960_v15 = vadd.f32 %v18959_v31, %v30590_v29  ;;  %v18961_v61 = vpop.f32.mrb[89].mxu0  ;;  %v26660_v29 = vld [vmem:[%s28457_s11 + $0x3474] ss:$8 sps:$4 sm:$0xff]   ;;  %v26719_v54 = vld [vmem:[%s28457_s11 + $0x3700] ss:$8 sps:$4 sm:$0xff]  }
 0x6e7   : > { %v19002_v41 = vpop.f32.mrb[89].mxu1  ;;  %v18962_v23 = vadd.f32 %v18961_v61, %v30594_v10  ;;  %v18963_v45 = vpop.f32.mrb[90].mxu0  ;;  %19264 = vmatpush1.bf16.msra.mxu0 %v26646_v51  ;;  %v26663_v10 = vld [vmem:[%s28457_s11 + $0x3574] ss:$8 sps:$4 sm:$0xff]   ;;  %v26730_v31 = vld [vmem:[%s28457_s11 + $0x3624] ss:$8 sps:$4 sm:$0xff]  }
 0x6e8   : > { %v19004_v22 = vpop.f32.mrb[90].mxu1  ;;  %19305 = vmatpush1.bf16.msra.mxu1 %v26649_v12  ;;  %v30674_v47 = vadd.f32 %v19000_v16, %v18960_v15  ;;  %v18964_v33 = vpop.f32.mrb[91].mxu0  ;;  %19265 = vmatprep.subr.bf16.mxu0 %v26654_v14  ;;  %v26724_v51 = vld [vmem:[%s28457_s11 + $0x3614] ss:$8 sps:$4 sm:$0xff]   ;;  %v26722_v14 = vld [vmem:[%s28457_s11 + $0x3610] ss:$8 sps:$4 sm:$0xff]  }
 0x6e9   : > { %v19005_v9 = vpop.f32.mrb[91].mxu1  ;;  %19306 = vmatprep.subr.bf16.mxu1 %v26657_v40  ;;  %v30678_v30 = vadd.f32 %v19002_v41, %v18962_v23  ;;  %v26727_v12 = vld [vmem:[%s28457_s11 + $0x3714] ss:$8 sps:$4 sm:$0xff]   ;;  %v26725_v40 = vld [vmem:[%s28457_s11 + $0x3710] ss:$8 sps:$4 sm:$0xff]  }
 0x6ea   : > { %v26733_v16 = vld [vmem:[%s28457_s11 + $0x3724] ss:$8 sps:$4 sm:$0xff]   ;;  %v26728_v15 = vld [vmem:[%s28457_s11 + $0x3620] ss:$8 sps:$4 sm:$0xff]   ;;  %v26736_v41 = vld [vmem:[%s28457_s11 + $0x3634] ss:$8 sps:$4 sm:$0xff]  }
 0x6eb   : > { %19266 = vmatpush1.bf16.msra.mxu0 %v26652_v0  ;;  %v26731_v61 = vld [vmem:[%s28457_s11 + $0x3720] ss:$8 sps:$4 sm:$0xff]   ;;  %v26739_v23 = vld [vmem:[%s28457_s11 + $0x3734] ss:$8 sps:$4 sm:$0xff]   ;;  %v26734_v45 = vld [vmem:[%s28457_s11 + $0x3630] ss:$8 sps:$4 sm:$0xff]  }
 0x6ec   : > { %19307 = vmatpush1.bf16.msra.mxu1 %v26655_v24  ;;  %19267 = vmatprep.subr.bf16.mxu0 %v26660_v29  ;;  %v26737_v22 = vld [vmem:[%s28457_s11 + $0x3730] ss:$8 sps:$4 sm:$0xff]   ;;  %v26742_v0 = vld [vmem:[%s28457_s11 + $0x3644] ss:$8 sps:$4 sm:$0xff]   ;;  %v26740_v33 = vld [vmem:[%s28457_s11 + $0x3640] ss:$8 sps:$4 sm:$0xff]  }
 0x6ed   : > { %19308 = vmatprep.subr.bf16.mxu1 %v26663_v10  ;;  %v26745_v24 = vld [vmem:[%s28457_s11 + $0x3744] ss:$8 sps:$4 sm:$0xff]   ;;  %v26743_v9 = vld [vmem:[%s28457_s11 + $0x3740] ss:$8 sps:$4 sm:$0xff]   ;;  %v26748_v29 = vld [vmem:[%s28457_s11 + $0x3654] ss:$8 sps:$4 sm:$0xff]  }
 0x6ee   : > { %v26751_v10 = vld [vmem:[%s28457_s11 + $0x3754] ss:$8 sps:$4 sm:$0xff]  }
 0x6ef   : > { %19268 = vmatpush1.bf16.msra.mxu0 %v26658_v7  ;;  %v26746_v7 = vld [vmem:[%s28457_s11 + $0x3650] ss:$8 sps:$4 sm:$0xff]  }
 0x6f0   : > { %19309 = vmatpush1.bf16.msra.mxu1 %v26661_v34  ;;  %19269 = vmatprep.subr.bf16.mxu0 %v26666_v35  ;;  %v26749_v34 = vld [vmem:[%s28457_s11 + $0x3750] ss:$8 sps:$4 sm:$0xff]   ;;  %v26754_v35 = vld [vmem:[%s28457_s11 + $0x3664] ss:$8 sps:$4 sm:$0xff]  }
 0x6f1   : > { %19310 = vmatprep.subr.bf16.mxu1 %v26669_v57  ;;  %v26757_v57 = vld [vmem:[%s28457_s11 + $0x3764] ss:$8 sps:$4 sm:$0xff]  }
 0x6f3   : > { %19270 = vmatpush1.bf16.msra.mxu0 %v26664_v13 }
 0x6f4   : > { %19311 = vmatpush1.bf16.msra.mxu1 %v26667_v38  ;;  %19271 = vmatprep.subr.bf16.mxu0 %v26672_v37 }
 0x6f5   : > { %19312 = vmatprep.subr.bf16.mxu1 %v26675_v17 }
 0x6f7   : > { %19272 = vmatpush1.bf16.msra.mxu0 %v26670_v59 }
 0x6f8   : > { %19313 = vmatpush1.bf16.msra.mxu1 %v26673_v43  ;;  %19273 = vmatprep.subr.bf16.mxu0 %v26678_v63 }
 0x6f9   : > { %19314 = vmatprep.subr.bf16.mxu1 %v26681_v42 }
 0x6fb   : > { %19274 = vmatpush1.bf16.msra.mxu0 %v26676_v20  ;;  %v26752_v20 = vld [vmem:[%s28457_s11 + $0x3660] ss:$8 sps:$4 sm:$0xff]  }
 0x6fc   : > { %19315 = vmatpush1.bf16.msra.mxu1 %v26679_v44  ;;  %19275 = vmatprep.subr.bf16.mxu0 %v26684_v2  ;;  %v26755_v44 = vld [vmem:[%s28457_s11 + $0x3760] ss:$8 sps:$4 sm:$0xff]  }
 0x6fd   : > { %19316 = vmatprep.subr.bf16.mxu1 %v26687_v49 }
 0x6ff   : > { %19276 = vmatpush1.bf16.msra.mxu0 %v26682_v1 }
 0x700   : > { %19317 = vmatpush1.bf16.msra.mxu1 %v26685_v48  ;;  %19277 = vmatprep.subr.bf16.mxu0 %v26690_v28  ;;  %v26758_v28 = vld [vmem:[%s28457_s11 + $0x3670] ss:$8 sps:$4 sm:$0xff]  }
 0x701   : > { %19318 = vmatprep.subr.bf16.mxu1 %v26693_v50  ;;  %v26761_v50 = vld [vmem:[%s28457_s11 + $0x3770] ss:$8 sps:$4 sm:$0xff]  }
 0x703   : > { %19278 = vmatpush1.bf16.msra.mxu0 %v26688_v52  ;;  %v26766_v52 = vld [vmem:[%s28457_s11 + $0x3684] ss:$8 sps:$4 sm:$0xff]  }
 0x704   : > { %19319 = vmatpush1.bf16.msra.mxu1 %v26691_v36  ;;  %19279 = vmatprep.subr.bf16.mxu0 %v26696_v26  ;;  %v26769_v36 = vld [vmem:[%s28457_s11 + $0x3784] ss:$8 sps:$4 sm:$0xff]   ;;  %v26764_v26 = vld [vmem:[%s28457_s11 + $0x3680] ss:$8 sps:$4 sm:$0xff]  }
 0x705   : > { %19320 = vmatprep.subr.bf16.mxu1 %v26699_v56  ;;  %v26767_v56 = vld [vmem:[%s28457_s11 + $0x3780] ss:$8 sps:$4 sm:$0xff]  }
 0x707   : > { %19280 = vmatpush1.bf16.msra.mxu0 %v26694_v55  ;;  %v26772_v55 = vld [vmem:[%s28457_s11 + $0x3694] ss:$8 sps:$4 sm:$0xff]  }
 0x708   : > { %19321 = vmatpush1.bf16.msra.mxu1 %v26697_v39  ;;  %19281 = vmatprep.subr.bf16.mxu0 %v26702_v58  ;;  %v26775_v39 = vld [vmem:[%s28457_s11 + $0x3794] ss:$8 sps:$4 sm:$0xff]   ;;  %v26770_v58 = vld [vmem:[%s28457_s11 + $0x3690] ss:$8 sps:$4 sm:$0xff]  }
 0x709   : > { %19322 = vmatprep.subr.bf16.mxu1 %v26705_v18  ;;  %v26773_v18 = vld [vmem:[%s28457_s11 + $0x3790] ss:$8 sps:$4 sm:$0xff]  }
 0x70b   : > { %19282 = vmatpush1.bf16.msra.mxu0 %v26700_v19  ;;  %v26778_v19 = vld [vmem:[%s28457_s11 + $0x36a4] ss:$8 sps:$4 sm:$0xff]  }
 0x70c   : > { %19323 = vmatpush1.bf16.msra.mxu1 %v26703_v60  ;;  %19283 = vmatprep.subr.bf16.mxu0 %v26708_v32  ;;  %v26781_v60 = vld [vmem:[%s28457_s11 + $0x37a4] ss:$8 sps:$4 sm:$0xff]   ;;  %v26776_v32 = vld [vmem:[%s28457_s11 + $0x36a0] ss:$8 sps:$4 sm:$0xff]  }
 0x70d   : > { %19324 = vmatprep.subr.bf16.mxu1 %v26711_v62  ;;  %v26779_v62 = vld [vmem:[%s28457_s11 + $0x37a0] ss:$8 sps:$4 sm:$0xff]  }
 0x70f   : > { %19284 = vmatpush1.bf16.msra.mxu0 %v26706_v21  ;;  %v26784_v21 = vld [vmem:[%s28457_s11 + $0x36b4] ss:$8 sps:$4 sm:$0xff]  }
 0x710   : > { %19325 = vmatpush1.bf16.msra.mxu1 %v26709_v5  ;;  %19335 = vmatprep.subr.bf16.mxu0 %v26718_v27  ;;  %v26787_v5 = vld [vmem:[%s28457_s11 + $0x37b4] ss:$8 sps:$4 sm:$0xff]   ;;  %v26782_v27 = vld [vmem:[%s28457_s11 + $0x36b0] ss:$8 sps:$4 sm:$0xff]  }
 0x711   : > { %19376 = vmatprep.subr.bf16.mxu1 %v26721_v3  ;;  %v26785_v3 = vld [vmem:[%s28457_s11 + $0x37b0] ss:$8 sps:$4 sm:$0xff]  }
 0x712   : > { %19286 = vmatmul.mubr.bf16.vlgmr.msra.gmra.mrb[104].mxu0 %v21050_v46  ;;  %v26790_v46 = vld [vmem:[%s28457_s11 + $0x36c4] ss:$8 sps:$4 sm:$0xff]  }
 0x713   : > { %19327 = vmatmul.mubr.bf16.vlgmr.msra.gmra.mrb[104].mxu1 %v21052_v6  ;;  %19336 = vmatpush1.bf16.msra.mxu0 %v26716_v8  ;;  %v26793_v6 = vld [vmem:[%s28457_s11 + $0x37c4] ss:$8 sps:$4 sm:$0xff]   ;;  %v26788_v8 = vld [vmem:[%s28457_s11 + $0x36c0] ss:$8 sps:$4 sm:$0xff]  }
 0x714   : > { %19377 = vmatpush1.bf16.msra.mxu1 %v26719_v54  ;;  %19337 = vmatprep.subr.bf16.mxu0 %v26724_v51  ;;  %v26791_v54 = vld [vmem:[%s28457_s11 + $0x37c0] ss:$8 sps:$4 sm:$0xff]   ;;  %v26796_v51 = vld [vmem:[%s28457_s11 + $0x36d4] ss:$8 sps:$4 sm:$0xff]  }
 0x715   : > { %19378 = vmatprep.subr.bf16.mxu1 %v26727_v12  ;;  %19367 = vmatprep.mubr.bf16.mxu0 %v21055_v11  ;;  %v26799_v12 = vld [vmem:[%s28457_s11 + $0x37d4] ss:$8 sps:$4 sm:$0xff]   ;;  %v26794_v11 = vld [vmem:[%s28457_s11 + $0x36d0] ss:$8 sps:$4 sm:$0xff]  }
 0x716   : > { %19408 = vmatprep.mubr.bf16.mxu1 %v21057_v25  ;;  %v26797_v25 = vld [vmem:[%s28457_s11 + $0x37d0] ss:$8 sps:$4 sm:$0xff]  }
 0x717   : > { %19338 = vmatpush1.bf16.msra.mxu0 %v26722_v14  ;;  %v26802_v14 = vld [vmem:[%s28457_s11 + $0x36e4] ss:$8 sps:$4 sm:$0xff]  }
 0x718   : > { %19379 = vmatpush1.bf16.msra.mxu1 %v26725_v40  ;;  %19339 = vmatprep.subr.bf16.mxu0 %v26730_v31  ;;  %v26805_v40 = vld [vmem:[%s28457_s11 + $0x37e4] ss:$8 sps:$4 sm:$0xff]   ;;  %v26800_v31 = vld [vmem:[%s28457_s11 + $0x36e0] ss:$8 sps:$4 sm:$0xff]  }
 0x719   : > { %19380 = vmatprep.subr.bf16.mxu1 %v26733_v16  ;;  %v26803_v16 = vld [vmem:[%s28457_s11 + $0x37e0] ss:$8 sps:$4 sm:$0xff]  }
 0x71b   : > { %19340 = vmatpush1.bf16.msra.mxu0 %v26728_v15  ;;  %v26808_v15 = vld [vmem:[%s28457_s11 + $0x36f4] ss:$8 sps:$4 sm:$0xff]  }
 0x71c   : > { %19381 = vmatpush1.bf16.msra.mxu1 %v26731_v61  ;;  %19341 = vmatprep.subr.bf16.mxu0 %v26736_v41  ;;  %v26811_v61 = vld [vmem:[%s28457_s11 + $0x37f4] ss:$8 sps:$4 sm:$0xff]   ;;  %v26806_v41 = vld [vmem:[%s28457_s11 + $0x36f0] ss:$8 sps:$4 sm:$0xff]  }
 0x71d   : > { %19382 = vmatprep.subr.bf16.mxu1 %v26739_v23  ;;  %v26809_v23 = vld [vmem:[%s28457_s11 + $0x37f0] ss:$8 sps:$4 sm:$0xff]  }
 0x71f   : > { %19342 = vmatpush1.bf16.msra.mxu0 %v26734_v45  ;;  %v26818_v45 = vld [vmem:[%s28457_s11 + $0x3804] ss:$8 sps:$4 sm:$0xff]  }
 0x720   : > { %19383 = vmatpush1.bf16.msra.mxu1 %v26737_v22  ;;  %19343 = vmatprep.subr.bf16.mxu0 %v26742_v0  ;;  %v26821_v22 = vld [vmem:[%s28457_s11 + $0x3904] ss:$8 sps:$4 sm:$0xff]   ;;  %v21054_v0 = vcombine.low %v30721_v4, %v30721_v4 }
 0x721   : > { %19384 = vmatprep.subr.bf16.mxu1 %v26745_v24  ;;  %v21056_v24 = vcombine.low %v30724_v53, %v30724_v53 }
 0x723   : > { %19344 = vmatpush1.bf16.msra.mxu0 %v26740_v33  ;;  %v30805_v33 = vld [vmem:[%s28474_s27 + $0x1c0] sm:$0xff] }
 0x724   : > { %19385 = vmatpush1.bf16.msra.mxu1 %v26743_v9  ;;  %19345 = vmatprep.subr.bf16.mxu0 %v26748_v29  ;;  %v30808_v9 = vld [vmem:[%s28474_s27 + $0x1c8] sm:$0xff]  ;;  %v26816_v29 = vld [vmem:[%s28457_s11 + $0x3800] ss:$8 sps:$4 sm:$0xff]   ;;  %v21059_v4 = vcombine.high %v30805_v33, %v30805_v33 }
 0x725   : > { %19386 = vmatprep.subr.bf16.mxu1 %v26751_v10  ;;  %v19041_v13 = vpop.f32.mrb[92].mxu0  ;;  %v26819_v10 = vld [vmem:[%s28457_s11 + $0x3900] ss:$8 sps:$4 sm:$0xff]   ;;  %v21061_v53 = vcombine.high %v30808_v9, %v30808_v9 }
 0x726   : > { %v19082_v38 = vpop.f32.mrb[92].mxu1  ;;  %v19042_v37 = vadd.f32 %v19041_v13, %v30674_v47  ;;  %v19043_v17 = vpop.f32.mrb[93].mxu0  ;;  %v26760_v47 = vld [vmem:[%s28457_s11 + $0x3674] ss:$8 sps:$4 sm:$0xff]   ;;  %v26830_v13 = vld [vmem:[%s28457_s11 + $0x3824] ss:$8 sps:$4 sm:$0xff]  }
 0x727   : > { %v19084_v59 = vpop.f32.mrb[93].mxu1  ;;  %v19044_v43 = vadd.f32 %v19043_v17, %v30678_v30  ;;  %v19045_v63 = vpop.f32.mrb[94].mxu0  ;;  %19346 = vmatpush1.bf16.msra.mxu0 %v26746_v7  ;;  %v26763_v30 = vld [vmem:[%s28457_s11 + $0x3774] ss:$8 sps:$4 sm:$0xff]   ;;  %v26831_v17 = vld [vmem:[%s28457_s11 + $0x3920] ss:$8 sps:$4 sm:$0xff]  }
 0x728   : > { %v19086_v42 = vpop.f32.mrb[94].mxu1  ;;  %19387 = vmatpush1.bf16.msra.mxu1 %v26749_v34  ;;  %v30758_v2 = vadd.f32 %v19082_v38, %v19042_v37  ;;  %v19046_v49 = vpop.f32.mrb[95].mxu0  ;;  %19347 = vmatprep.subr.bf16.mxu0 %v26754_v35  ;;  %v26824_v7 = vld [vmem:[%s28457_s11 + $0x3814] ss:$8 sps:$4 sm:$0xff]   ;;  %v26822_v35 = vld [vmem:[%s28457_s11 + $0x3810] ss:$8 sps:$4 sm:$0xff]  }
 0x729   : > { %v19087_v1 = vpop.f32.mrb[95].mxu1  ;;  %19388 = vmatprep.subr.bf16.mxu1 %v26757_v57  ;;  %v30762_v48 = vadd.f32 %v19084_v59, %v19044_v43  ;;  %v26827_v34 = vld [vmem:[%s28457_s11 + $0x3914] ss:$8 sps:$4 sm:$0xff]   ;;  %v26825_v57 = vld [vmem:[%s28457_s11 + $0x3910] ss:$8 sps:$4 sm:$0xff]  }
 0x72a   : > { %v26833_v38 = vld [vmem:[%s28457_s11 + $0x3924] ss:$8 sps:$4 sm:$0xff]   ;;  %v26828_v37 = vld [vmem:[%s28457_s11 + $0x3820] ss:$8 sps:$4 sm:$0xff]   ;;  %v26836_v59 = vld [vmem:[%s28457_s11 + $0x3834] ss:$8 sps:$4 sm:$0xff]  }
 0x72b   : > { %19348 = vmatpush1.bf16.msra.mxu0 %v26752_v20  ;;  %v26839_v43 = vld [vmem:[%s28457_s11 + $0x3934] ss:$8 sps:$4 sm:$0xff]   ;;  %v26834_v63 = vld [vmem:[%s28457_s11 + $0x3830] ss:$8 sps:$4 sm:$0xff]   ;;  %v26842_v20 = vld [vmem:[%s28457_s11 + $0x3844] ss:$8 sps:$4 sm:$0xff]  }
 0x72c   : > { %19389 = vmatpush1.bf16.msra.mxu1 %v26755_v44  ;;  %19349 = vmatprep.subr.bf16.mxu0 %v26760_v47  ;;  %v26837_v42 = vld [vmem:[%s28457_s11 + $0x3930] ss:$8 sps:$4 sm:$0xff]   ;;  %v26845_v44 = vld [vmem:[%s28457_s11 + $0x3944] ss:$8 sps:$4 sm:$0xff]   ;;  %v26840_v49 = vld [vmem:[%s28457_s11 + $0x3840] ss:$8 sps:$4 sm:$0xff]  }
 0x72d   : > { %19390 = vmatprep.subr.bf16.mxu1 %v26763_v30  ;;  %v26843_v1 = vld [vmem:[%s28457_s11 + $0x3940] ss:$8 sps:$4 sm:$0xff]   ;;  %v26848_v47 = vld [vmem:[%s28457_s11 + $0x3854] ss:$8 sps:$4 sm:$0xff]  }
 0x72e   : > { %v26851_v30 = vld [vmem:[%s28457_s11 + $0x3954] ss:$8 sps:$4 sm:$0xff]  }
 0x72f   : > { %19350 = vmatpush1.bf16.msra.mxu0 %v26758_v28  ;;  %v26846_v28 = vld [vmem:[%s28457_s11 + $0x3850] ss:$8 sps:$4 sm:$0xff]  }
 0x730   : > { %19391 = vmatpush1.bf16.msra.mxu1 %v26761_v50  ;;  %19351 = vmatprep.subr.bf16.mxu0 %v26766_v52  ;;  %v26849_v50 = vld [vmem:[%s28457_s11 + $0x3950] ss:$8 sps:$4 sm:$0xff]   ;;  %v26854_v52 = vld [vmem:[%s28457_s11 + $0x3864] ss:$8 sps:$4 sm:$0xff]  }
 0x731   : > { %19392 = vmatprep.subr.bf16.mxu1 %v26769_v36  ;;  %v26857_v36 = vld [vmem:[%s28457_s11 + $0x3964] ss:$8 sps:$4 sm:$0xff]  }
 0x733   : > { %19352 = vmatpush1.bf16.msra.mxu0 %v26764_v26 }
 0x734   : > { %19393 = vmatpush1.bf16.msra.mxu1 %v26767_v56  ;;  %19353 = vmatprep.subr.bf16.mxu0 %v26772_v55 }
 0x735   : > { %19394 = vmatprep.subr.bf16.mxu1 %v26775_v39 }
 0x737   : > { %19354 = vmatpush1.bf16.msra.mxu0 %v26770_v58 }
 0x738   : > { %19395 = vmatpush1.bf16.msra.mxu1 %v26773_v18  ;;  %19355 = vmatprep.subr.bf16.mxu0 %v26778_v19 }
 0x739   : > { %19396 = vmatprep.subr.bf16.mxu1 %v26781_v60 }
 0x73b   : > { %19356 = vmatpush1.bf16.msra.mxu0 %v26776_v32  ;;  %v26852_v32 = vld [vmem:[%s28457_s11 + $0x3860] ss:$8 sps:$4 sm:$0xff]  }
 0x73c   : > { %19397 = vmatpush1.bf16.msra.mxu1 %v26779_v62  ;;  %19357 = vmatprep.subr.bf16.mxu0 %v26784_v21  ;;  %v26855_v62 = vld [vmem:[%s28457_s11 + $0x3960] ss:$8 sps:$4 sm:$0xff]  }
 0x73d   : > { %19398 = vmatprep.subr.bf16.mxu1 %v26787_v5 }
 0x73f   : > { %19358 = vmatpush1.bf16.msra.mxu0 %v26782_v27 }
 0x740   : > { %19399 = vmatpush1.bf16.msra.mxu1 %v26785_v3  ;;  %19359 = vmatprep.subr.bf16.mxu0 %v26790_v46  ;;  %v26858_v46 = vld [vmem:[%s28457_s11 + $0x3870] ss:$8 sps:$4 sm:$0xff]  }
 0x741   : > { %19400 = vmatprep.subr.bf16.mxu1 %v26793_v6  ;;  %v26861_v6 = vld [vmem:[%s28457_s11 + $0x3970] ss:$8 sps:$4 sm:$0xff]  }
 0x743   : > { %19360 = vmatpush1.bf16.msra.mxu0 %v26788_v8  ;;  %v26866_v8 = vld [vmem:[%s28457_s11 + $0x3884] ss:$8 sps:$4 sm:$0xff]  }
 0x744   : > { %19401 = vmatpush1.bf16.msra.mxu1 %v26791_v54  ;;  %19361 = vmatprep.subr.bf16.mxu0 %v26796_v51  ;;  %v26869_v54 = vld [vmem:[%s28457_s11 + $0x3984] ss:$8 sps:$4 sm:$0xff]   ;;  %v26864_v51 = vld [vmem:[%s28457_s11 + $0x3880] ss:$8 sps:$4 sm:$0xff]  }
 0x745   : > { %19402 = vmatprep.subr.bf16.mxu1 %v26799_v12  ;;  %v26867_v12 = vld [vmem:[%s28457_s11 + $0x3980] ss:$8 sps:$4 sm:$0xff]  }
 0x747   : > { %19362 = vmatpush1.bf16.msra.mxu0 %v26794_v11  ;;  %v26872_v11 = vld [vmem:[%s28457_s11 + $0x3894] ss:$8 sps:$4 sm:$0xff]  }
 0x748   : > { %19403 = vmatpush1.bf16.msra.mxu1 %v26797_v25  ;;  %19363 = vmatprep.subr.bf16.mxu0 %v26802_v14  ;;  %v26875_v25 = vld [vmem:[%s28457_s11 + $0x3994] ss:$8 sps:$4 sm:$0xff]   ;;  %v26870_v14 = vld [vmem:[%s28457_s11 + $0x3890] ss:$8 sps:$4 sm:$0xff]  }
 0x749   : > { %19404 = vmatprep.subr.bf16.mxu1 %v26805_v40  ;;  %v26873_v40 = vld [vmem:[%s28457_s11 + $0x3990] ss:$8 sps:$4 sm:$0xff]  }
 0x74b   : > { %19364 = vmatpush1.bf16.msra.mxu0 %v26800_v31  ;;  %v26878_v31 = vld [vmem:[%s28457_s11 + $0x38a4] ss:$8 sps:$4 sm:$0xff]  }
 0x74c   : > { %19405 = vmatpush1.bf16.msra.mxu1 %v26803_v16  ;;  %19365 = vmatprep.subr.bf16.mxu0 %v26808_v15  ;;  %v26881_v16 = vld [vmem:[%s28457_s11 + $0x39a4] ss:$8 sps:$4 sm:$0xff]   ;;  %v26876_v15 = vld [vmem:[%s28457_s11 + $0x38a0] ss:$8 sps:$4 sm:$0xff]  }
 0x74d   : > { %19406 = vmatprep.subr.bf16.mxu1 %v26811_v61  ;;  %v26879_v61 = vld [vmem:[%s28457_s11 + $0x39a0] ss:$8 sps:$4 sm:$0xff]  }
 0x74f   : > { %19366 = vmatpush1.bf16.msra.mxu0 %v26806_v41  ;;  %v26884_v41 = vld [vmem:[%s28457_s11 + $0x38b4] ss:$8 sps:$4 sm:$0xff]  }
 0x750   : > { %19407 = vmatpush1.bf16.msra.mxu1 %v26809_v23  ;;  %19417 = vmatprep.subr.bf16.mxu0 %v26818_v45  ;;  %v26887_v23 = vld [vmem:[%s28457_s11 + $0x39b4] ss:$8 sps:$4 sm:$0xff]   ;;  %v26882_v45 = vld [vmem:[%s28457_s11 + $0x38b0] ss:$8 sps:$4 sm:$0xff]  }
 0x751   : > { %19458 = vmatprep.subr.bf16.mxu1 %v26821_v22  ;;  %v26885_v22 = vld [vmem:[%s28457_s11 + $0x39b0] ss:$8 sps:$4 sm:$0xff]  }
 0x752   : > { %19368 = vmatmul.mubr.bf16.vlgmr.msra.gmra.mrb[108].mxu0 %v21054_v0  ;;  %v26890_v0 = vld [vmem:[%s28457_s11 + $0x38c4] ss:$8 sps:$4 sm:$0xff]  }
 0x753   : > { %19409 = vmatmul.mubr.bf16.vlgmr.msra.gmra.mrb[108].mxu1 %v21056_v24  ;;  %19418 = vmatpush1.bf16.msra.mxu0 %v26816_v29  ;;  %v26893_v24 = vld [vmem:[%s28457_s11 + $0x39c4] ss:$8 sps:$4 sm:$0xff]   ;;  %v26888_v29 = vld [vmem:[%s28457_s11 + $0x38c0] ss:$8 sps:$4 sm:$0xff]  }
 0x754   : > { %19459 = vmatpush1.bf16.msra.mxu1 %v26819_v10  ;;  %19419 = vmatprep.subr.bf16.mxu0 %v26824_v7  ;;  %v26891_v10 = vld [vmem:[%s28457_s11 + $0x39c0] ss:$8 sps:$4 sm:$0xff]   ;;  %v26896_v7 = vld [vmem:[%s28457_s11 + $0x38d4] ss:$8 sps:$4 sm:$0xff]  }
 0x755   : > { %19460 = vmatprep.subr.bf16.mxu1 %v26827_v34  ;;  %19449 = vmatprep.mubr.bf16.mxu0 %v21059_v4  ;;  %v26899_v34 = vld [vmem:[%s28457_s11 + $0x39d4] ss:$8 sps:$4 sm:$0xff]   ;;  %v26894_v4 = vld [vmem:[%s28457_s11 + $0x38d0] ss:$8 sps:$4 sm:$0xff]  }
 0x756   : > { %19490 = vmatprep.mubr.bf16.mxu1 %v21061_v53  ;;  %v26897_v53 = vld [vmem:[%s28457_s11 + $0x39d0] ss:$8 sps:$4 sm:$0xff]  }
 0x757   : > { %19420 = vmatpush1.bf16.msra.mxu0 %v26822_v35  ;;  %v26902_v35 = vld [vmem:[%s28457_s11 + $0x38e4] ss:$8 sps:$4 sm:$0xff]  }
 0x758   : > { %19461 = vmatpush1.bf16.msra.mxu1 %v26825_v57  ;;  %19421 = vmatprep.subr.bf16.mxu0 %v26830_v13  ;;  %v26905_v57 = vld [vmem:[%s28457_s11 + $0x39e4] ss:$8 sps:$4 sm:$0xff]   ;;  %v26900_v13 = vld [vmem:[%s28457_s11 + $0x38e0] ss:$8 sps:$4 sm:$0xff]  }
 0x759   : > { %19462 = vmatprep.subr.bf16.mxu1 %v26833_v38  ;;  %v26903_v38 = vld [vmem:[%s28457_s11 + $0x39e0] ss:$8 sps:$4 sm:$0xff]  }
 0x75b   : > { %19422 = vmatpush1.bf16.msra.mxu0 %v26828_v37  ;;  %v26908_v37 = vld [vmem:[%s28457_s11 + $0x38f4] ss:$8 sps:$4 sm:$0xff]  }
 0x75c   : > { %19463 = vmatpush1.bf16.msra.mxu1 %v26831_v17  ;;  %19423 = vmatprep.subr.bf16.mxu0 %v26836_v59  ;;  %v26911_v17 = vld [vmem:[%s28457_s11 + $0x39f4] ss:$8 sps:$4 sm:$0xff]   ;;  %v26906_v59 = vld [vmem:[%s28457_s11 + $0x38f0] ss:$8 sps:$4 sm:$0xff]  }
 0x75d   : > { %19464 = vmatprep.subr.bf16.mxu1 %v26839_v43  ;;  %v26909_v43 = vld [vmem:[%s28457_s11 + $0x39f0] ss:$8 sps:$4 sm:$0xff]  }
 0x75f   : > { %19424 = vmatpush1.bf16.msra.mxu0 %v26834_v63  ;;  %v26918_v63 = vld [vmem:[%s28457_s11 + $0x3a04] ss:$8 sps:$4 sm:$0xff]  }
 0x760   : > { %19465 = vmatpush1.bf16.msra.mxu1 %v26837_v42  ;;  %19425 = vmatprep.subr.bf16.mxu0 %v26842_v20  ;;  %v26921_v42 = vld [vmem:[%s28457_s11 + $0x3b04] ss:$8 sps:$4 sm:$0xff]   ;;  %v21058_v20 = vcombine.low %v30805_v33, %v30805_v33 }
 0x761   : > { %19466 = vmatprep.subr.bf16.mxu1 %v26845_v44  ;;  %v21060_v44 = vcombine.low %v30808_v9, %v30808_v9 }
 0x763   : > { %19426 = vmatpush1.bf16.msra.mxu0 %v26840_v49  ;;  %v30889_v49 = vld [vmem:[%s28474_s27 + $0x1d0] sm:$0xff] }
 0x764   : > { %19467 = vmatpush1.bf16.msra.mxu1 %v26843_v1  ;;  %19427 = vmatprep.subr.bf16.mxu0 %v26848_v47  ;;  %v30892_v1 = vld [vmem:[%s28474_s27 + $0x1d8] sm:$0xff]  ;;  %v21063_v33 = vcombine.high %v30889_v49, %v30889_v49 }
 0x765   : > { %19468 = vmatprep.subr.bf16.mxu1 %v26851_v30  ;;  %v19123_v26 = vpop.f32.mrb[96].mxu0  ;;  %v26916_v47 = vld [vmem:[%s28457_s11 + $0x3a00] ss:$8 sps:$4 sm:$0xff]   ;;  %v21065_v9 = vcombine.high %v30892_v1, %v30892_v1 }
 0x766   : > { %v19164_v56 = vpop.f32.mrb[96].mxu1  ;;  %v19124_v55 = vadd.f32 %v19123_v26, %v30758_v2  ;;  %v19125_v39 = vpop.f32.mrb[97].mxu0  ;;  %v26860_v2 = vld [vmem:[%s28457_s11 + $0x3874] ss:$8 sps:$4 sm:$0xff]   ;;  %v26919_v30 = vld [vmem:[%s28457_s11 + $0x3b00] ss:$8 sps:$4 sm:$0xff]  }
 0x767   : > { %v19166_v58 = vpop.f32.mrb[97].mxu1  ;;  %v19126_v18 = vadd.f32 %v19125_v39, %v30762_v48  ;;  %v19127_v19 = vpop.f32.mrb[98].mxu0  ;;  %19428 = vmatpush1.bf16.msra.mxu0 %v26846_v28  ;;  %v26863_v48 = vld [vmem:[%s28457_s11 + $0x3974] ss:$8 sps:$4 sm:$0xff]   ;;  %v26930_v26 = vld [vmem:[%s28457_s11 + $0x3a24] ss:$8 sps:$4 sm:$0xff]  }
 0x768   : > { %v19168_v60 = vpop.f32.mrb[98].mxu1  ;;  %19469 = vmatpush1.bf16.msra.mxu1 %v26849_v50  ;;  %v30842_v21 = vadd.f32 %v19164_v56, %v19124_v55  ;;  %v19128_v5 = vpop.f32.mrb[99].mxu0  ;;  %19429 = vmatprep.subr.bf16.mxu0 %v26854_v52  ;;  %v26924_v28 = vld [vmem:[%s28457_s11 + $0x3a14] ss:$8 sps:$4 sm:$0xff]   ;;  %v26922_v52 = vld [vmem:[%s28457_s11 + $0x3a10] ss:$8 sps:$4 sm:$0xff]  }
 0x769   : > { %v19169_v27 = vpop.f32.mrb[99].mxu1  ;;  %19470 = vmatprep.subr.bf16.mxu1 %v26857_v36  ;;  %v30846_v3 = vadd.f32 %v19166_v58, %v19126_v18  ;;  %v26927_v50 = vld [vmem:[%s28457_s11 + $0x3b14] ss:$8 sps:$4 sm:$0xff]   ;;  %v26925_v36 = vld [vmem:[%s28457_s11 + $0x3b10] ss:$8 sps:$4 sm:$0xff]  }
 0x76a   : > { %v26933_v56 = vld [vmem:[%s28457_s11 + $0x3b24] ss:$8 sps:$4 sm:$0xff]   ;;  %v26928_v55 = vld [vmem:[%s28457_s11 + $0x3a20] ss:$8 sps:$4 sm:$0xff]   ;;  %v26936_v58 = vld [vmem:[%s28457_s11 + $0x3a34] ss:$8 sps:$4 sm:$0xff]  }
 0x76b   : > { %19430 = vmatpush1.bf16.msra.mxu0 %v26852_v32  ;;  %v26931_v39 = vld [vmem:[%s28457_s11 + $0x3b20] ss:$8 sps:$4 sm:$0xff]   ;;  %v26939_v18 = vld [vmem:[%s28457_s11 + $0x3b34] ss:$8 sps:$4 sm:$0xff]   ;;  %v26934_v19 = vld [vmem:[%s28457_s11 + $0x3a30] ss:$8 sps:$4 sm:$0xff]  }
 0x76c   : > { %19471 = vmatpush1.bf16.msra.mxu1 %v26855_v62  ;;  %19431 = vmatprep.subr.bf16.mxu0 %v26860_v2  ;;  %v26937_v60 = vld [vmem:[%s28457_s11 + $0x3b30] ss:$8 sps:$4 sm:$0xff]   ;;  %v26942_v32 = vld [vmem:[%s28457_s11 + $0x3a44] ss:$8 sps:$4 sm:$0xff]   ;;  %v26940_v5 = vld [vmem:[%s28457_s11 + $0x3a40] ss:$8 sps:$4 sm:$0xff]  }
 0x76d   : > { %19472 = vmatprep.subr.bf16.mxu1 %v26863_v48  ;;  %v26945_v62 = vld [vmem:[%s28457_s11 + $0x3b44] ss:$8 sps:$4 sm:$0xff]   ;;  %v26943_v27 = vld [vmem:[%s28457_s11 + $0x3b40] ss:$8 sps:$4 sm:$0xff]   ;;  %v26948_v2 = vld [vmem:[%s28457_s11 + $0x3a54] ss:$8 sps:$4 sm:$0xff]  }
 0x76e   : > { %v26951_v48 = vld [vmem:[%s28457_s11 + $0x3b54] ss:$8 sps:$4 sm:$0xff]  }
 0x76f   : > { %19432 = vmatpush1.bf16.msra.mxu0 %v26858_v46  ;;  %v26946_v46 = vld [vmem:[%s28457_s11 + $0x3a50] ss:$8 sps:$4 sm:$0xff]  }
 0x770   : > { %19473 = vmatpush1.bf16.msra.mxu1 %v26861_v6  ;;  %19433 = vmatprep.subr.bf16.mxu0 %v26866_v8  ;;  %v26949_v6 = vld [vmem:[%s28457_s11 + $0x3b50] ss:$8 sps:$4 sm:$0xff]   ;;  %v26954_v8 = vld [vmem:[%s28457_s11 + $0x3a64] ss:$8 sps:$4 sm:$0xff]  }
 0x771   : > { %19474 = vmatprep.subr.bf16.mxu1 %v26869_v54  ;;  %v26957_v54 = vld [vmem:[%s28457_s11 + $0x3b64] ss:$8 sps:$4 sm:$0xff]  }
 0x773   : > { %19434 = vmatpush1.bf16.msra.mxu0 %v26864_v51 }
 0x774   : > { %19475 = vmatpush1.bf16.msra.mxu1 %v26867_v12  ;;  %19435 = vmatprep.subr.bf16.mxu0 %v26872_v11 }
 0x775   : > { %19476 = vmatprep.subr.bf16.mxu1 %v26875_v25 }
 0x777   : > { %19436 = vmatpush1.bf16.msra.mxu0 %v26870_v14 }
 0x778   : > { %19477 = vmatpush1.bf16.msra.mxu1 %v26873_v40  ;;  %19437 = vmatprep.subr.bf16.mxu0 %v26878_v31 }
 0x779   : > { %19478 = vmatprep.subr.bf16.mxu1 %v26881_v16 }
 0x77b   : > { %19438 = vmatpush1.bf16.msra.mxu0 %v26876_v15  ;;  %v26952_v15 = vld [vmem:[%s28457_s11 + $0x3a60] ss:$8 sps:$4 sm:$0xff]  }
 0x77c   : > { %19479 = vmatpush1.bf16.msra.mxu1 %v26879_v61  ;;  %19439 = vmatprep.subr.bf16.mxu0 %v26884_v41  ;;  %v26955_v61 = vld [vmem:[%s28457_s11 + $0x3b60] ss:$8 sps:$4 sm:$0xff]  }
 0x77d   : > { %19480 = vmatprep.subr.bf16.mxu1 %v26887_v23 }
 0x77f   : > { %19440 = vmatpush1.bf16.msra.mxu0 %v26882_v45 }
 0x780   : > { %19481 = vmatpush1.bf16.msra.mxu1 %v26885_v22  ;;  %19441 = vmatprep.subr.bf16.mxu0 %v26890_v0  ;;  %v26958_v0 = vld [vmem:[%s28457_s11 + $0x3a70] ss:$8 sps:$4 sm:$0xff]  }
 0x781   : > { %19482 = vmatprep.subr.bf16.mxu1 %v26893_v24  ;;  %v26961_v24 = vld [vmem:[%s28457_s11 + $0x3b70] ss:$8 sps:$4 sm:$0xff]  }
 0x783   : > { %19442 = vmatpush1.bf16.msra.mxu0 %v26888_v29  ;;  %v26966_v29 = vld [vmem:[%s28457_s11 + $0x3a84] ss:$8 sps:$4 sm:$0xff]  }
 0x784   : > { %19483 = vmatpush1.bf16.msra.mxu1 %v26891_v10  ;;  %19443 = vmatprep.subr.bf16.mxu0 %v26896_v7  ;;  %v26969_v10 = vld [vmem:[%s28457_s11 + $0x3b84] ss:$8 sps:$4 sm:$0xff]   ;;  %v26964_v7 = vld [vmem:[%s28457_s11 + $0x3a80] ss:$8 sps:$4 sm:$0xff]  }
 0x785   : > { %19484 = vmatprep.subr.bf16.mxu1 %v26899_v34  ;;  %v26967_v34 = vld [vmem:[%s28457_s11 + $0x3b80] ss:$8 sps:$4 sm:$0xff]  }
 0x787   : > { %19444 = vmatpush1.bf16.msra.mxu0 %v26894_v4  ;;  %v26972_v4 = vld [vmem:[%s28457_s11 + $0x3a94] ss:$8 sps:$4 sm:$0xff]  }
 0x788   : > { %19485 = vmatpush1.bf16.msra.mxu1 %v26897_v53  ;;  %19445 = vmatprep.subr.bf16.mxu0 %v26902_v35  ;;  %v26975_v53 = vld [vmem:[%s28457_s11 + $0x3b94] ss:$8 sps:$4 sm:$0xff]   ;;  %v26970_v35 = vld [vmem:[%s28457_s11 + $0x3a90] ss:$8 sps:$4 sm:$0xff]  }
 0x789   : > { %19486 = vmatprep.subr.bf16.mxu1 %v26905_v57  ;;  %v26973_v57 = vld [vmem:[%s28457_s11 + $0x3b90] ss:$8 sps:$4 sm:$0xff]  }
 0x78b   : > { %19446 = vmatpush1.bf16.msra.mxu0 %v26900_v13  ;;  %v26978_v13 = vld [vmem:[%s28457_s11 + $0x3aa4] ss:$8 sps:$4 sm:$0xff]  }
 0x78c   : > { %19487 = vmatpush1.bf16.msra.mxu1 %v26903_v38  ;;  %19447 = vmatprep.subr.bf16.mxu0 %v26908_v37  ;;  %v26981_v38 = vld [vmem:[%s28457_s11 + $0x3ba4] ss:$8 sps:$4 sm:$0xff]   ;;  %v26976_v37 = vld [vmem:[%s28457_s11 + $0x3aa0] ss:$8 sps:$4 sm:$0xff]  }
 0x78d   : > { %19488 = vmatprep.subr.bf16.mxu1 %v26911_v17  ;;  %v26979_v17 = vld [vmem:[%s28457_s11 + $0x3ba0] ss:$8 sps:$4 sm:$0xff]  }
 0x78f   : > { %19448 = vmatpush1.bf16.msra.mxu0 %v26906_v59  ;;  %v26984_v59 = vld [vmem:[%s28457_s11 + $0x3ab4] ss:$8 sps:$4 sm:$0xff]  }
 0x790   : > { %19489 = vmatpush1.bf16.msra.mxu1 %v26909_v43  ;;  %19499 = vmatprep.subr.bf16.mxu0 %v26918_v63  ;;  %v26987_v43 = vld [vmem:[%s28457_s11 + $0x3bb4] ss:$8 sps:$4 sm:$0xff]   ;;  %v26982_v63 = vld [vmem:[%s28457_s11 + $0x3ab0] ss:$8 sps:$4 sm:$0xff]  }
 0x791   : > { %19540 = vmatprep.subr.bf16.mxu1 %v26921_v42  ;;  %v26985_v42 = vld [vmem:[%s28457_s11 + $0x3bb0] ss:$8 sps:$4 sm:$0xff]  }
 0x792   : > { %19450 = vmatmul.mubr.bf16.vlgmr.msra.gmra.mrb[112].mxu0 %v21058_v20  ;;  %v26990_v20 = vld [vmem:[%s28457_s11 + $0x3ac4] ss:$8 sps:$4 sm:$0xff]  }
 0x793   : > { %19491 = vmatmul.mubr.bf16.vlgmr.msra.gmra.mrb[112].mxu1 %v21060_v44  ;;  %19500 = vmatpush1.bf16.msra.mxu0 %v26916_v47  ;;  %v26993_v44 = vld [vmem:[%s28457_s11 + $0x3bc4] ss:$8 sps:$4 sm:$0xff]   ;;  %v26988_v47 = vld [vmem:[%s28457_s11 + $0x3ac0] ss:$8 sps:$4 sm:$0xff]  }
 0x794   : > { %19541 = vmatpush1.bf16.msra.mxu1 %v26919_v30  ;;  %19501 = vmatprep.subr.bf16.mxu0 %v26924_v28  ;;  %v26991_v30 = vld [vmem:[%s28457_s11 + $0x3bc0] ss:$8 sps:$4 sm:$0xff]   ;;  %v26996_v28 = vld [vmem:[%s28457_s11 + $0x3ad4] ss:$8 sps:$4 sm:$0xff]  }
 0x795   : > { %19542 = vmatprep.subr.bf16.mxu1 %v26927_v50  ;;  %19531 = vmatprep.mubr.bf16.mxu0 %v21063_v33  ;;  %v26999_v50 = vld [vmem:[%s28457_s11 + $0x3bd4] ss:$8 sps:$4 sm:$0xff]   ;;  %v26994_v33 = vld [vmem:[%s28457_s11 + $0x3ad0] ss:$8 sps:$4 sm:$0xff]  }
 0x796   : > { %19572 = vmatprep.mubr.bf16.mxu1 %v21065_v9  ;;  %v26997_v9 = vld [vmem:[%s28457_s11 + $0x3bd0] ss:$8 sps:$4 sm:$0xff]  }
 0x797   : > { %19502 = vmatpush1.bf16.msra.mxu0 %v26922_v52  ;;  %v27002_v52 = vld [vmem:[%s28457_s11 + $0x3ae4] ss:$8 sps:$4 sm:$0xff]  }
 0x798   : > { %19543 = vmatpush1.bf16.msra.mxu1 %v26925_v36  ;;  %19503 = vmatprep.subr.bf16.mxu0 %v26930_v26  ;;  %v27005_v36 = vld [vmem:[%s28457_s11 + $0x3be4] ss:$8 sps:$4 sm:$0xff]   ;;  %v27000_v26 = vld [vmem:[%s28457_s11 + $0x3ae0] ss:$8 sps:$4 sm:$0xff]  }
 0x799   : > { %19544 = vmatprep.subr.bf16.mxu1 %v26933_v56  ;;  %v27003_v56 = vld [vmem:[%s28457_s11 + $0x3be0] ss:$8 sps:$4 sm:$0xff]  }
 0x79b   : > { %19504 = vmatpush1.bf16.msra.mxu0 %v26928_v55  ;;  %v27008_v55 = vld [vmem:[%s28457_s11 + $0x3af4] ss:$8 sps:$4 sm:$0xff]  }
 0x79c   : > { %19545 = vmatpush1.bf16.msra.mxu1 %v26931_v39  ;;  %19505 = vmatprep.subr.bf16.mxu0 %v26936_v58  ;;  %v27011_v39 = vld [vmem:[%s28457_s11 + $0x3bf4] ss:$8 sps:$4 sm:$0xff]   ;;  %v27006_v58 = vld [vmem:[%s28457_s11 + $0x3af0] ss:$8 sps:$4 sm:$0xff]  }
 0x79d   : > { %19546 = vmatprep.subr.bf16.mxu1 %v26939_v18  ;;  %v27009_v18 = vld [vmem:[%s28457_s11 + $0x3bf0] ss:$8 sps:$4 sm:$0xff]  }
 0x79f   : > { %19506 = vmatpush1.bf16.msra.mxu0 %v26934_v19  ;;  %v27018_v19 = vld [vmem:[%s28457_s11 + $0x3c04] ss:$8 sps:$4 sm:$0xff]  }
 0x7a0   : > { %19547 = vmatpush1.bf16.msra.mxu1 %v26937_v60  ;;  %19507 = vmatprep.subr.bf16.mxu0 %v26942_v32  ;;  %v27021_v60 = vld [vmem:[%s28457_s11 + $0x3d04] ss:$8 sps:$4 sm:$0xff]   ;;  %v21062_v32 = vcombine.low %v30889_v49, %v30889_v49 }
 0x7a1   : > { %19548 = vmatprep.subr.bf16.mxu1 %v26945_v62  ;;  %v21064_v62 = vcombine.low %v30892_v1, %v30892_v1 }
 0x7a3   : > { %19508 = vmatpush1.bf16.msra.mxu0 %v26940_v5  ;;  %v30973_v5 = vld [vmem:[%s28474_s27 + $0x1e0] sm:$0xff] }
 0x7a4   : > { %19549 = vmatpush1.bf16.msra.mxu1 %v26943_v27  ;;  %19509 = vmatprep.subr.bf16.mxu0 %v26948_v2  ;;  %v30976_v27 = vld [vmem:[%s28474_s27 + $0x1e8] sm:$0xff]  ;;  %v27016_v2 = vld [vmem:[%s28457_s11 + $0x3c00] ss:$8 sps:$4 sm:$0xff]   ;;  %v21067_v49 = vcombine.high %v30973_v5, %v30973_v5 }
 0x7a5   : > { %19550 = vmatprep.subr.bf16.mxu1 %v26951_v48  ;;  %v19205_v51 = vpop.f32.mrb[100].mxu0  ;;  %v27019_v48 = vld [vmem:[%s28457_s11 + $0x3d00] ss:$8 sps:$4 sm:$0xff]   ;;  %v21069_v1 = vcombine.high %v30976_v27, %v30976_v27 }
 0x7a6   : > { %v19246_v12 = vpop.f32.mrb[100].mxu1  ;;  %v19206_v11 = vadd.f32 %v19205_v51, %v30842_v21  ;;  %v19207_v25 = vpop.f32.mrb[101].mxu0  ;;  %v26960_v21 = vld [vmem:[%s28457_s11 + $0x3a74] ss:$8 sps:$4 sm:$0xff]   ;;  %v27030_v51 = vld [vmem:[%s28457_s11 + $0x3c24] ss:$8 sps:$4 sm:$0xff]  }
 0x7a7   : > { %v19248_v14 = vpop.f32.mrb[101].mxu1  ;;  %v19208_v40 = vadd.f32 %v19207_v25, %v30846_v3  ;;  %v19209_v31 = vpop.f32.mrb[102].mxu0  ;;  %19510 = vmatpush1.bf16.msra.mxu0 %v26946_v46  ;;  %v26963_v3 = vld [vmem:[%s28457_s11 + $0x3b74] ss:$8 sps:$4 sm:$0xff]   ;;  %v27031_v25 = vld [vmem:[%s28457_s11 + $0x3d20] ss:$8 sps:$4 sm:$0xff]  }
 0x7a8   : > { %v19250_v16 = vpop.f32.mrb[102].mxu1  ;;  %19551 = vmatpush1.bf16.msra.mxu1 %v26949_v6  ;;  %v30926_v41 = vadd.f32 %v19246_v12, %v19206_v11  ;;  %v19210_v23 = vpop.f32.mrb[103].mxu0  ;;  %19511 = vmatprep.subr.bf16.mxu0 %v26954_v8  ;;  %v27024_v46 = vld [vmem:[%s28457_s11 + $0x3c14] ss:$8 sps:$4 sm:$0xff]   ;;  %v27022_v8 = vld [vmem:[%s28457_s11 + $0x3c10] ss:$8 sps:$4 sm:$0xff]  }
 0x7a9   : > { %v19251_v45 = vpop.f32.mrb[103].mxu1  ;;  %19552 = vmatprep.subr.bf16.mxu1 %v26957_v54  ;;  %v30930_v22 = vadd.f32 %v19248_v14, %v19208_v40  ;;  %v27027_v6 = vld [vmem:[%s28457_s11 + $0x3d14] ss:$8 sps:$4 sm:$0xff]   ;;  %v27025_v54 = vld [vmem:[%s28457_s11 + $0x3d10] ss:$8 sps:$4 sm:$0xff]  }
 0x7aa   : > { %v27033_v12 = vld [vmem:[%s28457_s11 + $0x3d24] ss:$8 sps:$4 sm:$0xff]   ;;  %v27028_v11 = vld [vmem:[%s28457_s11 + $0x3c20] ss:$8 sps:$4 sm:$0xff]   ;;  %v27036_v14 = vld [vmem:[%s28457_s11 + $0x3c34] ss:$8 sps:$4 sm:$0xff]  }
 0x7ab   : > { %19512 = vmatpush1.bf16.msra.mxu0 %v26952_v15  ;;  %v27039_v40 = vld [vmem:[%s28457_s11 + $0x3d34] ss:$8 sps:$4 sm:$0xff]   ;;  %v27034_v31 = vld [vmem:[%s28457_s11 + $0x3c30] ss:$8 sps:$4 sm:$0xff]   ;;  %v27042_v15 = vld [vmem:[%s28457_s11 + $0x3c44] ss:$8 sps:$4 sm:$0xff]  }
 0x7ac   : > { %19553 = vmatpush1.bf16.msra.mxu1 %v26955_v61  ;;  %19513 = vmatprep.subr.bf16.mxu0 %v26960_v21  ;;  %v27037_v16 = vld [vmem:[%s28457_s11 + $0x3d30] ss:$8 sps:$4 sm:$0xff]   ;;  %v27045_v61 = vld [vmem:[%s28457_s11 + $0x3d44] ss:$8 sps:$4 sm:$0xff]   ;;  %v27040_v23 = vld [vmem:[%s28457_s11 + $0x3c40] ss:$8 sps:$4 sm:$0xff]  }
 0x7ad   : > { %19554 = vmatprep.subr.bf16.mxu1 %v26963_v3  ;;  %v27043_v45 = vld [vmem:[%s28457_s11 + $0x3d40] ss:$8 sps:$4 sm:$0xff]   ;;  %v27048_v21 = vld [vmem:[%s28457_s11 + $0x3c54] ss:$8 sps:$4 sm:$0xff]  }
 0x7ae   : > { %v27051_v3 = vld [vmem:[%s28457_s11 + $0x3d54] ss:$8 sps:$4 sm:$0xff]  }
 0x7af   : > { %19514 = vmatpush1.bf16.msra.mxu0 %v26958_v0  ;;  %v27046_v0 = vld [vmem:[%s28457_s11 + $0x3c50] ss:$8 sps:$4 sm:$0xff]  }
 0x7b0   : > { %19555 = vmatpush1.bf16.msra.mxu1 %v26961_v24  ;;  %19515 = vmatprep.subr.bf16.mxu0 %v26966_v29  ;;  %v27049_v24 = vld [vmem:[%s28457_s11 + $0x3d50] ss:$8 sps:$4 sm:$0xff]   ;;  %v27054_v29 = vld [vmem:[%s28457_s11 + $0x3c64] ss:$8 sps:$4 sm:$0xff]  }
 0x7b1   : > { %19556 = vmatprep.subr.bf16.mxu1 %v26969_v10  ;;  %v27057_v10 = vld [vmem:[%s28457_s11 + $0x3d64] ss:$8 sps:$4 sm:$0xff]  }
 0x7b3   : > { %19516 = vmatpush1.bf16.msra.mxu0 %v26964_v7 }
 0x7b4   : > { %19557 = vmatpush1.bf16.msra.mxu1 %v26967_v34  ;;  %19517 = vmatprep.subr.bf16.mxu0 %v26972_v4 }
 0x7b5   : > { %19558 = vmatprep.subr.bf16.mxu1 %v26975_v53 }
 0x7b7   : > { %19518 = vmatpush1.bf16.msra.mxu0 %v26970_v35 }
 0x7b8   : > { %19559 = vmatpush1.bf16.msra.mxu1 %v26973_v57  ;;  %19519 = vmatprep.subr.bf16.mxu0 %v26978_v13 }
 0x7b9   : > { %19560 = vmatprep.subr.bf16.mxu1 %v26981_v38 }
 0x7bb   : > { %19520 = vmatpush1.bf16.msra.mxu0 %v26976_v37  ;;  %v27052_v37 = vld [vmem:[%s28457_s11 + $0x3c60] ss:$8 sps:$4 sm:$0xff]  }
 0x7bc   : > { %19561 = vmatpush1.bf16.msra.mxu1 %v26979_v17  ;;  %19521 = vmatprep.subr.bf16.mxu0 %v26984_v59  ;;  %v27055_v17 = vld [vmem:[%s28457_s11 + $0x3d60] ss:$8 sps:$4 sm:$0xff]  }
 0x7bd   : > { %19562 = vmatprep.subr.bf16.mxu1 %v26987_v43 }
 0x7bf   : > { %19522 = vmatpush1.bf16.msra.mxu0 %v26982_v63 }
 0x7c0   : > { %19563 = vmatpush1.bf16.msra.mxu1 %v26985_v42  ;;  %19523 = vmatprep.subr.bf16.mxu0 %v26990_v20  ;;  %v27058_v20 = vld [vmem:[%s28457_s11 + $0x3c70] ss:$8 sps:$4 sm:$0xff]  }
 0x7c1   : > { %19564 = vmatprep.subr.bf16.mxu1 %v26993_v44  ;;  %v27061_v44 = vld [vmem:[%s28457_s11 + $0x3d70] ss:$8 sps:$4 sm:$0xff]  }
 0x7c3   : > { %19524 = vmatpush1.bf16.msra.mxu0 %v26988_v47  ;;  %v27066_v47 = vld [vmem:[%s28457_s11 + $0x3c84] ss:$8 sps:$4 sm:$0xff]  }
 0x7c4   : > { %19565 = vmatpush1.bf16.msra.mxu1 %v26991_v30  ;;  %19525 = vmatprep.subr.bf16.mxu0 %v26996_v28  ;;  %v27069_v30 = vld [vmem:[%s28457_s11 + $0x3d84] ss:$8 sps:$4 sm:$0xff]   ;;  %v27064_v28 = vld [vmem:[%s28457_s11 + $0x3c80] ss:$8 sps:$4 sm:$0xff]  }
 0x7c5   : > { %19566 = vmatprep.subr.bf16.mxu1 %v26999_v50  ;;  %v27067_v50 = vld [vmem:[%s28457_s11 + $0x3d80] ss:$8 sps:$4 sm:$0xff]  }
 0x7c7   : > { %19526 = vmatpush1.bf16.msra.mxu0 %v26994_v33  ;;  %v27072_v33 = vld [vmem:[%s28457_s11 + $0x3c94] ss:$8 sps:$4 sm:$0xff]  }
 0x7c8   : > { %19567 = vmatpush1.bf16.msra.mxu1 %v26997_v9  ;;  %19527 = vmatprep.subr.bf16.mxu0 %v27002_v52  ;;  %v27075_v9 = vld [vmem:[%s28457_s11 + $0x3d94] ss:$8 sps:$4 sm:$0xff]   ;;  %v27070_v52 = vld [vmem:[%s28457_s11 + $0x3c90] ss:$8 sps:$4 sm:$0xff]  }
 0x7c9   : > { %19568 = vmatprep.subr.bf16.mxu1 %v27005_v36  ;;  %v27073_v36 = vld [vmem:[%s28457_s11 + $0x3d90] ss:$8 sps:$4 sm:$0xff]  }
 0x7cb   : > { %19528 = vmatpush1.bf16.msra.mxu0 %v27000_v26  ;;  %v27078_v26 = vld [vmem:[%s28457_s11 + $0x3ca4] ss:$8 sps:$4 sm:$0xff]  }
 0x7cc   : > { %19569 = vmatpush1.bf16.msra.mxu1 %v27003_v56  ;;  %19529 = vmatprep.subr.bf16.mxu0 %v27008_v55  ;;  %v27081_v56 = vld [vmem:[%s28457_s11 + $0x3da4] ss:$8 sps:$4 sm:$0xff]   ;;  %v27076_v55 = vld [vmem:[%s28457_s11 + $0x3ca0] ss:$8 sps:$4 sm:$0xff]  }
 0x7cd   : > { %19570 = vmatprep.subr.bf16.mxu1 %v27011_v39  ;;  %v27079_v39 = vld [vmem:[%s28457_s11 + $0x3da0] ss:$8 sps:$4 sm:$0xff]  }
 0x7cf   : > { %19530 = vmatpush1.bf16.msra.mxu0 %v27006_v58  ;;  %v27084_v58 = vld [vmem:[%s28457_s11 + $0x3cb4] ss:$8 sps:$4 sm:$0xff]  }
 0x7d0   : > { %19571 = vmatpush1.bf16.msra.mxu1 %v27009_v18  ;;  %19581 = vmatprep.subr.bf16.mxu0 %v27018_v19  ;;  %v27087_v18 = vld [vmem:[%s28457_s11 + $0x3db4] ss:$8 sps:$4 sm:$0xff]   ;;  %v27082_v19 = vld [vmem:[%s28457_s11 + $0x3cb0] ss:$8 sps:$4 sm:$0xff]  }
 0x7d1   : > { %19622 = vmatprep.subr.bf16.mxu1 %v27021_v60  ;;  %v27085_v60 = vld [vmem:[%s28457_s11 + $0x3db0] ss:$8 sps:$4 sm:$0xff]  }
 0x7d2   : > { %19532 = vmatmul.mubr.bf16.vlgmr.msra.gmra.mrb[116].mxu0 %v21062_v32  ;;  %v27090_v32 = vld [vmem:[%s28457_s11 + $0x3cc4] ss:$8 sps:$4 sm:$0xff]  }
 0x7d3   : > { %19573 = vmatmul.mubr.bf16.vlgmr.msra.gmra.mrb[116].mxu1 %v21064_v62  ;;  %19582 = vmatpush1.bf16.msra.mxu0 %v27016_v2  ;;  %v27093_v62 = vld [vmem:[%s28457_s11 + $0x3dc4] ss:$8 sps:$4 sm:$0xff]   ;;  %v27088_v2 = vld [vmem:[%s28457_s11 + $0x3cc0] ss:$8 sps:$4 sm:$0xff]  }
 0x7d4   : > { %19623 = vmatpush1.bf16.msra.mxu1 %v27019_v48  ;;  %19583 = vmatprep.subr.bf16.mxu0 %v27024_v46  ;;  %v27091_v48 = vld [vmem:[%s28457_s11 + $0x3dc0] ss:$8 sps:$4 sm:$0xff]   ;;  %v27096_v46 = vld [vmem:[%s28457_s11 + $0x3cd4] ss:$8 sps:$4 sm:$0xff]  }
 0x7d5   : > { %19624 = vmatprep.subr.bf16.mxu1 %v27027_v6  ;;  %19613 = vmatprep.mubr.bf16.mxu0 %v21067_v49  ;;  %v27099_v6 = vld [vmem:[%s28457_s11 + $0x3dd4] ss:$8 sps:$4 sm:$0xff]   ;;  %v27094_v49 = vld [vmem:[%s28457_s11 + $0x3cd0] ss:$8 sps:$4 sm:$0xff]  }
 0x7d6   : > { %19654 = vmatprep.mubr.bf16.mxu1 %v21069_v1  ;;  %v27097_v1 = vld [vmem:[%s28457_s11 + $0x3dd0] ss:$8 sps:$4 sm:$0xff]  }
 0x7d7   : > { %19584 = vmatpush1.bf16.msra.mxu0 %v27022_v8  ;;  %v27102_v8 = vld [vmem:[%s28457_s11 + $0x3ce4] ss:$8 sps:$4 sm:$0xff]  }
 0x7d8   : > { %19625 = vmatpush1.bf16.msra.mxu1 %v27025_v54  ;;  %19585 = vmatprep.subr.bf16.mxu0 %v27030_v51  ;;  %v27105_v54 = vld [vmem:[%s28457_s11 + $0x3de4] ss:$8 sps:$4 sm:$0xff]   ;;  %v27100_v51 = vld [vmem:[%s28457_s11 + $0x3ce0] ss:$8 sps:$4 sm:$0xff]  }
 0x7d9   : > { %19626 = vmatprep.subr.bf16.mxu1 %v27033_v12  ;;  %v27103_v12 = vld [vmem:[%s28457_s11 + $0x3de0] ss:$8 sps:$4 sm:$0xff]  }
 0x7db   : > { %19586 = vmatpush1.bf16.msra.mxu0 %v27028_v11  ;;  %v27108_v11 = vld [vmem:[%s28457_s11 + $0x3cf4] ss:$8 sps:$4 sm:$0xff]  }
 0x7dc   : > { %19627 = vmatpush1.bf16.msra.mxu1 %v27031_v25  ;;  %19587 = vmatprep.subr.bf16.mxu0 %v27036_v14  ;;  %v27111_v25 = vld [vmem:[%s28457_s11 + $0x3df4] ss:$8 sps:$4 sm:$0xff]   ;;  %v27106_v14 = vld [vmem:[%s28457_s11 + $0x3cf0] ss:$8 sps:$4 sm:$0xff]  }
 0x7dd   : > { %19628 = vmatprep.subr.bf16.mxu1 %v27039_v40  ;;  %v27109_v40 = vld [vmem:[%s28457_s11 + $0x3df0] ss:$8 sps:$4 sm:$0xff]  }
 0x7df   : > { %19588 = vmatpush1.bf16.msra.mxu0 %v27034_v31  ;;  %v27118_v31 = vld [vmem:[%s28457_s11 + $0x3e04] ss:$8 sps:$4 sm:$0xff]  }
 0x7e0   : > { %19629 = vmatpush1.bf16.msra.mxu1 %v27037_v16  ;;  %19589 = vmatprep.subr.bf16.mxu0 %v27042_v15  ;;  %v27121_v16 = vld [vmem:[%s28457_s11 + $0x3f04] ss:$8 sps:$4 sm:$0xff]   ;;  %v21066_v15 = vcombine.low %v30973_v5, %v30973_v5 }
 0x7e1   : > { %19630 = vmatprep.subr.bf16.mxu1 %v27045_v61  ;;  %v21068_v61 = vcombine.low %v30976_v27, %v30976_v27 }
 0x7e3   : > { %19590 = vmatpush1.bf16.msra.mxu0 %v27040_v23  ;;  %v31057_v23 = vld [vmem:[%s28474_s27 + $0x1f0] sm:$0xff] }
 0x7e4   : > { %19631 = vmatpush1.bf16.msra.mxu1 %v27043_v45  ;;  %19591 = vmatprep.subr.bf16.mxu0 %v27048_v21  ;;  %v31060_v45 = vld [vmem:[%s28474_s27 + $0x1f8] sm:$0xff]  ;;  %v21071_v5 = vcombine.high %v31057_v23, %v31057_v23 }
 0x7e5   : > { %19632 = vmatprep.subr.bf16.mxu1 %v27051_v3  ;;  %v19287_v7 = vpop.f32.mrb[104].mxu0  ;;  %v27116_v21 = vld [vmem:[%s28457_s11 + $0x3e00] ss:$8 sps:$4 sm:$0xff]   ;;  %v21073_v27 = vcombine.high %v31060_v45, %v31060_v45 }
 0x7e6   : > { %v19328_v34 = vpop.f32.mrb[104].mxu1  ;;  %v19288_v4 = vadd.f32 %v19287_v7, %v30926_v41  ;;  %v19289_v53 = vpop.f32.mrb[105].mxu0  ;;  %v27060_v41 = vld [vmem:[%s28457_s11 + $0x3c74] ss:$8 sps:$4 sm:$0xff]   ;;  %v27119_v3 = vld [vmem:[%s28457_s11 + $0x3f00] ss:$8 sps:$4 sm:$0xff]  }
 0x7e7   : > { %v19330_v35 = vpop.f32.mrb[105].mxu1  ;;  %v19290_v57 = vadd.f32 %v19289_v53, %v30930_v22  ;;  %v19291_v13 = vpop.f32.mrb[106].mxu0  ;;  %19592 = vmatpush1.bf16.msra.mxu0 %v27046_v0  ;;  %v27063_v22 = vld [vmem:[%s28457_s11 + $0x3d74] ss:$8 sps:$4 sm:$0xff]   ;;  %v27130_v7 = vld [vmem:[%s28457_s11 + $0x3e24] ss:$8 sps:$4 sm:$0xff]  }
 0x7e8   : > { %v19332_v38 = vpop.f32.mrb[106].mxu1  ;;  %19633 = vmatpush1.bf16.msra.mxu1 %v27049_v24  ;;  %v31010_v59 = vadd.f32 %v19328_v34, %v19288_v4  ;;  %v19292_v43 = vpop.f32.mrb[107].mxu0  ;;  %19593 = vmatprep.subr.bf16.mxu0 %v27054_v29  ;;  %v27124_v0 = vld [vmem:[%s28457_s11 + $0x3e14] ss:$8 sps:$4 sm:$0xff]   ;;  %v27122_v29 = vld [vmem:[%s28457_s11 + $0x3e10] ss:$8 sps:$4 sm:$0xff]  }
 0x7e9   : > { %v19333_v63 = vpop.f32.mrb[107].mxu1  ;;  %19634 = vmatprep.subr.bf16.mxu1 %v27057_v10  ;;  %v31014_v42 = vadd.f32 %v19330_v35, %v19290_v57  ;;  %v27127_v24 = vld [vmem:[%s28457_s11 + $0x3f14] ss:$8 sps:$4 sm:$0xff]   ;;  %v27125_v10 = vld [vmem:[%s28457_s11 + $0x3f10] ss:$8 sps:$4 sm:$0xff]  }
 0x7ea   : > { %v27133_v34 = vld [vmem:[%s28457_s11 + $0x3f24] ss:$8 sps:$4 sm:$0xff]   ;;  %v27128_v4 = vld [vmem:[%s28457_s11 + $0x3e20] ss:$8 sps:$4 sm:$0xff]   ;;  %v27136_v35 = vld [vmem:[%s28457_s11 + $0x3e34] ss:$8 sps:$4 sm:$0xff]  }
 0x7eb   : > { %19594 = vmatpush1.bf16.msra.mxu0 %v27052_v37  ;;  %v27131_v53 = vld [vmem:[%s28457_s11 + $0x3f20] ss:$8 sps:$4 sm:$0xff]   ;;  %v27139_v57 = vld [vmem:[%s28457_s11 + $0x3f34] ss:$8 sps:$4 sm:$0xff]   ;;  %v27134_v13 = vld [vmem:[%s28457_s11 + $0x3e30] ss:$8 sps:$4 sm:$0xff]  }
 0x7ec   : > { %19635 = vmatpush1.bf16.msra.mxu1 %v27055_v17  ;;  %19595 = vmatprep.subr.bf16.mxu0 %v27060_v41  ;;  %v27137_v38 = vld [vmem:[%s28457_s11 + $0x3f30] ss:$8 sps:$4 sm:$0xff]   ;;  %v27142_v37 = vld [vmem:[%s28457_s11 + $0x3e44] ss:$8 sps:$4 sm:$0xff]   ;;  %v27140_v43 = vld [vmem:[%s28457_s11 + $0x3e40] ss:$8 sps:$4 sm:$0xff]  }
 0x7ed   : > { %19636 = vmatprep.subr.bf16.mxu1 %v27063_v22  ;;  %v27145_v17 = vld [vmem:[%s28457_s11 + $0x3f44] ss:$8 sps:$4 sm:$0xff]   ;;  %v27143_v63 = vld [vmem:[%s28457_s11 + $0x3f40] ss:$8 sps:$4 sm:$0xff]   ;;  %v27148_v41 = vld [vmem:[%s28457_s11 + $0x3e54] ss:$8 sps:$4 sm:$0xff]  }
 0x7ee   : > { %v27151_v22 = vld [vmem:[%s28457_s11 + $0x3f54] ss:$8 sps:$4 sm:$0xff]  }
 0x7ef   : > { %19596 = vmatpush1.bf16.msra.mxu0 %v27058_v20  ;;  %v27146_v20 = vld [vmem:[%s28457_s11 + $0x3e50] ss:$8 sps:$4 sm:$0xff]  }
 0x7f0   : > { %19637 = vmatpush1.bf16.msra.mxu1 %v27061_v44  ;;  %19597 = vmatprep.subr.bf16.mxu0 %v27066_v47  ;;  %v27149_v44 = vld [vmem:[%s28457_s11 + $0x3f50] ss:$8 sps:$4 sm:$0xff]   ;;  %v27154_v47 = vld [vmem:[%s28457_s11 + $0x3e64] ss:$8 sps:$4 sm:$0xff]  }
 0x7f1   : > { %19638 = vmatprep.subr.bf16.mxu1 %v27069_v30  ;;  %v27157_v30 = vld [vmem:[%s28457_s11 + $0x3f64] ss:$8 sps:$4 sm:$0xff]  }
 0x7f3   : > { %19598 = vmatpush1.bf16.msra.mxu0 %v27064_v28 }
 0x7f4   : > { %19639 = vmatpush1.bf16.msra.mxu1 %v27067_v50  ;;  %19599 = vmatprep.subr.bf16.mxu0 %v27072_v33 }
 0x7f5   : > { %19640 = vmatprep.subr.bf16.mxu1 %v27075_v9 }
 0x7f7   : > { %19600 = vmatpush1.bf16.msra.mxu0 %v27070_v52 }
 0x7f8   : > { %19641 = vmatpush1.bf16.msra.mxu1 %v27073_v36  ;;  %19601 = vmatprep.subr.bf16.mxu0 %v27078_v26 }
 0x7f9   : > { %19642 = vmatprep.subr.bf16.mxu1 %v27081_v56 }
 0x7fb   : > { %19602 = vmatpush1.bf16.msra.mxu0 %v27076_v55  ;;  %v27152_v55 = vld [vmem:[%s28457_s11 + $0x3e60] ss:$8 sps:$4 sm:$0xff]  }
 0x7fc   : > { %19643 = vmatpush1.bf16.msra.mxu1 %v27079_v39  ;;  %19603 = vmatprep.subr.bf16.mxu0 %v27084_v58  ;;  %v27155_v39 = vld [vmem:[%s28457_s11 + $0x3f60] ss:$8 sps:$4 sm:$0xff]  }
 0x7fd   : > { %19644 = vmatprep.subr.bf16.mxu1 %v27087_v18 }
 0x7ff   : > { %19604 = vmatpush1.bf16.msra.mxu0 %v27082_v19 }
 0x800   : > { %19645 = vmatpush1.bf16.msra.mxu1 %v27085_v60  ;;  %19605 = vmatprep.subr.bf16.mxu0 %v27090_v32  ;;  %v27158_v32 = vld [vmem:[%s28457_s11 + $0x3e70] ss:$8 sps:$4 sm:$0xff]  }
 0x801   : > { %19646 = vmatprep.subr.bf16.mxu1 %v27093_v62  ;;  %v27161_v62 = vld [vmem:[%s28457_s11 + $0x3f70] ss:$8 sps:$4 sm:$0xff]  }
 0x803   : > { %19606 = vmatpush1.bf16.msra.mxu0 %v27088_v2  ;;  %v27166_v2 = vld [vmem:[%s28457_s11 + $0x3e84] ss:$8 sps:$4 sm:$0xff]  }
 0x804   : > { %19647 = vmatpush1.bf16.msra.mxu1 %v27091_v48  ;;  %19607 = vmatprep.subr.bf16.mxu0 %v27096_v46  ;;  %v27169_v48 = vld [vmem:[%s28457_s11 + $0x3f84] ss:$8 sps:$4 sm:$0xff]   ;;  %v27164_v46 = vld [vmem:[%s28457_s11 + $0x3e80] ss:$8 sps:$4 sm:$0xff]  }
 0x805   : > { %19648 = vmatprep.subr.bf16.mxu1 %v27099_v6  ;;  %v27167_v6 = vld [vmem:[%s28457_s11 + $0x3f80] ss:$8 sps:$4 sm:$0xff]  }
 0x807   : > { %19608 = vmatpush1.bf16.msra.mxu0 %v27094_v49  ;;  %v27172_v49 = vld [vmem:[%s28457_s11 + $0x3e94] ss:$8 sps:$4 sm:$0xff]  }
 0x808   : > { %19649 = vmatpush1.bf16.msra.mxu1 %v27097_v1  ;;  %19609 = vmatprep.subr.bf16.mxu0 %v27102_v8  ;;  %v27175_v1 = vld [vmem:[%s28457_s11 + $0x3f94] ss:$8 sps:$4 sm:$0xff]   ;;  %v27170_v8 = vld [vmem:[%s28457_s11 + $0x3e90] ss:$8 sps:$4 sm:$0xff]  }
 0x809   : > { %19650 = vmatprep.subr.bf16.mxu1 %v27105_v54  ;;  %v27173_v54 = vld [vmem:[%s28457_s11 + $0x3f90] ss:$8 sps:$4 sm:$0xff]  }
 0x80b   : > { %19610 = vmatpush1.bf16.msra.mxu0 %v27100_v51  ;;  %v27178_v51 = vld [vmem:[%s28457_s11 + $0x3ea4] ss:$8 sps:$4 sm:$0xff]  }
 0x80c   : > { %19651 = vmatpush1.bf16.msra.mxu1 %v27103_v12  ;;  %19611 = vmatprep.subr.bf16.mxu0 %v27108_v11  ;;  %v27181_v12 = vld [vmem:[%s28457_s11 + $0x3fa4] ss:$8 sps:$4 sm:$0xff]   ;;  %v27176_v11 = vld [vmem:[%s28457_s11 + $0x3ea0] ss:$8 sps:$4 sm:$0xff]  }
 0x80d   : > { %19652 = vmatprep.subr.bf16.mxu1 %v27111_v25  ;;  %v27179_v25 = vld [vmem:[%s28457_s11 + $0x3fa0] ss:$8 sps:$4 sm:$0xff]  }
 0x80f   : > { %19612 = vmatpush1.bf16.msra.mxu0 %v27106_v14  ;;  %v27184_v14 = vld [vmem:[%s28457_s11 + $0x3eb4] ss:$8 sps:$4 sm:$0xff]  }
 0x810   : > { %19653 = vmatpush1.bf16.msra.mxu1 %v27109_v40  ;;  %19663 = vmatprep.subr.bf16.mxu0 %v27118_v31  ;;  %v27187_v40 = vld [vmem:[%s28457_s11 + $0x3fb4] ss:$8 sps:$4 sm:$0xff]   ;;  %v27182_v31 = vld [vmem:[%s28457_s11 + $0x3eb0] ss:$8 sps:$4 sm:$0xff]  }
 0x811   : > { %19704 = vmatprep.subr.bf16.mxu1 %v27121_v16  ;;  %v27185_v16 = vld [vmem:[%s28457_s11 + $0x3fb0] ss:$8 sps:$4 sm:$0xff]  }
 0x812   : > { %19614 = vmatmul.mubr.bf16.vlgmr.msra.gmra.mrb[120].mxu0 %v21066_v15  ;;  %v27190_v15 = vld [vmem:[%s28457_s11 + $0x3ec4] ss:$8 sps:$4 sm:$0xff]  }
 0x813   : > { %19655 = vmatmul.mubr.bf16.vlgmr.msra.gmra.mrb[120].mxu1 %v21068_v61  ;;  %19664 = vmatpush1.bf16.msra.mxu0 %v27116_v21  ;;  %v27193_v61 = vld [vmem:[%s28457_s11 + $0x3fc4] ss:$8 sps:$4 sm:$0xff]   ;;  %v27188_v21 = vld [vmem:[%s28457_s11 + $0x3ec0] ss:$8 sps:$4 sm:$0xff]  }
 0x814   : > { %19705 = vmatpush1.bf16.msra.mxu1 %v27119_v3  ;;  %19665 = vmatprep.subr.bf16.mxu0 %v27124_v0  ;;  %v27191_v3 = vld [vmem:[%s28457_s11 + $0x3fc0] ss:$8 sps:$4 sm:$0xff]   ;;  %v27196_v0 = vld [vmem:[%s28457_s11 + $0x3ed4] ss:$8 sps:$4 sm:$0xff]  }
 0x815   : > { %19706 = vmatprep.subr.bf16.mxu1 %v27127_v24  ;;  %19695 = vmatprep.mubr.bf16.mxu0 %v21071_v5  ;;  %v27199_v24 = vld [vmem:[%s28457_s11 + $0x3fd4] ss:$8 sps:$4 sm:$0xff]   ;;  %v27194_v5 = vld [vmem:[%s28457_s11 + $0x3ed0] ss:$8 sps:$4 sm:$0xff]  }
 0x816   : > { %19736 = vmatprep.mubr.bf16.mxu1 %v21073_v27  ;;  %v27197_v27 = vld [vmem:[%s28457_s11 + $0x3fd0] ss:$8 sps:$4 sm:$0xff]  }
 0x817   : > { %19666 = vmatpush1.bf16.msra.mxu0 %v27122_v29  ;;  %v27202_v29 = vld [vmem:[%s28457_s11 + $0x3ee4] ss:$8 sps:$4 sm:$0xff]  }
 0x818   : > { %19707 = vmatpush1.bf16.msra.mxu1 %v27125_v10  ;;  %19667 = vmatprep.subr.bf16.mxu0 %v27130_v7  ;;  %v27205_v10 = vld [vmem:[%s28457_s11 + $0x3fe4] ss:$8 sps:$4 sm:$0xff]   ;;  %v27200_v7 = vld [vmem:[%s28457_s11 + $0x3ee0] ss:$8 sps:$4 sm:$0xff]  }
 0x819   : > { %19708 = vmatprep.subr.bf16.mxu1 %v27133_v34  ;;  %v27203_v34 = vld [vmem:[%s28457_s11 + $0x3fe0] ss:$8 sps:$4 sm:$0xff]  }
 0x81b   : > { %19668 = vmatpush1.bf16.msra.mxu0 %v27128_v4  ;;  %v27208_v4 = vld [vmem:[%s28457_s11 + $0x3ef4] ss:$8 sps:$4 sm:$0xff]  }
 0x81c   : > { %19709 = vmatpush1.bf16.msra.mxu1 %v27131_v53  ;;  %19669 = vmatprep.subr.bf16.mxu0 %v27136_v35  ;;  %v27211_v53 = vld [vmem:[%s28457_s11 + $0x3ff4] ss:$8 sps:$4 sm:$0xff]   ;;  %v27206_v35 = vld [vmem:[%s28457_s11 + $0x3ef0] ss:$8 sps:$4 sm:$0xff]  }
 0x81d   : > { %19710 = vmatprep.subr.bf16.mxu1 %v27139_v57  ;;  %v27209_v57 = vld [vmem:[%s28457_s11 + $0x3ff0] ss:$8 sps:$4 sm:$0xff]  }
 0x81f   : > { %19670 = vmatpush1.bf16.msra.mxu0 %v27134_v13  ;;  %v27218_v13 = vld [vmem:[%s28457_s11 + $0x4004] ss:$8 sps:$4 sm:$0xff]  }
 0x820   : > { %19711 = vmatpush1.bf16.msra.mxu1 %v27137_v38  ;;  %19671 = vmatprep.subr.bf16.mxu0 %v27142_v37  ;;  %v27221_v38 = vld [vmem:[%s28457_s11 + $0x4104] ss:$8 sps:$4 sm:$0xff]   ;;  %v21070_v37 = vcombine.low %v31057_v23, %v31057_v23 }
 0x821   : > { %19712 = vmatprep.subr.bf16.mxu1 %v27145_v17  ;;  %v21072_v17 = vcombine.low %v31060_v45, %v31060_v45 }
 0x823   : > { %19672 = vmatpush1.bf16.msra.mxu0 %v27140_v43  ;;  %v31141_v43 = vld [vmem:[%s28474_s27 + $0x200] sm:$0xff] }
 0x824   : > { %19713 = vmatpush1.bf16.msra.mxu1 %v27143_v63  ;;  %19673 = vmatprep.subr.bf16.mxu0 %v27148_v41  ;;  %v31144_v63 = vld [vmem:[%s28474_s27 + $0x208] sm:$0xff]  ;;  %v27216_v41 = vld [vmem:[%s28457_s11 + $0x4000] ss:$8 sps:$4 sm:$0xff]   ;;  %v21075_v23 = vcombine.high %v31141_v43, %v31141_v43 }
 0x825   : > { %19714 = vmatprep.subr.bf16.mxu1 %v27151_v22  ;;  %v19369_v28 = vpop.f32.mrb[108].mxu0  ;;  %v27219_v22 = vld [vmem:[%s28457_s11 + $0x4100] ss:$8 sps:$4 sm:$0xff]   ;;  %v21077_v45 = vcombine.high %v31144_v63, %v31144_v63 }
 0x826   : > { %v19410_v50 = vpop.f32.mrb[108].mxu1  ;;  %v19370_v33 = vadd.f32 %v19369_v28, %v31010_v59  ;;  %v19371_v9 = vpop.f32.mrb[109].mxu0  ;;  %v27160_v59 = vld [vmem:[%s28457_s11 + $0x3e74] ss:$8 sps:$4 sm:$0xff]   ;;  %v27230_v28 = vld [vmem:[%s28457_s11 + $0x4024] ss:$8 sps:$4 sm:$0xff]  }
 0x827   : > { %v19412_v52 = vpop.f32.mrb[109].mxu1  ;;  %v19372_v36 = vadd.f32 %v19371_v9, %v31014_v42  ;;  %v19373_v26 = vpop.f32.mrb[110].mxu0  ;;  %19674 = vmatpush1.bf16.msra.mxu0 %v27146_v20  ;;  %v27163_v42 = vld [vmem:[%s28457_s11 + $0x3f74] ss:$8 sps:$4 sm:$0xff]   ;;  %v27231_v9 = vld [vmem:[%s28457_s11 + $0x4120] ss:$8 sps:$4 sm:$0xff]  }
 0x828   : > { %v19414_v56 = vpop.f32.mrb[110].mxu1  ;;  %19715 = vmatpush1.bf16.msra.mxu1 %v27149_v44  ;;  %v31094_v58 = vadd.f32 %v19410_v50, %v19370_v33  ;;  %v19374_v18 = vpop.f32.mrb[111].mxu0  ;;  %19675 = vmatprep.subr.bf16.mxu0 %v27154_v47  ;;  %v27224_v20 = vld [vmem:[%s28457_s11 + $0x4014] ss:$8 sps:$4 sm:$0xff]   ;;  %v27222_v47 = vld [vmem:[%s28457_s11 + $0x4010] ss:$8 sps:$4 sm:$0xff]  }
 0x829   : > { %v19415_v19 = vpop.f32.mrb[111].mxu1  ;;  %19716 = vmatprep.subr.bf16.mxu1 %v27157_v30  ;;  %v31098_v60 = vadd.f32 %v19412_v52, %v19372_v36  ;;  %v27227_v44 = vld [vmem:[%s28457_s11 + $0x4114] ss:$8 sps:$4 sm:$0xff]   ;;  %v27225_v30 = vld [vmem:[%s28457_s11 + $0x4110] ss:$8 sps:$4 sm:$0xff]  }
 0x82a   : > { %v27233_v50 = vld [vmem:[%s28457_s11 + $0x4124] ss:$8 sps:$4 sm:$0xff]   ;;  %v27228_v33 = vld [vmem:[%s28457_s11 + $0x4020] ss:$8 sps:$4 sm:$0xff]   ;;  %v27236_v52 = vld [vmem:[%s28457_s11 + $0x4034] ss:$8 sps:$4 sm:$0xff]  }
 0x82b   : > { %19676 = vmatpush1.bf16.msra.mxu0 %v27152_v55  ;;  %v27239_v36 = vld [vmem:[%s28457_s11 + $0x4134] ss:$8 sps:$4 sm:$0xff]   ;;  %v27234_v26 = vld [vmem:[%s28457_s11 + $0x4030] ss:$8 sps:$4 sm:$0xff]   ;;  %v27242_v55 = vld [vmem:[%s28457_s11 + $0x4044] ss:$8 sps:$4 sm:$0xff]  }
 0x82c   : > { %19717 = vmatpush1.bf16.msra.mxu1 %v27155_v39  ;;  %19677 = vmatprep.subr.bf16.mxu0 %v27160_v59  ;;  %v27237_v56 = vld [vmem:[%s28457_s11 + $0x4130] ss:$8 sps:$4 sm:$0xff]   ;;  %v27245_v39 = vld [vmem:[%s28457_s11 + $0x4144] ss:$8 sps:$4 sm:$0xff]   ;;  %v27240_v18 = vld [vmem:[%s28457_s11 + $0x4040] ss:$8 sps:$4 sm:$0xff]  }
 0x82d   : > { %19718 = vmatprep.subr.bf16.mxu1 %v27163_v42  ;;  %v27243_v19 = vld [vmem:[%s28457_s11 + $0x4140] ss:$8 sps:$4 sm:$0xff]   ;;  %v27248_v59 = vld [vmem:[%s28457_s11 + $0x4054] ss:$8 sps:$4 sm:$0xff]  }
 0x82e   : > { %v27251_v42 = vld [vmem:[%s28457_s11 + $0x4154] ss:$8 sps:$4 sm:$0xff]  }
 0x82f   : > { %19678 = vmatpush1.bf16.msra.mxu0 %v27158_v32  ;;  %v27246_v32 = vld [vmem:[%s28457_s11 + $0x4050] ss:$8 sps:$4 sm:$0xff]  }
 0x830   : > { %19719 = vmatpush1.bf16.msra.mxu1 %v27161_v62  ;;  %19679 = vmatprep.subr.bf16.mxu0 %v27166_v2  ;;  %v27249_v62 = vld [vmem:[%s28457_s11 + $0x4150] ss:$8 sps:$4 sm:$0xff]   ;;  %v27254_v2 = vld [vmem:[%s28457_s11 + $0x4064] ss:$8 sps:$4 sm:$0xff]  }
 0x831   : > { %19720 = vmatprep.subr.bf16.mxu1 %v27169_v48  ;;  %v27257_v48 = vld [vmem:[%s28457_s11 + $0x4164] ss:$8 sps:$4 sm:$0xff]  }
 0x833   : > { %19680 = vmatpush1.bf16.msra.mxu0 %v27164_v46 }
 0x834   : > { %19721 = vmatpush1.bf16.msra.mxu1 %v27167_v6  ;;  %19681 = vmatprep.subr.bf16.mxu0 %v27172_v49 }
 0x835   : > { %19722 = vmatprep.subr.bf16.mxu1 %v27175_v1 }
 0x837   : > { %19682 = vmatpush1.bf16.msra.mxu0 %v27170_v8 }
 0x838   : > { %19723 = vmatpush1.bf16.msra.mxu1 %v27173_v54  ;;  %19683 = vmatprep.subr.bf16.mxu0 %v27178_v51 }
 0x839   : > { %19724 = vmatprep.subr.bf16.mxu1 %v27181_v12 }
 0x83b   : > { %19684 = vmatpush1.bf16.msra.mxu0 %v27176_v11  ;;  %v27252_v11 = vld [vmem:[%s28457_s11 + $0x4060] ss:$8 sps:$4 sm:$0xff]  }
 0x83c   : > { %19725 = vmatpush1.bf16.msra.mxu1 %v27179_v25  ;;  %19685 = vmatprep.subr.bf16.mxu0 %v27184_v14  ;;  %v27255_v25 = vld [vmem:[%s28457_s11 + $0x4160] ss:$8 sps:$4 sm:$0xff]  }
 0x83d   : > { %19726 = vmatprep.subr.bf16.mxu1 %v27187_v40 }
 0x83f   : > { %19686 = vmatpush1.bf16.msra.mxu0 %v27182_v31 }
 0x840   : > { %19727 = vmatpush1.bf16.msra.mxu1 %v27185_v16  ;;  %19687 = vmatprep.subr.bf16.mxu0 %v27190_v15  ;;  %v27258_v15 = vld [vmem:[%s28457_s11 + $0x4070] ss:$8 sps:$4 sm:$0xff]  }
 0x841   : > { %19728 = vmatprep.subr.bf16.mxu1 %v27193_v61  ;;  %v27261_v61 = vld [vmem:[%s28457_s11 + $0x4170] ss:$8 sps:$4 sm:$0xff]  }
 0x843   : > { %19688 = vmatpush1.bf16.msra.mxu0 %v27188_v21  ;;  %v27266_v21 = vld [vmem:[%s28457_s11 + $0x4084] ss:$8 sps:$4 sm:$0xff]  }
 0x844   : > { %19729 = vmatpush1.bf16.msra.mxu1 %v27191_v3  ;;  %19689 = vmatprep.subr.bf16.mxu0 %v27196_v0  ;;  %v27269_v3 = vld [vmem:[%s28457_s11 + $0x4184] ss:$8 sps:$4 sm:$0xff]   ;;  %v27264_v0 = vld [vmem:[%s28457_s11 + $0x4080] ss:$8 sps:$4 sm:$0xff]  }
 0x845   : > { %19730 = vmatprep.subr.bf16.mxu1 %v27199_v24  ;;  %v27267_v24 = vld [vmem:[%s28457_s11 + $0x4180] ss:$8 sps:$4 sm:$0xff]  }
 0x847   : > { %19690 = vmatpush1.bf16.msra.mxu0 %v27194_v5  ;;  %v27272_v5 = vld [vmem:[%s28457_s11 + $0x4094] ss:$8 sps:$4 sm:$0xff]  }
 0x848   : > { %19731 = vmatpush1.bf16.msra.mxu1 %v27197_v27  ;;  %19691 = vmatprep.subr.bf16.mxu0 %v27202_v29  ;;  %v27275_v27 = vld [vmem:[%s28457_s11 + $0x4194] ss:$8 sps:$4 sm:$0xff]   ;;  %v27270_v29 = vld [vmem:[%s28457_s11 + $0x4090] ss:$8 sps:$4 sm:$0xff]  }
 0x849   : > { %19732 = vmatprep.subr.bf16.mxu1 %v27205_v10  ;;  %v27273_v10 = vld [vmem:[%s28457_s11 + $0x4190] ss:$8 sps:$4 sm:$0xff]  }
 0x84b   : > { %19692 = vmatpush1.bf16.msra.mxu0 %v27200_v7  ;;  %v27278_v7 = vld [vmem:[%s28457_s11 + $0x40a4] ss:$8 sps:$4 sm:$0xff]  }
 0x84c   : > { %19733 = vmatpush1.bf16.msra.mxu1 %v27203_v34  ;;  %19693 = vmatprep.subr.bf16.mxu0 %v27208_v4  ;;  %v27281_v34 = vld [vmem:[%s28457_s11 + $0x41a4] ss:$8 sps:$4 sm:$0xff]   ;;  %v27276_v4 = vld [vmem:[%s28457_s11 + $0x40a0] ss:$8 sps:$4 sm:$0xff]  }
 0x84d   : > { %19734 = vmatprep.subr.bf16.mxu1 %v27211_v53  ;;  %v27279_v53 = vld [vmem:[%s28457_s11 + $0x41a0] ss:$8 sps:$4 sm:$0xff]  }
 0x84f   : > { %19694 = vmatpush1.bf16.msra.mxu0 %v27206_v35  ;;  %v27284_v35 = vld [vmem:[%s28457_s11 + $0x40b4] ss:$8 sps:$4 sm:$0xff]  }
 0x850   : > { %19735 = vmatpush1.bf16.msra.mxu1 %v27209_v57  ;;  %19745 = vmatprep.subr.bf16.mxu0 %v27218_v13  ;;  %v27287_v57 = vld [vmem:[%s28457_s11 + $0x41b4] ss:$8 sps:$4 sm:$0xff]   ;;  %v27282_v13 = vld [vmem:[%s28457_s11 + $0x40b0] ss:$8 sps:$4 sm:$0xff]  }
 0x851   : > { %19786 = vmatprep.subr.bf16.mxu1 %v27221_v38  ;;  %v27285_v38 = vld [vmem:[%s28457_s11 + $0x41b0] ss:$8 sps:$4 sm:$0xff]  }
 0x852   : > { %19696 = vmatmul.mubr.bf16.vlgmr.msra.gmra.mrb[124].mxu0 %v21070_v37  ;;  %v27290_v37 = vld [vmem:[%s28457_s11 + $0x40c4] ss:$8 sps:$4 sm:$0xff]  }
 0x853   : > { %19737 = vmatmul.mubr.bf16.vlgmr.msra.gmra.mrb[124].mxu1 %v21072_v17  ;;  %19746 = vmatpush1.bf16.msra.mxu0 %v27216_v41  ;;  %v27293_v17 = vld [vmem:[%s28457_s11 + $0x41c4] ss:$8 sps:$4 sm:$0xff]   ;;  %v27288_v41 = vld [vmem:[%s28457_s11 + $0x40c0] ss:$8 sps:$4 sm:$0xff]  }
 0x854   : > { %19787 = vmatpush1.bf16.msra.mxu1 %v27219_v22  ;;  %19747 = vmatprep.subr.bf16.mxu0 %v27224_v20  ;;  %v27291_v22 = vld [vmem:[%s28457_s11 + $0x41c0] ss:$8 sps:$4 sm:$0xff]   ;;  %v27296_v20 = vld [vmem:[%s28457_s11 + $0x40d4] ss:$8 sps:$4 sm:$0xff]  }
 0x855   : > { %19788 = vmatprep.subr.bf16.mxu1 %v27227_v44  ;;  %19777 = vmatprep.mubr.bf16.mxu0 %v21075_v23  ;;  %v27299_v44 = vld [vmem:[%s28457_s11 + $0x41d4] ss:$8 sps:$4 sm:$0xff]   ;;  %v27294_v23 = vld [vmem:[%s28457_s11 + $0x40d0] ss:$8 sps:$4 sm:$0xff]  }
 0x856   : > { %19818 = vmatprep.mubr.bf16.mxu1 %v21077_v45  ;;  %v27297_v45 = vld [vmem:[%s28457_s11 + $0x41d0] ss:$8 sps:$4 sm:$0xff]  }
 0x857   : > { %19748 = vmatpush1.bf16.msra.mxu0 %v27222_v47  ;;  %v27302_v47 = vld [vmem:[%s28457_s11 + $0x40e4] ss:$8 sps:$4 sm:$0xff]  }
 0x858   : > { %19789 = vmatpush1.bf16.msra.mxu1 %v27225_v30  ;;  %19749 = vmatprep.subr.bf16.mxu0 %v27230_v28  ;;  %v27305_v30 = vld [vmem:[%s28457_s11 + $0x41e4] ss:$8 sps:$4 sm:$0xff]   ;;  %v27300_v28 = vld [vmem:[%s28457_s11 + $0x40e0] ss:$8 sps:$4 sm:$0xff]  }
 0x859   : > { %19790 = vmatprep.subr.bf16.mxu1 %v27233_v50  ;;  %v27303_v50 = vld [vmem:[%s28457_s11 + $0x41e0] ss:$8 sps:$4 sm:$0xff]  }
 0x85b   : > { %19750 = vmatpush1.bf16.msra.mxu0 %v27228_v33  ;;  %v27308_v33 = vld [vmem:[%s28457_s11 + $0x40f4] ss:$8 sps:$4 sm:$0xff]  }
 0x85c   : > { %19791 = vmatpush1.bf16.msra.mxu1 %v27231_v9  ;;  %19751 = vmatprep.subr.bf16.mxu0 %v27236_v52  ;;  %v27311_v9 = vld [vmem:[%s28457_s11 + $0x41f4] ss:$8 sps:$4 sm:$0xff]   ;;  %v27306_v52 = vld [vmem:[%s28457_s11 + $0x40f0] ss:$8 sps:$4 sm:$0xff]  }
 0x85d   : > { %19792 = vmatprep.subr.bf16.mxu1 %v27239_v36  ;;  %v27309_v36 = vld [vmem:[%s28457_s11 + $0x41f0] ss:$8 sps:$4 sm:$0xff]  }
 0x85f   : > { %19752 = vmatpush1.bf16.msra.mxu0 %v27234_v26  ;;  %v27318_v26 = vld [vmem:[%s28457_s11 + $0x4204] ss:$8 sps:$4 sm:$0xff]  }
 0x860   : > { %19793 = vmatpush1.bf16.msra.mxu1 %v27237_v56  ;;  %19753 = vmatprep.subr.bf16.mxu0 %v27242_v55  ;;  %v27321_v56 = vld [vmem:[%s28457_s11 + $0x4304] ss:$8 sps:$4 sm:$0xff]   ;;  %v21074_v55 = vcombine.low %v31141_v43, %v31141_v43 }
 0x861   : > { %19794 = vmatprep.subr.bf16.mxu1 %v27245_v39  ;;  %v21076_v39 = vcombine.low %v31144_v63, %v31144_v63 }
 0x863   : > { %19754 = vmatpush1.bf16.msra.mxu0 %v27240_v18  ;;  %v31225_v18 = vld [vmem:[%s28474_s27 + $0x210] sm:$0xff] }
 0x864   : > { %19795 = vmatpush1.bf16.msra.mxu1 %v27243_v19  ;;  %19755 = vmatprep.subr.bf16.mxu0 %v27248_v59  ;;  %v31228_v19 = vld [vmem:[%s28474_s27 + $0x218] sm:$0xff]  ;;  %v21079_v43 = vcombine.high %v31225_v18, %v31225_v18 }
 0x865   : > { %19796 = vmatprep.subr.bf16.mxu1 %v27251_v42  ;;  %v19451_v46 = vpop.f32.mrb[112].mxu0  ;;  %v27316_v59 = vld [vmem:[%s28457_s11 + $0x4200] ss:$8 sps:$4 sm:$0xff]   ;;  %v21081_v63 = vcombine.high %v31228_v19, %v31228_v19 }
 0x866   : > { %v19492_v6 = vpop.f32.mrb[112].mxu1  ;;  %v19452_v49 = vadd.f32 %v19451_v46, %v31094_v58  ;;  %v19453_v1 = vpop.f32.mrb[113].mxu0  ;;  %v27260_v58 = vld [vmem:[%s28457_s11 + $0x4074] ss:$8 sps:$4 sm:$0xff]   ;;  %v27319_v42 = vld [vmem:[%s28457_s11 + $0x4300] ss:$8 sps:$4 sm:$0xff]  }
 0x867   : > { %v19494_v8 = vpop.f32.mrb[113].mxu1  ;;  %v19454_v54 = vadd.f32 %v19453_v1, %v31098_v60  ;;  %v19455_v51 = vpop.f32.mrb[114].mxu0  ;;  %19756 = vmatpush1.bf16.msra.mxu0 %v27246_v32  ;;  %v27263_v60 = vld [vmem:[%s28457_s11 + $0x4174] ss:$8 sps:$4 sm:$0xff]   ;;  %v27330_v46 = vld [vmem:[%s28457_s11 + $0x4224] ss:$8 sps:$4 sm:$0xff]  }
 0x868   : > { %v19496_v12 = vpop.f32.mrb[114].mxu1  ;;  %19797 = vmatpush1.bf16.msra.mxu1 %v27249_v62  ;;  %v31178_v14 = vadd.f32 %v19492_v6, %v19452_v49  ;;  %v19456_v40 = vpop.f32.mrb[115].mxu0  ;;  %19757 = vmatprep.subr.bf16.mxu0 %v27254_v2  ;;  %v27324_v32 = vld [vmem:[%s28457_s11 + $0x4214] ss:$8 sps:$4 sm:$0xff]   ;;  %v27322_v2 = vld [vmem:[%s28457_s11 + $0x4210] ss:$8 sps:$4 sm:$0xff]  }
 0x869   : > { %v19497_v31 = vpop.f32.mrb[115].mxu1  ;;  %19798 = vmatprep.subr.bf16.mxu1 %v27257_v48  ;;  %v31182_v16 = vadd.f32 %v19494_v8, %v19454_v54  ;;  %v27327_v62 = vld [vmem:[%s28457_s11 + $0x4314] ss:$8 sps:$4 sm:$0xff]   ;;  %v27325_v48 = vld [vmem:[%s28457_s11 + $0x4310] ss:$8 sps:$4 sm:$0xff]  }
 0x86a   : > { %v27333_v6 = vld [vmem:[%s28457_s11 + $0x4324] ss:$8 sps:$4 sm:$0xff]   ;;  %v27328_v49 = vld [vmem:[%s28457_s11 + $0x4220] ss:$8 sps:$4 sm:$0xff]   ;;  %v27336_v8 = vld [vmem:[%s28457_s11 + $0x4234] ss:$8 sps:$4 sm:$0xff]  }
 0x86b   : > { %19758 = vmatpush1.bf16.msra.mxu0 %v27252_v11  ;;  %v27331_v1 = vld [vmem:[%s28457_s11 + $0x4320] ss:$8 sps:$4 sm:$0xff]   ;;  %v27339_v54 = vld [vmem:[%s28457_s11 + $0x4334] ss:$8 sps:$4 sm:$0xff]   ;;  %v27334_v51 = vld [vmem:[%s28457_s11 + $0x4230] ss:$8 sps:$4 sm:$0xff]  }
 0x86c   : > { %19799 = vmatpush1.bf16.msra.mxu1 %v27255_v25  ;;  %19759 = vmatprep.subr.bf16.mxu0 %v27260_v58  ;;  %v27337_v12 = vld [vmem:[%s28457_s11 + $0x4330] ss:$8 sps:$4 sm:$0xff]   ;;  %v27342_v11 = vld [vmem:[%s28457_s11 + $0x4244] ss:$8 sps:$4 sm:$0xff]   ;;  %v27340_v40 = vld [vmem:[%s28457_s11 + $0x4240] ss:$8 sps:$4 sm:$0xff]  }
 0x86d   : > { %19800 = vmatprep.subr.bf16.mxu1 %v27263_v60  ;;  %v27345_v25 = vld [vmem:[%s28457_s11 + $0x4344] ss:$8 sps:$4 sm:$0xff]   ;;  %v27343_v31 = vld [vmem:[%s28457_s11 + $0x4340] ss:$8 sps:$4 sm:$0xff]   ;;  %v27348_v58 = vld [vmem:[%s28457_s11 + $0x4254] ss:$8 sps:$4 sm:$0xff]  }
 0x86e   : > { %v27351_v60 = vld [vmem:[%s28457_s11 + $0x4354] ss:$8 sps:$4 sm:$0xff]  }
 0x86f   : > { %19760 = vmatpush1.bf16.msra.mxu0 %v27258_v15  ;;  %v27346_v15 = vld [vmem:[%s28457_s11 + $0x4250] ss:$8 sps:$4 sm:$0xff]  }
 0x870   : > { %19801 = vmatpush1.bf16.msra.mxu1 %v27261_v61  ;;  %19761 = vmatprep.subr.bf16.mxu0 %v27266_v21  ;;  %v27349_v61 = vld [vmem:[%s28457_s11 + $0x4350] ss:$8 sps:$4 sm:$0xff]   ;;  %v27354_v21 = vld [vmem:[%s28457_s11 + $0x4264] ss:$8 sps:$4 sm:$0xff]  }
 0x871   : > { %19802 = vmatprep.subr.bf16.mxu1 %v27269_v3  ;;  %v27357_v3 = vld [vmem:[%s28457_s11 + $0x4364] ss:$8 sps:$4 sm:$0xff]  }
 0x873   : > { %19762 = vmatpush1.bf16.msra.mxu0 %v27264_v0 }
 0x874   : > { %19803 = vmatpush1.bf16.msra.mxu1 %v27267_v24  ;;  %19763 = vmatprep.subr.bf16.mxu0 %v27272_v5 }
 0x875   : > { %19804 = vmatprep.subr.bf16.mxu1 %v27275_v27 }
 0x877   : > { %19764 = vmatpush1.bf16.msra.mxu0 %v27270_v29 }
 0x878   : > { %19805 = vmatpush1.bf16.msra.mxu1 %v27273_v10  ;;  %19765 = vmatprep.subr.bf16.mxu0 %v27278_v7 }
 0x879   : > { %19806 = vmatprep.subr.bf16.mxu1 %v27281_v34 }
 0x87b   : > { %19766 = vmatpush1.bf16.msra.mxu0 %v27276_v4  ;;  %v27352_v4 = vld [vmem:[%s28457_s11 + $0x4260] ss:$8 sps:$4 sm:$0xff]  }
 0x87c   : > { %19807 = vmatpush1.bf16.msra.mxu1 %v27279_v53  ;;  %19767 = vmatprep.subr.bf16.mxu0 %v27284_v35  ;;  %v27355_v53 = vld [vmem:[%s28457_s11 + $0x4360] ss:$8 sps:$4 sm:$0xff]  }
 0x87d   : > { %19808 = vmatprep.subr.bf16.mxu1 %v27287_v57 }
 0x87f   : > { %19768 = vmatpush1.bf16.msra.mxu0 %v27282_v13 }
 0x880   : > { %19809 = vmatpush1.bf16.msra.mxu1 %v27285_v38  ;;  %19769 = vmatprep.subr.bf16.mxu0 %v27290_v37  ;;  %v27358_v37 = vld [vmem:[%s28457_s11 + $0x4270] ss:$8 sps:$4 sm:$0xff]  }
 0x881   : > { %19810 = vmatprep.subr.bf16.mxu1 %v27293_v17  ;;  %v27361_v17 = vld [vmem:[%s28457_s11 + $0x4370] ss:$8 sps:$4 sm:$0xff]  }
 0x883   : > { %19770 = vmatpush1.bf16.msra.mxu0 %v27288_v41  ;;  %v27366_v41 = vld [vmem:[%s28457_s11 + $0x4284] ss:$8 sps:$4 sm:$0xff]  }
 0x884   : > { %19811 = vmatpush1.bf16.msra.mxu1 %v27291_v22  ;;  %19771 = vmatprep.subr.bf16.mxu0 %v27296_v20  ;;  %v27369_v22 = vld [vmem:[%s28457_s11 + $0x4384] ss:$8 sps:$4 sm:$0xff]   ;;  %v27364_v20 = vld [vmem:[%s28457_s11 + $0x4280] ss:$8 sps:$4 sm:$0xff]  }
 0x885   : > { %19812 = vmatprep.subr.bf16.mxu1 %v27299_v44  ;;  %v27367_v44 = vld [vmem:[%s28457_s11 + $0x4380] ss:$8 sps:$4 sm:$0xff]  }
 0x887   : > { %19772 = vmatpush1.bf16.msra.mxu0 %v27294_v23  ;;  %v27372_v23 = vld [vmem:[%s28457_s11 + $0x4294] ss:$8 sps:$4 sm:$0xff]  }
 0x888   : > { %19813 = vmatpush1.bf16.msra.mxu1 %v27297_v45  ;;  %19773 = vmatprep.subr.bf16.mxu0 %v27302_v47  ;;  %v27375_v45 = vld [vmem:[%s28457_s11 + $0x4394] ss:$8 sps:$4 sm:$0xff]   ;;  %v27370_v47 = vld [vmem:[%s28457_s11 + $0x4290] ss:$8 sps:$4 sm:$0xff]  }
 0x889   : > { %19814 = vmatprep.subr.bf16.mxu1 %v27305_v30  ;;  %v27373_v30 = vld [vmem:[%s28457_s11 + $0x4390] ss:$8 sps:$4 sm:$0xff]  }
 0x88b   : > { %19774 = vmatpush1.bf16.msra.mxu0 %v27300_v28  ;;  %v27378_v28 = vld [vmem:[%s28457_s11 + $0x42a4] ss:$8 sps:$4 sm:$0xff]  }
 0x88c   : > { %19815 = vmatpush1.bf16.msra.mxu1 %v27303_v50  ;;  %19775 = vmatprep.subr.bf16.mxu0 %v27308_v33  ;;  %v27381_v50 = vld [vmem:[%s28457_s11 + $0x43a4] ss:$8 sps:$4 sm:$0xff]   ;;  %v27376_v33 = vld [vmem:[%s28457_s11 + $0x42a0] ss:$8 sps:$4 sm:$0xff]  }
 0x88d   : > { %19816 = vmatprep.subr.bf16.mxu1 %v27311_v9  ;;  %v27379_v9 = vld [vmem:[%s28457_s11 + $0x43a0] ss:$8 sps:$4 sm:$0xff]  }
 0x88f   : > { %19776 = vmatpush1.bf16.msra.mxu0 %v27306_v52  ;;  %v27384_v52 = vld [vmem:[%s28457_s11 + $0x42b4] ss:$8 sps:$4 sm:$0xff]  }
 0x890   : > { %19817 = vmatpush1.bf16.msra.mxu1 %v27309_v36  ;;  %19827 = vmatprep.subr.bf16.mxu0 %v27318_v26  ;;  %v27387_v36 = vld [vmem:[%s28457_s11 + $0x43b4] ss:$8 sps:$4 sm:$0xff]   ;;  %v27382_v26 = vld [vmem:[%s28457_s11 + $0x42b0] ss:$8 sps:$4 sm:$0xff]  }
 0x891   : > { %19868 = vmatprep.subr.bf16.mxu1 %v27321_v56  ;;  %v27385_v56 = vld [vmem:[%s28457_s11 + $0x43b0] ss:$8 sps:$4 sm:$0xff]  }
 0x892   : > { %19778 = vmatmul.mubr.bf16.vlgmr.msra.gmra.mrb[128].mxu0 %v21074_v55  ;;  %v27390_v55 = vld [vmem:[%s28457_s11 + $0x42c4] ss:$8 sps:$4 sm:$0xff]  }
 0x893   : > { %19819 = vmatmul.mubr.bf16.vlgmr.msra.gmra.mrb[128].mxu1 %v21076_v39  ;;  %19828 = vmatpush1.bf16.msra.mxu0 %v27316_v59  ;;  %v27393_v39 = vld [vmem:[%s28457_s11 + $0x43c4] ss:$8 sps:$4 sm:$0xff]   ;;  %v27388_v59 = vld [vmem:[%s28457_s11 + $0x42c0] ss:$8 sps:$4 sm:$0xff]  }
 0x894   : > { %19869 = vmatpush1.bf16.msra.mxu1 %v27319_v42  ;;  %19829 = vmatprep.subr.bf16.mxu0 %v27324_v32  ;;  %v27391_v42 = vld [vmem:[%s28457_s11 + $0x43c0] ss:$8 sps:$4 sm:$0xff]   ;;  %v27396_v32 = vld [vmem:[%s28457_s11 + $0x42d4] ss:$8 sps:$4 sm:$0xff]  }
 0x895   : > { %19870 = vmatprep.subr.bf16.mxu1 %v27327_v62  ;;  %19859 = vmatprep.mubr.bf16.mxu0 %v21079_v43  ;;  %v27399_v62 = vld [vmem:[%s28457_s11 + $0x43d4] ss:$8 sps:$4 sm:$0xff]   ;;  %v27394_v43 = vld [vmem:[%s28457_s11 + $0x42d0] ss:$8 sps:$4 sm:$0xff]  }
 0x896   : > { %19900 = vmatprep.mubr.bf16.mxu1 %v21081_v63  ;;  %v27397_v63 = vld [vmem:[%s28457_s11 + $0x43d0] ss:$8 sps:$4 sm:$0xff]  }
 0x897   : > { %19830 = vmatpush1.bf16.msra.mxu0 %v27322_v2  ;;  %v27402_v2 = vld [vmem:[%s28457_s11 + $0x42e4] ss:$8 sps:$4 sm:$0xff]  }
 0x898   : > { %19871 = vmatpush1.bf16.msra.mxu1 %v27325_v48  ;;  %19831 = vmatprep.subr.bf16.mxu0 %v27330_v46  ;;  %v27405_v48 = vld [vmem:[%s28457_s11 + $0x43e4] ss:$8 sps:$4 sm:$0xff]   ;;  %v27400_v46 = vld [vmem:[%s28457_s11 + $0x42e0] ss:$8 sps:$4 sm:$0xff]  }
 0x899   : > { %19872 = vmatprep.subr.bf16.mxu1 %v27333_v6  ;;  %v27403_v6 = vld [vmem:[%s28457_s11 + $0x43e0] ss:$8 sps:$4 sm:$0xff]  }
 0x89b   : > { %19832 = vmatpush1.bf16.msra.mxu0 %v27328_v49  ;;  %v27408_v49 = vld [vmem:[%s28457_s11 + $0x42f4] ss:$8 sps:$4 sm:$0xff]  }
 0x89c   : > { %19873 = vmatpush1.bf16.msra.mxu1 %v27331_v1  ;;  %19833 = vmatprep.subr.bf16.mxu0 %v27336_v8  ;;  %v27411_v1 = vld [vmem:[%s28457_s11 + $0x43f4] ss:$8 sps:$4 sm:$0xff]   ;;  %v27406_v8 = vld [vmem:[%s28457_s11 + $0x42f0] ss:$8 sps:$4 sm:$0xff]  }
 0x89d   : > { %19874 = vmatprep.subr.bf16.mxu1 %v27339_v54  ;;  %v27409_v54 = vld [vmem:[%s28457_s11 + $0x43f0] ss:$8 sps:$4 sm:$0xff]  }
 0x89f   : > { %19834 = vmatpush1.bf16.msra.mxu0 %v27334_v51  ;;  %v27418_v51 = vld [vmem:[%s28457_s11 + $0x4404] ss:$8 sps:$4 sm:$0xff]  }
 0x8a0   : > { %19875 = vmatpush1.bf16.msra.mxu1 %v27337_v12  ;;  %19835 = vmatprep.subr.bf16.mxu0 %v27342_v11  ;;  %v27421_v12 = vld [vmem:[%s28457_s11 + $0x4504] ss:$8 sps:$4 sm:$0xff]   ;;  %v21078_v11 = vcombine.low %v31225_v18, %v31225_v18 }
 0x8a1   : > { %19876 = vmatprep.subr.bf16.mxu1 %v27345_v25  ;;  %v21080_v25 = vcombine.low %v31228_v19, %v31228_v19 }
 0x8a3   : > { %19836 = vmatpush1.bf16.msra.mxu0 %v27340_v40  ;;  %v31309_v40 = vld [vmem:[%s28474_s27 + $0x220] sm:$0xff] }
 0x8a4   : > { %19877 = vmatpush1.bf16.msra.mxu1 %v27343_v31  ;;  %19837 = vmatprep.subr.bf16.mxu0 %v27348_v58  ;;  %v31312_v31 = vld [vmem:[%s28474_s27 + $0x228] sm:$0xff]  ;;  %v27416_v58 = vld [vmem:[%s28457_s11 + $0x4400] ss:$8 sps:$4 sm:$0xff]   ;;  %v21083_v18 = vcombine.high %v31309_v40, %v31309_v40 }
 0x8a5   : > { %19878 = vmatprep.subr.bf16.mxu1 %v27351_v60  ;;  %v19533_v0 = vpop.f32.mrb[116].mxu0  ;;  %v27419_v60 = vld [vmem:[%s28457_s11 + $0x4500] ss:$8 sps:$4 sm:$0xff]   ;;  %v21085_v19 = vcombine.high %v31312_v31, %v31312_v31 }
 0x8a6   : > { %v19574_v24 = vpop.f32.mrb[116].mxu1  ;;  %v19534_v5 = vadd.f32 %v19533_v0, %v31178_v14  ;;  %v19535_v27 = vpop.f32.mrb[117].mxu0  ;;  %v27360_v14 = vld [vmem:[%s28457_s11 + $0x4274] ss:$8 sps:$4 sm:$0xff]   ;;  %v27430_v0 = vld [vmem:[%s28457_s11 + $0x4424] ss:$8 sps:$4 sm:$0xff]  }
 0x8a7   : > { %v19576_v29 = vpop.f32.mrb[117].mxu1  ;;  %v19536_v10 = vadd.f32 %v19535_v27, %v31182_v16  ;;  %v19537_v7 = vpop.f32.mrb[118].mxu0  ;;  %19838 = vmatpush1.bf16.msra.mxu0 %v27346_v15  ;;  %v27363_v16 = vld [vmem:[%s28457_s11 + $0x4374] ss:$8 sps:$4 sm:$0xff]   ;;  %v27431_v27 = vld [vmem:[%s28457_s11 + $0x4520] ss:$8 sps:$4 sm:$0xff]  }
 0x8a8   : > { %v19578_v34 = vpop.f32.mrb[118].mxu1  ;;  %19879 = vmatpush1.bf16.msra.mxu1 %v27349_v61  ;;  %v31262_v35 = vadd.f32 %v19574_v24, %v19534_v5  ;;  %v19538_v57 = vpop.f32.mrb[119].mxu0  ;;  %19839 = vmatprep.subr.bf16.mxu0 %v27354_v21  ;;  %v27424_v15 = vld [vmem:[%s28457_s11 + $0x4414] ss:$8 sps:$4 sm:$0xff]   ;;  %v27422_v21 = vld [vmem:[%s28457_s11 + $0x4410] ss:$8 sps:$4 sm:$0xff]  }
 0x8a9   : > { %v19579_v13 = vpop.f32.mrb[119].mxu1  ;;  %19880 = vmatprep.subr.bf16.mxu1 %v27357_v3  ;;  %v31266_v38 = vadd.f32 %v19576_v29, %v19536_v10  ;;  %v27427_v61 = vld [vmem:[%s28457_s11 + $0x4514] ss:$8 sps:$4 sm:$0xff]   ;;  %v27425_v3 = vld [vmem:[%s28457_s11 + $0x4510] ss:$8 sps:$4 sm:$0xff]  }
 0x8aa   : > { %v27433_v24 = vld [vmem:[%s28457_s11 + $0x4524] ss:$8 sps:$4 sm:$0xff]   ;;  %v27428_v5 = vld [vmem:[%s28457_s11 + $0x4420] ss:$8 sps:$4 sm:$0xff]   ;;  %v27436_v29 = vld [vmem:[%s28457_s11 + $0x4434] ss:$8 sps:$4 sm:$0xff]  }
 0x8ab   : > { %19840 = vmatpush1.bf16.msra.mxu0 %v27352_v4  ;;  %v27439_v10 = vld [vmem:[%s28457_s11 + $0x4534] ss:$8 sps:$4 sm:$0xff]   ;;  %v27434_v7 = vld [vmem:[%s28457_s11 + $0x4430] ss:$8 sps:$4 sm:$0xff]   ;;  %v27442_v4 = vld [vmem:[%s28457_s11 + $0x4444] ss:$8 sps:$4 sm:$0xff]  }
 0x8ac   : > { %19881 = vmatpush1.bf16.msra.mxu1 %v27355_v53  ;;  %19841 = vmatprep.subr.bf16.mxu0 %v27360_v14  ;;  %v27437_v34 = vld [vmem:[%s28457_s11 + $0x4530] ss:$8 sps:$4 sm:$0xff]   ;;  %v27445_v53 = vld [vmem:[%s28457_s11 + $0x4544] ss:$8 sps:$4 sm:$0xff]   ;;  %v27440_v57 = vld [vmem:[%s28457_s11 + $0x4440] ss:$8 sps:$4 sm:$0xff]  }
 0x8ad   : > { %19882 = vmatprep.subr.bf16.mxu1 %v27363_v16  ;;  %v27443_v13 = vld [vmem:[%s28457_s11 + $0x4540] ss:$8 sps:$4 sm:$0xff]   ;;  %v27448_v14 = vld [vmem:[%s28457_s11 + $0x4454] ss:$8 sps:$4 sm:$0xff]  }
 0x8ae   : > { %v27451_v16 = vld [vmem:[%s28457_s11 + $0x4554] ss:$8 sps:$4 sm:$0xff]  }
 0x8af   : > { %19842 = vmatpush1.bf16.msra.mxu0 %v27358_v37  ;;  %v27446_v37 = vld [vmem:[%s28457_s11 + $0x4450] ss:$8 sps:$4 sm:$0xff]  }
 0x8b0   : > { %19883 = vmatpush1.bf16.msra.mxu1 %v27361_v17  ;;  %19843 = vmatprep.subr.bf16.mxu0 %v27366_v41  ;;  %v27449_v17 = vld [vmem:[%s28457_s11 + $0x4550] ss:$8 sps:$4 sm:$0xff]   ;;  %v27454_v41 = vld [vmem:[%s28457_s11 + $0x4464] ss:$8 sps:$4 sm:$0xff]  }
 0x8b1   : > { %19884 = vmatprep.subr.bf16.mxu1 %v27369_v22  ;;  %v27457_v22 = vld [vmem:[%s28457_s11 + $0x4564] ss:$8 sps:$4 sm:$0xff]  }
 0x8b3   : > { %19844 = vmatpush1.bf16.msra.mxu0 %v27364_v20 }
 0x8b4   : > { %19885 = vmatpush1.bf16.msra.mxu1 %v27367_v44  ;;  %19845 = vmatprep.subr.bf16.mxu0 %v27372_v23 }
 0x8b5   : > { %19886 = vmatprep.subr.bf16.mxu1 %v27375_v45 }
 0x8b7   : > { %19846 = vmatpush1.bf16.msra.mxu0 %v27370_v47 }
 0x8b8   : > { %19887 = vmatpush1.bf16.msra.mxu1 %v27373_v30  ;;  %19847 = vmatprep.subr.bf16.mxu0 %v27378_v28 }
 0x8b9   : > { %19888 = vmatprep.subr.bf16.mxu1 %v27381_v50 }
 0x8bb   : > { %19848 = vmatpush1.bf16.msra.mxu0 %v27376_v33  ;;  %v27452_v33 = vld [vmem:[%s28457_s11 + $0x4460] ss:$8 sps:$4 sm:$0xff]  }
 0x8bc   : > { %19889 = vmatpush1.bf16.msra.mxu1 %v27379_v9  ;;  %19849 = vmatprep.subr.bf16.mxu0 %v27384_v52  ;;  %v27455_v9 = vld [vmem:[%s28457_s11 + $0x4560] ss:$8 sps:$4 sm:$0xff]  }
 0x8bd   : > { %19890 = vmatprep.subr.bf16.mxu1 %v27387_v36 }
 0x8bf   : > { %19850 = vmatpush1.bf16.msra.mxu0 %v27382_v26 }
 0x8c0   : > { %19891 = vmatpush1.bf16.msra.mxu1 %v27385_v56  ;;  %19851 = vmatprep.subr.bf16.mxu0 %v27390_v55  ;;  %v27458_v55 = vld [vmem:[%s28457_s11 + $0x4470] ss:$8 sps:$4 sm:$0xff]  }
 0x8c1   : > { %19892 = vmatprep.subr.bf16.mxu1 %v27393_v39  ;;  %v27461_v39 = vld [vmem:[%s28457_s11 + $0x4570] ss:$8 sps:$4 sm:$0xff]  }
 0x8c3   : > { %19852 = vmatpush1.bf16.msra.mxu0 %v27388_v59  ;;  %v27466_v59 = vld [vmem:[%s28457_s11 + $0x4484] ss:$8 sps:$4 sm:$0xff]  }
 0x8c4   : > { %19893 = vmatpush1.bf16.msra.mxu1 %v27391_v42  ;;  %19853 = vmatprep.subr.bf16.mxu0 %v27396_v32  ;;  %v27469_v42 = vld [vmem:[%s28457_s11 + $0x4584] ss:$8 sps:$4 sm:$0xff]   ;;  %v27464_v32 = vld [vmem:[%s28457_s11 + $0x4480] ss:$8 sps:$4 sm:$0xff]  }
 0x8c5   : > { %19894 = vmatprep.subr.bf16.mxu1 %v27399_v62  ;;  %v27467_v62 = vld [vmem:[%s28457_s11 + $0x4580] ss:$8 sps:$4 sm:$0xff]  }
 0x8c7   : > { %19854 = vmatpush1.bf16.msra.mxu0 %v27394_v43  ;;  %v27472_v43 = vld [vmem:[%s28457_s11 + $0x4494] ss:$8 sps:$4 sm:$0xff]  }
 0x8c8   : > { %19895 = vmatpush1.bf16.msra.mxu1 %v27397_v63  ;;  %19855 = vmatprep.subr.bf16.mxu0 %v27402_v2  ;;  %v27475_v63 = vld [vmem:[%s28457_s11 + $0x4594] ss:$8 sps:$4 sm:$0xff]   ;;  %v27470_v2 = vld [vmem:[%s28457_s11 + $0x4490] ss:$8 sps:$4 sm:$0xff]  }
 0x8c9   : > { %19896 = vmatprep.subr.bf16.mxu1 %v27405_v48  ;;  %v27473_v48 = vld [vmem:[%s28457_s11 + $0x4590] ss:$8 sps:$4 sm:$0xff]  }
 0x8cb   : > { %19856 = vmatpush1.bf16.msra.mxu0 %v27400_v46  ;;  %v27478_v46 = vld [vmem:[%s28457_s11 + $0x44a4] ss:$8 sps:$4 sm:$0xff]  }
 0x8cc   : > { %19897 = vmatpush1.bf16.msra.mxu1 %v27403_v6  ;;  %19857 = vmatprep.subr.bf16.mxu0 %v27408_v49  ;;  %v27481_v6 = vld [vmem:[%s28457_s11 + $0x45a4] ss:$8 sps:$4 sm:$0xff]   ;;  %v27476_v49 = vld [vmem:[%s28457_s11 + $0x44a0] ss:$8 sps:$4 sm:$0xff]  }
 0x8cd   : > { %19898 = vmatprep.subr.bf16.mxu1 %v27411_v1  ;;  %v27479_v1 = vld [vmem:[%s28457_s11 + $0x45a0] ss:$8 sps:$4 sm:$0xff]  }
 0x8cf   : > { %19858 = vmatpush1.bf16.msra.mxu0 %v27406_v8  ;;  %v27484_v8 = vld [vmem:[%s28457_s11 + $0x44b4] ss:$8 sps:$4 sm:$0xff]  }
 0x8d0   : > { %19899 = vmatpush1.bf16.msra.mxu1 %v27409_v54  ;;  %19909 = vmatprep.subr.bf16.mxu0 %v27418_v51  ;;  %v27487_v54 = vld [vmem:[%s28457_s11 + $0x45b4] ss:$8 sps:$4 sm:$0xff]   ;;  %v27482_v51 = vld [vmem:[%s28457_s11 + $0x44b0] ss:$8 sps:$4 sm:$0xff]  }
 0x8d1   : > { %19950 = vmatprep.subr.bf16.mxu1 %v27421_v12  ;;  %v27485_v12 = vld [vmem:[%s28457_s11 + $0x45b0] ss:$8 sps:$4 sm:$0xff]  }
 0x8d2   : > { %19860 = vmatmul.mubr.bf16.vlgmr.msra.gmra.mrb[132].mxu0 %v21078_v11  ;;  %v27490_v11 = vld [vmem:[%s28457_s11 + $0x44c4] ss:$8 sps:$4 sm:$0xff]  }
 0x8d3   : > { %19901 = vmatmul.mubr.bf16.vlgmr.msra.gmra.mrb[132].mxu1 %v21080_v25  ;;  %19910 = vmatpush1.bf16.msra.mxu0 %v27416_v58  ;;  %v27493_v25 = vld [vmem:[%s28457_s11 + $0x45c4] ss:$8 sps:$4 sm:$0xff]   ;;  %v27488_v58 = vld [vmem:[%s28457_s11 + $0x44c0] ss:$8 sps:$4 sm:$0xff]  }
 0x8d4   : > { %19951 = vmatpush1.bf16.msra.mxu1 %v27419_v60  ;;  %19911 = vmatprep.subr.bf16.mxu0 %v27424_v15  ;;  %v27491_v60 = vld [vmem:[%s28457_s11 + $0x45c0] ss:$8 sps:$4 sm:$0xff]   ;;  %v27496_v15 = vld [vmem:[%s28457_s11 + $0x44d4] ss:$8 sps:$4 sm:$0xff]  }
 0x8d5   : > { %19952 = vmatprep.subr.bf16.mxu1 %v27427_v61  ;;  %19941 = vmatprep.mubr.bf16.mxu0 %v21083_v18  ;;  %v27499_v61 = vld [vmem:[%s28457_s11 + $0x45d4] ss:$8 sps:$4 sm:$0xff]   ;;  %v27494_v18 = vld [vmem:[%s28457_s11 + $0x44d0] ss:$8 sps:$4 sm:$0xff]  }
 0x8d6   : > { %19982 = vmatprep.mubr.bf16.mxu1 %v21085_v19  ;;  %v27497_v19 = vld [vmem:[%s28457_s11 + $0x45d0] ss:$8 sps:$4 sm:$0xff]  }
 0x8d7   : > { %19912 = vmatpush1.bf16.msra.mxu0 %v27422_v21  ;;  %v27502_v21 = vld [vmem:[%s28457_s11 + $0x44e4] ss:$8 sps:$4 sm:$0xff]  }
 0x8d8   : > { %19953 = vmatpush1.bf16.msra.mxu1 %v27425_v3  ;;  %19913 = vmatprep.subr.bf16.mxu0 %v27430_v0  ;;  %v27505_v3 = vld [vmem:[%s28457_s11 + $0x45e4] ss:$8 sps:$4 sm:$0xff]   ;;  %v27500_v0 = vld [vmem:[%s28457_s11 + $0x44e0] ss:$8 sps:$4 sm:$0xff]  }
 0x8d9   : > { %19954 = vmatprep.subr.bf16.mxu1 %v27433_v24  ;;  %v27503_v24 = vld [vmem:[%s28457_s11 + $0x45e0] ss:$8 sps:$4 sm:$0xff]  }
 0x8db   : > { %19914 = vmatpush1.bf16.msra.mxu0 %v27428_v5  ;;  %v27508_v5 = vld [vmem:[%s28457_s11 + $0x44f4] ss:$8 sps:$4 sm:$0xff]  }
 0x8dc   : > { %19955 = vmatpush1.bf16.msra.mxu1 %v27431_v27  ;;  %19915 = vmatprep.subr.bf16.mxu0 %v27436_v29  ;;  %v27511_v27 = vld [vmem:[%s28457_s11 + $0x45f4] ss:$8 sps:$4 sm:$0xff]   ;;  %v27506_v29 = vld [vmem:[%s28457_s11 + $0x44f0] ss:$8 sps:$4 sm:$0xff]  }
 0x8dd   : > { %19956 = vmatprep.subr.bf16.mxu1 %v27439_v10  ;;  %v27509_v10 = vld [vmem:[%s28457_s11 + $0x45f0] ss:$8 sps:$4 sm:$0xff]  }
 0x8df   : > { %19916 = vmatpush1.bf16.msra.mxu0 %v27434_v7  ;;  %v27518_v7 = vld [vmem:[%s28457_s11 + $0x4604] ss:$8 sps:$4 sm:$0xff]  }
 0x8e0   : > { %19957 = vmatpush1.bf16.msra.mxu1 %v27437_v34  ;;  %19917 = vmatprep.subr.bf16.mxu0 %v27442_v4  ;;  %v27521_v34 = vld [vmem:[%s28457_s11 + $0x4704] ss:$8 sps:$4 sm:$0xff]   ;;  %v21082_v4 = vcombine.low %v31309_v40, %v31309_v40 }
 0x8e1   : > { %19958 = vmatprep.subr.bf16.mxu1 %v27445_v53  ;;  %v21084_v53 = vcombine.low %v31312_v31, %v31312_v31 }
 0x8e3   : > { %19918 = vmatpush1.bf16.msra.mxu0 %v27440_v57  ;;  %v31393_v57 = vld [vmem:[%s28474_s27 + $0x230] sm:$0xff] }
 0x8e4   : > { %19959 = vmatpush1.bf16.msra.mxu1 %v27443_v13  ;;  %19919 = vmatprep.subr.bf16.mxu0 %v27448_v14  ;;  %v31396_v13 = vld [vmem:[%s28474_s27 + $0x238] sm:$0xff]  ;;  %v21087_v40 = vcombine.high %v31393_v57, %v31393_v57 }
 0x8e5   : > { %19960 = vmatprep.subr.bf16.mxu1 %v27451_v16  ;;  %v19615_v20 = vpop.f32.mrb[120].mxu0  ;;  %v27516_v14 = vld [vmem:[%s28457_s11 + $0x4600] ss:$8 sps:$4 sm:$0xff]   ;;  %v21089_v31 = vcombine.high %v31396_v13, %v31396_v13 }
 0x8e6   : > { %v19656_v44 = vpop.f32.mrb[120].mxu1  ;;  %v19616_v23 = vadd.f32 %v19615_v20, %v31262_v35  ;;  %v19617_v45 = vpop.f32.mrb[121].mxu0  ;;  %v27460_v35 = vld [vmem:[%s28457_s11 + $0x4474] ss:$8 sps:$4 sm:$0xff]   ;;  %v27519_v16 = vld [vmem:[%s28457_s11 + $0x4700] ss:$8 sps:$4 sm:$0xff]  }
 0x8e7   : > { %v19658_v47 = vpop.f32.mrb[121].mxu1  ;;  %v19618_v30 = vadd.f32 %v19617_v45, %v31266_v38  ;;  %v19619_v28 = vpop.f32.mrb[122].mxu0  ;;  %19920 = vmatpush1.bf16.msra.mxu0 %v27446_v37  ;;  %v27463_v38 = vld [vmem:[%s28457_s11 + $0x4574] ss:$8 sps:$4 sm:$0xff]   ;;  %v27530_v20 = vld [vmem:[%s28457_s11 + $0x4624] ss:$8 sps:$4 sm:$0xff]  }
 0x8e8   : > { %v19660_v50 = vpop.f32.mrb[122].mxu1  ;;  %19961 = vmatpush1.bf16.msra.mxu1 %v27449_v17  ;;  %v31346_v52 = vadd.f32 %v19656_v44, %v19616_v23  ;;  %v19620_v36 = vpop.f32.mrb[123].mxu0  ;;  %19921 = vmatprep.subr.bf16.mxu0 %v27454_v41  ;;  %v27524_v37 = vld [vmem:[%s28457_s11 + $0x4614] ss:$8 sps:$4 sm:$0xff]   ;;  %v27522_v41 = vld [vmem:[%s28457_s11 + $0x4610] ss:$8 sps:$4 sm:$0xff]  }
 0x8e9   : > { %v19661_v26 = vpop.f32.mrb[123].mxu1  ;;  %19962 = vmatprep.subr.bf16.mxu1 %v27457_v22  ;;  %v31350_v56 = vadd.f32 %v19658_v47, %v19618_v30  ;;  %v27527_v17 = vld [vmem:[%s28457_s11 + $0x4714] ss:$8 sps:$4 sm:$0xff]   ;;  %v27525_v22 = vld [vmem:[%s28457_s11 + $0x4710] ss:$8 sps:$4 sm:$0xff]  }
 0x8ea   : > { %v27533_v44 = vld [vmem:[%s28457_s11 + $0x4724] ss:$8 sps:$4 sm:$0xff]   ;;  %v27528_v23 = vld [vmem:[%s28457_s11 + $0x4620] ss:$8 sps:$4 sm:$0xff]   ;;  %v27536_v47 = vld [vmem:[%s28457_s11 + $0x4634] ss:$8 sps:$4 sm:$0xff]  }
 0x8eb   : > { %19922 = vmatpush1.bf16.msra.mxu0 %v27452_v33  ;;  %v27531_v45 = vld [vmem:[%s28457_s11 + $0x4720] ss:$8 sps:$4 sm:$0xff]   ;;  %v27539_v30 = vld [vmem:[%s28457_s11 + $0x4734] ss:$8 sps:$4 sm:$0xff]   ;;  %v27534_v28 = vld [vmem:[%s28457_s11 + $0x4630] ss:$8 sps:$4 sm:$0xff]  }
 0x8ec   : > { %19963 = vmatpush1.bf16.msra.mxu1 %v27455_v9  ;;  %19923 = vmatprep.subr.bf16.mxu0 %v27460_v35  ;;  %v27537_v50 = vld [vmem:[%s28457_s11 + $0x4730] ss:$8 sps:$4 sm:$0xff]   ;;  %v27542_v33 = vld [vmem:[%s28457_s11 + $0x4644] ss:$8 sps:$4 sm:$0xff]   ;;  %v27540_v36 = vld [vmem:[%s28457_s11 + $0x4640] ss:$8 sps:$4 sm:$0xff]  }
 0x8ed   : > { %19964 = vmatprep.subr.bf16.mxu1 %v27463_v38  ;;  %v27545_v9 = vld [vmem:[%s28457_s11 + $0x4744] ss:$8 sps:$4 sm:$0xff]   ;;  %v27543_v26 = vld [vmem:[%s28457_s11 + $0x4740] ss:$8 sps:$4 sm:$0xff]   ;;  %v27548_v35 = vld [vmem:[%s28457_s11 + $0x4654] ss:$8 sps:$4 sm:$0xff]  }
 0x8ee   : > { %v27551_v38 = vld [vmem:[%s28457_s11 + $0x4754] ss:$8 sps:$4 sm:$0xff]  }
 0x8ef   : > { %19924 = vmatpush1.bf16.msra.mxu0 %v27458_v55  ;;  %v27546_v55 = vld [vmem:[%s28457_s11 + $0x4650] ss:$8 sps:$4 sm:$0xff]  }
 0x8f0   : > { %19965 = vmatpush1.bf16.msra.mxu1 %v27461_v39  ;;  %19925 = vmatprep.subr.bf16.mxu0 %v27466_v59  ;;  %v27549_v39 = vld [vmem:[%s28457_s11 + $0x4750] ss:$8 sps:$4 sm:$0xff]   ;;  %v27554_v59 = vld [vmem:[%s28457_s11 + $0x4664] ss:$8 sps:$4 sm:$0xff]  }
 0x8f1   : > { %19966 = vmatprep.subr.bf16.mxu1 %v27469_v42  ;;  %v27557_v42 = vld [vmem:[%s28457_s11 + $0x4764] ss:$8 sps:$4 sm:$0xff]  }
 0x8f3   : > { %19926 = vmatpush1.bf16.msra.mxu0 %v27464_v32 }
 0x8f4   : > { %19967 = vmatpush1.bf16.msra.mxu1 %v27467_v62  ;;  %19927 = vmatprep.subr.bf16.mxu0 %v27472_v43 }
 0x8f5   : > { %19968 = vmatprep.subr.bf16.mxu1 %v27475_v63 }
 0x8f7   : > { %19928 = vmatpush1.bf16.msra.mxu0 %v27470_v2 }
 0x8f8   : > { %19969 = vmatpush1.bf16.msra.mxu1 %v27473_v48  ;;  %19929 = vmatprep.subr.bf16.mxu0 %v27478_v46 }
 0x8f9   : > { %19970 = vmatprep.subr.bf16.mxu1 %v27481_v6 }
 0x8fb   : > { %19930 = vmatpush1.bf16.msra.mxu0 %v27476_v49  ;;  %v27552_v49 = vld [vmem:[%s28457_s11 + $0x4660] ss:$8 sps:$4 sm:$0xff]  }
 0x8fc   : > { %19971 = vmatpush1.bf16.msra.mxu1 %v27479_v1  ;;  %19931 = vmatprep.subr.bf16.mxu0 %v27484_v8  ;;  %v27555_v1 = vld [vmem:[%s28457_s11 + $0x4760] ss:$8 sps:$4 sm:$0xff]  }
 0x8fd   : > { %19972 = vmatprep.subr.bf16.mxu1 %v27487_v54 }
 0x8ff   : > { %19932 = vmatpush1.bf16.msra.mxu0 %v27482_v51 }
 0x900   : > { %19973 = vmatpush1.bf16.msra.mxu1 %v27485_v12  ;;  %19933 = vmatprep.subr.bf16.mxu0 %v27490_v11  ;;  %v27558_v11 = vld [vmem:[%s28457_s11 + $0x4670] ss:$8 sps:$4 sm:$0xff]  }
 0x901   : > { %19974 = vmatprep.subr.bf16.mxu1 %v27493_v25  ;;  %v27561_v25 = vld [vmem:[%s28457_s11 + $0x4770] ss:$8 sps:$4 sm:$0xff]  }
 0x903   : > { %19934 = vmatpush1.bf16.msra.mxu0 %v27488_v58  ;;  %v27566_v58 = vld [vmem:[%s28457_s11 + $0x4684] ss:$8 sps:$4 sm:$0xff]  }
 0x904   : > { %19975 = vmatpush1.bf16.msra.mxu1 %v27491_v60  ;;  %19935 = vmatprep.subr.bf16.mxu0 %v27496_v15  ;;  %v27569_v60 = vld [vmem:[%s28457_s11 + $0x4784] ss:$8 sps:$4 sm:$0xff]   ;;  %v27564_v15 = vld [vmem:[%s28457_s11 + $0x4680] ss:$8 sps:$4 sm:$0xff]  }
 0x905   : > { %19976 = vmatprep.subr.bf16.mxu1 %v27499_v61  ;;  %v27567_v61 = vld [vmem:[%s28457_s11 + $0x4780] ss:$8 sps:$4 sm:$0xff]  }
 0x907   : > { %19936 = vmatpush1.bf16.msra.mxu0 %v27494_v18  ;;  %v27572_v18 = vld [vmem:[%s28457_s11 + $0x4694] ss:$8 sps:$4 sm:$0xff]  }
 0x908   : > { %19977 = vmatpush1.bf16.msra.mxu1 %v27497_v19  ;;  %19937 = vmatprep.subr.bf16.mxu0 %v27502_v21  ;;  %v27575_v19 = vld [vmem:[%s28457_s11 + $0x4794] ss:$8 sps:$4 sm:$0xff]   ;;  %v27570_v21 = vld [vmem:[%s28457_s11 + $0x4690] ss:$8 sps:$4 sm:$0xff]  }
 0x909   : > { %19978 = vmatprep.subr.bf16.mxu1 %v27505_v3  ;;  %v27573_v3 = vld [vmem:[%s28457_s11 + $0x4790] ss:$8 sps:$4 sm:$0xff]  }
 0x90b   : > { %19938 = vmatpush1.bf16.msra.mxu0 %v27500_v0  ;;  %v27578_v0 = vld [vmem:[%s28457_s11 + $0x46a4] ss:$8 sps:$4 sm:$0xff]  }
 0x90c   : > { %19979 = vmatpush1.bf16.msra.mxu1 %v27503_v24  ;;  %19939 = vmatprep.subr.bf16.mxu0 %v27508_v5  ;;  %v27581_v24 = vld [vmem:[%s28457_s11 + $0x47a4] ss:$8 sps:$4 sm:$0xff]   ;;  %v27576_v5 = vld [vmem:[%s28457_s11 + $0x46a0] ss:$8 sps:$4 sm:$0xff]  }
 0x90d   : > { %19980 = vmatprep.subr.bf16.mxu1 %v27511_v27  ;;  %v27579_v27 = vld [vmem:[%s28457_s11 + $0x47a0] ss:$8 sps:$4 sm:$0xff]  }
 0x90f   : > { %19940 = vmatpush1.bf16.msra.mxu0 %v27506_v29  ;;  %v27584_v29 = vld [vmem:[%s28457_s11 + $0x46b4] ss:$8 sps:$4 sm:$0xff]  }
 0x910   : > { %19981 = vmatpush1.bf16.msra.mxu1 %v27509_v10  ;;  %19991 = vmatprep.subr.bf16.mxu0 %v27518_v7  ;;  %v27587_v10 = vld [vmem:[%s28457_s11 + $0x47b4] ss:$8 sps:$4 sm:$0xff]   ;;  %v27582_v7 = vld [vmem:[%s28457_s11 + $0x46b0] ss:$8 sps:$4 sm:$0xff]  }
 0x911   : > { %20032 = vmatprep.subr.bf16.mxu1 %v27521_v34  ;;  %v27585_v34 = vld [vmem:[%s28457_s11 + $0x47b0] ss:$8 sps:$4 sm:$0xff]  }
 0x912   : > { %19942 = vmatmul.mubr.bf16.vlgmr.msra.gmra.mrb[136].mxu0 %v21082_v4  ;;  %v27590_v4 = vld [vmem:[%s28457_s11 + $0x46c4] ss:$8 sps:$4 sm:$0xff]  }
 0x913   : > { %19983 = vmatmul.mubr.bf16.vlgmr.msra.gmra.mrb[136].mxu1 %v21084_v53  ;;  %19992 = vmatpush1.bf16.msra.mxu0 %v27516_v14  ;;  %v27593_v53 = vld [vmem:[%s28457_s11 + $0x47c4] ss:$8 sps:$4 sm:$0xff]   ;;  %v27588_v14 = vld [vmem:[%s28457_s11 + $0x46c0] ss:$8 sps:$4 sm:$0xff]  }
 0x914   : > { %20033 = vmatpush1.bf16.msra.mxu1 %v27519_v16  ;;  %19993 = vmatprep.subr.bf16.mxu0 %v27524_v37  ;;  %v27591_v16 = vld [vmem:[%s28457_s11 + $0x47c0] ss:$8 sps:$4 sm:$0xff]   ;;  %v27596_v37 = vld [vmem:[%s28457_s11 + $0x46d4] ss:$8 sps:$4 sm:$0xff]  }
 0x915   : > { %20034 = vmatprep.subr.bf16.mxu1 %v27527_v17  ;;  %20023 = vmatprep.mubr.bf16.mxu0 %v21087_v40  ;;  %v27599_v17 = vld [vmem:[%s28457_s11 + $0x47d4] ss:$8 sps:$4 sm:$0xff]   ;;  %v27594_v40 = vld [vmem:[%s28457_s11 + $0x46d0] ss:$8 sps:$4 sm:$0xff]  }
 0x916   : > { %20064 = vmatprep.mubr.bf16.mxu1 %v21089_v31  ;;  %v27597_v31 = vld [vmem:[%s28457_s11 + $0x47d0] ss:$8 sps:$4 sm:$0xff]  }
 0x917   : > { %19994 = vmatpush1.bf16.msra.mxu0 %v27522_v41  ;;  %v27602_v41 = vld [vmem:[%s28457_s11 + $0x46e4] ss:$8 sps:$4 sm:$0xff]  }
 0x918   : > { %20035 = vmatpush1.bf16.msra.mxu1 %v27525_v22  ;;  %19995 = vmatprep.subr.bf16.mxu0 %v27530_v20  ;;  %v27605_v22 = vld [vmem:[%s28457_s11 + $0x47e4] ss:$8 sps:$4 sm:$0xff]   ;;  %v27600_v20 = vld [vmem:[%s28457_s11 + $0x46e0] ss:$8 sps:$4 sm:$0xff]  }
 0x919   : > { %20036 = vmatprep.subr.bf16.mxu1 %v27533_v44  ;;  %v27603_v44 = vld [vmem:[%s28457_s11 + $0x47e0] ss:$8 sps:$4 sm:$0xff]  }
 0x91b   : > { %19996 = vmatpush1.bf16.msra.mxu0 %v27528_v23  ;;  %v27608_v23 = vld [vmem:[%s28457_s11 + $0x46f4] ss:$8 sps:$4 sm:$0xff]  }
 0x91c   : > { %20037 = vmatpush1.bf16.msra.mxu1 %v27531_v45  ;;  %19997 = vmatprep.subr.bf16.mxu0 %v27536_v47  ;;  %v27611_v45 = vld [vmem:[%s28457_s11 + $0x47f4] ss:$8 sps:$4 sm:$0xff]   ;;  %v27606_v47 = vld [vmem:[%s28457_s11 + $0x46f0] ss:$8 sps:$4 sm:$0xff]  }
 0x91d   : > { %20038 = vmatprep.subr.bf16.mxu1 %v27539_v30  ;;  %v27609_v30 = vld [vmem:[%s28457_s11 + $0x47f0] ss:$8 sps:$4 sm:$0xff]  }
 0x91f   : > { %19998 = vmatpush1.bf16.msra.mxu0 %v27534_v28  ;;  %v27618_v28 = vld [vmem:[%s28457_s11 + $0x4804] ss:$8 sps:$4 sm:$0xff]  }
 0x920   : > { %20039 = vmatpush1.bf16.msra.mxu1 %v27537_v50  ;;  %19999 = vmatprep.subr.bf16.mxu0 %v27542_v33  ;;  %v27621_v50 = vld [vmem:[%s28457_s11 + $0x4904] ss:$8 sps:$4 sm:$0xff]   ;;  %v21086_v33 = vcombine.low %v31393_v57, %v31393_v57 }
 0x921   : > { %20040 = vmatprep.subr.bf16.mxu1 %v27545_v9  ;;  %v21088_v9 = vcombine.low %v31396_v13, %v31396_v13 }
 0x923   : > { %20000 = vmatpush1.bf16.msra.mxu0 %v27540_v36  ;;  %v31477_v36 = vld [vmem:[%s28474_s27 + $0x240] sm:$0xff] }
 0x924   : > { %20041 = vmatpush1.bf16.msra.mxu1 %v27543_v26  ;;  %20001 = vmatprep.subr.bf16.mxu0 %v27548_v35  ;;  %v31480_v26 = vld [vmem:[%s28474_s27 + $0x248] sm:$0xff]  ;;  %v27616_v35 = vld [vmem:[%s28457_s11 + $0x4800] ss:$8 sps:$4 sm:$0xff]   ;;  %v21091_v57 = vcombine.high %v31477_v36, %v31477_v36 }
 0x925   : > { %20042 = vmatprep.subr.bf16.mxu1 %v27551_v38  ;;  %v19697_v32 = vpop.f32.mrb[124].mxu0  ;;  %v27619_v38 = vld [vmem:[%s28457_s11 + $0x4900] ss:$8 sps:$4 sm:$0xff]   ;;  %v21093_v13 = vcombine.high %v31480_v26, %v31480_v26 }
 0x926   : > { %v19738_v62 = vpop.f32.mrb[124].mxu1  ;;  %v19698_v43 = vadd.f32 %v19697_v32, %v31346_v52  ;;  %v19699_v63 = vpop.f32.mrb[125].mxu0  ;;  %v27560_v52 = vld [vmem:[%s28457_s11 + $0x4674] ss:$8 sps:$4 sm:$0xff]   ;;  %v27630_v32 = vld [vmem:[%s28457_s11 + $0x4824] ss:$8 sps:$4 sm:$0xff]  }
 0x927   : > { %v19740_v2 = vpop.f32.mrb[125].mxu1  ;;  %v19700_v48 = vadd.f32 %v19699_v63, %v31350_v56  ;;  %v19701_v46 = vpop.f32.mrb[126].mxu0  ;;  %20002 = vmatpush1.bf16.msra.mxu0 %v27546_v55  ;;  %v27563_v56 = vld [vmem:[%s28457_s11 + $0x4774] ss:$8 sps:$4 sm:$0xff]   ;;  %v27631_v63 = vld [vmem:[%s28457_s11 + $0x4920] ss:$8 sps:$4 sm:$0xff]  }
 0x928   : > { %v19742_v6 = vpop.f32.mrb[126].mxu1  ;;  %20043 = vmatpush1.bf16.msra.mxu1 %v27549_v39  ;;  %v31430_v8 = vadd.f32 %v19738_v62, %v19698_v43  ;;  %v19702_v54 = vpop.f32.mrb[127].mxu0  ;;  %20003 = vmatprep.subr.bf16.mxu0 %v27554_v59  ;;  %v27624_v55 = vld [vmem:[%s28457_s11 + $0x4814] ss:$8 sps:$4 sm:$0xff]   ;;  %v27622_v59 = vld [vmem:[%s28457_s11 + $0x4810] ss:$8 sps:$4 sm:$0xff]  }
 0x929   : > { %v19743_v51 = vpop.f32.mrb[127].mxu1  ;;  %20044 = vmatprep.subr.bf16.mxu1 %v27557_v42  ;;  %v31434_v12 = vadd.f32 %v19740_v2, %v19700_v48  ;;  %v27627_v39 = vld [vmem:[%s28457_s11 + $0x4914] ss:$8 sps:$4 sm:$0xff]   ;;  %v27625_v42 = vld [vmem:[%s28457_s11 + $0x4910] ss:$8 sps:$4 sm:$0xff]  }
 0x92a   : > { %v27633_v62 = vld [vmem:[%s28457_s11 + $0x4924] ss:$8 sps:$4 sm:$0xff]   ;;  %v27628_v43 = vld [vmem:[%s28457_s11 + $0x4820] ss:$8 sps:$4 sm:$0xff]   ;;  %v27636_v2 = vld [vmem:[%s28457_s11 + $0x4834] ss:$8 sps:$4 sm:$0xff]  }
 0x92b   : > { %20004 = vmatpush1.bf16.msra.mxu0 %v27552_v49  ;;  %v27639_v48 = vld [vmem:[%s28457_s11 + $0x4934] ss:$8 sps:$4 sm:$0xff]   ;;  %v27634_v46 = vld [vmem:[%s28457_s11 + $0x4830] ss:$8 sps:$4 sm:$0xff]   ;;  %v27642_v49 = vld [vmem:[%s28457_s11 + $0x4844] ss:$8 sps:$4 sm:$0xff]  }
 0x92c   : > { %20045 = vmatpush1.bf16.msra.mxu1 %v27555_v1  ;;  %20005 = vmatprep.subr.bf16.mxu0 %v27560_v52  ;;  %v27637_v6 = vld [vmem:[%s28457_s11 + $0x4930] ss:$8 sps:$4 sm:$0xff]   ;;  %v27645_v1 = vld [vmem:[%s28457_s11 + $0x4944] ss:$8 sps:$4 sm:$0xff]   ;;  %v27640_v54 = vld [vmem:[%s28457_s11 + $0x4840] ss:$8 sps:$4 sm:$0xff]  }
 0x92d   : > { %20046 = vmatprep.subr.bf16.mxu1 %v27563_v56  ;;  %v27643_v51 = vld [vmem:[%s28457_s11 + $0x4940] ss:$8 sps:$4 sm:$0xff]   ;;  %v27648_v52 = vld [vmem:[%s28457_s11 + $0x4854] ss:$8 sps:$4 sm:$0xff]  }
 0x92e   : > { %v27651_v56 = vld [vmem:[%s28457_s11 + $0x4954] ss:$8 sps:$4 sm:$0xff]  }
 0x92f   : > { %20006 = vmatpush1.bf16.msra.mxu0 %v27558_v11  ;;  %v27646_v11 = vld [vmem:[%s28457_s11 + $0x4850] ss:$8 sps:$4 sm:$0xff]  }
 0x930   : > { %20047 = vmatpush1.bf16.msra.mxu1 %v27561_v25  ;;  %20007 = vmatprep.subr.bf16.mxu0 %v27566_v58  ;;  %v27649_v25 = vld [vmem:[%s28457_s11 + $0x4950] ss:$8 sps:$4 sm:$0xff]   ;;  %v27654_v58 = vld [vmem:[%s28457_s11 + $0x4864] ss:$8 sps:$4 sm:$0xff]  }
 0x931   : > { %20048 = vmatprep.subr.bf16.mxu1 %v27569_v60  ;;  %v27657_v60 = vld [vmem:[%s28457_s11 + $0x4964] ss:$8 sps:$4 sm:$0xff]  }
 0x933   : > { %20008 = vmatpush1.bf16.msra.mxu0 %v27564_v15 }
 0x934   : > { %20049 = vmatpush1.bf16.msra.mxu1 %v27567_v61  ;;  %20009 = vmatprep.subr.bf16.mxu0 %v27572_v18 }
 0x935   : > { %20050 = vmatprep.subr.bf16.mxu1 %v27575_v19 }
 0x937   : > { %20010 = vmatpush1.bf16.msra.mxu0 %v27570_v21 }
 0x938   : > { %20051 = vmatpush1.bf16.msra.mxu1 %v27573_v3  ;;  %20011 = vmatprep.subr.bf16.mxu0 %v27578_v0 }
 0x939   : > { %20052 = vmatprep.subr.bf16.mxu1 %v27581_v24 }
 0x93b   : > { %20012 = vmatpush1.bf16.msra.mxu0 %v27576_v5  ;;  %v27652_v5 = vld [vmem:[%s28457_s11 + $0x4860] ss:$8 sps:$4 sm:$0xff]  }
 0x93c   : > { %20053 = vmatpush1.bf16.msra.mxu1 %v27579_v27  ;;  %20013 = vmatprep.subr.bf16.mxu0 %v27584_v29  ;;  %v27655_v27 = vld [vmem:[%s28457_s11 + $0x4960] ss:$8 sps:$4 sm:$0xff]  }
 0x93d   : > { %20054 = vmatprep.subr.bf16.mxu1 %v27587_v10 }
 0x93f   : > { %20014 = vmatpush1.bf16.msra.mxu0 %v27582_v7 }
 0x940   : > { %20055 = vmatpush1.bf16.msra.mxu1 %v27585_v34  ;;  %20015 = vmatprep.subr.bf16.mxu0 %v27590_v4  ;;  %v27658_v4 = vld [vmem:[%s28457_s11 + $0x4870] ss:$8 sps:$4 sm:$0xff]  }
 0x941   : > { %20056 = vmatprep.subr.bf16.mxu1 %v27593_v53  ;;  %v27661_v53 = vld [vmem:[%s28457_s11 + $0x4970] ss:$8 sps:$4 sm:$0xff]  }
 0x943   : > { %20016 = vmatpush1.bf16.msra.mxu0 %v27588_v14  ;;  %v27666_v14 = vld [vmem:[%s28457_s11 + $0x4884] ss:$8 sps:$4 sm:$0xff]  }
 0x944   : > { %20057 = vmatpush1.bf16.msra.mxu1 %v27591_v16  ;;  %20017 = vmatprep.subr.bf16.mxu0 %v27596_v37  ;;  %v27669_v16 = vld [vmem:[%s28457_s11 + $0x4984] ss:$8 sps:$4 sm:$0xff]   ;;  %v27664_v37 = vld [vmem:[%s28457_s11 + $0x4880] ss:$8 sps:$4 sm:$0xff]  }
 0x945   : > { %20058 = vmatprep.subr.bf16.mxu1 %v27599_v17  ;;  %v27667_v17 = vld [vmem:[%s28457_s11 + $0x4980] ss:$8 sps:$4 sm:$0xff]  }
 0x947   : > { %20018 = vmatpush1.bf16.msra.mxu0 %v27594_v40  ;;  %v27672_v40 = vld [vmem:[%s28457_s11 + $0x4894] ss:$8 sps:$4 sm:$0xff]  }
 0x948   : > { %20059 = vmatpush1.bf16.msra.mxu1 %v27597_v31  ;;  %20019 = vmatprep.subr.bf16.mxu0 %v27602_v41  ;;  %v27675_v31 = vld [vmem:[%s28457_s11 + $0x4994] ss:$8 sps:$4 sm:$0xff]   ;;  %v27670_v41 = vld [vmem:[%s28457_s11 + $0x4890] ss:$8 sps:$4 sm:$0xff]  }
 0x949   : > { %20060 = vmatprep.subr.bf16.mxu1 %v27605_v22  ;;  %v27673_v22 = vld [vmem:[%s28457_s11 + $0x4990] ss:$8 sps:$4 sm:$0xff]  }
 0x94b   : > { %20020 = vmatpush1.bf16.msra.mxu0 %v27600_v20  ;;  %v27678_v20 = vld [vmem:[%s28457_s11 + $0x48a4] ss:$8 sps:$4 sm:$0xff]  }
 0x94c   : > { %20061 = vmatpush1.bf16.msra.mxu1 %v27603_v44  ;;  %20021 = vmatprep.subr.bf16.mxu0 %v27608_v23  ;;  %v27681_v44 = vld [vmem:[%s28457_s11 + $0x49a4] ss:$8 sps:$4 sm:$0xff]   ;;  %v27676_v23 = vld [vmem:[%s28457_s11 + $0x48a0] ss:$8 sps:$4 sm:$0xff]  }
 0x94d   : > { %20062 = vmatprep.subr.bf16.mxu1 %v27611_v45  ;;  %v27679_v45 = vld [vmem:[%s28457_s11 + $0x49a0] ss:$8 sps:$4 sm:$0xff]  }
 0x94f   : > { %20022 = vmatpush1.bf16.msra.mxu0 %v27606_v47  ;;  %v27684_v47 = vld [vmem:[%s28457_s11 + $0x48b4] ss:$8 sps:$4 sm:$0xff]  }
 0x950   : > { %20063 = vmatpush1.bf16.msra.mxu1 %v27609_v30  ;;  %20073 = vmatprep.subr.bf16.mxu0 %v27618_v28  ;;  %v27687_v30 = vld [vmem:[%s28457_s11 + $0x49b4] ss:$8 sps:$4 sm:$0xff]   ;;  %v27682_v28 = vld [vmem:[%s28457_s11 + $0x48b0] ss:$8 sps:$4 sm:$0xff]  }
 0x951   : > { %20114 = vmatprep.subr.bf16.mxu1 %v27621_v50  ;;  %v27685_v50 = vld [vmem:[%s28457_s11 + $0x49b0] ss:$8 sps:$4 sm:$0xff]  }
 0x952   : > { %20024 = vmatmul.mubr.bf16.vlgmr.msra.gmra.mrb[140].mxu0 %v21086_v33  ;;  %v27690_v33 = vld [vmem:[%s28457_s11 + $0x48c4] ss:$8 sps:$4 sm:$0xff]  }
 0x953   : > { %20065 = vmatmul.mubr.bf16.vlgmr.msra.gmra.mrb[140].mxu1 %v21088_v9  ;;  %20074 = vmatpush1.bf16.msra.mxu0 %v27616_v35  ;;  %v27693_v9 = vld [vmem:[%s28457_s11 + $0x49c4] ss:$8 sps:$4 sm:$0xff]   ;;  %v27688_v35 = vld [vmem:[%s28457_s11 + $0x48c0] ss:$8 sps:$4 sm:$0xff]  }
 0x954   : > { %20115 = vmatpush1.bf16.msra.mxu1 %v27619_v38  ;;  %20075 = vmatprep.subr.bf16.mxu0 %v27624_v55  ;;  %v27691_v38 = vld [vmem:[%s28457_s11 + $0x49c0] ss:$8 sps:$4 sm:$0xff]   ;;  %v27696_v55 = vld [vmem:[%s28457_s11 + $0x48d4] ss:$8 sps:$4 sm:$0xff]  }
 0x955   : > { %20116 = vmatprep.subr.bf16.mxu1 %v27627_v39  ;;  %20105 = vmatprep.mubr.bf16.mxu0 %v21091_v57  ;;  %v27699_v39 = vld [vmem:[%s28457_s11 + $0x49d4] ss:$8 sps:$4 sm:$0xff]   ;;  %v27694_v57 = vld [vmem:[%s28457_s11 + $0x48d0] ss:$8 sps:$4 sm:$0xff]  }
 0x956   : > { %20146 = vmatprep.mubr.bf16.mxu1 %v21093_v13  ;;  %v27697_v13 = vld [vmem:[%s28457_s11 + $0x49d0] ss:$8 sps:$4 sm:$0xff]  }
 0x957   : > { %20076 = vmatpush1.bf16.msra.mxu0 %v27622_v59  ;;  %v27702_v59 = vld [vmem:[%s28457_s11 + $0x48e4] ss:$8 sps:$4 sm:$0xff]  }
 0x958   : > { %20117 = vmatpush1.bf16.msra.mxu1 %v27625_v42  ;;  %20077 = vmatprep.subr.bf16.mxu0 %v27630_v32  ;;  %v27705_v42 = vld [vmem:[%s28457_s11 + $0x49e4] ss:$8 sps:$4 sm:$0xff]   ;;  %v27700_v32 = vld [vmem:[%s28457_s11 + $0x48e0] ss:$8 sps:$4 sm:$0xff]  }
 0x959   : > { %20118 = vmatprep.subr.bf16.mxu1 %v27633_v62  ;;  %v27703_v62 = vld [vmem:[%s28457_s11 + $0x49e0] ss:$8 sps:$4 sm:$0xff]  }
 0x95b   : > { %20078 = vmatpush1.bf16.msra.mxu0 %v27628_v43  ;;  %v27708_v43 = vld [vmem:[%s28457_s11 + $0x48f4] ss:$8 sps:$4 sm:$0xff]  }
 0x95c   : > { %20119 = vmatpush1.bf16.msra.mxu1 %v27631_v63  ;;  %20079 = vmatprep.subr.bf16.mxu0 %v27636_v2  ;;  %v27711_v63 = vld [vmem:[%s28457_s11 + $0x49f4] ss:$8 sps:$4 sm:$0xff]   ;;  %v27706_v2 = vld [vmem:[%s28457_s11 + $0x48f0] ss:$8 sps:$4 sm:$0xff]  }
 0x95d   : > { %20120 = vmatprep.subr.bf16.mxu1 %v27639_v48  ;;  %v27709_v48 = vld [vmem:[%s28457_s11 + $0x49f0] ss:$8 sps:$4 sm:$0xff]  }
 0x95f   : > { %20080 = vmatpush1.bf16.msra.mxu0 %v27634_v46  ;;  %v27718_v46 = vld [vmem:[%s28457_s11 + $0x4a04] ss:$8 sps:$4 sm:$0xff]  }
 0x960   : > { %20121 = vmatpush1.bf16.msra.mxu1 %v27637_v6  ;;  %20081 = vmatprep.subr.bf16.mxu0 %v27642_v49  ;;  %v27721_v6 = vld [vmem:[%s28457_s11 + $0x4b04] ss:$8 sps:$4 sm:$0xff]   ;;  %v21090_v49 = vcombine.low %v31477_v36, %v31477_v36 }
 0x961   : > { %20122 = vmatprep.subr.bf16.mxu1 %v27645_v1  ;;  %v21092_v1 = vcombine.low %v31480_v26, %v31480_v26 }
 0x963   : > { %20082 = vmatpush1.bf16.msra.mxu0 %v27640_v54  ;;  %v31561_v54 = vld [vmem:[%s28474_s27 + $0x250] sm:$0xff] }
 0x964   : > { %20123 = vmatpush1.bf16.msra.mxu1 %v27643_v51  ;;  %20083 = vmatprep.subr.bf16.mxu0 %v27648_v52  ;;  %v31564_v51 = vld [vmem:[%s28474_s27 + $0x258] sm:$0xff]  ;;  %v21095_v36 = vcombine.high %v31561_v54, %v31561_v54 }
 0x965   : > { %20124 = vmatprep.subr.bf16.mxu1 %v27651_v56  ;;  %v19779_v15 = vpop.f32.mrb[128].mxu0  ;;  %v27716_v52 = vld [vmem:[%s28457_s11 + $0x4a00] ss:$8 sps:$4 sm:$0xff]   ;;  %v21097_v26 = vcombine.high %v31564_v51, %v31564_v51 }
 0x966   : > { %v19820_v61 = vpop.f32.mrb[128].mxu1  ;;  %v19780_v18 = vadd.f32 %v19779_v15, %v31430_v8  ;;  %v19781_v19 = vpop.f32.mrb[129].mxu0  ;;  %v27660_v8 = vld [vmem:[%s28457_s11 + $0x4874] ss:$8 sps:$4 sm:$0xff]   ;;  %v27719_v56 = vld [vmem:[%s28457_s11 + $0x4b00] ss:$8 sps:$4 sm:$0xff]  }
 0x967   : > { %v19822_v21 = vpop.f32.mrb[129].mxu1  ;;  %v19782_v3 = vadd.f32 %v19781_v19, %v31434_v12  ;;  %v19783_v0 = vpop.f32.mrb[130].mxu0  ;;  %20084 = vmatpush1.bf16.msra.mxu0 %v27646_v11  ;;  %v27663_v12 = vld [vmem:[%s28457_s11 + $0x4974] ss:$8 sps:$4 sm:$0xff]   ;;  %v27730_v15 = vld [vmem:[%s28457_s11 + $0x4a24] ss:$8 sps:$4 sm:$0xff]  }
 0x968   : > { %v19824_v24 = vpop.f32.mrb[130].mxu1  ;;  %20125 = vmatpush1.bf16.msra.mxu1 %v27649_v25  ;;  %v31514_v29 = vadd.f32 %v19820_v61, %v19780_v18  ;;  %v19784_v10 = vpop.f32.mrb[131].mxu0  ;;  %20085 = vmatprep.subr.bf16.mxu0 %v27654_v58  ;;  %v27724_v11 = vld [vmem:[%s28457_s11 + $0x4a14] ss:$8 sps:$4 sm:$0xff]   ;;  %v27722_v58 = vld [vmem:[%s28457_s11 + $0x4a10] ss:$8 sps:$4 sm:$0xff]  }
 0x969   : > { %v19825_v7 = vpop.f32.mrb[131].mxu1  ;;  %20126 = vmatprep.subr.bf16.mxu1 %v27657_v60  ;;  %v31518_v34 = vadd.f32 %v19822_v21, %v19782_v3  ;;  %v27727_v25 = vld [vmem:[%s28457_s11 + $0x4b14] ss:$8 sps:$4 sm:$0xff]   ;;  %v27725_v60 = vld [vmem:[%s28457_s11 + $0x4b10] ss:$8 sps:$4 sm:$0xff]  }
 0x96a   : > { %v27733_v61 = vld [vmem:[%s28457_s11 + $0x4b24] ss:$8 sps:$4 sm:$0xff]   ;;  %v27728_v18 = vld [vmem:[%s28457_s11 + $0x4a20] ss:$8 sps:$4 sm:$0xff]   ;;  %v27736_v21 = vld [vmem:[%s28457_s11 + $0x4a34] ss:$8 sps:$4 sm:$0xff]  }
 0x96b   : > { %20086 = vmatpush1.bf16.msra.mxu0 %v27652_v5  ;;  %v27731_v19 = vld [vmem:[%s28457_s11 + $0x4b20] ss:$8 sps:$4 sm:$0xff]   ;;  %v27739_v3 = vld [vmem:[%s28457_s11 + $0x4b34] ss:$8 sps:$4 sm:$0xff]   ;;  %v27734_v0 = vld [vmem:[%s28457_s11 + $0x4a30] ss:$8 sps:$4 sm:$0xff]  }
 0x96c   : > { %20127 = vmatpush1.bf16.msra.mxu1 %v27655_v27  ;;  %20087 = vmatprep.subr.bf16.mxu0 %v27660_v8  ;;  %v27737_v24 = vld [vmem:[%s28457_s11 + $0x4b30] ss:$8 sps:$4 sm:$0xff]   ;;  %v27742_v5 = vld [vmem:[%s28457_s11 + $0x4a44] ss:$8 sps:$4 sm:$0xff]   ;;  %v27740_v10 = vld [vmem:[%s28457_s11 + $0x4a40] ss:$8 sps:$4 sm:$0xff]  }
 0x96d   : > { %20128 = vmatprep.subr.bf16.mxu1 %v27663_v12  ;;  %v27745_v27 = vld [vmem:[%s28457_s11 + $0x4b44] ss:$8 sps:$4 sm:$0xff]   ;;  %v27743_v7 = vld [vmem:[%s28457_s11 + $0x4b40] ss:$8 sps:$4 sm:$0xff]   ;;  %v27748_v8 = vld [vmem:[%s28457_s11 + $0x4a54] ss:$8 sps:$4 sm:$0xff]  }
 0x96e   : > { %v27751_v12 = vld [vmem:[%s28457_s11 + $0x4b54] ss:$8 sps:$4 sm:$0xff]  }
 0x96f   : > { %20088 = vmatpush1.bf16.msra.mxu0 %v27658_v4  ;;  %v27746_v4 = vld [vmem:[%s28457_s11 + $0x4a50] ss:$8 sps:$4 sm:$0xff]  }
 0x970   : > { %20129 = vmatpush1.bf16.msra.mxu1 %v27661_v53  ;;  %20089 = vmatprep.subr.bf16.mxu0 %v27666_v14  ;;  %v27749_v53 = vld [vmem:[%s28457_s11 + $0x4b50] ss:$8 sps:$4 sm:$0xff]   ;;  %v27754_v14 = vld [vmem:[%s28457_s11 + $0x4a64] ss:$8 sps:$4 sm:$0xff]  }
 0x971   : > { %20130 = vmatprep.subr.bf16.mxu1 %v27669_v16  ;;  %v27757_v16 = vld [vmem:[%s28457_s11 + $0x4b64] ss:$8 sps:$4 sm:$0xff]  }
 0x973   : > { %20090 = vmatpush1.bf16.msra.mxu0 %v27664_v37 }
 0x974   : > { %20131 = vmatpush1.bf16.msra.mxu1 %v27667_v17  ;;  %20091 = vmatprep.subr.bf16.mxu0 %v27672_v40 }
 0x975   : > { %20132 = vmatprep.subr.bf16.mxu1 %v27675_v31 }
 0x977   : > { %20092 = vmatpush1.bf16.msra.mxu0 %v27670_v41 }
 0x978   : > { %20133 = vmatpush1.bf16.msra.mxu1 %v27673_v22  ;;  %20093 = vmatprep.subr.bf16.mxu0 %v27678_v20 }
 0x979   : > { %20134 = vmatprep.subr.bf16.mxu1 %v27681_v44 }
 0x97b   : > { %20094 = vmatpush1.bf16.msra.mxu0 %v27676_v23  ;;  %v27752_v23 = vld [vmem:[%s28457_s11 + $0x4a60] ss:$8 sps:$4 sm:$0xff]  }
 0x97c   : > { %20135 = vmatpush1.bf16.msra.mxu1 %v27679_v45  ;;  %20095 = vmatprep.subr.bf16.mxu0 %v27684_v47  ;;  %v27755_v45 = vld [vmem:[%s28457_s11 + $0x4b60] ss:$8 sps:$4 sm:$0xff]  }
 0x97d   : > { %20136 = vmatprep.subr.bf16.mxu1 %v27687_v30 }
 0x97f   : > { %20096 = vmatpush1.bf16.msra.mxu0 %v27682_v28 }
 0x980   : > { %20137 = vmatpush1.bf16.msra.mxu1 %v27685_v50  ;;  %20097 = vmatprep.subr.bf16.mxu0 %v27690_v33  ;;  %v27758_v33 = vld [vmem:[%s28457_s11 + $0x4a70] ss:$8 sps:$4 sm:$0xff]  }
 0x981   : > { %20138 = vmatprep.subr.bf16.mxu1 %v27693_v9  ;;  %v27761_v9 = vld [vmem:[%s28457_s11 + $0x4b70] ss:$8 sps:$4 sm:$0xff]  }
 0x983   : > { %20098 = vmatpush1.bf16.msra.mxu0 %v27688_v35  ;;  %v27766_v35 = vld [vmem:[%s28457_s11 + $0x4a84] ss:$8 sps:$4 sm:$0xff]  }
 0x984   : > { %20139 = vmatpush1.bf16.msra.mxu1 %v27691_v38  ;;  %20099 = vmatprep.subr.bf16.mxu0 %v27696_v55  ;;  %v27769_v38 = vld [vmem:[%s28457_s11 + $0x4b84] ss:$8 sps:$4 sm:$0xff]   ;;  %v27764_v55 = vld [vmem:[%s28457_s11 + $0x4a80] ss:$8 sps:$4 sm:$0xff]  }
 0x985   : > { %20140 = vmatprep.subr.bf16.mxu1 %v27699_v39  ;;  %v27767_v39 = vld [vmem:[%s28457_s11 + $0x4b80] ss:$8 sps:$4 sm:$0xff]  }
 0x987   : > { %20100 = vmatpush1.bf16.msra.mxu0 %v27694_v57  ;;  %v27772_v57 = vld [vmem:[%s28457_s11 + $0x4a94] ss:$8 sps:$4 sm:$0xff]  }
 0x988   : > { %20141 = vmatpush1.bf16.msra.mxu1 %v27697_v13  ;;  %20101 = vmatprep.subr.bf16.mxu0 %v27702_v59  ;;  %v27775_v13 = vld [vmem:[%s28457_s11 + $0x4b94] ss:$8 sps:$4 sm:$0xff]   ;;  %v27770_v59 = vld [vmem:[%s28457_s11 + $0x4a90] ss:$8 sps:$4 sm:$0xff]  }
 0x989   : > { %20142 = vmatprep.subr.bf16.mxu1 %v27705_v42  ;;  %v27773_v42 = vld [vmem:[%s28457_s11 + $0x4b90] ss:$8 sps:$4 sm:$0xff]  }
 0x98b   : > { %20102 = vmatpush1.bf16.msra.mxu0 %v27700_v32  ;;  %v27778_v32 = vld [vmem:[%s28457_s11 + $0x4aa4] ss:$8 sps:$4 sm:$0xff]  }
 0x98c   : > { %20143 = vmatpush1.bf16.msra.mxu1 %v27703_v62  ;;  %20103 = vmatprep.subr.bf16.mxu0 %v27708_v43  ;;  %v27781_v62 = vld [vmem:[%s28457_s11 + $0x4ba4] ss:$8 sps:$4 sm:$0xff]   ;;  %v27776_v43 = vld [vmem:[%s28457_s11 + $0x4aa0] ss:$8 sps:$4 sm:$0xff]  }
 0x98d   : > { %20144 = vmatprep.subr.bf16.mxu1 %v27711_v63  ;;  %v27779_v63 = vld [vmem:[%s28457_s11 + $0x4ba0] ss:$8 sps:$4 sm:$0xff]  }
 0x98f   : > { %20104 = vmatpush1.bf16.msra.mxu0 %v27706_v2  ;;  %v27784_v2 = vld [vmem:[%s28457_s11 + $0x4ab4] ss:$8 sps:$4 sm:$0xff]  }
 0x990   : > { %20145 = vmatpush1.bf16.msra.mxu1 %v27709_v48  ;;  %20155 = vmatprep.subr.bf16.mxu0 %v27718_v46  ;;  %v27787_v48 = vld [vmem:[%s28457_s11 + $0x4bb4] ss:$8 sps:$4 sm:$0xff]   ;;  %v27782_v46 = vld [vmem:[%s28457_s11 + $0x4ab0] ss:$8 sps:$4 sm:$0xff]  }
 0x991   : > { %20196 = vmatprep.subr.bf16.mxu1 %v27721_v6  ;;  %v27785_v6 = vld [vmem:[%s28457_s11 + $0x4bb0] ss:$8 sps:$4 sm:$0xff]  }
 0x992   : > { %20106 = vmatmul.mubr.bf16.vlgmr.msra.gmra.mrb[144].mxu0 %v21090_v49  ;;  %v27790_v49 = vld [vmem:[%s28457_s11 + $0x4ac4] ss:$8 sps:$4 sm:$0xff]  }
 0x993   : > { %20147 = vmatmul.mubr.bf16.vlgmr.msra.gmra.mrb[144].mxu1 %v21092_v1  ;;  %20156 = vmatpush1.bf16.msra.mxu0 %v27716_v52  ;;  %v27793_v1 = vld [vmem:[%s28457_s11 + $0x4bc4] ss:$8 sps:$4 sm:$0xff]   ;;  %v27788_v52 = vld [vmem:[%s28457_s11 + $0x4ac0] ss:$8 sps:$4 sm:$0xff]  }
 0x994   : > { %20197 = vmatpush1.bf16.msra.mxu1 %v27719_v56  ;;  %20157 = vmatprep.subr.bf16.mxu0 %v27724_v11  ;;  %v27791_v56 = vld [vmem:[%s28457_s11 + $0x4bc0] ss:$8 sps:$4 sm:$0xff]   ;;  %v27796_v11 = vld [vmem:[%s28457_s11 + $0x4ad4] ss:$8 sps:$4 sm:$0xff]  }
 0x995   : > { %20198 = vmatprep.subr.bf16.mxu1 %v27727_v25  ;;  %20187 = vmatprep.mubr.bf16.mxu0 %v21095_v36  ;;  %v27799_v25 = vld [vmem:[%s28457_s11 + $0x4bd4] ss:$8 sps:$4 sm:$0xff]   ;;  %v27794_v36 = vld [vmem:[%s28457_s11 + $0x4ad0] ss:$8 sps:$4 sm:$0xff]  }
 0x996   : > { %20228 = vmatprep.mubr.bf16.mxu1 %v21097_v26  ;;  %v27797_v26 = vld [vmem:[%s28457_s11 + $0x4bd0] ss:$8 sps:$4 sm:$0xff]  }
 0x997   : > { %20158 = vmatpush1.bf16.msra.mxu0 %v27722_v58  ;;  %v27802_v58 = vld [vmem:[%s28457_s11 + $0x4ae4] ss:$8 sps:$4 sm:$0xff]  }
 0x998   : > { %20199 = vmatpush1.bf16.msra.mxu1 %v27725_v60  ;;  %20159 = vmatprep.subr.bf16.mxu0 %v27730_v15  ;;  %v27805_v60 = vld [vmem:[%s28457_s11 + $0x4be4] ss:$8 sps:$4 sm:$0xff]   ;;  %v27800_v15 = vld [vmem:[%s28457_s11 + $0x4ae0] ss:$8 sps:$4 sm:$0xff]  }
 0x999   : > { %20200 = vmatprep.subr.bf16.mxu1 %v27733_v61  ;;  %v27803_v61 = vld [vmem:[%s28457_s11 + $0x4be0] ss:$8 sps:$4 sm:$0xff]  }
 0x99b   : > { %20160 = vmatpush1.bf16.msra.mxu0 %v27728_v18  ;;  %v27808_v18 = vld [vmem:[%s28457_s11 + $0x4af4] ss:$8 sps:$4 sm:$0xff]  }
 0x99c   : > { %20201 = vmatpush1.bf16.msra.mxu1 %v27731_v19  ;;  %20161 = vmatprep.subr.bf16.mxu0 %v27736_v21  ;;  %v27811_v19 = vld [vmem:[%s28457_s11 + $0x4bf4] ss:$8 sps:$4 sm:$0xff]   ;;  %v27806_v21 = vld [vmem:[%s28457_s11 + $0x4af0] ss:$8 sps:$4 sm:$0xff]  }
 0x99d   : > { %20202 = vmatprep.subr.bf16.mxu1 %v27739_v3  ;;  %v27809_v3 = vld [vmem:[%s28457_s11 + $0x4bf0] ss:$8 sps:$4 sm:$0xff]  }
 0x99f   : > { %20162 = vmatpush1.bf16.msra.mxu0 %v27734_v0  ;;  %v27818_v0 = vld [vmem:[%s28457_s11 + $0x4c04] ss:$8 sps:$4 sm:$0xff]  }
 0x9a0   : > { %20203 = vmatpush1.bf16.msra.mxu1 %v27737_v24  ;;  %20163 = vmatprep.subr.bf16.mxu0 %v27742_v5  ;;  %v27821_v24 = vld [vmem:[%s28457_s11 + $0x4d04] ss:$8 sps:$4 sm:$0xff]   ;;  %v21094_v5 = vcombine.low %v31561_v54, %v31561_v54 }
 0x9a1   : > { %20204 = vmatprep.subr.bf16.mxu1 %v27745_v27  ;;  %v21096_v27 = vcombine.low %v31564_v51, %v31564_v51 }
 0x9a3   : > { %20164 = vmatpush1.bf16.msra.mxu0 %v27740_v10  ;;  %v31645_v10 = vld [vmem:[%s28474_s27 + $0x260] sm:$0xff] }
 0x9a4   : > { %20205 = vmatpush1.bf16.msra.mxu1 %v27743_v7  ;;  %20165 = vmatprep.subr.bf16.mxu0 %v27748_v8  ;;  %v31648_v7 = vld [vmem:[%s28474_s27 + $0x268] sm:$0xff]  ;;  %v27816_v8 = vld [vmem:[%s28457_s11 + $0x4c00] ss:$8 sps:$4 sm:$0xff]   ;;  %v21099_v54 = vcombine.high %v31645_v10, %v31645_v10 }
 0x9a5   : > { %20206 = vmatprep.subr.bf16.mxu1 %v27751_v12  ;;  %v19861_v37 = vpop.f32.mrb[132].mxu0  ;;  %v27819_v12 = vld [vmem:[%s28457_s11 + $0x4d00] ss:$8 sps:$4 sm:$0xff]   ;;  %v21101_v51 = vcombine.high %v31648_v7, %v31648_v7 }
 0x9a6   : > { %v19902_v17 = vpop.f32.mrb[132].mxu1  ;;  %v19862_v40 = vadd.f32 %v19861_v37, %v31514_v29  ;;  %v19863_v31 = vpop.f32.mrb[133].mxu0  ;;  %v27760_v29 = vld [vmem:[%s28457_s11 + $0x4a74] ss:$8 sps:$4 sm:$0xff]   ;;  %v27830_v37 = vld [vmem:[%s28457_s11 + $0x4c24] ss:$8 sps:$4 sm:$0xff]  }
 0x9a7   : > { %v19904_v41 = vpop.f32.mrb[133].mxu1  ;;  %v19864_v22 = vadd.f32 %v19863_v31, %v31518_v34  ;;  %v19865_v20 = vpop.f32.mrb[134].mxu0  ;;  %20166 = vmatpush1.bf16.msra.mxu0 %v27746_v4  ;;  %v27763_v34 = vld [vmem:[%s28457_s11 + $0x4b74] ss:$8 sps:$4 sm:$0xff]   ;;  %v27831_v31 = vld [vmem:[%s28457_s11 + $0x4d20] ss:$8 sps:$4 sm:$0xff]  }
 0x9a8   : > { %v19906_v44 = vpop.f32.mrb[134].mxu1  ;;  %20207 = vmatpush1.bf16.msra.mxu1 %v27749_v53  ;;  %v31598_v47 = vadd.f32 %v19902_v17, %v19862_v40  ;;  %v19866_v30 = vpop.f32.mrb[135].mxu0  ;;  %20167 = vmatprep.subr.bf16.mxu0 %v27754_v14  ;;  %v27824_v4 = vld [vmem:[%s28457_s11 + $0x4c14] ss:$8 sps:$4 sm:$0xff]   ;;  %v27822_v14 = vld [vmem:[%s28457_s11 + $0x4c10] ss:$8 sps:$4 sm:$0xff]  }
 0x9a9   : > { %v19907_v28 = vpop.f32.mrb[135].mxu1  ;;  %20208 = vmatprep.subr.bf16.mxu1 %v27757_v16  ;;  %v31602_v50 = vadd.f32 %v19904_v41, %v19864_v22  ;;  %v27827_v53 = vld [vmem:[%s28457_s11 + $0x4d14] ss:$8 sps:$4 sm:$0xff]   ;;  %v27825_v16 = vld [vmem:[%s28457_s11 + $0x4d10] ss:$8 sps:$4 sm:$0xff]  }
 0x9aa   : > { %v27833_v17 = vld [vmem:[%s28457_s11 + $0x4d24] ss:$8 sps:$4 sm:$0xff]   ;;  %v27828_v40 = vld [vmem:[%s28457_s11 + $0x4c20] ss:$8 sps:$4 sm:$0xff]   ;;  %v27836_v41 = vld [vmem:[%s28457_s11 + $0x4c34] ss:$8 sps:$4 sm:$0xff]  }
 0x9ab   : > { %20168 = vmatpush1.bf16.msra.mxu0 %v27752_v23  ;;  %v27839_v22 = vld [vmem:[%s28457_s11 + $0x4d34] ss:$8 sps:$4 sm:$0xff]   ;;  %v27834_v20 = vld [vmem:[%s28457_s11 + $0x4c30] ss:$8 sps:$4 sm:$0xff]   ;;  %v27842_v23 = vld [vmem:[%s28457_s11 + $0x4c44] ss:$8 sps:$4 sm:$0xff]  }
 0x9ac   : > { %20209 = vmatpush1.bf16.msra.mxu1 %v27755_v45  ;;  %20169 = vmatprep.subr.bf16.mxu0 %v27760_v29  ;;  %v27837_v44 = vld [vmem:[%s28457_s11 + $0x4d30] ss:$8 sps:$4 sm:$0xff]   ;;  %v27845_v45 = vld [vmem:[%s28457_s11 + $0x4d44] ss:$8 sps:$4 sm:$0xff]   ;;  %v27840_v30 = vld [vmem:[%s28457_s11 + $0x4c40] ss:$8 sps:$4 sm:$0xff]  }
 0x9ad   : > { %20210 = vmatprep.subr.bf16.mxu1 %v27763_v34  ;;  %v27843_v28 = vld [vmem:[%s28457_s11 + $0x4d40] ss:$8 sps:$4 sm:$0xff]   ;;  %v27848_v29 = vld [vmem:[%s28457_s11 + $0x4c54] ss:$8 sps:$4 sm:$0xff]  }
 0x9ae   : > { %v27851_v34 = vld [vmem:[%s28457_s11 + $0x4d54] ss:$8 sps:$4 sm:$0xff]  }
 0x9af   : > { %20170 = vmatpush1.bf16.msra.mxu0 %v27758_v33  ;;  %v27846_v33 = vld [vmem:[%s28457_s11 + $0x4c50] ss:$8 sps:$4 sm:$0xff]  }
 0x9b0   : > { %20211 = vmatpush1.bf16.msra.mxu1 %v27761_v9  ;;  %20171 = vmatprep.subr.bf16.mxu0 %v27766_v35  ;;  %v27849_v9 = vld [vmem:[%s28457_s11 + $0x4d50] ss:$8 sps:$4 sm:$0xff]   ;;  %v27854_v35 = vld [vmem:[%s28457_s11 + $0x4c64] ss:$8 sps:$4 sm:$0xff]  }
 0x9b1   : > { %20212 = vmatprep.subr.bf16.mxu1 %v27769_v38  ;;  %v27857_v38 = vld [vmem:[%s28457_s11 + $0x4d64] ss:$8 sps:$4 sm:$0xff]  }
 0x9b3   : > { %20172 = vmatpush1.bf16.msra.mxu0 %v27764_v55 }
 0x9b4   : > { %20213 = vmatpush1.bf16.msra.mxu1 %v27767_v39  ;;  %20173 = vmatprep.subr.bf16.mxu0 %v27772_v57 }
 0x9b5   : > { %20214 = vmatprep.subr.bf16.mxu1 %v27775_v13 }
 0x9b7   : > { %20174 = vmatpush1.bf16.msra.mxu0 %v27770_v59 }
 0x9b8   : > { %20215 = vmatpush1.bf16.msra.mxu1 %v27773_v42  ;;  %20175 = vmatprep.subr.bf16.mxu0 %v27778_v32 }
 0x9b9   : > { %20216 = vmatprep.subr.bf16.mxu1 %v27781_v62 }
 0x9bb   : > { %20176 = vmatpush1.bf16.msra.mxu0 %v27776_v43  ;;  %v27852_v43 = vld [vmem:[%s28457_s11 + $0x4c60] ss:$8 sps:$4 sm:$0xff]  }
 0x9bc   : > { %20217 = vmatpush1.bf16.msra.mxu1 %v27779_v63  ;;  %20177 = vmatprep.subr.bf16.mxu0 %v27784_v2  ;;  %v27855_v63 = vld [vmem:[%s28457_s11 + $0x4d60] ss:$8 sps:$4 sm:$0xff]  }
 0x9bd   : > { %20218 = vmatprep.subr.bf16.mxu1 %v27787_v48 }
 0x9bf   : > { %20178 = vmatpush1.bf16.msra.mxu0 %v27782_v46 }
 0x9c0   : > { %20219 = vmatpush1.bf16.msra.mxu1 %v27785_v6  ;;  %20179 = vmatprep.subr.bf16.mxu0 %v27790_v49  ;;  %v27858_v49 = vld [vmem:[%s28457_s11 + $0x4c70] ss:$8 sps:$4 sm:$0xff]  }
 0x9c1   : > { %20220 = vmatprep.subr.bf16.mxu1 %v27793_v1  ;;  %v27861_v1 = vld [vmem:[%s28457_s11 + $0x4d70] ss:$8 sps:$4 sm:$0xff]  }
 0x9c3   : > { %20180 = vmatpush1.bf16.msra.mxu0 %v27788_v52  ;;  %v27866_v52 = vld [vmem:[%s28457_s11 + $0x4c84] ss:$8 sps:$4 sm:$0xff]  }
 0x9c4   : > { %20221 = vmatpush1.bf16.msra.mxu1 %v27791_v56  ;;  %20181 = vmatprep.subr.bf16.mxu0 %v27796_v11  ;;  %v27869_v56 = vld [vmem:[%s28457_s11 + $0x4d84] ss:$8 sps:$4 sm:$0xff]   ;;  %v27864_v11 = vld [vmem:[%s28457_s11 + $0x4c80] ss:$8 sps:$4 sm:$0xff]  }
 0x9c5   : > { %20222 = vmatprep.subr.bf16.mxu1 %v27799_v25  ;;  %v27867_v25 = vld [vmem:[%s28457_s11 + $0x4d80] ss:$8 sps:$4 sm:$0xff]  }
 0x9c7   : > { %20182 = vmatpush1.bf16.msra.mxu0 %v27794_v36  ;;  %v27872_v36 = vld [vmem:[%s28457_s11 + $0x4c94] ss:$8 sps:$4 sm:$0xff]  }
 0x9c8   : > { %20223 = vmatpush1.bf16.msra.mxu1 %v27797_v26  ;;  %20183 = vmatprep.subr.bf16.mxu0 %v27802_v58  ;;  %v27875_v26 = vld [vmem:[%s28457_s11 + $0x4d94] ss:$8 sps:$4 sm:$0xff]   ;;  %v27870_v58 = vld [vmem:[%s28457_s11 + $0x4c90] ss:$8 sps:$4 sm:$0xff]  }
 0x9c9   : > { %20224 = vmatprep.subr.bf16.mxu1 %v27805_v60  ;;  %v27873_v60 = vld [vmem:[%s28457_s11 + $0x4d90] ss:$8 sps:$4 sm:$0xff]  }
 0x9cb   : > { %20184 = vmatpush1.bf16.msra.mxu0 %v27800_v15  ;;  %v27878_v15 = vld [vmem:[%s28457_s11 + $0x4ca4] ss:$8 sps:$4 sm:$0xff]  }
 0x9cc   : > { %20225 = vmatpush1.bf16.msra.mxu1 %v27803_v61  ;;  %20185 = vmatprep.subr.bf16.mxu0 %v27808_v18  ;;  %v27881_v61 = vld [vmem:[%s28457_s11 + $0x4da4] ss:$8 sps:$4 sm:$0xff]   ;;  %v27876_v18 = vld [vmem:[%s28457_s11 + $0x4ca0] ss:$8 sps:$4 sm:$0xff]  }
 0x9cd   : > { %20226 = vmatprep.subr.bf16.mxu1 %v27811_v19  ;;  %v27879_v19 = vld [vmem:[%s28457_s11 + $0x4da0] ss:$8 sps:$4 sm:$0xff]  }
 0x9cf   : > { %20186 = vmatpush1.bf16.msra.mxu0 %v27806_v21  ;;  %v27884_v21 = vld [vmem:[%s28457_s11 + $0x4cb4] ss:$8 sps:$4 sm:$0xff]  }
 0x9d0   : > { %20227 = vmatpush1.bf16.msra.mxu1 %v27809_v3  ;;  %20237 = vmatprep.subr.bf16.mxu0 %v27818_v0  ;;  %v27887_v3 = vld [vmem:[%s28457_s11 + $0x4db4] ss:$8 sps:$4 sm:$0xff]   ;;  %v27882_v0 = vld [vmem:[%s28457_s11 + $0x4cb0] ss:$8 sps:$4 sm:$0xff]  }
 0x9d1   : > { %20278 = vmatprep.subr.bf16.mxu1 %v27821_v24  ;;  %v27885_v24 = vld [vmem:[%s28457_s11 + $0x4db0] ss:$8 sps:$4 sm:$0xff]  }
 0x9d2   : > { %20188 = vmatmul.mubr.bf16.vlgmr.msra.gmra.mrb[148].mxu0 %v21094_v5  ;;  %v27890_v5 = vld [vmem:[%s28457_s11 + $0x4cc4] ss:$8 sps:$4 sm:$0xff]  }
 0x9d3   : > { %20229 = vmatmul.mubr.bf16.vlgmr.msra.gmra.mrb[148].mxu1 %v21096_v27  ;;  %20238 = vmatpush1.bf16.msra.mxu0 %v27816_v8  ;;  %v27893_v27 = vld [vmem:[%s28457_s11 + $0x4dc4] ss:$8 sps:$4 sm:$0xff]   ;;  %v27888_v8 = vld [vmem:[%s28457_s11 + $0x4cc0] ss:$8 sps:$4 sm:$0xff]  }
 0x9d4   : > { %20279 = vmatpush1.bf16.msra.mxu1 %v27819_v12  ;;  %20239 = vmatprep.subr.bf16.mxu0 %v27824_v4  ;;  %v27891_v12 = vld [vmem:[%s28457_s11 + $0x4dc0] ss:$8 sps:$4 sm:$0xff]   ;;  %v27896_v4 = vld [vmem:[%s28457_s11 + $0x4cd4] ss:$8 sps:$4 sm:$0xff]  }
 0x9d5   : > { %20280 = vmatprep.subr.bf16.mxu1 %v27827_v53  ;;  %20269 = vmatprep.mubr.bf16.mxu0 %v21099_v54  ;;  %v27899_v53 = vld [vmem:[%s28457_s11 + $0x4dd4] ss:$8 sps:$4 sm:$0xff]   ;;  %v27894_v54 = vld [vmem:[%s28457_s11 + $0x4cd0] ss:$8 sps:$4 sm:$0xff]  }
 0x9d6   : > { %20310 = vmatprep.mubr.bf16.mxu1 %v21101_v51  ;;  %v27897_v51 = vld [vmem:[%s28457_s11 + $0x4dd0] ss:$8 sps:$4 sm:$0xff]  }
 0x9d7   : > { %20240 = vmatpush1.bf16.msra.mxu0 %v27822_v14  ;;  %v27902_v14 = vld [vmem:[%s28457_s11 + $0x4ce4] ss:$8 sps:$4 sm:$0xff]  }
 0x9d8   : > { %20281 = vmatpush1.bf16.msra.mxu1 %v27825_v16  ;;  %20241 = vmatprep.subr.bf16.mxu0 %v27830_v37  ;;  %v27905_v16 = vld [vmem:[%s28457_s11 + $0x4de4] ss:$8 sps:$4 sm:$0xff]   ;;  %v27900_v37 = vld [vmem:[%s28457_s11 + $0x4ce0] ss:$8 sps:$4 sm:$0xff]  }
 0x9d9   : > { %20282 = vmatprep.subr.bf16.mxu1 %v27833_v17  ;;  %v27903_v17 = vld [vmem:[%s28457_s11 + $0x4de0] ss:$8 sps:$4 sm:$0xff]  }
 0x9db   : > { %20242 = vmatpush1.bf16.msra.mxu0 %v27828_v40  ;;  %v27908_v40 = vld [vmem:[%s28457_s11 + $0x4cf4] ss:$8 sps:$4 sm:$0xff]  }
 0x9dc   : > { %20283 = vmatpush1.bf16.msra.mxu1 %v27831_v31  ;;  %20243 = vmatprep.subr.bf16.mxu0 %v27836_v41  ;;  %v27911_v31 = vld [vmem:[%s28457_s11 + $0x4df4] ss:$8 sps:$4 sm:$0xff]   ;;  %v27906_v41 = vld [vmem:[%s28457_s11 + $0x4cf0] ss:$8 sps:$4 sm:$0xff]  }
 0x9dd   : > { %20284 = vmatprep.subr.bf16.mxu1 %v27839_v22  ;;  %v27909_v22 = vld [vmem:[%s28457_s11 + $0x4df0] ss:$8 sps:$4 sm:$0xff]  }
 0x9df   : > { %20244 = vmatpush1.bf16.msra.mxu0 %v27834_v20  ;;  %v27918_v20 = vld [vmem:[%s28457_s11 + $0x4e04] ss:$8 sps:$4 sm:$0xff]  }
 0x9e0   : > { %20285 = vmatpush1.bf16.msra.mxu1 %v27837_v44  ;;  %20245 = vmatprep.subr.bf16.mxu0 %v27842_v23  ;;  %v27921_v44 = vld [vmem:[%s28457_s11 + $0x4f04] ss:$8 sps:$4 sm:$0xff]   ;;  %v21098_v23 = vcombine.low %v31645_v10, %v31645_v10 }
 0x9e1   : > { %20286 = vmatprep.subr.bf16.mxu1 %v27845_v45  ;;  %v21100_v45 = vcombine.low %v31648_v7, %v31648_v7 }
 0x9e3   : > { %20246 = vmatpush1.bf16.msra.mxu0 %v27840_v30  ;;  %v31729_v30 = vld [vmem:[%s28474_s27 + $0x270] sm:$0xff] }
 0x9e4   : > { %20287 = vmatpush1.bf16.msra.mxu1 %v27843_v28  ;;  %20247 = vmatprep.subr.bf16.mxu0 %v27848_v29  ;;  %v31732_v28 = vld [vmem:[%s28474_s27 + $0x278] sm:$0xff]  ;;  %v21103_v10 = vcombine.high %v31729_v30, %v31729_v30 }
 0x9e5   : > { %20288 = vmatprep.subr.bf16.mxu1 %v27851_v34  ;;  %v19943_v55 = vpop.f32.mrb[136].mxu0  ;;  %v27916_v29 = vld [vmem:[%s28457_s11 + $0x4e00] ss:$8 sps:$4 sm:$0xff]   ;;  %v21105_v7 = vcombine.high %v31732_v28, %v31732_v28 }
 0x9e6   : > { %v19984_v39 = vpop.f32.mrb[136].mxu1  ;;  %v19944_v57 = vadd.f32 %v19943_v55, %v31598_v47  ;;  %v19945_v13 = vpop.f32.mrb[137].mxu0  ;;  %v27860_v47 = vld [vmem:[%s28457_s11 + $0x4c74] ss:$8 sps:$4 sm:$0xff]   ;;  %v27919_v34 = vld [vmem:[%s28457_s11 + $0x4f00] ss:$8 sps:$4 sm:$0xff]  }
 0x9e7   : > { %v19986_v59 = vpop.f32.mrb[137].mxu1  ;;  %v19946_v42 = vadd.f32 %v19945_v13, %v31602_v50  ;;  %v19947_v32 = vpop.f32.mrb[138].mxu0  ;;  %20248 = vmatpush1.bf16.msra.mxu0 %v27846_v33  ;;  %v27863_v50 = vld [vmem:[%s28457_s11 + $0x4d74] ss:$8 sps:$4 sm:$0xff]   ;;  %v27930_v55 = vld [vmem:[%s28457_s11 + $0x4e24] ss:$8 sps:$4 sm:$0xff]  }
 0x9e8   : > { %v19988_v62 = vpop.f32.mrb[138].mxu1  ;;  %20289 = vmatpush1.bf16.msra.mxu1 %v27849_v9  ;;  %v31682_v2 = vadd.f32 %v19984_v39, %v19944_v57  ;;  %v19948_v48 = vpop.f32.mrb[139].mxu0  ;;  %20249 = vmatprep.subr.bf16.mxu0 %v27854_v35  ;;  %v27924_v33 = vld [vmem:[%s28457_s11 + $0x4e14] ss:$8 sps:$4 sm:$0xff]   ;;  %v27922_v35 = vld [vmem:[%s28457_s11 + $0x4e10] ss:$8 sps:$4 sm:$0xff]  }
 0x9e9   : > { %v19989_v46 = vpop.f32.mrb[139].mxu1  ;;  %20290 = vmatprep.subr.bf16.mxu1 %v27857_v38  ;;  %v31686_v6 = vadd.f32 %v19986_v59, %v19946_v42  ;;  %v27927_v9 = vld [vmem:[%s28457_s11 + $0x4f14] ss:$8 sps:$4 sm:$0xff]   ;;  %v27925_v38 = vld [vmem:[%s28457_s11 + $0x4f10] ss:$8 sps:$4 sm:$0xff]  }
 0x9ea   : > { %v27933_v39 = vld [vmem:[%s28457_s11 + $0x4f24] ss:$8 sps:$4 sm:$0xff]   ;;  %v27928_v57 = vld [vmem:[%s28457_s11 + $0x4e20] ss:$8 sps:$4 sm:$0xff]   ;;  %v27936_v59 = vld [vmem:[%s28457_s11 + $0x4e34] ss:$8 sps:$4 sm:$0xff]  }
 0x9eb   : > { %20250 = vmatpush1.bf16.msra.mxu0 %v27852_v43  ;;  %v27931_v13 = vld [vmem:[%s28457_s11 + $0x4f20] ss:$8 sps:$4 sm:$0xff]   ;;  %v27939_v42 = vld [vmem:[%s28457_s11 + $0x4f34] ss:$8 sps:$4 sm:$0xff]   ;;  %v27934_v32 = vld [vmem:[%s28457_s11 + $0x4e30] ss:$8 sps:$4 sm:$0xff]  }
 0x9ec   : > { %20291 = vmatpush1.bf16.msra.mxu1 %v27855_v63  ;;  %20251 = vmatprep.subr.bf16.mxu0 %v27860_v47  ;;  %v27937_v62 = vld [vmem:[%s28457_s11 + $0x4f30] ss:$8 sps:$4 sm:$0xff]   ;;  %v27942_v43 = vld [vmem:[%s28457_s11 + $0x4e44] ss:$8 sps:$4 sm:$0xff]   ;;  %v27940_v48 = vld [vmem:[%s28457_s11 + $0x4e40] ss:$8 sps:$4 sm:$0xff]  }
 0x9ed   : > { %20292 = vmatprep.subr.bf16.mxu1 %v27863_v50  ;;  %v27945_v63 = vld [vmem:[%s28457_s11 + $0x4f44] ss:$8 sps:$4 sm:$0xff]   ;;  %v27943_v46 = vld [vmem:[%s28457_s11 + $0x4f40] ss:$8 sps:$4 sm:$0xff]   ;;  %v27948_v47 = vld [vmem:[%s28457_s11 + $0x4e54] ss:$8 sps:$4 sm:$0xff]  }
 0x9ee   : > { %v27951_v50 = vld [vmem:[%s28457_s11 + $0x4f54] ss:$8 sps:$4 sm:$0xff]  }
 0x9ef   : > { %20252 = vmatpush1.bf16.msra.mxu0 %v27858_v49  ;;  %v27946_v49 = vld [vmem:[%s28457_s11 + $0x4e50] ss:$8 sps:$4 sm:$0xff]  }
 0x9f0   : > { %20293 = vmatpush1.bf16.msra.mxu1 %v27861_v1  ;;  %20253 = vmatprep.subr.bf16.mxu0 %v27866_v52  ;;  %v27949_v1 = vld [vmem:[%s28457_s11 + $0x4f50] ss:$8 sps:$4 sm:$0xff]   ;;  %v27954_v52 = vld [vmem:[%s28457_s11 + $0x4e64] ss:$8 sps:$4 sm:$0xff]  }
 0x9f1   : > { %20294 = vmatprep.subr.bf16.mxu1 %v27869_v56  ;;  %v27957_v56 = vld [vmem:[%s28457_s11 + $0x4f64] ss:$8 sps:$4 sm:$0xff]  }
 0x9f3   : > { %20254 = vmatpush1.bf16.msra.mxu0 %v27864_v11 }
 0x9f4   : > { %20295 = vmatpush1.bf16.msra.mxu1 %v27867_v25  ;;  %20255 = vmatprep.subr.bf16.mxu0 %v27872_v36 }
 0x9f5   : > { %20296 = vmatprep.subr.bf16.mxu1 %v27875_v26 }
 0x9f7   : > { %20256 = vmatpush1.bf16.msra.mxu0 %v27870_v58 }
 0x9f8   : > { %20297 = vmatpush1.bf16.msra.mxu1 %v27873_v60  ;;  %20257 = vmatprep.subr.bf16.mxu0 %v27878_v15 }
 0x9f9   : > { %20298 = vmatprep.subr.bf16.mxu1 %v27881_v61 }
 0x9fb   : > { %20258 = vmatpush1.bf16.msra.mxu0 %v27876_v18  ;;  %v27952_v18 = vld [vmem:[%s28457_s11 + $0x4e60] ss:$8 sps:$4 sm:$0xff]  }
 0x9fc   : > { %20299 = vmatpush1.bf16.msra.mxu1 %v27879_v19  ;;  %20259 = vmatprep.subr.bf16.mxu0 %v27884_v21  ;;  %v27955_v19 = vld [vmem:[%s28457_s11 + $0x4f60] ss:$8 sps:$4 sm:$0xff]  }
 0x9fd   : > { %20300 = vmatprep.subr.bf16.mxu1 %v27887_v3 }
 0x9ff   : > { %20260 = vmatpush1.bf16.msra.mxu0 %v27882_v0 }
 0xa00   : > { %20301 = vmatpush1.bf16.msra.mxu1 %v27885_v24  ;;  %20261 = vmatprep.subr.bf16.mxu0 %v27890_v5  ;;  %v27958_v5 = vld [vmem:[%s28457_s11 + $0x4e70] ss:$8 sps:$4 sm:$0xff]  }
 0xa01   : > { %20302 = vmatprep.subr.bf16.mxu1 %v27893_v27  ;;  %v27961_v27 = vld [vmem:[%s28457_s11 + $0x4f70] ss:$8 sps:$4 sm:$0xff]  }
 0xa03   : > { %20262 = vmatpush1.bf16.msra.mxu0 %v27888_v8  ;;  %v27966_v8 = vld [vmem:[%s28457_s11 + $0x4e84] ss:$8 sps:$4 sm:$0xff]  }
 0xa04   : > { %20303 = vmatpush1.bf16.msra.mxu1 %v27891_v12  ;;  %20263 = vmatprep.subr.bf16.mxu0 %v27896_v4  ;;  %v27969_v12 = vld [vmem:[%s28457_s11 + $0x4f84] ss:$8 sps:$4 sm:$0xff]   ;;  %v27964_v4 = vld [vmem:[%s28457_s11 + $0x4e80] ss:$8 sps:$4 sm:$0xff]  }
 0xa05   : > { %20304 = vmatprep.subr.bf16.mxu1 %v27899_v53  ;;  %v27967_v53 = vld [vmem:[%s28457_s11 + $0x4f80] ss:$8 sps:$4 sm:$0xff]  }
 0xa07   : > { %20264 = vmatpush1.bf16.msra.mxu0 %v27894_v54  ;;  %v27972_v54 = vld [vmem:[%s28457_s11 + $0x4e94] ss:$8 sps:$4 sm:$0xff]  }
 0xa08   : > { %20305 = vmatpush1.bf16.msra.mxu1 %v27897_v51  ;;  %20265 = vmatprep.subr.bf16.mxu0 %v27902_v14  ;;  %v27975_v51 = vld [vmem:[%s28457_s11 + $0x4f94] ss:$8 sps:$4 sm:$0xff]   ;;  %v27970_v14 = vld [vmem:[%s28457_s11 + $0x4e90] ss:$8 sps:$4 sm:$0xff]  }
 0xa09   : > { %20306 = vmatprep.subr.bf16.mxu1 %v27905_v16  ;;  %v27973_v16 = vld [vmem:[%s28457_s11 + $0x4f90] ss:$8 sps:$4 sm:$0xff]  }
 0xa0b   : > { %20266 = vmatpush1.bf16.msra.mxu0 %v27900_v37  ;;  %v27978_v37 = vld [vmem:[%s28457_s11 + $0x4ea4] ss:$8 sps:$4 sm:$0xff]  }
 0xa0c   : > { %20307 = vmatpush1.bf16.msra.mxu1 %v27903_v17  ;;  %20267 = vmatprep.subr.bf16.mxu0 %v27908_v40  ;;  %v27981_v17 = vld [vmem:[%s28457_s11 + $0x4fa4] ss:$8 sps:$4 sm:$0xff]   ;;  %v27976_v40 = vld [vmem:[%s28457_s11 + $0x4ea0] ss:$8 sps:$4 sm:$0xff]  }
 0xa0d   : > { %20308 = vmatprep.subr.bf16.mxu1 %v27911_v31  ;;  %v27979_v31 = vld [vmem:[%s28457_s11 + $0x4fa0] ss:$8 sps:$4 sm:$0xff]  }
 0xa0f   : > { %20268 = vmatpush1.bf16.msra.mxu0 %v27906_v41  ;;  %v27984_v41 = vld [vmem:[%s28457_s11 + $0x4eb4] ss:$8 sps:$4 sm:$0xff]  }
 0xa10   : > { %20309 = vmatpush1.bf16.msra.mxu1 %v27909_v22  ;;  %20319 = vmatprep.subr.bf16.mxu0 %v27918_v20  ;;  %v27987_v22 = vld [vmem:[%s28457_s11 + $0x4fb4] ss:$8 sps:$4 sm:$0xff]   ;;  %v27982_v20 = vld [vmem:[%s28457_s11 + $0x4eb0] ss:$8 sps:$4 sm:$0xff]  }
 0xa11   : > { %20360 = vmatprep.subr.bf16.mxu1 %v27921_v44  ;;  %v27985_v44 = vld [vmem:[%s28457_s11 + $0x4fb0] ss:$8 sps:$4 sm:$0xff]  }
 0xa12   : > { %20270 = vmatmul.mubr.bf16.vlgmr.msra.gmra.mrb[152].mxu0 %v21098_v23  ;;  %v27990_v23 = vld [vmem:[%s28457_s11 + $0x4ec4] ss:$8 sps:$4 sm:$0xff]  }
 0xa13   : > { %20311 = vmatmul.mubr.bf16.vlgmr.msra.gmra.mrb[152].mxu1 %v21100_v45  ;;  %20320 = vmatpush1.bf16.msra.mxu0 %v27916_v29  ;;  %v27993_v45 = vld [vmem:[%s28457_s11 + $0x4fc4] ss:$8 sps:$4 sm:$0xff]   ;;  %v27988_v29 = vld [vmem:[%s28457_s11 + $0x4ec0] ss:$8 sps:$4 sm:$0xff]  }
 0xa14   : > { %20361 = vmatpush1.bf16.msra.mxu1 %v27919_v34  ;;  %20321 = vmatprep.subr.bf16.mxu0 %v27924_v33  ;;  %v27991_v34 = vld [vmem:[%s28457_s11 + $0x4fc0] ss:$8 sps:$4 sm:$0xff]   ;;  %v27996_v33 = vld [vmem:[%s28457_s11 + $0x4ed4] ss:$8 sps:$4 sm:$0xff]  }
 0xa15   : > { %20362 = vmatprep.subr.bf16.mxu1 %v27927_v9  ;;  %20351 = vmatprep.mubr.bf16.mxu0 %v21103_v10  ;;  %v27999_v9 = vld [vmem:[%s28457_s11 + $0x4fd4] ss:$8 sps:$4 sm:$0xff]   ;;  %v27994_v10 = vld [vmem:[%s28457_s11 + $0x4ed0] ss:$8 sps:$4 sm:$0xff]  }
 0xa16   : > { %20392 = vmatprep.mubr.bf16.mxu1 %v21105_v7  ;;  %v27997_v7 = vld [vmem:[%s28457_s11 + $0x4fd0] ss:$8 sps:$4 sm:$0xff]  }
 0xa17   : > { %20322 = vmatpush1.bf16.msra.mxu0 %v27922_v35  ;;  %v28002_v35 = vld [vmem:[%s28457_s11 + $0x4ee4] ss:$8 sps:$4 sm:$0xff]  }
 0xa18   : > { %20363 = vmatpush1.bf16.msra.mxu1 %v27925_v38  ;;  %20323 = vmatprep.subr.bf16.mxu0 %v27930_v55  ;;  %v28005_v38 = vld [vmem:[%s28457_s11 + $0x4fe4] ss:$8 sps:$4 sm:$0xff]   ;;  %v28000_v55 = vld [vmem:[%s28457_s11 + $0x4ee0] ss:$8 sps:$4 sm:$0xff]  }
 0xa19   : > { %20364 = vmatprep.subr.bf16.mxu1 %v27933_v39  ;;  %v28003_v39 = vld [vmem:[%s28457_s11 + $0x4fe0] ss:$8 sps:$4 sm:$0xff]  }
 0xa1b   : > { %20324 = vmatpush1.bf16.msra.mxu0 %v27928_v57  ;;  %v28008_v57 = vld [vmem:[%s28457_s11 + $0x4ef4] ss:$8 sps:$4 sm:$0xff]  }
 0xa1c   : > { %20365 = vmatpush1.bf16.msra.mxu1 %v27931_v13  ;;  %20325 = vmatprep.subr.bf16.mxu0 %v27936_v59  ;;  %v28011_v13 = vld [vmem:[%s28457_s11 + $0x4ff4] ss:$8 sps:$4 sm:$0xff]   ;;  %v28006_v59 = vld [vmem:[%s28457_s11 + $0x4ef0] ss:$8 sps:$4 sm:$0xff]  }
 0xa1d   : > { %20366 = vmatprep.subr.bf16.mxu1 %v27939_v42  ;;  %v28009_v42 = vld [vmem:[%s28457_s11 + $0x4ff0] ss:$8 sps:$4 sm:$0xff]  }
 0xa1f   : > { %20326 = vmatpush1.bf16.msra.mxu0 %v27934_v32  ;;  %v28018_v32 = vld [vmem:[%s28457_s11 + $0x5004] ss:$8 sps:$4 sm:$0xff]  }
 0xa20   : > { %20367 = vmatpush1.bf16.msra.mxu1 %v27937_v62  ;;  %20327 = vmatprep.subr.bf16.mxu0 %v27942_v43  ;;  %v28021_v62 = vld [vmem:[%s28457_s11 + $0x5104] ss:$8 sps:$4 sm:$0xff]   ;;  %v21102_v43 = vcombine.low %v31729_v30, %v31729_v30 }
 0xa21   : > { %20368 = vmatprep.subr.bf16.mxu1 %v27945_v63  ;;  %v21104_v63 = vcombine.low %v31732_v28, %v31732_v28 }
 0xa23   : > { %20328 = vmatpush1.bf16.msra.mxu0 %v27940_v48  ;;  %v31813_v48 = vld [vmem:[%s28474_s27 + $0x280] sm:$0xff] }
 0xa24   : > { %20369 = vmatpush1.bf16.msra.mxu1 %v27943_v46  ;;  %20329 = vmatprep.subr.bf16.mxu0 %v27948_v47  ;;  %v31816_v46 = vld [vmem:[%s28474_s27 + $0x288] sm:$0xff]  ;;  %v28016_v47 = vld [vmem:[%s28457_s11 + $0x5000] ss:$8 sps:$4 sm:$0xff]   ;;  %v21107_v30 = vcombine.high %v31813_v48, %v31813_v48 }
 0xa25   : > { %20370 = vmatprep.subr.bf16.mxu1 %v27951_v50  ;;  %v20025_v11 = vpop.f32.mrb[140].mxu0  ;;  %v28019_v50 = vld [vmem:[%s28457_s11 + $0x5100] ss:$8 sps:$4 sm:$0xff]   ;;  %v21109_v28 = vcombine.high %v31816_v46, %v31816_v46 }
 0xa26   : > { %v20066_v25 = vpop.f32.mrb[140].mxu1  ;;  %v20026_v36 = vadd.f32 %v20025_v11, %v31682_v2  ;;  %v20027_v26 = vpop.f32.mrb[141].mxu0  ;;  %v27960_v2 = vld [vmem:[%s28457_s11 + $0x4e74] ss:$8 sps:$4 sm:$0xff]   ;;  %v28030_v11 = vld [vmem:[%s28457_s11 + $0x5024] ss:$8 sps:$4 sm:$0xff]  }
 0xa27   : > { %v20068_v58 = vpop.f32.mrb[141].mxu1  ;;  %v20028_v60 = vadd.f32 %v20027_v26, %v31686_v6  ;;  %v20029_v15 = vpop.f32.mrb[142].mxu0  ;;  %20330 = vmatpush1.bf16.msra.mxu0 %v27946_v49  ;;  %v27963_v6 = vld [vmem:[%s28457_s11 + $0x4f74] ss:$8 sps:$4 sm:$0xff]   ;;  %v28031_v26 = vld [vmem:[%s28457_s11 + $0x5120] ss:$8 sps:$4 sm:$0xff]  }
 0xa28   : > { %v20070_v61 = vpop.f32.mrb[142].mxu1  ;;  %20371 = vmatpush1.bf16.msra.mxu1 %v27949_v1  ;;  %v31766_v21 = vadd.f32 %v20066_v25, %v20026_v36  ;;  %v20030_v3 = vpop.f32.mrb[143].mxu0  ;;  %20331 = vmatprep.subr.bf16.mxu0 %v27954_v52  ;;  %v28024_v49 = vld [vmem:[%s28457_s11 + $0x5014] ss:$8 sps:$4 sm:$0xff]   ;;  %v28022_v52 = vld [vmem:[%s28457_s11 + $0x5010] ss:$8 sps:$4 sm:$0xff]  }
 0xa29   : > { %v20071_v0 = vpop.f32.mrb[143].mxu1  ;;  %20372 = vmatprep.subr.bf16.mxu1 %v27957_v56  ;;  %v31770_v24 = vadd.f32 %v20068_v58, %v20028_v60  ;;  %v28027_v1 = vld [vmem:[%s28457_s11 + $0x5114] ss:$8 sps:$4 sm:$0xff]   ;;  %v28025_v56 = vld [vmem:[%s28457_s11 + $0x5110] ss:$8 sps:$4 sm:$0xff]  }
 0xa2a   : > { %v28033_v25 = vld [vmem:[%s28457_s11 + $0x5124] ss:$8 sps:$4 sm:$0xff]   ;;  %v28028_v36 = vld [vmem:[%s28457_s11 + $0x5020] ss:$8 sps:$4 sm:$0xff]   ;;  %v28036_v58 = vld [vmem:[%s28457_s11 + $0x5034] ss:$8 sps:$4 sm:$0xff]  }
 0xa2b   : > { %20332 = vmatpush1.bf16.msra.mxu0 %v27952_v18  ;;  %v28039_v60 = vld [vmem:[%s28457_s11 + $0x5134] ss:$8 sps:$4 sm:$0xff]   ;;  %v28034_v15 = vld [vmem:[%s28457_s11 + $0x5030] ss:$8 sps:$4 sm:$0xff]   ;;  %v28042_v18 = vld [vmem:[%s28457_s11 + $0x5044] ss:$8 sps:$4 sm:$0xff]  }
 0xa2c   : > { %20373 = vmatpush1.bf16.msra.mxu1 %v27955_v19  ;;  %20333 = vmatprep.subr.bf16.mxu0 %v27960_v2  ;;  %v28037_v61 = vld [vmem:[%s28457_s11 + $0x5130] ss:$8 sps:$4 sm:$0xff]   ;;  %v28045_v19 = vld [vmem:[%s28457_s11 + $0x5144] ss:$8 sps:$4 sm:$0xff]   ;;  %v28040_v3 = vld [vmem:[%s28457_s11 + $0x5040] ss:$8 sps:$4 sm:$0xff]  }
 0xa2d   : > { %20374 = vmatprep.subr.bf16.mxu1 %v27963_v6  ;;  %v28043_v0 = vld [vmem:[%s28457_s11 + $0x5140] ss:$8 sps:$4 sm:$0xff]   ;;  %v28048_v2 = vld [vmem:[%s28457_s11 + $0x5054] ss:$8 sps:$4 sm:$0xff]  }
 0xa2e   : > { %v28051_v6 = vld [vmem:[%s28457_s11 + $0x5154] ss:$8 sps:$4 sm:$0xff]  }
 0xa2f   : > { %20334 = vmatpush1.bf16.msra.mxu0 %v27958_v5  ;;  %v28046_v5 = vld [vmem:[%s28457_s11 + $0x5050] ss:$8 sps:$4 sm:$0xff]  }
 0xa30   : > { %20375 = vmatpush1.bf16.msra.mxu1 %v27961_v27  ;;  %20335 = vmatprep.subr.bf16.mxu0 %v27966_v8  ;;  %v28049_v27 = vld [vmem:[%s28457_s11 + $0x5150] ss:$8 sps:$4 sm:$0xff]   ;;  %v28054_v8 = vld [vmem:[%s28457_s11 + $0x5064] ss:$8 sps:$4 sm:$0xff]  }
 0xa31   : > { %20376 = vmatprep.subr.bf16.mxu1 %v27969_v12  ;;  %v28057_v12 = vld [vmem:[%s28457_s11 + $0x5164] ss:$8 sps:$4 sm:$0xff]  }
 0xa33   : > { %20336 = vmatpush1.bf16.msra.mxu0 %v27964_v4 }
 0xa34   : > { %20377 = vmatpush1.bf16.msra.mxu1 %v27967_v53  ;;  %20337 = vmatprep.subr.bf16.mxu0 %v27972_v54 }
 0xa35   : > { %20378 = vmatprep.subr.bf16.mxu1 %v27975_v51 }
 0xa37   : > { %20338 = vmatpush1.bf16.msra.mxu0 %v27970_v14 }
 0xa38   : > { %20379 = vmatpush1.bf16.msra.mxu1 %v27973_v16  ;;  %20339 = vmatprep.subr.bf16.mxu0 %v27978_v37 }
 0xa39   : > { %20380 = vmatprep.subr.bf16.mxu1 %v27981_v17 }
 0xa3b   : > { %20340 = vmatpush1.bf16.msra.mxu0 %v27976_v40  ;;  %v28052_v40 = vld [vmem:[%s28457_s11 + $0x5060] ss:$8 sps:$4 sm:$0xff]  }
 0xa3c   : > { %20381 = vmatpush1.bf16.msra.mxu1 %v27979_v31  ;;  %20341 = vmatprep.subr.bf16.mxu0 %v27984_v41  ;;  %v28055_v31 = vld [vmem:[%s28457_s11 + $0x5160] ss:$8 sps:$4 sm:$0xff]  }
 0xa3d   : > { %20382 = vmatprep.subr.bf16.mxu1 %v27987_v22 }
 0xa3f   : > { %20342 = vmatpush1.bf16.msra.mxu0 %v27982_v20 }
 0xa40   : > { %20383 = vmatpush1.bf16.msra.mxu1 %v27985_v44  ;;  %20343 = vmatprep.subr.bf16.mxu0 %v27990_v23  ;;  %v28058_v23 = vld [vmem:[%s28457_s11 + $0x5070] ss:$8 sps:$4 sm:$0xff]  }
 0xa41   : > { %20384 = vmatprep.subr.bf16.mxu1 %v27993_v45  ;;  %v28061_v45 = vld [vmem:[%s28457_s11 + $0x5170] ss:$8 sps:$4 sm:$0xff]  }
 0xa43   : > { %20344 = vmatpush1.bf16.msra.mxu0 %v27988_v29  ;;  %v28066_v29 = vld [vmem:[%s28457_s11 + $0x5084] ss:$8 sps:$4 sm:$0xff]  }
 0xa44   : > { %20385 = vmatpush1.bf16.msra.mxu1 %v27991_v34  ;;  %20345 = vmatprep.subr.bf16.mxu0 %v27996_v33  ;;  %v28069_v34 = vld [vmem:[%s28457_s11 + $0x5184] ss:$8 sps:$4 sm:$0xff]   ;;  %v28064_v33 = vld [vmem:[%s28457_s11 + $0x5080] ss:$8 sps:$4 sm:$0xff]  }
 0xa45   : > { %20386 = vmatprep.subr.bf16.mxu1 %v27999_v9  ;;  %v28067_v9 = vld [vmem:[%s28457_s11 + $0x5180] ss:$8 sps:$4 sm:$0xff]  }
 0xa47   : > { %20346 = vmatpush1.bf16.msra.mxu0 %v27994_v10  ;;  %v28072_v10 = vld [vmem:[%s28457_s11 + $0x5094] ss:$8 sps:$4 sm:$0xff]  }
 0xa48   : > { %20387 = vmatpush1.bf16.msra.mxu1 %v27997_v7  ;;  %20347 = vmatprep.subr.bf16.mxu0 %v28002_v35  ;;  %v28075_v7 = vld [vmem:[%s28457_s11 + $0x5194] ss:$8 sps:$4 sm:$0xff]   ;;  %v28070_v35 = vld [vmem:[%s28457_s11 + $0x5090] ss:$8 sps:$4 sm:$0xff]  }
 0xa49   : > { %20388 = vmatprep.subr.bf16.mxu1 %v28005_v38  ;;  %v28073_v38 = vld [vmem:[%s28457_s11 + $0x5190] ss:$8 sps:$4 sm:$0xff]  }
 0xa4b   : > { %20348 = vmatpush1.bf16.msra.mxu0 %v28000_v55  ;;  %v28078_v55 = vld [vmem:[%s28457_s11 + $0x50a4] ss:$8 sps:$4 sm:$0xff]  }
 0xa4c   : > { %20389 = vmatpush1.bf16.msra.mxu1 %v28003_v39  ;;  %20349 = vmatprep.subr.bf16.mxu0 %v28008_v57  ;;  %v28081_v39 = vld [vmem:[%s28457_s11 + $0x51a4] ss:$8 sps:$4 sm:$0xff]   ;;  %v28076_v57 = vld [vmem:[%s28457_s11 + $0x50a0] ss:$8 sps:$4 sm:$0xff]  }
 0xa4d   : > { %20390 = vmatprep.subr.bf16.mxu1 %v28011_v13  ;;  %v28079_v13 = vld [vmem:[%s28457_s11 + $0x51a0] ss:$8 sps:$4 sm:$0xff]  }
 0xa4f   : > { %20350 = vmatpush1.bf16.msra.mxu0 %v28006_v59  ;;  %v28084_v59 = vld [vmem:[%s28457_s11 + $0x50b4] ss:$8 sps:$4 sm:$0xff]  }
 0xa50   : > { %20391 = vmatpush1.bf16.msra.mxu1 %v28009_v42  ;;  %20401 = vmatprep.subr.bf16.mxu0 %v28018_v32  ;;  %v28087_v42 = vld [vmem:[%s28457_s11 + $0x51b4] ss:$8 sps:$4 sm:$0xff]   ;;  %v28082_v32 = vld [vmem:[%s28457_s11 + $0x50b0] ss:$8 sps:$4 sm:$0xff]  }
 0xa51   : > { %20442 = vmatprep.subr.bf16.mxu1 %v28021_v62  ;;  %v28085_v62 = vld [vmem:[%s28457_s11 + $0x51b0] ss:$8 sps:$4 sm:$0xff]  }
 0xa52   : > { %20352 = vmatmul.mubr.bf16.vlgmr.msra.gmra.mrb[156].mxu0 %v21102_v43  ;;  %v28090_v43 = vld [vmem:[%s28457_s11 + $0x50c4] ss:$8 sps:$4 sm:$0xff]  }
 0xa53   : > { %20393 = vmatmul.mubr.bf16.vlgmr.msra.gmra.mrb[156].mxu1 %v21104_v63  ;;  %20402 = vmatpush1.bf16.msra.mxu0 %v28016_v47  ;;  %v28093_v63 = vld [vmem:[%s28457_s11 + $0x51c4] ss:$8 sps:$4 sm:$0xff]   ;;  %v28088_v47 = vld [vmem:[%s28457_s11 + $0x50c0] ss:$8 sps:$4 sm:$0xff]  }
 0xa54   : > { %20443 = vmatpush1.bf16.msra.mxu1 %v28019_v50  ;;  %20403 = vmatprep.subr.bf16.mxu0 %v28024_v49  ;;  %v28091_v50 = vld [vmem:[%s28457_s11 + $0x51c0] ss:$8 sps:$4 sm:$0xff]   ;;  %v28096_v49 = vld [vmem:[%s28457_s11 + $0x50d4] ss:$8 sps:$4 sm:$0xff]  }
 0xa55   : > { %20444 = vmatprep.subr.bf16.mxu1 %v28027_v1  ;;  %20433 = vmatprep.mubr.bf16.mxu0 %v21107_v30  ;;  %v28099_v1 = vld [vmem:[%s28457_s11 + $0x51d4] ss:$8 sps:$4 sm:$0xff]   ;;  %v28094_v30 = vld [vmem:[%s28457_s11 + $0x50d0] ss:$8 sps:$4 sm:$0xff]  }
 0xa56   : > { %20474 = vmatprep.mubr.bf16.mxu1 %v21109_v28  ;;  %v28097_v28 = vld [vmem:[%s28457_s11 + $0x51d0] ss:$8 sps:$4 sm:$0xff]  }
 0xa57   : > { %20404 = vmatpush1.bf16.msra.mxu0 %v28022_v52  ;;  %v28102_v52 = vld [vmem:[%s28457_s11 + $0x50e4] ss:$8 sps:$4 sm:$0xff]  }
 0xa58   : > { %20445 = vmatpush1.bf16.msra.mxu1 %v28025_v56  ;;  %20405 = vmatprep.subr.bf16.mxu0 %v28030_v11  ;;  %v28105_v56 = vld [vmem:[%s28457_s11 + $0x51e4] ss:$8 sps:$4 sm:$0xff]   ;;  %v28100_v11 = vld [vmem:[%s28457_s11 + $0x50e0] ss:$8 sps:$4 sm:$0xff]  }
 0xa59   : > { %20446 = vmatprep.subr.bf16.mxu1 %v28033_v25  ;;  %v28103_v25 = vld [vmem:[%s28457_s11 + $0x51e0] ss:$8 sps:$4 sm:$0xff]  }
 0xa5b   : > { %20406 = vmatpush1.bf16.msra.mxu0 %v28028_v36  ;;  %v28108_v36 = vld [vmem:[%s28457_s11 + $0x50f4] ss:$8 sps:$4 sm:$0xff]  }
 0xa5c   : > { %20447 = vmatpush1.bf16.msra.mxu1 %v28031_v26  ;;  %20407 = vmatprep.subr.bf16.mxu0 %v28036_v58  ;;  %v28111_v26 = vld [vmem:[%s28457_s11 + $0x51f4] ss:$8 sps:$4 sm:$0xff]   ;;  %v28106_v58 = vld [vmem:[%s28457_s11 + $0x50f0] ss:$8 sps:$4 sm:$0xff]  }
 0xa5d   : > { %20448 = vmatprep.subr.bf16.mxu1 %v28039_v60  ;;  %v28109_v60 = vld [vmem:[%s28457_s11 + $0x51f0] ss:$8 sps:$4 sm:$0xff]  }
 0xa5f   : > { %20408 = vmatpush1.bf16.msra.mxu0 %v28034_v15  ;;  %v28118_v15 = vld [vmem:[%s28457_s11 + $0x5204] ss:$8 sps:$4 sm:$0xff]  }
 0xa60   : > { %20449 = vmatpush1.bf16.msra.mxu1 %v28037_v61  ;;  %20409 = vmatprep.subr.bf16.mxu0 %v28042_v18  ;;  %v28121_v61 = vld [vmem:[%s28457_s11 + $0x5304] ss:$8 sps:$4 sm:$0xff]   ;;  %v21106_v18 = vcombine.low %v31813_v48, %v31813_v48 }
 0xa61   : > { %20450 = vmatprep.subr.bf16.mxu1 %v28045_v19  ;;  %v21108_v19 = vcombine.low %v31816_v46, %v31816_v46 }
 0xa63   : > { %20410 = vmatpush1.bf16.msra.mxu0 %v28040_v3  ;;  %v31897_v3 = vld [vmem:[%s28474_s27 + $0x290] sm:$0xff] }
 0xa64   : > { %20451 = vmatpush1.bf16.msra.mxu1 %v28043_v0  ;;  %20411 = vmatprep.subr.bf16.mxu0 %v28048_v2  ;;  %v31900_v0 = vld [vmem:[%s28474_s27 + $0x298] sm:$0xff]  ;;  %v21111_v48 = vcombine.high %v31897_v3, %v31897_v3 }
 0xa65   : > { %20452 = vmatprep.subr.bf16.mxu1 %v28051_v6  ;;  %v20107_v4 = vpop.f32.mrb[144].mxu0  ;;  %v28116_v2 = vld [vmem:[%s28457_s11 + $0x5200] ss:$8 sps:$4 sm:$0xff]   ;;  %v21113_v46 = vcombine.high %v31900_v0, %v31900_v0 }
 0xa66   : > { %v20148_v53 = vpop.f32.mrb[144].mxu1  ;;  %v20108_v54 = vadd.f32 %v20107_v4, %v31766_v21  ;;  %v20109_v51 = vpop.f32.mrb[145].mxu0  ;;  %v28060_v21 = vld [vmem:[%s28457_s11 + $0x5074] ss:$8 sps:$4 sm:$0xff]   ;;  %v28119_v6 = vld [vmem:[%s28457_s11 + $0x5300] ss:$8 sps:$4 sm:$0xff]  }
 0xa67   : > { %v20150_v14 = vpop.f32.mrb[145].mxu1  ;;  %v20110_v16 = vadd.f32 %v20109_v51, %v31770_v24  ;;  %v20111_v37 = vpop.f32.mrb[146].mxu0  ;;  %20412 = vmatpush1.bf16.msra.mxu0 %v28046_v5  ;;  %v28063_v24 = vld [vmem:[%s28457_s11 + $0x5174] ss:$8 sps:$4 sm:$0xff]   ;;  %v28130_v4 = vld [vmem:[%s28457_s11 + $0x5224] ss:$8 sps:$4 sm:$0xff]  }
 0xa68   : > { %v20152_v17 = vpop.f32.mrb[146].mxu1  ;;  %20453 = vmatpush1.bf16.msra.mxu1 %v28049_v27  ;;  %v31850_v41 = vadd.f32 %v20148_v53, %v20108_v54  ;;  %v20112_v22 = vpop.f32.mrb[147].mxu0  ;;  %20413 = vmatprep.subr.bf16.mxu0 %v28054_v8  ;;  %v28124_v5 = vld [vmem:[%s28457_s11 + $0x5214] ss:$8 sps:$4 sm:$0xff]   ;;  %v28122_v8 = vld [vmem:[%s28457_s11 + $0x5210] ss:$8 sps:$4 sm:$0xff]  }
 0xa69   : > { %v20153_v20 = vpop.f32.mrb[147].mxu1  ;;  %20454 = vmatprep.subr.bf16.mxu1 %v28057_v12  ;;  %v31854_v44 = vadd.f32 %v20150_v14, %v20110_v16  ;;  %v28127_v27 = vld [vmem:[%s28457_s11 + $0x5314] ss:$8 sps:$4 sm:$0xff]   ;;  %v28125_v12 = vld [vmem:[%s28457_s11 + $0x5310] ss:$8 sps:$4 sm:$0xff]  }
 0xa6a   : > { %v28133_v53 = vld [vmem:[%s28457_s11 + $0x5324] ss:$8 sps:$4 sm:$0xff]   ;;  %v28128_v54 = vld [vmem:[%s28457_s11 + $0x5220] ss:$8 sps:$4 sm:$0xff]   ;;  %v28136_v14 = vld [vmem:[%s28457_s11 + $0x5234] ss:$8 sps:$4 sm:$0xff]  }
 0xa6b   : > { %20414 = vmatpush1.bf16.msra.mxu0 %v28052_v40  ;;  %v28131_v51 = vld [vmem:[%s28457_s11 + $0x5320] ss:$8 sps:$4 sm:$0xff]   ;;  %v28139_v16 = vld [vmem:[%s28457_s11 + $0x5334] ss:$8 sps:$4 sm:$0xff]   ;;  %v28134_v37 = vld [vmem:[%s28457_s11 + $0x5230] ss:$8 sps:$4 sm:$0xff]  }
 0xa6c   : > { %20455 = vmatpush1.bf16.msra.mxu1 %v28055_v31  ;;  %20415 = vmatprep.subr.bf16.mxu0 %v28060_v21  ;;  %v28137_v17 = vld [vmem:[%s28457_s11 + $0x5330] ss:$8 sps:$4 sm:$0xff]   ;;  %v28142_v40 = vld [vmem:[%s28457_s11 + $0x5244] ss:$8 sps:$4 sm:$0xff]   ;;  %v28140_v22 = vld [vmem:[%s28457_s11 + $0x5240] ss:$8 sps:$4 sm:$0xff]  }
 0xa6d   : > { %20456 = vmatprep.subr.bf16.mxu1 %v28063_v24  ;;  %v28145_v31 = vld [vmem:[%s28457_s11 + $0x5344] ss:$8 sps:$4 sm:$0xff]   ;;  %v28143_v20 = vld [vmem:[%s28457_s11 + $0x5340] ss:$8 sps:$4 sm:$0xff]   ;;  %v28148_v21 = vld [vmem:[%s28457_s11 + $0x5254] ss:$8 sps:$4 sm:$0xff]  }
 0xa6e   : > { %v28151_v24 = vld [vmem:[%s28457_s11 + $0x5354] ss:$8 sps:$4 sm:$0xff]  }
 0xa6f   : > { %20416 = vmatpush1.bf16.msra.mxu0 %v28058_v23  ;;  %v28146_v23 = vld [vmem:[%s28457_s11 + $0x5250] ss:$8 sps:$4 sm:$0xff]  }
 0xa70   : > { %20457 = vmatpush1.bf16.msra.mxu1 %v28061_v45  ;;  %20417 = vmatprep.subr.bf16.mxu0 %v28066_v29  ;;  %v28149_v45 = vld [vmem:[%s28457_s11 + $0x5350] ss:$8 sps:$4 sm:$0xff]   ;;  %v28154_v29 = vld [vmem:[%s28457_s11 + $0x5264] ss:$8 sps:$4 sm:$0xff]  }
 0xa71   : > { %20458 = vmatprep.subr.bf16.mxu1 %v28069_v34  ;;  %v28157_v34 = vld [vmem:[%s28457_s11 + $0x5364] ss:$8 sps:$4 sm:$0xff]  }
 0xa73   : > { %20418 = vmatpush1.bf16.msra.mxu0 %v28064_v33 }
 0xa74   : > { %20459 = vmatpush1.bf16.msra.mxu1 %v28067_v9  ;;  %20419 = vmatprep.subr.bf16.mxu0 %v28072_v10 }
 0xa75   : > { %20460 = vmatprep.subr.bf16.mxu1 %v28075_v7 }
 0xa77   : > { %20420 = vmatpush1.bf16.msra.mxu0 %v28070_v35 }
 0xa78   : > { %20461 = vmatpush1.bf16.msra.mxu1 %v28073_v38  ;;  %20421 = vmatprep.subr.bf16.mxu0 %v28078_v55 }
 0xa79   : > { %20462 = vmatprep.subr.bf16.mxu1 %v28081_v39 }
 0xa7b   : > { %20422 = vmatpush1.bf16.msra.mxu0 %v28076_v57  ;;  %v28152_v57 = vld [vmem:[%s28457_s11 + $0x5260] ss:$8 sps:$4 sm:$0xff]  }
 0xa7c   : > { %20463 = vmatpush1.bf16.msra.mxu1 %v28079_v13  ;;  %20423 = vmatprep.subr.bf16.mxu0 %v28084_v59  ;;  %v28155_v13 = vld [vmem:[%s28457_s11 + $0x5360] ss:$8 sps:$4 sm:$0xff]  }
 0xa7d   : > { %20464 = vmatprep.subr.bf16.mxu1 %v28087_v42 }
 0xa7f   : > { %20424 = vmatpush1.bf16.msra.mxu0 %v28082_v32 }
 0xa80   : > { %20465 = vmatpush1.bf16.msra.mxu1 %v28085_v62  ;;  %20425 = vmatprep.subr.bf16.mxu0 %v28090_v43  ;;  %v28158_v43 = vld [vmem:[%s28457_s11 + $0x5270] ss:$8 sps:$4 sm:$0xff]  }
 0xa81   : > { %20466 = vmatprep.subr.bf16.mxu1 %v28093_v63  ;;  %v28161_v63 = vld [vmem:[%s28457_s11 + $0x5370] ss:$8 sps:$4 sm:$0xff]  }
 0xa83   : > { %20426 = vmatpush1.bf16.msra.mxu0 %v28088_v47  ;;  %v28166_v47 = vld [vmem:[%s28457_s11 + $0x5284] ss:$8 sps:$4 sm:$0xff]  }
 0xa84   : > { %20467 = vmatpush1.bf16.msra.mxu1 %v28091_v50  ;;  %20427 = vmatprep.subr.bf16.mxu0 %v28096_v49  ;;  %v28169_v50 = vld [vmem:[%s28457_s11 + $0x5384] ss:$8 sps:$4 sm:$0xff]   ;;  %v28164_v49 = vld [vmem:[%s28457_s11 + $0x5280] ss:$8 sps:$4 sm:$0xff]  }
 0xa85   : > { %20468 = vmatprep.subr.bf16.mxu1 %v28099_v1  ;;  %v28167_v1 = vld [vmem:[%s28457_s11 + $0x5380] ss:$8 sps:$4 sm:$0xff]  }
 0xa87   : > { %20428 = vmatpush1.bf16.msra.mxu0 %v28094_v30  ;;  %v28172_v30 = vld [vmem:[%s28457_s11 + $0x5294] ss:$8 sps:$4 sm:$0xff]  }
 0xa88   : > { %20469 = vmatpush1.bf16.msra.mxu1 %v28097_v28  ;;  %20429 = vmatprep.subr.bf16.mxu0 %v28102_v52  ;;  %v28175_v28 = vld [vmem:[%s28457_s11 + $0x5394] ss:$8 sps:$4 sm:$0xff]   ;;  %v28170_v52 = vld [vmem:[%s28457_s11 + $0x5290] ss:$8 sps:$4 sm:$0xff]  }
 0xa89   : > { %20470 = vmatprep.subr.bf16.mxu1 %v28105_v56  ;;  %v28173_v56 = vld [vmem:[%s28457_s11 + $0x5390] ss:$8 sps:$4 sm:$0xff]  }
 0xa8b   : > { %20430 = vmatpush1.bf16.msra.mxu0 %v28100_v11  ;;  %v28178_v11 = vld [vmem:[%s28457_s11 + $0x52a4] ss:$8 sps:$4 sm:$0xff]  }
 0xa8c   : > { %20471 = vmatpush1.bf16.msra.mxu1 %v28103_v25  ;;  %20431 = vmatprep.subr.bf16.mxu0 %v28108_v36  ;;  %v28181_v25 = vld [vmem:[%s28457_s11 + $0x53a4] ss:$8 sps:$4 sm:$0xff]   ;;  %v28176_v36 = vld [vmem:[%s28457_s11 + $0x52a0] ss:$8 sps:$4 sm:$0xff]  }
 0xa8d   : > { %20472 = vmatprep.subr.bf16.mxu1 %v28111_v26  ;;  %v28179_v26 = vld [vmem:[%s28457_s11 + $0x53a0] ss:$8 sps:$4 sm:$0xff]  }
 0xa8f   : > { %20432 = vmatpush1.bf16.msra.mxu0 %v28106_v58  ;;  %v28184_v58 = vld [vmem:[%s28457_s11 + $0x52b4] ss:$8 sps:$4 sm:$0xff]  }
 0xa90   : > { %20473 = vmatpush1.bf16.msra.mxu1 %v28109_v60  ;;  %20483 = vmatprep.subr.bf16.mxu0 %v28118_v15  ;;  %v28187_v60 = vld [vmem:[%s28457_s11 + $0x53b4] ss:$8 sps:$4 sm:$0xff]   ;;  %v28182_v15 = vld [vmem:[%s28457_s11 + $0x52b0] ss:$8 sps:$4 sm:$0xff]  }
 0xa91   : > { %20524 = vmatprep.subr.bf16.mxu1 %v28121_v61  ;;  %v28185_v61 = vld [vmem:[%s28457_s11 + $0x53b0] ss:$8 sps:$4 sm:$0xff]  }
 0xa92   : > { %20434 = vmatmul.mubr.bf16.vlgmr.msra.gmra.mrb[160].mxu0 %v21106_v18  ;;  %v28190_v18 = vld [vmem:[%s28457_s11 + $0x52c4] ss:$8 sps:$4 sm:$0xff]  }
 0xa93   : > { %20475 = vmatmul.mubr.bf16.vlgmr.msra.gmra.mrb[160].mxu1 %v21108_v19  ;;  %20484 = vmatpush1.bf16.msra.mxu0 %v28116_v2  ;;  %v28193_v19 = vld [vmem:[%s28457_s11 + $0x53c4] ss:$8 sps:$4 sm:$0xff]   ;;  %v28188_v2 = vld [vmem:[%s28457_s11 + $0x52c0] ss:$8 sps:$4 sm:$0xff]  }
 0xa94   : > { %20525 = vmatpush1.bf16.msra.mxu1 %v28119_v6  ;;  %20485 = vmatprep.subr.bf16.mxu0 %v28124_v5  ;;  %v28191_v6 = vld [vmem:[%s28457_s11 + $0x53c0] ss:$8 sps:$4 sm:$0xff]   ;;  %v28196_v5 = vld [vmem:[%s28457_s11 + $0x52d4] ss:$8 sps:$4 sm:$0xff]  }
 0xa95   : > { %20526 = vmatprep.subr.bf16.mxu1 %v28127_v27  ;;  %20515 = vmatprep.mubr.bf16.mxu0 %v21111_v48  ;;  %v28199_v27 = vld [vmem:[%s28457_s11 + $0x53d4] ss:$8 sps:$4 sm:$0xff]   ;;  %v28194_v48 = vld [vmem:[%s28457_s11 + $0x52d0] ss:$8 sps:$4 sm:$0xff]  }
 0xa96   : > { %20556 = vmatprep.mubr.bf16.mxu1 %v21113_v46  ;;  %v28197_v46 = vld [vmem:[%s28457_s11 + $0x53d0] ss:$8 sps:$4 sm:$0xff]  }
 0xa97   : > { %20486 = vmatpush1.bf16.msra.mxu0 %v28122_v8  ;;  %v28202_v8 = vld [vmem:[%s28457_s11 + $0x52e4] ss:$8 sps:$4 sm:$0xff]  }
 0xa98   : > { %20527 = vmatpush1.bf16.msra.mxu1 %v28125_v12  ;;  %20487 = vmatprep.subr.bf16.mxu0 %v28130_v4  ;;  %v28205_v12 = vld [vmem:[%s28457_s11 + $0x53e4] ss:$8 sps:$4 sm:$0xff]   ;;  %v28200_v4 = vld [vmem:[%s28457_s11 + $0x52e0] ss:$8 sps:$4 sm:$0xff]  }
 0xa99   : > { %20528 = vmatprep.subr.bf16.mxu1 %v28133_v53  ;;  %v28203_v53 = vld [vmem:[%s28457_s11 + $0x53e0] ss:$8 sps:$4 sm:$0xff]  }
 0xa9b   : > { %20488 = vmatpush1.bf16.msra.mxu0 %v28128_v54  ;;  %v28208_v54 = vld [vmem:[%s28457_s11 + $0x52f4] ss:$8 sps:$4 sm:$0xff]  }
 0xa9c   : > { %20529 = vmatpush1.bf16.msra.mxu1 %v28131_v51  ;;  %20489 = vmatprep.subr.bf16.mxu0 %v28136_v14  ;;  %v28211_v51 = vld [vmem:[%s28457_s11 + $0x53f4] ss:$8 sps:$4 sm:$0xff]   ;;  %v28206_v14 = vld [vmem:[%s28457_s11 + $0x52f0] ss:$8 sps:$4 sm:$0xff]  }
 0xa9d   : > { %20530 = vmatprep.subr.bf16.mxu1 %v28139_v16  ;;  %v28209_v16 = vld [vmem:[%s28457_s11 + $0x53f0] ss:$8 sps:$4 sm:$0xff]  }
 0xa9f   : > { %20490 = vmatpush1.bf16.msra.mxu0 %v28134_v37  ;;  %v21110_v37 = vcombine.low %v31897_v3, %v31897_v3 }
 0xaa0   : > { %20531 = vmatpush1.bf16.msra.mxu1 %v28137_v17  ;;  %20491 = vmatprep.subr.bf16.mxu0 %v28142_v40  ;;  %v21112_v17 = vcombine.low %v31900_v0, %v31900_v0 }
 0xaa1   : > { %20532 = vmatprep.subr.bf16.mxu1 %v28145_v31 }
 0xaa3   : > { %20492 = vmatpush1.bf16.msra.mxu0 %v28140_v22 }
 0xaa4   : > { %20533 = vmatpush1.bf16.msra.mxu1 %v28143_v20  ;;  %20493 = vmatprep.subr.bf16.mxu0 %v28148_v21 }
 0xaa5   : > { %20534 = vmatprep.subr.bf16.mxu1 %v28151_v24  ;;  %v20189_v33 = vpop.f32.mrb[148].mxu0 }
 0xaa6   : > { %v20230_v9 = vpop.f32.mrb[148].mxu1  ;;  %v20190_v10 = vadd.f32 %v20189_v33, %v31850_v41  ;;  %v20191_v7 = vpop.f32.mrb[149].mxu0  ;;  %v28160_v41 = vld [vmem:[%s28457_s11 + $0x5274] ss:$8 sps:$4 sm:$0xff]  }
 0xaa7   : > { %v20232_v35 = vpop.f32.mrb[149].mxu1  ;;  %v20192_v38 = vadd.f32 %v20191_v7, %v31854_v44  ;;  %v20193_v55 = vpop.f32.mrb[150].mxu0  ;;  %20494 = vmatpush1.bf16.msra.mxu0 %v28146_v23  ;;  %v28163_v44 = vld [vmem:[%s28457_s11 + $0x5374] ss:$8 sps:$4 sm:$0xff]  }
 0xaa8   : > { %v20234_v39 = vpop.f32.mrb[150].mxu1  ;;  %20535 = vmatpush1.bf16.msra.mxu1 %v28149_v45  ;;  %v31934_v59 = vadd.f32 %v20230_v9, %v20190_v10  ;;  %v20194_v42 = vpop.f32.mrb[151].mxu0  ;;  %20495 = vmatprep.subr.bf16.mxu0 %v28154_v29 }
 0xaa9   : > { %v20235_v32 = vpop.f32.mrb[151].mxu1  ;;  %20536 = vmatprep.subr.bf16.mxu1 %v28157_v34  ;;  %v31938_v62 = vadd.f32 %v20232_v35, %v20192_v38 }
 0xaab   : > { %20496 = vmatpush1.bf16.msra.mxu0 %v28152_v57 }
 0xaac   : > { %20537 = vmatpush1.bf16.msra.mxu1 %v28155_v13  ;;  %20497 = vmatprep.subr.bf16.mxu0 %v28160_v41 }
 0xaad   : > { %20538 = vmatprep.subr.bf16.mxu1 %v28163_v44 }
 0xaaf   : > { %20498 = vmatpush1.bf16.msra.mxu0 %v28158_v43 }
 0xab0   : > { %20539 = vmatpush1.bf16.msra.mxu1 %v28161_v63  ;;  %20499 = vmatprep.subr.bf16.mxu0 %v28166_v47 }
 0xab1   : > { %20540 = vmatprep.subr.bf16.mxu1 %v28169_v50 }
 0xab3   : > { %20500 = vmatpush1.bf16.msra.mxu0 %v28164_v49 }
 0xab4   : > { %20541 = vmatpush1.bf16.msra.mxu1 %v28167_v1  ;;  %20501 = vmatprep.subr.bf16.mxu0 %v28172_v30 }
 0xab5   : > { %20542 = vmatprep.subr.bf16.mxu1 %v28175_v28 }
 0xab7   : > { %20502 = vmatpush1.bf16.msra.mxu0 %v28170_v52 }
 0xab8   : > { %20543 = vmatpush1.bf16.msra.mxu1 %v28173_v56  ;;  %20503 = vmatprep.subr.bf16.mxu0 %v28178_v11 }
 0xab9   : > { %20544 = vmatprep.subr.bf16.mxu1 %v28181_v25 }
 0xabb   : > { %20504 = vmatpush1.bf16.msra.mxu0 %v28176_v36 }
 0xabc   : > { %20545 = vmatpush1.bf16.msra.mxu1 %v28179_v26  ;;  %20505 = vmatprep.subr.bf16.mxu0 %v28184_v58  ;;  %v319_v26 = vld [vmem:[#allocation2] sm:$0xff] }
 0xabd   : > { %20546 = vmatprep.subr.bf16.mxu1 %v28187_v60 }
 0xabf   : > { %20506 = vmatpush1.bf16.msra.mxu0 %v28182_v15 }
 0xac0   : > { %20547 = vmatpush1.bf16.msra.mxu1 %v28185_v61  ;;  %20507 = vmatprep.subr.bf16.mxu0 %v28190_v18  ;;  %v320_v18 = vld [vmem:[#allocation2 + $0x8] sm:$0xff] }
 0xac1   : > { %20548 = vmatprep.subr.bf16.mxu1 %v28193_v19 }
 0xac3   : > { %20508 = vmatpush1.bf16.msra.mxu0 %v28188_v2 }
 0xac4   : > { %20549 = vmatpush1.bf16.msra.mxu1 %v28191_v6  ;;  %20509 = vmatprep.subr.bf16.mxu0 %v28196_v5 }
 0xac5   : > { %20550 = vmatprep.subr.bf16.mxu1 %v28199_v27 }
 0xac7   : > { %20510 = vmatpush1.bf16.msra.mxu0 %v28194_v48  ;;  %v20578_v48 = vld [vmem:[%s28480_s10 + $0x8] sm:$0xff] (!%p23802_p9) }
 0xac8   : > { %20551 = vmatpush1.bf16.msra.mxu1 %v28197_v46  ;;  %20511 = vmatprep.subr.bf16.mxu0 %v28202_v8  ;;  %v20581_v46 = vld [vmem:[%s28480_s10 + $0x20] sm:$0xff] (!%p23802_p9) }
 0xac9   : > { %20552 = vmatprep.subr.bf16.mxu1 %v28205_v12  ;;  %v20577_v8 = vld [vmem:[%s28480_s10] sm:$0xff] (!%p23802_p9)  ;;  %v23841_v12 = vpack.c.bf16 (!%p23802_p9), %v20581_v46, %v20578_v48  ;;  %v20651_v48 = vld [vmem:[%s28480_s10 + $0x250] sm:$0xff] (!%p23802_p9)  ;;  %v20654_v46 = vld [vmem:[%s28480_s10 + $0x268] sm:$0xff] (!%p23802_p9) }
 0xacb   : > { %20512 = vmatpush1.bf16.msra.mxu0 %v28200_v4  ;;  %v20580_v4 = vld [vmem:[%s28480_s10 + $0x18] sm:$0xff] (!%p23802_p9) }
 0xacc   : > { %20553 = vmatpush1.bf16.msra.mxu1 %v28203_v53  ;;  %20513 = vmatprep.subr.bf16.mxu0 %v28208_v54  ;;  %v20584_v53 = vld [vmem:[%s28480_s10 + $0x38] sm:$0xff] (!%p23802_p9)  ;;  %v20587_v54 = vld [vmem:[%s28480_s10 + $0x50] sm:$0xff] (!%p23802_p9) }
 0xacd   : > { %20554 = vmatprep.subr.bf16.mxu1 %v28211_v51  ;;  %v23843_v51 = vpack.c.bf16 (!%p23802_p9), %v20580_v4, %v20577_v8  ;;  %v20620_v8 = vld [vmem:[%s28480_s10 + $0x158] sm:$0xff] (!%p23802_p9) }
 0xacf   : > { %20514 = vmatpush1.bf16.msra.mxu0 %v28206_v14  ;;  %v23845_v14 = vpack.c.bf16 (!%p23802_p9), %v20587_v54, %v20584_v53  ;;  %v20619_v54 = vld [vmem:[%s28480_s10 + $0x150] sm:$0xff] (!%p23802_p9) }
 0xad0   : > { %20555 = vmatpush1.bf16.msra.mxu1 %v28209_v16  ;;  %v20583_v16 = vld [vmem:[%s28480_s10 + $0x30] sm:$0xff] (!%p23802_p9)  ;;  %23842 = vmatprep.subr.bf16.mxu0 (!%p23802_p9), %v23841_v12 }
 0xad1   : > { %v20623_v12 = vld [vmem:[%s28480_s10 + $0x170] sm:$0xff] (!%p23802_p9) }
 0xad2   : > { %20516 = vmatmul.mubr.bf16.vlgmr.msra.gmra.mrb[164].mxu0 %v21110_v37  ;;  %v20586_v37 = vld [vmem:[%s28480_s10 + $0x48] sm:$0xff] (!%p23802_p9) }
 0xad3   : > { %20557 = vmatmul.mubr.bf16.vlgmr.msra.gmra.mrb[164].mxu1 %v21112_v17  ;;  %v20590_v17 = vld [vmem:[%s28480_s10 + $0x68] sm:$0xff] (!%p23802_p9)  ;;  %23844 = vmatpush1.bf16.msra.mxu0 (!%p23802_p9), %v23843_v51  ;;  %v23921_v51 = vpack.c.bf16 (!%p23802_p9), %v20654_v46, %v20651_v48  ;;  %v20652_v48 = vld [vmem:[%s28480_s10 + $0x258] sm:$0xff] (!%p23802_p9) }
 0xad4   : > { %23846 = vmatprep.subr.bf16.mxu0 (!%p23802_p9), %v23845_v14  ;;  %v20603_v14 = vld [vmem:[%s28480_s10 + $0xd0] sm:$0xff] (!%p23802_p9)  ;;  %v20656_v46 = vld [vmem:[%s28480_s10 + $0x278] sm:$0xff] (!%p23802_p9) }
 0xae5   : > { %v20271_v40 = vpop.f32.mrb[152].mxu0 }
 0xae6   : > { %v20312_v31 = vpop.f32.mrb[152].mxu1  ;;  %v20272_v22 = vadd.f32 %v20271_v40, %v31934_v59  ;;  %v20273_v20 = vpop.f32.mrb[153].mxu0  ;;  %v20593_v40 = vld [vmem:[%s28480_s10 + $0x80] sm:$0xff] (!%p23802_p9) }
 0xae7   : > { %v20314_v21 = vpop.f32.mrb[153].mxu1  ;;  %v20274_v24 = vadd.f32 %v20273_v20, %v31938_v62  ;;  %v20275_v23 = vpop.f32.mrb[154].mxu0  ;;  %v20589_v20 = vld [vmem:[%s28480_s10 + $0x60] sm:$0xff] (!%p23802_p9) }
 0xae8   : > { %v20316_v45 = vpop.f32.mrb[154].mxu1  ;;  %v20313_v29 = vadd.f32 %v20312_v31, %v20272_v22  ;;  %v20276_v34 = vpop.f32.mrb[155].mxu0  ;;  %v23847_v31 = vpack.c.bf16 (!%p23802_p9), %v20586_v37, %v20583_v16  ;;  %v23849_v22 = vpack.c.bf16 (!%p23802_p9), %v20593_v40, %v20590_v17  ;;  %v20599_v23 = vld [vmem:[%s28480_s10 + $0xb0] sm:$0xff] (!%p23802_p9)  ;;  %v20606_v16 = vld [vmem:[%s28480_s10 + $0xe8] sm:$0xff] (!%p23802_p9)  ;;  %v23869_v37 = vpack.c.bf16 (!%p23802_p9), %v20623_v12, %v20620_v8  ;;  %v20657_v40 = vld [vmem:[%s28480_s10 + $0x280] sm:$0xff] (!%p23802_p9) }
 0xae9   : > { %v20317_v3 = vpop.f32.mrb[155].mxu1  ;;  %v20315_v33 = vadd.f32 %v20314_v21, %v20274_v24  ;;  %v20592_v21 = vld [vmem:[%s28480_s10 + $0x78] sm:$0xff] (!%p23802_p9)  ;;  %v20595_v34 = vld [vmem:[%s28480_s10 + $0x90] sm:$0xff] (!%p23802_p9)  ;;  %v20622_v17 = vld [vmem:[%s28480_s10 + $0x168] sm:$0xff] (!%p23802_p9) }
 0xaea   : > { %v20596_v24 = vld [vmem:[%s28480_s10 + $0x98] sm:$0xff] (!%p23802_p9)  ;;  %23848 = vmatpush1.bf16.msra.mxu0 (!%p23802_p9), %v23847_v31  ;;  %v23851_v45 = vpack.c.bf16 (!%p23802_p9), %v20592_v21, %v20589_v20  ;;  %v20598_v3 = vld [vmem:[%s28480_s10 + $0xa8] sm:$0xff] (!%p23802_p9)  ;;  %v20629_v20 = vld [vmem:[%s28480_s10 + $0x1a0] sm:$0xff] (!%p23802_p9)  ;;  %v23923_v21 = vpack.c.bf16 (!%p23802_p9), %v20606_v16, %v20603_v14 }
 0xaeb   : > { %23850 = vmatprep.subr.bf16.mxu0 (!%p23802_p9), %v23849_v22  ;;  %v20660_v31 = vld [vmem:[%s28480_s10 + $0x298] sm:$0xff] (!%p23802_p9)  ;;  %v20626_v22 = vld [vmem:[%s28480_s10 + $0x188] sm:$0xff] (!%p23802_p9)  ;;  %v20659_v8 = vld [vmem:[%s28480_s10 + $0x290] sm:$0xff] (!%p23802_p9) }
 0xaec   : > { %v20665_v14 = vld [vmem:[%s28480_s10 + $0x2c0] sm:$0xff] (!%p23802_p9) }
 0xaee   : > { %23852 = vmatpush1.bf16.msra.mxu0 (!%p23802_p9), %v23851_v45  ;;  %v23925_v45 = vpack.c.bf16 (!%p23802_p9), %v20660_v31, %v20657_v40  ;;  %v20664_v40 = vld [vmem:[%s28480_s10 + $0x2b8] sm:$0xff] (!%p23802_p9) }
 0xaef   : > { %v20668_v31 = vld [vmem:[%s28480_s10 + $0x2d8] sm:$0xff] (!%p23802_p9) }
 0xb25   : > { %v20353_v9 = vpop.f32.mrb[156].mxu0 }
 0xb26   : > { %v20394_v0 = vpop.f32.mrb[156].mxu1  ;;  %v20354_v10 = vadd.f32 %v20353_v9, %v20313_v29  ;;  %v20355_v7 = vpop.f32.mrb[157].mxu0  ;;  %v23853_v29 = vpack.c.bf16 (!%p23802_p9), %v20599_v23, %v20596_v24  ;;  %v20605_v9 = vld [vmem:[%s28480_s10 + $0xe0] sm:$0xff] (!%p23802_p9)  ;;  %v23871_v24 = vpack.c.bf16 (!%p23802_p9), %v20622_v17, %v20619_v54  ;;  %v20658_v54 = vld [vmem:[%s28480_s10 + $0x288] sm:$0xff] (!%p23802_p9) }
 0xb27   : > { %v20396_v35 = vpop.f32.mrb[157].mxu1  ;;  %v20356_v38 = vadd.f32 %v20355_v7, %v20315_v33  ;;  %v20357_v55 = vpop.f32.mrb[158].mxu0  ;;  %v20602_v33 = vld [vmem:[%s28480_s10 + $0xc8] sm:$0xff] (!%p23802_p9)  ;;  %v20579_v7 = vld [vmem:[%s28480_s10 + $0x10] sm:$0xff] (!%p23802_p9)  ;;  %v20625_v23 = vld [vmem:[%s28480_s10 + $0x180] sm:$0xff] (!%p23802_p9) }
 0xb28   : > { %v20398_v39 = vpop.f32.mrb[158].mxu1  ;;  %v20395_v57 = vadd.f32 %v20394_v0, %v20354_v10  ;;  %v20358_v13 = vpop.f32.mrb[159].mxu0  ;;  %v20627_v0 = vld [vmem:[%s28480_s10 + $0x190] sm:$0xff] (!%p23802_p9)  ;;  %v20630_v10 = vld [vmem:[%s28480_s10 + $0x1a8] sm:$0xff] (!%p23802_p9)  ;;  %v20601_v55 = vld [vmem:[%s28480_s10 + $0xc0] sm:$0xff] (!%p23802_p9)  ;;  %23854 = vmatprep.subr.bf16.mxu0 (!%p23802_p9), %v23853_v29 }
 0xb29   : > { %v20399_v59 = vpop.f32.mrb[159].mxu1  ;;  %v20397_v42 = vadd.f32 %v20396_v35, %v20356_v38  ;;  %v20582_v35 = vld [vmem:[%s28480_s10 + $0x28] sm:$0xff] (!%p23802_p9)  ;;  %v23855_v38 = vpack.c.bf16 (!%p23802_p9), %v20598_v3, %v20595_v34  ;;  %v20604_v39 = vld [vmem:[%s28480_s10 + $0xd8] sm:$0xff] (!%p23802_p9)  ;;  %v20609_v29 = vld [vmem:[%s28480_s10 + $0x100] sm:$0xff] (!%p23802_p9)  ;;  %v23873_v3 = vpack.c.bf16 (!%p23802_p9), %v20629_v20, %v20626_v22 }
 0xb2a   : > { %v23907_v13 = vpack.c.bf16 (!%p23802_p9), %v20582_v35, %v20579_v7  ;;  %v23857_v59 = vpack.c.bf16 (!%p23802_p9), %v20605_v9, %v20602_v33  ;;  %v20612_v34 = vld [vmem:[%s28480_s10 + $0x118] sm:$0xff] (!%p23802_p9)  ;;  %v20663_v9 = vld [vmem:[%s28480_s10 + $0x2b0] sm:$0xff] (!%p23802_p9)  ;;  %v20661_v17 = vld [vmem:[%s28480_s10 + $0x2a0] sm:$0xff] (!%p23802_p9) }
 0xb2b   : > { %23856 = vmatpush1.bf16.msra.mxu0 (!%p23802_p9), %v23855_v38  ;;  %v20628_v33 = vld [vmem:[%s28480_s10 + $0x198] sm:$0xff] (!%p23802_p9)  ;;  %v20635_v7 = vld [vmem:[%s28480_s10 + $0x1d0] sm:$0xff] (!%p23802_p9)  ;;  %v23927_v35 = vpack.c.bf16 (!%p23802_p9), %v20612_v34, %v20609_v29  ;;  %v23899_v20 = vpack.c.bf16 (!%p23802_p9), %v20664_v40, %v20661_v17 }
 0xb2c   : > { %23858 = vmatprep.subr.bf16.mxu0 (!%p23802_p9), %v23857_v59  ;;  %v20618_v59 = vld [vmem:[%s28480_s10 + $0x148] sm:$0xff] (!%p23802_p9)  ;;  %v20671_v22 = vld [vmem:[%s28480_s10 + $0x2f0] sm:$0xff] (!%p23802_p9) }
 0xb65   : > { %v20435_v32 = vpop.f32.mrb[160].mxu0 }
 0xb66   : > { %v20476_v41 = vpop.f32.mrb[160].mxu1  ;;  %v20436_v44 = vadd.f32 %v20435_v32, %v20395_v57  ;;  %v20437_v62 = vpop.f32.mrb[161].mxu0  ;;  %v23905_v57 = vpack.c.bf16 (!%p23802_p9), %v20630_v10, %v20627_v0  ;;  %v20633_v32 = vld [vmem:[%s28480_s10 + $0x1c0] sm:$0xff] (!%p23802_p9)  ;;  %v20666_v0 = vld [vmem:[%s28480_s10 + $0x2c8] sm:$0xff] (!%p23802_p9)  ;;  %v20632_v10 = vld [vmem:[%s28480_s10 + $0x1b8] sm:$0xff] (!%p23802_p9) }
 0xb67   : > { %v20478_v43 = vpop.f32.mrb[161].mxu1  ;;  %v20438_v63 = vadd.f32 %v20437_v62, %v20397_v42  ;;  %v20439_v47 = vpop.f32.mrb[162].mxu0  ;;  %v20608_v42 = vld [vmem:[%s28480_s10 + $0xf8] sm:$0xff] (!%p23802_p9) }
 0xb68   : > { %v20480_v50 = vpop.f32.mrb[162].mxu1  ;;  %v20477_v49 = vadd.f32 %v20476_v41, %v20436_v44  ;;  %v20440_v1 = vpop.f32.mrb[163].mxu0  ;;  %v20636_v41 = vld [vmem:[%s28480_s10 + $0x1d8] sm:$0xff] (!%p23802_p9)  ;;  %v20611_v44 = vld [vmem:[%s28480_s10 + $0x110] sm:$0xff] (!%p23802_p9)  ;;  %23906 = vmatprep.subr.bf16.mxu1 (!%p23802_p9), %v23905_v57  ;;  %v23929_v57 = vpack.c.bf16 (!%p23802_p9), %v20666_v0, %v20663_v9 }
 0xb69   : > { %v20481_v30 = vpop.f32.mrb[163].mxu1  ;;  %v20479_v28 = vadd.f32 %v20478_v43, %v20438_v63  ;;  %v23909_v62 = vpack.c.bf16 (!%p23802_p9), %v20636_v41, %v20633_v32  ;;  %v20585_v43 = vld [vmem:[%s28480_s10 + $0x40] sm:$0xff] (!%p23802_p9)  ;;  %v20588_v63 = vld [vmem:[%s28480_s10 + $0x58] sm:$0xff] (!%p23802_p9)  ;;  %23908 = vmatpush3.bf16.msra.mxu1 (!%p23802_p9), %v23907_v13  ;;  %v23859_v50 = vpack.c.bf16 (!%p23802_p9), %v20604_v39, %v20601_v55  ;;  %v20642_v1 = vld [vmem:[%s28480_s10 + $0x208] sm:$0xff] (!%p23802_p9)  ;;  %v23875_v55 = vpack.c.bf16 (!%p23802_p9), %v20628_v33, %v20625_v23 }
 0xb6a   : > { %v23911_v47 = vpack.c.bf16 (!%p23802_p9), %v20588_v63, %v20585_v43  ;;  %v20591_v30 = vld [vmem:[%s28480_s10 + $0x70] sm:$0xff] (!%p23802_p9)  ;;  %v23877_v32 = vpack.c.bf16 (!%p23802_p9), %v20635_v7, %v20632_v10  ;;  %v20634_v41 = vld [vmem:[%s28480_s10 + $0x1c8] sm:$0xff] (!%p23802_p9)  ;;  %v20641_v63 = vld [vmem:[%s28480_s10 + $0x200] sm:$0xff] (!%p23802_p9) }
 0xb6b   : > { %23910 = vmatprep.subr.bf16.mxu1 (!%p23802_p9), %v23909_v62  ;;  %23860 = vmatpush1.bf16.msra.mxu0 (!%p23802_p9), %v23859_v50  ;;  %v20631_v39 = vld [vmem:[%s28480_s10 + $0x1b0] sm:$0xff] (!%p23802_p9)  ;;  %v20672_v62 = vld [vmem:[%s28480_s10 + $0x2f8] sm:$0xff] (!%p23802_p9)  ;;  %v20638_v43 = vld [vmem:[%s28480_s10 + $0x1e8] sm:$0xff] (!%p23802_p9) }
 0xb6c   : > { %v20615_v13 = vld [vmem:[%s28480_s10 + $0x130] sm:$0xff] (!%p23802_p9)  ;;  %v23879_v50 = vpack.c.bf16 (!%p23802_p9), %v20634_v41, %v20631_v39  ;;  %v20670_v23 = vld [vmem:[%s28480_s10 + $0x2e8] sm:$0xff] (!%p23802_p9) }
 0xb6d   : > { %23912 = vmatpush3.bf16.msra.mxu1 (!%p23802_p9), %v23911_v47  ;;  %v23931_v47 = vpack.c.bf16 (!%p23802_p9), %v20618_v59, %v20615_v13 }
 0xba5   : > { %v20517_v52 = vpop.f32.mrb[164].mxu0 }
 0xba6   : > { %v20558_v56 = vpop.f32.mrb[164].mxu1  ;;  %v20518_v11 = vadd.f32 %v20517_v52, %v20477_v49  ;;  %v20519_v25 = vpop.f32.mrb[165].mxu0  ;;  %v20639_v49 = vld [vmem:[%s28480_s10 + $0x1f0] sm:$0xff] (!%p23802_p9) }
 0xba7   : > { %v20560_v36 = vpop.f32.mrb[165].mxu1  ;;  %v20520_v58 = vadd.f32 %v20519_v25, %v20479_v28  ;;  %v20521_v60 = vpop.f32.mrb[166].mxu0  ;;  %20572 = sbr.rel (%p23802_p9) target bundleno = 3245 (0xcad), region = 48  ;;  %v23861_v28 = vpack.c.bf16 (!%p23802_p9), %v20611_v44, %v20608_v42  ;;  %v20607_v52 = vld [vmem:[%s28480_s10 + $0xf0] sm:$0xff] (!%p23802_p9)  ;;  %v20594_v25 = vld [vmem:[%s28480_s10 + $0x88] sm:$0xff] (!%p23802_p9)  ;;  %v20669_v44 = vld [vmem:[%s28480_s10 + $0x2e0] sm:$0xff] (!%p23802_p9) }
 0xba8   : > { %v20562_v15 = vpop.f32.mrb[166].mxu1  ;;  %v20559_v61 = vadd.f32 %v20558_v56, %v20518_v11  ;;  %v20522_v19 = vpop.f32.mrb[167].mxu0  ;;  %v20610_v56 = vld [vmem:[%s28480_s10 + $0x108] sm:$0xff] (!%p23802_p9)  ;;  %v23913_v11 = vpack.c.bf16 (!%p23802_p9), %v20642_v1, %v20639_v49  ;;  %v23915_v60 = vpack.c.bf16 (!%p23802_p9), %v20594_v25, %v20591_v30  ;;  %v23933_v49 = vpack.c.bf16 (!%p23802_p9), %v20672_v62, %v20669_v44  ;;  %v20621_v1 = vld [vmem:[%s28480_s10 + $0x160] sm:$0xff] (!%p23802_p9)  ;;  %v20624_v30 = vld [vmem:[%s28480_s10 + $0x178] sm:$0xff] (!%p23802_p9) }
 0xba9   : > { %v20563_v2 = vpop.f32.mrb[167].mxu1  ;;  %v20561_v6 = vadd.f32 %v20560_v36, %v20520_v58  ;;  %v20614_v36 = vld [vmem:[%s28480_s10 + $0x128] sm:$0xff] (!%p23802_p9)  ;;  %v20645_v58 = vld [vmem:[%s28480_s10 + $0x220] sm:$0xff] (!%p23802_p9)  ;;  %v20648_v15 = vld [vmem:[%s28480_s10 + $0x238] sm:$0xff] (!%p23802_p9)  ;;  %23862 = vmatprep.subr.bf16.mxu0 (!%p23802_p9), %v23861_v28  ;;  %v23881_v28 = vpack.c.bf16 (!%p23802_p9), %v20641_v63, %v20638_v43 }
 0xbaa   : > { %v20565_v5 = vadd.f32 %v20559_v61, %v319_v26  ;;  %v20617_v26 = vld [vmem:[%s28480_s10 + $0x140] sm:$0xff] (!%p23802_p9)  ;;  %v23863_v61 = vpack.c.bf16 (!%p23802_p9), %v20610_v56, %v20607_v52  ;;  %23914 = vmatprep.subr.bf16.mxu1 (!%p23802_p9), %v23913_v11  ;;  %v23917_v19 = vpack.c.bf16 (!%p23802_p9), %v20648_v15, %v20645_v58  ;;  %v20640_v56 = vld [vmem:[%s28480_s10 + $0x1f8] sm:$0xff] (!%p23802_p9)  ;;  %v20647_v25 = vld [vmem:[%s28480_s10 + $0x230] sm:$0xff] (!%p23802_p9) }
 0xbab   : > { %v20566_v27 = vadd.f32 %v20561_v6, %v320_v18  ;;  %v20613_v18 = vld [vmem:[%s28480_s10 + $0x120] sm:$0xff] (!%p23802_p9)  ;;  %v20600_v6 = vld [vmem:[%s28480_s10 + $0xb8] sm:$0xff] (!%p23802_p9)  ;;  %23916 = vmatpush3.bf16.msra.mxu1 (!%p23802_p9), %v23915_v60  ;;  %v20643_v15 = vld [vmem:[%s28480_s10 + $0x210] sm:$0xff] (!%p23802_p9) }
 0xbac   : > { %20567 = vst [vmem:[#allocation2] sm:$0xff] %v20565_v5  ;;  %v20597_v2 = vld [vmem:[%s28480_s10 + $0xa0] sm:$0xff] (!%p23802_p9)  ;;  %v23865_v5 = vpack.c.bf16 (!%p23802_p9), %v20617_v26, %v20614_v36  ;;  %23864 = vmatpush1.bf16.msra.mxu0 (!%p23802_p9), %v23863_v61  ;;  %23918 = vmatprep.subr.bf16.mxu1 (!%p23802_p9), %v23917_v19  ;;  %v20644_v11 = vld [vmem:[%s28480_s10 + $0x218] sm:$0xff] (!%p23802_p9)  ;;  %v23935_v36 = vpack.c.bf16 (!%p23802_p9), %v20624_v30, %v20621_v1  ;;  %v20646_v61 = vld [vmem:[%s28480_s10 + $0x228] sm:$0xff] (!%p23802_p9) }
 0xbad   : > { %20568 = vst [vmem:[#allocation2 + $0x8] sm:$0xff] %v20566_v27  ;;  %v20616_v27 = vld [vmem:[%s28480_s10 + $0x138] sm:$0xff] (!%p23802_p9)  ;;  %v23919_v4 = vpack.c.bf16 (!%p23802_p9), %v20600_v6, %v20597_v2  ;;  %v20637_v52 = vld [vmem:[%s28480_s10 + $0x1e0] sm:$0xff] (!%p23802_p9)  ;;  %v23885_v60 = vpack.c.bf16 (!%p23802_p9), %v20647_v25, %v20644_v11  ;;  %v23887_v6 = vpack.c.bf16 (!%p23802_p9), %v20646_v61, %v20643_v15 }
 0xbae   : > { %v23867_v53 = vpack.c.bf16 %v20616_v27, %v20613_v18  ;;  %23866 = vmatprep.subr.bf16.mxu0 %v23865_v5  ;;  %v23883_v58 = vpack.c.bf16 %v20640_v56, %v20637_v52  ;;  %v20650_v18 = vld [vmem:[%s28480_s10 + $0x248] sm:$0xff]  ;;  %v20653_v19 = vld [vmem:[%s28480_s10 + $0x260] sm:$0xff] }
 0xbaf   : > { %23920 = vmatpush3.bf16.msra.mxu1 %v23919_v4  ;;  %v23889_v5 = vpack.c.bf16 %v20653_v19, %v20650_v18  ;;  %v20649_v27 = vld [vmem:[%s28480_s10 + $0x240] sm:$0xff]  ;;  %v23893_v4 = vpack.c.bf16 %v20659_v8, %v20656_v46 }
 0xbb0   : > { %23868 = vmatpush1.bf16.msra.mxu0 %v23867_v53  ;;  %23922 = vmatprep.subr.bf16.mxu1 %v23921_v51  ;;  %v23891_v12 = vpack.c.bf16 %v20652_v48, %v20649_v27  ;;  %v20655_v53 = vld [vmem:[%s28480_s10 + $0x270] sm:$0xff]  ;;  %v20662_v51 = vld [vmem:[%s28480_s10 + $0x2a8] sm:$0xff] }
 0xbb1   : > { %23870 = vmatprep.subr.bf16.mxu0 %v23869_v37  ;;  %v23895_v16 = vpack.c.bf16 %v20658_v54, %v20655_v53  ;;  %v23897_v37 = vpack.c.bf16 %v20665_v14, %v20662_v51 }
 0xbb3   : > { %23924 = vmatpush3.bf16.msra.mxu1 %v23923_v21  ;;  %v20573_v26 = vld [vmem:[#allocation2] sm:$0xff]  ;;  %v23901_v21 = vpack.c.bf16 %v20671_v22, %v20668_v31 }
 0xbb4   : > { %v20574_v38 = vld [vmem:[#allocation2 + $0x8] sm:$0xff]  ;;  %23872 = vmatpush1.bf16.msra.mxu0 %v23871_v24  ;;  %23926 = vmatprep.subr.bf16.mxu1 %v23925_v45  ;;  %v20575_v2 = vmax.f32 %v20573_v26, 0.0  ;;  %v20667_v24 = vld [vmem:[%s28480_s10 + $0x2d0] sm:$0xff] }
 0xbb5   : > { %v20576_v42 = vmax.f32 %v20574_v38, 0.0  ;;  %23874 = vmatprep.subr.bf16.mxu0 %v23873_v3  ;;  %v23903_v45 = vpack.c.bf16 %v20670_v23, %v20667_v24 }
 0xbb7   : > { %20808 = vmatprep.mubr.f32.mxu1 %v20576_v42  ;;  %20737 = vmatprep.mubr.f32.mxu0 %v20576_v42 }
 0xbb8   : > { %23928 = vmatpush3.bf16.msra.mxu1 %v23927_v35  ;;  %23876 = vmatpush1.bf16.msra.mxu0 %v23875_v55 }
 0xbb9   : > { %23930 = vmatprep.subr.bf16.mxu1 %v23929_v57  ;;  %23878 = vmatprep.subr.bf16.mxu0 %v23877_v32 }
 0xbbc   : > { %23932 = vmatpush3.bf16.msra.mxu1 %v23931_v47  ;;  %23880 = vmatpush1.bf16.msra.mxu0 %v23879_v50 }
 0xbbd   : > { %23934 = vmatprep.subr.bf16.mxu1 %v23933_v49  ;;  %23882 = vmatprep.subr.bf16.mxu0 %v23881_v28 }
 0xbc0   : > { %23936 = vmatpush3.bf16.msra.mxu1 %v23935_v36  ;;  %23884 = vmatpush1.bf16.msra.mxu0 %v23883_v58 }
 0xbc1   : > { %23886 = vmatprep.subr.bf16.mxu0 %v23885_v60 }
 0xbc3   : > { %20809 = vmatmul.mubr.f32.vlgmr.msra.gmra.mrb[0].mxu1 %v20575_v2 }
 0xbc4   : > { %23888 = vmatpush1.bf16.msra.mxu0 %v23887_v6 }
 0xbc5   : > { %23890 = vmatprep.subr.bf16.mxu0 %v23889_v5 }
 0xbc8   : > { %23892 = vmatpush1.bf16.msra.mxu0 %v23891_v12 }
 0xbc9   : > { %23894 = vmatprep.subr.bf16.mxu0 %v23893_v4 }
 0xbcc   : > { %23896 = vmatpush1.bf16.msra.mxu0 %v23895_v16 }
 0xbcd   : > { %23898 = vmatprep.subr.bf16.mxu0 %v23897_v37 }
 0xbd0   : > { %23900 = vmatpush1.bf16.msra.mxu0 %v23899_v20 }
 0xbd1   : > { %23902 = vmatprep.subr.bf16.mxu0 %v23901_v21 }
 0xbd4   : > { %23904 = vmatpush1.bf16.msra.mxu0 %v23903_v45 }
 0xbd7   : > { %20738 = vmatmul.mubr.f32.vlgmr.msra.gmra.mrb[0].mxu0 %v20575_v2 }
 0xc96   : > { %v23838_v29 = vpop.f32.mrb[0].mxu1 }
 0xc97   : > { %v23839_v34 = vpop.f32.mrb[1].mxu1 }
 0xc98   : > { %v23840_v3 = vadd.f32 %v23839_v34, %v23838_v29 }
 0xc9a   : > { %20817 = vst.msk [vmem:[%s28485_s6 + $0x10] sm:$0xff] %vm20816_vm0, %v23840_v3 }
 0xcaa   : > { %v20739_v33 = vpop.f32.mrb[0].mxu0 }
 0xcab   : > { %20814 = vst [vmem:[%s28485_s6] sm:$0xff] %v20739_v33  ;;  %v20741_v9 = vpop.f32.mrb[1].mxu0 }
 0xcac   : > { %20815 = vst [vmem:[%s28485_s6 + $0x8] sm:$0xff] %v20741_v9 }
 0xcad PF: > { %s17_s22 = sadd.s32 1, %s28312_s22   ;;  %s32114_s15 = smov %s28288_s16 }
 0xcae   : > { %p14_p11 = scmp.ge.s32.totalorder %s17_s22, 16   ;;  %s32115_s16 = smov %s28292_s17 }
 0xcaf   : > { %s32116_s17 = smov %s28410_s9  ;;  %s32117_s18 = smov %s28304_s20 }
 0xcb0   : > { %s32118_s19 = smov %s28308_s21  ;;  %s32119_s20 = smov %s32122_s24 }
 0xcb1   : > { %s32120_s21 = smov %s32126_s25  ;;  %16 = sbr.rel (!%p14_p11) target bundleno = 7 (0x7), region = 93 }
 0xcb8   :  { %20839 = vsyncpa [#allocation4], 1 }
 0xcb9   :  { %20841 = vsyncpa [#allocation4 + $0x1], 1 }

</bundles_post_ra>
